<compile_context>
chip_gen: v7x
topology: tpu7x:2x2x1
jax: 0.10.0
libtpu: 0.0.40
codegen_flags: <defaults>
</compile_context>

<pallas_src>
import jax
import jax.numpy as jnp
from jax.experimental import pallas as pl
from jax.experimental.pallas import tpu as pltpu

D = 768          # embedding dim fixed by the module (SimBlock(768))
H1, H2, H3 = 256, 64, 16


def _amodel_kernel(h_ref, b_ref,
                   ws0, bs0, ws1, bs1,
                   w1a, w1b, b1,
                   w2, b2, w3, b3, wf, bfc,
                   out_ref):
    f32, bf16 = jnp.float32, jnp.bfloat16
    tm = h_ref.shape[0]   # batch rows in this tile

    # Stack [a1; a2] along the batch (sublane) axis: each SimBlock becomes a
    # single M = 2*tile matmul against the pre-stacked (1536, 768) weight.
    x = jnp.concatenate([h_ref[...], b_ref[...]], axis=0)          # (2tm, D) f32

    def simblock(x, wstack_ref, bias_ref):
        # [a2; a1] via an XLU rotate (free slot) instead of slice + concat.
        xswap = pltpu.roll(x, shift=tm, axis=0)
        x2 = jnp.concatenate([x, xswap], axis=1).astype(bf16)      # (2tm, 2D)
        acc = jnp.dot(x2, wstack_ref[...], preferred_element_type=f32)
        return jnp.tanh(acc + bias_ref[...])

    x = simblock(x, ws0, bs0)
    x = simblock(x, ws1, bs1)

    # block1: relu(concat(a1, a2) @ W1 + b1) == relu(a1 @ W1a + a2 @ W1b + b1)
    a1 = x[:tm].astype(bf16)
    a2 = x[tm:].astype(bf16)
    h = (jnp.dot(a1, w1a[...], preferred_element_type=f32)
         + jnp.dot(a2, w1b[...], preferred_element_type=f32) + b1[...])
    h = jnp.maximum(h, 0.0)

    # block2 / block3: Linear -> ReLU  (dropout = identity at eval time)
    h = jnp.maximum(jnp.dot(h, w2[...], preferred_element_type=f32) + b2[...], 0.0)
    h = jnp.maximum(jnp.dot(h, w3[...], preferred_element_type=f32) + b3[...], 0.0)

    # final fc (16 -> 1) + tanh on the VPU (avoid an N=1 MXU pass)
    logit = jnp.sum(h * wf[...], axis=-1, keepdims=True) + bfc[...]
    out_ref[...] = jnp.tanh(logit)


def amodel_forward(headline, body, params, *, block_b=128):
    """headline, body: (B, 768) f32.  Returns (B,) f32."""
    assert block_b % 8 == 0
    B = headline.shape[0]
    tile = min(block_b, pl.cdiv(B, 8) * 8)       # batch rows per grid step (mult of 8)
    Bp = pl.cdiv(B, tile) * tile
    if Bp != B:                                  # pad batch up to a whole tile
        headline = jnp.pad(headline, ((0, Bp - B), (0, 0)))
        body = jnp.pad(body, ((0, Bp - B), (0, 0)))

    act_spec = pl.BlockSpec((tile, D), lambda i: (i, 0))
    # Constant index_map: every weight is DMA'd once and stays VMEM-resident
    # across all batch tiles; only activations stream per grid step.
    wt_specs = [pl.BlockSpec(p.shape, lambda i, nd=p.ndim: (0,) * nd)
                for p in params]

    weight_bytes = sum(int(p.size) * p.dtype.itemsize for p in params)
    bytes_accessed = weight_bytes + headline.nbytes + body.nbytes + Bp * 4
    flops = (2 * 2 * (2 * Bp) * (2 * D) * D            # two SimBlocks
             + 2 * Bp * (2 * D) * H1                   # block1
             + 2 * Bp * H1 * H2 + 2 * Bp * H2 * H3     # block2 / block3
             + 2 * Bp * H3)                            # fc
    transcendentals = 2 * (2 * Bp) * D + Bp            # tanh count

    out = pl.pallas_call(
        _amodel_kernel,
        grid=(Bp // tile,),
        out_shape=jax.ShapeDtypeStruct((Bp, 1), jnp.float32),
        in_specs=[act_spec, act_spec] + wt_specs,
        out_specs=pl.BlockSpec((tile, 1), lambda i: (i, 0)),
        compiler_params=pltpu.CompilerParams(
            dimension_semantics=("parallel",),          # v7x: shard tiles over 2 TCs
            vmem_limit_bytes=28 << 20),                 # resident weights x2 buffers fit
        cost_estimate=pl.CostEstimate(flops=flops,
                                      transcendentals=transcendentals,
                                      bytes_accessed=bytes_accessed),
    )(headline, body, *params)
    return out[:B, 0]   # .squeeze(1), drop batch padding


def init_params(key):
    """Deterministic PyTorch-Linear-style init (uniform +/- 1/sqrt(fan_in)),
    pre-packed into the kernel layout (stacked bf16 SimBlock weights, split W1,
    wf stored as a (1, 16) row)."""
    def linear(k, fan_in, fan_out):
        kw, kb = jax.random.split(k)
        bound = 1.0 / float(fan_in) ** 0.5
        w = jax.random.uniform(kw, (fan_in, fan_out), jnp.float32, -bound, bound)
        b = jax.random.uniform(kb, (1, fan_out), jnp.float32, -bound, bound)
        return w, b

    keys = jax.random.split(key, 8)
    params = []
    # SimBlocks: Wstack = [W_self; W_cross] (1536, 768) bf16, shared bias f32
    for i in range(2):
        ws, _ = linear(keys[2 * i], D, D)
        wc, bsb = linear(keys[2 * i + 1], D, D)
        params += [jnp.concatenate([ws, wc], axis=0).astype(jnp.bfloat16), bsb]
    # DownBlock 1: split W1 (1536, 256) into two 768-row halves, bf16
    w1, b1 = linear(keys[4], 2 * D, H1)
    params += [w1[:D].astype(jnp.bfloat16), w1[D:].astype(jnp.bfloat16), b1]
    # DownBlocks 2/3 + fc (small -> keep f32)
    w2, b2 = linear(keys[5], H1, H2)
    w3, b3 = linear(keys[6], H2, H3)
    wf, bf_fc = linear(keys[7], H3, 1)
    params += [w2, b2, w3, b3, wf.T, bf_fc]
    return params


def _reference_forward(headline, body, params):
    """Pure-JAX f32 reference with the same packed parameters."""
    f32 = jnp.float32
    ws0, bs0, ws1, bs1, w1a, w1b, b1, w2, b2, w3, b3, wf, bfc = params
    a1, a2 = headline, body
    for wstack, bias in ((ws0, bs0), (ws1, bs1)):
        w = wstack.astype(f32)
        n1 = jnp.tanh(jnp.concatenate([a1, a2], axis=1) @ w + bias)
        n2 = jnp.tanh(jnp.concatenate([a2, a1], axis=1) @ w + bias)
        a1, a2 = n1, n2
    h = jnp.maximum(a1 @ w1a.astype(f32) + a2 @ w1b.astype(f32) + b1, 0.0)
    h = jnp.maximum(h @ w2 + b2, 0.0)
    h = jnp.maximum(h @ w3 + b3, 0.0)
    logit = jnp.sum(h * wf, axis=-1, keepdims=True) + bfc
    return jnp.tanh(logit)[:, 0]


if __name__ == "__main__":
    key = jax.random.PRNGKey(0)
    k_h, k_b, k_p = jax.random.split(key, 3)

    B = 12   # small demo batch; exercises padding (12 -> 16) and 2 grid steps
    headline = jax.random.normal(k_h, (B, D), jnp.float32)
    body = jax.random.normal(k_b, (B, D), jnp.float32)
    params = init_params(k_p)

    out = amodel_forward(headline, body, params, block_b=8)
    out = jax.block_until_ready(out)
    assert out.shape == (B,) and out.dtype == jnp.float32

    ref = jax.block_until_ready(_reference_forward(headline, body, params))
    err = float(jnp.max(jnp.abs(out - ref)))
    assert err < 5e-2, f"kernel vs reference mismatch: {err}"

    print("KERNEL_OK")
</pallas_src>

<mosaic_0001>
module attributes {stable_mosaic.version = 11 : i64} {
  func.func @_amodel_kernel(%arg0: i32, %arg1: memref<8x768xf32, #tpu.memory_space<vmem>>, %arg2: memref<8x768xf32, #tpu.memory_space<vmem>>, %arg3: memref<1536x768xbf16, #tpu.memory_space<vmem>>, %arg4: memref<1x768xf32, #tpu.memory_space<vmem>>, %arg5: memref<1536x768xbf16, #tpu.memory_space<vmem>>, %arg6: memref<1x768xf32, #tpu.memory_space<vmem>>, %arg7: memref<768x256xbf16, #tpu.memory_space<vmem>>, %arg8: memref<768x256xbf16, #tpu.memory_space<vmem>>, %arg9: memref<1x256xf32, #tpu.memory_space<vmem>>, %arg10: memref<256x64xf32, #tpu.memory_space<vmem>>, %arg11: memref<1x64xf32, #tpu.memory_space<vmem>>, %arg12: memref<64x16xf32, #tpu.memory_space<vmem>>, %arg13: memref<1x16xf32, #tpu.memory_space<vmem>>, %arg14: memref<1x16xf32, #tpu.memory_space<vmem>>, %arg15: memref<1x1xf32, #tpu.memory_space<vmem>>, %arg16: memref<8x1xf32, #tpu.memory_space<vmem>>) attributes {dimension_semantics = [#tpu.dimension_semantics<parallel>], iteration_bounds = array<i64: 2>, scalar_prefetch = 0 : i64, scratch_operands = 0 : i64, tpu.core_type = #tpu.core_type<tc>, window_params = [{transform_indices = @transform_0, window_bounds = array<i64: 8, 768>}, {transform_indices = @transform_1, window_bounds = array<i64: 8, 768>}, {pipeline_mode = #tpu.pipeline_mode<synchronous>, transform_indices = @transform_2, window_bounds = array<i64: 1536, 768>}, {pipeline_mode = #tpu.pipeline_mode<synchronous>, transform_indices = @transform_3, window_bounds = array<i64: 1, 768>}, {pipeline_mode = #tpu.pipeline_mode<synchronous>, transform_indices = @transform_4, window_bounds = array<i64: 1536, 768>}, {pipeline_mode = #tpu.pipeline_mode<synchronous>, transform_indices = @transform_5, window_bounds = array<i64: 1, 768>}, {pipeline_mode = #tpu.pipeline_mode<synchronous>, transform_indices = @transform_6, window_bounds = array<i64: 768, 256>}, {pipeline_mode = #tpu.pipeline_mode<synchronous>, transform_indices = @transform_7, window_bounds = array<i64: 768, 256>}, {pipeline_mode = #tpu.pipeline_mode<synchronous>, transform_indices = @transform_8, window_bounds = array<i64: 1, 256>}, {pipeline_mode = #tpu.pipeline_mode<synchronous>, transform_indices = @transform_9, window_bounds = array<i64: 256, 64>}, {pipeline_mode = #tpu.pipeline_mode<synchronous>, transform_indices = @transform_10, window_bounds = array<i64: 1, 64>}, {pipeline_mode = #tpu.pipeline_mode<synchronous>, transform_indices = @transform_11, window_bounds = array<i64: 64, 16>}, {pipeline_mode = #tpu.pipeline_mode<synchronous>, transform_indices = @transform_12, window_bounds = array<i64: 1, 16>}, {pipeline_mode = #tpu.pipeline_mode<synchronous>, transform_indices = @transform_13, window_bounds = array<i64: 1, 16>}, {pipeline_mode = #tpu.pipeline_mode<synchronous>, transform_indices = @transform_14, window_bounds = array<i64: 1, 1>}, {transform_indices = @transform_15, window_bounds = array<i64: 8, 1>}]} {
    %c0 = arith.constant 0 : index
    %c0_0 = arith.constant 0 : index
    %0 = vector.load %arg1[%c0, %c0_0] : memref<8x768xf32, #tpu.memory_space<vmem>>, vector<8x768xf32>
    %c0_1 = arith.constant 0 : index
    %c0_2 = arith.constant 0 : index
    %1 = vector.load %arg2[%c0_1, %c0_2] : memref<8x768xf32, #tpu.memory_space<vmem>>, vector<8x768xf32>
    %2 = tpu.concatenate %0, %1 in 0 : vector<8x768xf32>, vector<8x768xf32> -> vector<16x768xf32>
    %c8_i32 = arith.constant 8 : i32
    %3 = tpu.dynamic_rotate %2 by %c8_i32 dim 0 : vector<16x768xf32>, i32 -> vector<16x768xf32>
    %4 = tpu.concatenate %2, %3 in 1 : vector<16x768xf32>, vector<16x768xf32> -> vector<16x1536xf32>
    %5 = arith.truncf %4 : vector<16x1536xf32> to vector<16x1536xbf16>
    %c0_3 = arith.constant 0 : index
    %c0_4 = arith.constant 0 : index
    %6 = vector.load %arg3[%c0_3, %c0_4] : memref<1536x768xbf16, #tpu.memory_space<vmem>>, vector<1536x768xbf16>
    %cst = arith.constant dense<0.000000e+00> : vector<16x768xf32>
    %7 = tpu.matmul %5, %6, %cst {dimension_numbers = #tpu.dot_dimension_numbers<[1], [0], [0], [1], [0, 0, 1, 1], [], []>} : vector<16x1536xbf16>, vector<1536x768xbf16>, vector<16x768xf32> -> vector<16x768xf32>
    %c0_5 = arith.constant 0 : index
    %c0_6 = arith.constant 0 : index
    %8 = vector.load %arg4[%c0_5, %c0_6] : memref<1x768xf32, #tpu.memory_space<vmem>>, vector<1x768xf32>
    %9 = vector.broadcast %8 : vector<1x768xf32> to vector<16x768xf32>
    %10 = arith.addf %7, %9 : vector<16x768xf32>
    %11 = math.tanh %10 : vector<16x768xf32>
    %c8_i32_7 = arith.constant 8 : i32
    %12 = tpu.dynamic_rotate %11 by %c8_i32_7 dim 0 : vector<16x768xf32>, i32 -> vector<16x768xf32>
    %13 = tpu.concatenate %11, %12 in 1 : vector<16x768xf32>, vector<16x768xf32> -> vector<16x1536xf32>
    %14 = arith.truncf %13 : vector<16x1536xf32> to vector<16x1536xbf16>
    %c0_8 = arith.constant 0 : index
    %c0_9 = arith.constant 0 : index
    %15 = vector.load %arg5[%c0_8, %c0_9] : memref<1536x768xbf16, #tpu.memory_space<vmem>>, vector<1536x768xbf16>
    %cst_10 = arith.constant dense<0.000000e+00> : vector<16x768xf32>
    %16 = tpu.matmul %14, %15, %cst_10 {dimension_numbers = #tpu.dot_dimension_numbers<[1], [0], [0], [1], [0, 0, 1, 1], [], []>} : vector<16x1536xbf16>, vector<1536x768xbf16>, vector<16x768xf32> -> vector<16x768xf32>
    %c0_11 = arith.constant 0 : index
    %c0_12 = arith.constant 0 : index
    %17 = vector.load %arg6[%c0_11, %c0_12] : memref<1x768xf32, #tpu.memory_space<vmem>>, vector<1x768xf32>
    %18 = vector.broadcast %17 : vector<1x768xf32> to vector<16x768xf32>
    %19 = arith.addf %16, %18 : vector<16x768xf32>
    %20 = math.tanh %19 : vector<16x768xf32>
    %21 = vector.extract_strided_slice %20 {offsets = [0, 0], sizes = [8, 768], strides = [1, 1]} : vector<16x768xf32> to vector<8x768xf32>
    %22 = arith.truncf %21 : vector<8x768xf32> to vector<8x768xbf16>
    %23 = vector.extract_strided_slice %20 {offsets = [8, 0], sizes = [8, 768], strides = [1, 1]} : vector<16x768xf32> to vector<8x768xf32>
    %24 = arith.truncf %23 : vector<8x768xf32> to vector<8x768xbf16>
    %c0_13 = arith.constant 0 : index
    %c0_14 = arith.constant 0 : index
    %25 = vector.load %arg7[%c0_13, %c0_14] : memref<768x256xbf16, #tpu.memory_space<vmem>>, vector<768x256xbf16>
    %cst_15 = arith.constant dense<0.000000e+00> : vector<8x256xf32>
    %26 = tpu.matmul %22, %25, %cst_15 {dimension_numbers = #tpu.dot_dimension_numbers<[1], [0], [0], [1], [0, 0, 1, 1], [], []>} : vector<8x768xbf16>, vector<768x256xbf16>, vector<8x256xf32> -> vector<8x256xf32>
    %c0_16 = arith.constant 0 : index
    %c0_17 = arith.constant 0 : index
    %27 = vector.load %arg8[%c0_16, %c0_17] : memref<768x256xbf16, #tpu.memory_space<vmem>>, vector<768x256xbf16>
    %cst_18 = arith.constant dense<0.000000e+00> : vector<8x256xf32>
    %28 = tpu.matmul %24, %27, %cst_18 {dimension_numbers = #tpu.dot_dimension_numbers<[1], [0], [0], [1], [0, 0, 1, 1], [], []>} : vector<8x768xbf16>, vector<768x256xbf16>, vector<8x256xf32> -> vector<8x256xf32>
    %29 = arith.addf %26, %28 : vector<8x256xf32>
    %c0_19 = arith.constant 0 : index
    %c0_20 = arith.constant 0 : index
    %30 = vector.load %arg9[%c0_19, %c0_20] : memref<1x256xf32, #tpu.memory_space<vmem>>, vector<1x256xf32>
    %31 = vector.broadcast %30 : vector<1x256xf32> to vector<8x256xf32>
    %32 = arith.addf %29, %31 : vector<8x256xf32>
    %cst_21 = arith.constant 0.000000e+00 : f32
    %33 = vector.broadcast %cst_21 : f32 to vector<8x256xf32>
    %34 = arith.maximumf %32, %33 : vector<8x256xf32>
    %c0_22 = arith.constant 0 : index
    %c0_23 = arith.constant 0 : index
    %35 = vector.load %arg10[%c0_22, %c0_23] : memref<256x64xf32, #tpu.memory_space<vmem>>, vector<256x64xf32>
    %cst_24 = arith.constant dense<0.000000e+00> : vector<8x64xf32>
    %36 = tpu.matmul %34, %35, %cst_24 {dimension_numbers = #tpu.dot_dimension_numbers<[1], [0], [0], [1], [0, 0, 1, 1], [], []>} : vector<8x256xf32>, vector<256x64xf32>, vector<8x64xf32> -> vector<8x64xf32>
    %c0_25 = arith.constant 0 : index
    %c0_26 = arith.constant 0 : index
    %37 = vector.load %arg11[%c0_25, %c0_26] : memref<1x64xf32, #tpu.memory_space<vmem>>, vector<1x64xf32>
    %38 = vector.broadcast %37 : vector<1x64xf32> to vector<8x64xf32>
    %39 = arith.addf %36, %38 : vector<8x64xf32>
    %cst_27 = arith.constant 0.000000e+00 : f32
    %40 = vector.broadcast %cst_27 : f32 to vector<8x64xf32>
    %41 = arith.maximumf %39, %40 : vector<8x64xf32>
    %c0_28 = arith.constant 0 : index
    %c0_29 = arith.constant 0 : index
    %42 = vector.load %arg12[%c0_28, %c0_29] : memref<64x16xf32, #tpu.memory_space<vmem>>, vector<64x16xf32>
    %cst_30 = arith.constant dense<0.000000e+00> : vector<8x16xf32>
    %43 = tpu.matmul %41, %42, %cst_30 {dimension_numbers = #tpu.dot_dimension_numbers<[1], [0], [0], [1], [0, 0, 1, 1], [], []>} : vector<8x64xf32>, vector<64x16xf32>, vector<8x16xf32> -> vector<8x16xf32>
    %c0_31 = arith.constant 0 : index
    %c0_32 = arith.constant 0 : index
    %44 = vector.load %arg13[%c0_31, %c0_32] : memref<1x16xf32, #tpu.memory_space<vmem>>, vector<1x16xf32>
    %45 = vector.broadcast %44 : vector<1x16xf32> to vector<8x16xf32>
    %46 = arith.addf %43, %45 : vector<8x16xf32>
    %cst_33 = arith.constant 0.000000e+00 : f32
    %47 = vector.broadcast %cst_33 : f32 to vector<8x16xf32>
    %48 = arith.maximumf %46, %47 : vector<8x16xf32>
    %c0_34 = arith.constant 0 : index
    %c0_35 = arith.constant 0 : index
    %49 = vector.load %arg14[%c0_34, %c0_35] : memref<1x16xf32, #tpu.memory_space<vmem>>, vector<1x16xf32>
    %50 = vector.broadcast %49 : vector<1x16xf32> to vector<8x16xf32>
    %51 = arith.mulf %48, %50 : vector<8x16xf32>
    %cst_36 = arith.constant dense<0.000000e+00> : vector<8xf32>
    %52 = vector.multi_reduction <add>, %51, %cst_36 [1] : vector<8x16xf32> to vector<8xf32>
    %53 = vector.shape_cast %52 : vector<8xf32> to vector<8x1xf32>
    %c0_37 = arith.constant 0 : index
    %c0_38 = arith.constant 0 : index
    %54 = vector.load %arg15[%c0_37, %c0_38] : memref<1x1xf32, #tpu.memory_space<vmem>>, vector<1x1xf32>
    %55 = vector.broadcast %54 : vector<1x1xf32> to vector<8x1xf32>
    %56 = arith.addf %53, %55 : vector<8x1xf32>
    %57 = math.tanh %56 : vector<8x1xf32>
    %c0_39 = arith.constant 0 : index
    %c0_40 = arith.constant 0 : index
    %58 = vector.load %arg16[%c0_39, %c0_40] : memref<8x1xf32, #tpu.memory_space<vmem>>, vector<8x1xf32>
    tpu.vector_store %arg16[%c0_39, %c0_40], %57 {strides = array<i32>} : memref<8x1xf32, #tpu.memory_space<vmem>>, vector<8x1xf32>,
    return
  }
  func.func @transform_0(%arg0: i32) -> (i32, i32) {
    %c0_i32 = arith.constant 0 : i32
    %c0_i32_0 = arith.constant 0 : i32
    return %arg0, %c0_i32 : i32, i32
  }
  func.func @transform_1(%arg0: i32) -> (i32, i32) {
    %c0_i32 = arith.constant 0 : i32
    %c0_i32_0 = arith.constant 0 : i32
    return %arg0, %c0_i32 : i32, i32
  }
  func.func @transform_2(%arg0: i32) -> (i32, i32) {
    %c0_i32 = arith.constant 0 : i32
    %c0_i32_0 = arith.constant 0 : i32
    %c0_i32_1 = arith.constant 0 : i32
    return %c0_i32, %c0_i32_0 : i32, i32
  }
  func.func @transform_3(%arg0: i32) -> (i32, i32) {
    %c0_i32 = arith.constant 0 : i32
    %c0_i32_0 = arith.constant 0 : i32
    %c0_i32_1 = arith.constant 0 : i32
    return %c0_i32, %c0_i32_0 : i32, i32
  }
  func.func @transform_4(%arg0: i32) -> (i32, i32) {
    %c0_i32 = arith.constant 0 : i32
    %c0_i32_0 = arith.constant 0 : i32
    %c0_i32_1 = arith.constant 0 : i32
    return %c0_i32, %c0_i32_0 : i32, i32
  }
  func.func @transform_5(%arg0: i32) -> (i32, i32) {
    %c0_i32 = arith.constant 0 : i32
    %c0_i32_0 = arith.constant 0 : i32
    %c0_i32_1 = arith.constant 0 : i32
    return %c0_i32, %c0_i32_0 : i32, i32
  }
  func.func @transform_6(%arg0: i32) -> (i32, i32) {
    %c0_i32 = arith.constant 0 : i32
    %c0_i32_0 = arith.constant 0 : i32
    %c0_i32_1 = arith.constant 0 : i32
    return %c0_i32, %c0_i32_0 : i32, i32
  }
  func.func @transform_7(%arg0: i32) -> (i32, i32) {
    %c0_i32 = arith.constant 0 : i32
    %c0_i32_0 = arith.constant 0 : i32
    %c0_i32_1 = arith.constant 0 : i32
    return %c0_i32, %c0_i32_0 : i32, i32
  }
  func.func @transform_8(%arg0: i32) -> (i32, i32) {
    %c0_i32 = arith.constant 0 : i32
    %c0_i32_0 = arith.constant 0 : i32
    %c0_i32_1 = arith.constant 0 : i32
    return %c0_i32, %c0_i32_0 : i32, i32
  }
  func.func @transform_9(%arg0: i32) -> (i32, i32) {
    %c0_i32 = arith.constant 0 : i32
    %c0_i32_0 = arith.constant 0 : i32
    %c0_i32_1 = arith.constant 0 : i32
    return %c0_i32, %c0_i32_0 : i32, i32
  }
  func.func @transform_10(%arg0: i32) -> (i32, i32) {
    %c0_i32 = arith.constant 0 : i32
    %c0_i32_0 = arith.constant 0 : i32
    %c0_i32_1 = arith.constant 0 : i32
    return %c0_i32, %c0_i32_0 : i32, i32
  }
  func.func @transform_11(%arg0: i32) -> (i32, i32) {
    %c0_i32 = arith.constant 0 : i32
    %c0_i32_0 = arith.constant 0 : i32
    %c0_i32_1 = arith.constant 0 : i32
    return %c0_i32, %c0_i32_0 : i32, i32
  }
  func.func @transform_12(%arg0: i32) -> (i32, i32) {
    %c0_i32 = arith.constant 0 : i32
    %c0_i32_0 = arith.constant 0 : i32
    %c0_i32_1 = arith.constant 0 : i32
    return %c0_i32, %c0_i32_0 : i32, i32
  }
  func.func @transform_13(%arg0: i32) -> (i32, i32) {
    %c0_i32 = arith.constant 0 : i32
    %c0_i32_0 = arith.constant 0 : i32
    %c0_i32_1 = arith.constant 0 : i32
    return %c0_i32, %c0_i32_0 : i32, i32
  }
  func.func @transform_14(%arg0: i32) -> (i32, i32) {
    %c0_i32 = arith.constant 0 : i32
    %c0_i32_0 = arith.constant 0 : i32
    %c0_i32_1 = arith.constant 0 : i32
    return %c0_i32, %c0_i32_0 : i32, i32
  }
  func.func @transform_15(%arg0: i32) -> (i32, i32) {
    %c0_i32 = arith.constant 0 : i32
    %c0_i32_0 = arith.constant 0 : i32
    return %arg0, %c0_i32 : i32, i32
  }
}

</mosaic_0001>

<bundles_post_ra>
// kernel: tpu_custom_call.1
= control target key start
LH: loop header
LB: loop body
LE: loop exit
PB: predicated region body
PF: predicated region fallthrough
CT: control target
= control target key end

     0   :  { %s16220_s0 = inlined_call_operand.hbm [shape: f32[16,768], index: 0, kind: input, shape index: {}]   ;;  %s16221_s1 = inlined_call_operand.hbm [shape: f32[16,768], index: 1, kind: input, shape index: {}]   ;;  %s16222_s2 = inlined_call_operand.hbm [shape: bf16[1536,768], index: 2, kind: input, shape index: {}]   ;;  %s16223_s3 = inlined_call_operand.hbm [shape: f32[1,768], index: 3, kind: input, shape index: {}]   ;;  %s16224_s4 = inlined_call_operand.hbm [shape: bf16[1536,768], index: 4, kind: input, shape index: {}]   ;;  %s16225_s5 = inlined_call_operand.hbm [shape: f32[1,768], index: 5, kind: input, shape index: {}]   ;;  %s16226_s6 = inlined_call_operand.hbm [shape: bf16[768,256], index: 6, kind: input, shape index: {}]   ;;  %s16227_s7 = inlined_call_operand.hbm [shape: bf16[768,256], index: 7, kind: input, shape index: {}]   ;;  %s16228_s8 = inlined_call_operand.hbm [shape: f32[1,256], index: 8, kind: input, shape index: {}]   ;;  %s16229_s9 = inlined_call_operand.vmem [shape: f32[256,64], index: 9, kind: input, shape index: {}]   ;;  %s16230_s10 = inlined_call_operand.hbm [shape: f32[1,64], index: 10, kind: input, shape index: {}]   ;;  %s16231_s11 = inlined_call_operand.vmem [shape: f32[64,16], index: 11, kind: input, shape index: {}]   ;;  %s16232_s12 = inlined_call_operand.hbm [shape: f32[1,16], index: 12, kind: input, shape index: {}]   ;;  %s16233_s13 = inlined_call_operand.hbm [shape: f32[1,16], index: 13, kind: input, shape index: {}]   ;;  %s16234_s14 = inlined_call_operand.<no memory space> [shape: f32[1,1], index: 14, kind: input, shape index: {}]   ;;  %s16235_s15 = inlined_call_operand.vmem [shape: f32[16,1], index: 15, kind: output, shape index: {}]  }
   0x1   :  { %16248 = sst [smem:[#allocation31_spill]] %s16220_s0  ;;  %v20_v0 = vstv %s16234_s14 }
   0x2   :  { %16249 = sst [smem:[#allocation32_spill]] %s16221_s1  ;;  %21 = vst [vmem:[#allocation2] sm:$0x1] %v20_v0 }
   0x3   :  { %16250 = sst [smem:[#allocation33_spill]] %s16222_s2 }
   0x4   :  { %16251 = sst [smem:[#allocation34_spill]] %s16223_s3 }
   0x5   :  { %16252 = sst [smem:[#allocation35_spill]] %s16229_s9 }
   0x6   :  { %16253 = sst [smem:[#allocation36_spill]] %s16231_s11 }
   0x7   :  { %16254 = sst [smem:[#allocation37_spill]] %s16235_s15 }
   0x8   :  { %22 = vsyncpa [#allocation4], 0 }
   0x9   :  { %24 = vsyncpa [#allocation4 + $0x1], 0 }
   0xa   :  { %25 = vsyncpa [#allocation6], 0 }
   0xb   :  { %27 = vsyncpa [#allocation6 + $0x1], 0 }
   0xc   :  { %28 = vsyncpa [#allocation9], 0 }
   0xd   :  { %29 = vsyncpa [#allocation12], 0 }
   0xe   :  { %30 = vsyncpa [#allocation15], 0 }
   0xf   :  { %31 = vsyncpa [#allocation18], 0 }
  0x10   :  { %32 = vsyncpa [#allocation21], 0  ;;  %s15469_s20 = smov 0   ;;  %s15471_s21 = smov 0  }
  0x11   :  { %s15473_s22 = smov 0   ;;  %s15475_s23 = smov 0  }
  0x12 LB: > { %s15367_s14 = smov [#allocation7]   ;;  %s15490_s25 = sadd.s32 4294967295, %s15365_s23   ;;  %s15365_s23 = sphi %s15475_s23, %s16291_s23   ;;  %s15361_s22 = sphi %s15473_s22, %s16290_s22   ;;  %s15357_s21 = sphi %s15471_s21, %s16289_s21   ;;  %s15353_s20 = sphi %s15469_s20, %s16288_s20  }
  0x13   : > { %s406_s24 = sshll.u32 %s15367_s14, 4  ;;  %p11101_p0 = scmp.ge.s32.totalorder %s15365_s23, 1  ;;  %s15495_s24 = int_to_ptr.vmem [resolvable:$true] %s406_s24 }
  0x14   : > { %p16242_p1 = scmp.eq.s32.totalorder %s15490_s25, 0  ;;  %p394_p2 = scmp.lt.s32.totalorder %s15365_s23, 3 }
  0x15   : > { %s15368_s27 = smov [#allocation8]   ;;  %s15369_s30 = smov [#allocation11]  }
  0x16   : > { %p15497_p3 = pnand %p11101_p0, %p394_p2  ;;  %s420_s28 = sshll.u32 %s15368_s27, 4  ;;  %s15509_s28 = int_to_ptr.vmem [resolvable:$true] %s420_s28 }
  0x17   : > { %s444_s16 = sshll.u32 %s15369_s30, 4  ;;  %s16258_s2 = sld [smem:[#allocation33_spill]]  ;;  %s15511_s16 = int_to_ptr.vmem [resolvable:$true] %s444_s16 }
  0x18   : > { %s16255_s26 = scalar_select %p15497_p3, 1, 0 }
  0x19   : > { %p12778_p4 = pneg %p15497_p3 }
  0x1a   : > { %16256 = sst [smem:[#allocation30_spill]] %s16255_s26 }
  0x1b   : > { %p15505_p5 = pnand %p12778_p4, %p16242_p1 }
  0x1d   : > { %s14963_s19 = scalar_lea.hbm %s16258_s2, 73728  ;;  %p15521_p7 = pneg %p15505_p5 }
  0x1e   : > { %p14964_p6 = scmp.ne.s32.totalorder %s16258_s2, %s14963_s19  ;;  %p14970_p10 = scmp.lt.u32.totalorder %s14963_s19, %s16258_s2 }
  0x20   : > { %p14966_p8 = pnand %p15521_p7, %p14964_p6 }
  0x22   : > { %p14967_p9 = pneg %p14966_p8 }
  0x24   : > { %p14972_p11 = pnand %p14970_p10, %p14967_p9 }
  0x26   : > { %14975 = shalt.err (!%p14972_p11)
}
  0x27   : > { %s14976_s15 = scalar_lea.vmem %s15495_s24, 73728  ;;  %p14984_p2 = scmp.lt.s32.totalorder %s15495_s24, %s15495_s24 }
  0x28   : > { %p14977_p12 = scmp.ne.s32.totalorder %s15495_s24, %s14976_s15  ;;  %p14985_p4 = scmp.lt.s32.totalorder %s14976_s15, %s14976_s15 }
  0x2a   : > { %p14979_p13 = pnand %p14977_p12, %p15521_p7  ;;  %p14986_p6 = por %p14985_p4, %p14984_p2 }
  0x2c   : > { %p14980_p0 = pneg %p14979_p13 }
  0x2e   : > { %p14987_p8 = pnand %p14986_p6, %p14980_p0 }
  0x30   : > { %14990 = shalt.err (!%p14987_p8)
}
  0x31   : > { %s16241_s17 = smov 384   ;;  %s15371_s11 = smov 24  }
  0x32   : > { %12781 = dma.hbm_to_vmem [thread:$0]  (!%p15505_p5), %s16258_s2, 73728, %s15495_s24, [#allocation6], %s16241_s17, %s16241_s17, %s15371_s11  }
  0x33   : > { %s16260_s3 = sld [smem:[#allocation34_spill]] }
  0x39   : > { %s14991_s15 = scalar_lea.hbm %s16260_s3, 96 }
  0x3a   : > { %p14992_p9 = scmp.ne.s32.totalorder %s16260_s3, %s14991_s15  ;;  %p14998_p12 = scmp.lt.u32.totalorder %s14991_s15, %s16260_s3 }
  0x3c   : > { %p14994_p10 = pnand %p14992_p9, %p15521_p7 }
  0x3e   : > { %p14995_p11 = pneg %p14994_p10 }
  0x40   : > { %p15000_p13 = pnand %p14998_p12, %p14995_p11 }
  0x42   : > { %15003 = shalt.err (!%p15000_p13)
}
  0x43   : > { %s15004_s24 = scalar_lea.vmem %s15509_s28, 96  ;;  %p15012_p6 = scmp.lt.s32.totalorder %s15509_s28, %s15509_s28 }
  0x44   : > { %p15005_p0 = scmp.ne.s32.totalorder %s15509_s28, %s15004_s24  ;;  %p15013_p8 = scmp.lt.s32.totalorder %s15004_s24, %s15004_s24 }
  0x46   : > { %p15007_p2 = pnand %p15005_p0, %p15521_p7  ;;  %p15014_p9 = por %p15013_p8, %p15012_p6 }
  0x48   : > { %p15008_p4 = pneg %p15007_p2 }
  0x4a   : > { %p15015_p10 = pnand %p15014_p9, %p15008_p4 }
  0x4c   : > { %15018 = shalt.err (!%p15015_p10)
}
  0x4d   : > { %12784 = dma.hbm_to_vmem [thread:$0]  (!%p15505_p5), %s16260_s3, 96, %s15509_s28, [#allocation9]  }
  0x4e   : > { %s15019_s18 = scalar_lea.hbm %s16225_s5, 96 }
  0x4f   : > { %p15020_p11 = scmp.ne.s32.totalorder %s16225_s5, %s15019_s18  ;;  %p15026_p0 = scmp.lt.u32.totalorder %s15019_s18, %s16225_s5 }
  0x51   : > { %p15022_p12 = pnand %p15020_p11, %p15521_p7 }
  0x53   : > { %p15023_p13 = pneg %p15022_p12 }
  0x55   : > { %p15028_p2 = pnand %p15026_p0, %p15023_p13 }
  0x57   : > { %15031 = shalt.err (!%p15028_p2)
}
  0x58   : > { %s15032_s28 = scalar_lea.vmem %s15511_s16, 96  ;;  %p15040_p9 = scmp.lt.s32.totalorder %s15511_s16, %s15511_s16 }
  0x59   : > { %p15033_p4 = scmp.ne.s32.totalorder %s15511_s16, %s15032_s28  ;;  %p15041_p10 = scmp.lt.s32.totalorder %s15032_s28, %s15032_s28 }
  0x5b   : > { %p15035_p6 = pnand %p15033_p4, %p15521_p7  ;;  %p15042_p11 = por %p15041_p10, %p15040_p9 }
  0x5d   : > { %p15036_p8 = pneg %p15035_p6 }
  0x5f   : > { %p15043_p12 = pnand %p15042_p11, %p15036_p8 }
  0x61   : > { %15046 = shalt.err (!%p15043_p12)
}
  0x62   : > { %12790 = dma.hbm_to_vmem [thread:$0]  (!%p15505_p5), %s16225_s5, 96, %s15511_s16, [#allocation12]  }
  0x63   : > { %s15372_s1 = smov [#allocation14]   ;;  %s15373_s26 = smov [#allocation17]  }
  0x64   : > { %s467_s9 = sshll.u32 %s15372_s1, 4  ;;  %s495_s18 = sshll.u32 %s15373_s26, 4  ;;  %s468_s9 = int_to_ptr.vmem [resolvable:$true] %s467_s9  ;;  %s496_s18 = int_to_ptr.vmem [resolvable:$true] %s495_s18 }
  0x65   : > { %s15047_s30 = scalar_lea.hbm %s16227_s7, 12288 }
  0x66   : > { %p15048_p13 = scmp.ne.s32.totalorder %s16227_s7, %s15047_s30  ;;  %p15054_p4 = scmp.lt.u32.totalorder %s15047_s30, %s16227_s7 }
  0x68   : > { %p15050_p0 = pnand %p15048_p13, %p15521_p7 }
  0x6a   : > { %p15051_p2 = pneg %p15050_p0 }
  0x6c   : > { %p15056_p6 = pnand %p15054_p4, %p15051_p2 }
  0x6e   : > { %15059 = shalt.err (!%p15056_p6)
}
  0x6f   : > { %s15060_s16 = scalar_lea.vmem %s468_s9, 12288  ;;  %p15068_p11 = scmp.lt.s32.totalorder %s468_s9, %s468_s9 }
  0x70   : > { %p15061_p8 = scmp.ne.s32.totalorder %s468_s9, %s15060_s16  ;;  %p15069_p12 = scmp.lt.s32.totalorder %s15060_s16, %s15060_s16 }
  0x72   : > { %p15063_p9 = pnand %p15061_p8, %p15521_p7  ;;  %p15070_p1 = por %p15069_p12, %p15068_p11 }
  0x74   : > { %p15064_p10 = pneg %p15063_p9 }
  0x76   : > { %p15071_p3 = pnand %p15070_p1, %p15064_p10 }
  0x78   : > { %15074 = shalt.err (!%p15071_p3)
}
  0x79   : > { %s16244_s0 = smov 128   ;;  %s16245_s1 = smov 8  }
  0x7a   : > { %12796 = dma.hbm_to_vmem [thread:$0]  (!%p15505_p5), %s16227_s7, 12288, %s468_s9, [#allocation15], %s16244_s0, %s16244_s0, %s16245_s1  }
  0x7b   : > { %s15075_s30 = scalar_lea.hbm %s16230_s10, 16 }
  0x7c   : > { %p15076_p1 = scmp.ne.s32.totalorder %s16230_s10, %s15075_s30  ;;  %p15082_p0 = scmp.lt.u32.totalorder %s15075_s30, %s16230_s10 }
  0x7e   : > { %p15078_p3 = pnand %p15076_p1, %p15521_p7 }
  0x80   : > { %p15079_p13 = pneg %p15078_p3 }
  0x82   : > { %p15084_p2 = pnand %p15082_p0, %p15079_p13 }
  0x84   : > { %15087 = shalt.err (!%p15084_p2)
}
  0x85   : > { %s15088_s17 = scalar_lea.vmem %s496_s18, 16  ;;  %s15095_s9 = scalar_lea.vmem %s496_s18, 32 }
  0x86   : > { %p15089_p4 = scmp.ne.s32.totalorder %s496_s18, %s15088_s17  ;;  %p15096_p9 = scmp.lt.s32.totalorder %s496_s18, %s496_s18 }
  0x87   : > { %p15097_p10 = scmp.lt.s32.totalorder %s15095_s9, %s15088_s17 }
  0x88   : > { %p15091_p6 = pnand %p15089_p4, %p15521_p7 }
  0x89   : > { %p15098_p11 = por %p15097_p10, %p15096_p9 }
  0x8a   : > { %p15092_p8 = pneg %p15091_p6 }
  0x8c   : > { %p15099_p12 = pnand %p15098_p11, %p15092_p8 }
  0x8e   : > { %15102 = shalt.err (!%p15099_p12)
}
  0x8f   : > { %12802 = dma.hbm_to_vmem [thread:$0]  (!%p15505_p5), %s16230_s10, 16, %s496_s18, [#allocation18]  }
  0x90   : > { %s15376_s14 = smov [#allocation10]   ;;  %s15377_s15 = smov [#allocation13]  }
  0x91   : > { %s430_s30 = sshll.u32 %s15376_s14, 4  ;;  %s454_s28 = sshll.u32 %s15377_s15, 4  ;;  %s431_s30 = int_to_ptr.vmem [resolvable:$true] %s430_s30  ;;  %s455_s28 = int_to_ptr.vmem [resolvable:$true] %s454_s28 }
  0x92   : > { %s15103_s0 = scalar_lea.hbm %s16224_s4, 73728 }
  0x93   : > { %p15104_p1 = scmp.ne.s32.totalorder %s16224_s4, %s15103_s0  ;;  %p15110_p0 = scmp.lt.u32.totalorder %s15103_s0, %s16224_s4 }
  0x95   : > { %p15106_p3 = pnand %p15104_p1, %p15521_p7 }
  0x97   : > { %p15107_p13 = pneg %p15106_p3 }
  0x99   : > { %p15112_p2 = pnand %p15110_p0, %p15107_p13 }
  0x9b   : > { %15115 = shalt.err (!%p15112_p2)
}
  0x9c   : > { %s15116_s18 = scalar_lea.vmem %s431_s30, 73728  ;;  %p15124_p9 = scmp.lt.s32.totalorder %s431_s30, %s431_s30 }
  0x9d   : > { %p15117_p4 = scmp.ne.s32.totalorder %s431_s30, %s15116_s18  ;;  %p15125_p10 = scmp.lt.s32.totalorder %s15116_s18, %s15116_s18 }
  0x9f   : > { %p15119_p6 = pnand %p15117_p4, %p15521_p7  ;;  %p15126_p11 = por %p15125_p10, %p15124_p9 }
  0xa1   : > { %p15120_p8 = pneg %p15119_p6 }
  0xa3   : > { %p15127_p12 = pnand %p15126_p11, %p15120_p8 }
  0xa5   : > { %15130 = shalt.err (!%p15127_p12)
}
  0xa6   : > { %s16261_s19 = smov 384   ;;  %s15131_s24 = scalar_lea.hbm %s16226_s6, 12288 }
  0xa7   : > { %12787 = dma.hbm_to_vmem [thread:$0]  (!%p15505_p5), %s16224_s4, 73728, %s431_s30, [#allocation9], %s16261_s19, %s16261_s19, %s15371_s11  }
  0xa8   : > { %p15132_p1 = scmp.ne.s32.totalorder %s16226_s6, %s15131_s24  ;;  %p15138_p0 = scmp.lt.u32.totalorder %s15131_s24, %s16226_s6 }
  0xaa   : > { %p15134_p3 = pnand %p15132_p1, %p15521_p7 }
  0xac   : > { %p15135_p13 = pneg %p15134_p3 }
  0xae   : > { %p15140_p2 = pnand %p15138_p0, %p15135_p13 }
  0xb0   : > { %15143 = shalt.err (!%p15140_p2)
}
  0xb1   : > { %s15144_s18 = scalar_lea.vmem %s455_s28, 12288  ;;  %p15152_p9 = scmp.lt.s32.totalorder %s455_s28, %s455_s28 }
  0xb2   : > { %p15145_p4 = scmp.ne.s32.totalorder %s455_s28, %s15144_s18  ;;  %p15153_p10 = scmp.lt.s32.totalorder %s15144_s18, %s15144_s18 }
  0xb4   : > { %p15147_p6 = pnand %p15145_p4, %p15521_p7  ;;  %p15154_p11 = por %p15153_p10, %p15152_p9 }
  0xb6   : > { %p15148_p8 = pneg %p15147_p6 }
  0xb8   : > { %p15155_p12 = pnand %p15154_p11, %p15148_p8 }
  0xba   : > { %15158 = shalt.err (!%p15155_p12)
}
  0xbb   : > { %s16262_s11 = smov 8   ;;  %s16263_s30 = smov 128  }
  0xbc   : > { %12793 = dma.hbm_to_vmem [thread:$0]  (!%p15505_p5), %s16226_s6, 12288, %s455_s28, [#allocation12], %s16263_s30, %s16263_s30, %s16262_s11  }
  0xbd   : > { %s15378_s0 = smov [#allocation16]   ;;  %s15379_s15 = smov [#allocation19]  }
  0xbe   : > { %s481_s14 = sshll.u32 %s15378_s0, 4  ;;  %s509_s24 = sshll.u32 %s15379_s15, 4  ;;  %s482_s14 = int_to_ptr.vmem [resolvable:$true] %s481_s14  ;;  %s510_s24 = int_to_ptr.vmem [resolvable:$true] %s509_s24 }
  0xbf   : > { %s15159_s9 = scalar_lea.hbm %s16228_s8, 32 }
  0xc0   : > { %p15160_p1 = scmp.ne.s32.totalorder %s16228_s8, %s15159_s9  ;;  %p15166_p0 = scmp.lt.u32.totalorder %s15159_s9, %s16228_s8 }
  0xc2   : > { %p15162_p3 = pnand %p15160_p1, %p15521_p7 }
  0xc4   : > { %p15163_p13 = pneg %p15162_p3 }
  0xc6   : > { %p15168_p2 = pnand %p15166_p0, %p15163_p13 }
  0xc8   : > { %15171 = shalt.err (!%p15168_p2)
}
  0xc9   : > { %s15172_s28 = scalar_lea.vmem %s482_s14, 32  ;;  %p15180_p9 = scmp.lt.s32.totalorder %s482_s14, %s482_s14 }
  0xca   : > { %p15173_p4 = scmp.ne.s32.totalorder %s482_s14, %s15172_s28  ;;  %p15181_p10 = scmp.lt.s32.totalorder %s15172_s28, %s15172_s28 }
  0xcc   : > { %p15175_p6 = pnand %p15173_p4, %p15521_p7  ;;  %p15182_p11 = por %p15181_p10, %p15180_p9 }
  0xce   : > { %p15176_p8 = pneg %p15175_p6 }
  0xd0   : > { %p15183_p12 = pnand %p15182_p11, %p15176_p8 }
  0xd2   : > { %15186 = shalt.err (!%p15183_p12)
}
  0xd3   : > { %12799 = dma.hbm_to_vmem [thread:$0]  (!%p15505_p5), %s16228_s8, 32, %s482_s14, [#allocation15]  }
  0xd4   : > { %s15187_s0 = scalar_lea.hbm %s16232_s12, 16 }
  0xd5   : > { %p15188_p1 = scmp.ne.s32.totalorder %s16232_s12, %s15187_s0  ;;  %p15194_p0 = scmp.lt.u32.totalorder %s15187_s0, %s16232_s12 }
  0xd7   : > { %p15190_p3 = pnand %p15188_p1, %p15521_p7 }
  0xd9   : > { %p15191_p13 = pneg %p15190_p3 }
  0xdb   : > { %p15196_p2 = pnand %p15194_p0, %p15191_p13 }
  0xdd   : > { %15199 = shalt.err (!%p15196_p2)
}
  0xde   : > { %s15200_s26 = scalar_lea.vmem %s510_s24, 16  ;;  %s15207_s14 = scalar_lea.vmem %s510_s24, 32 }
  0xdf   : > { %p15201_p4 = scmp.ne.s32.totalorder %s510_s24, %s15200_s26  ;;  %p15208_p9 = scmp.lt.s32.totalorder %s510_s24, %s510_s24 }
  0xe0   : > { %p15209_p10 = scmp.lt.s32.totalorder %s15207_s14, %s15200_s26 }
  0xe1   : > { %p15203_p6 = pnand %p15201_p4, %p15521_p7 }
  0xe2   : > { %p15210_p11 = por %p15209_p10, %p15208_p9 }
  0xe3   : > { %p15204_p8 = pneg %p15203_p6 }
  0xe5   : > { %p15211_p12 = pnand %p15210_p11, %p15204_p8 }
  0xe7   : > { %15214 = shalt.err (!%p15211_p12)
}
  0xe8   : > { %12805 = dma.hbm_to_vmem [thread:$0]  (!%p15505_p5), %s16232_s12, 16, %s510_s24, [#allocation18]  }
  0xe9   : > { %s15380_s28 = smov [#allocation20]   ;;  %s15215_s1 = scalar_lea.hbm %s16233_s13, 16 }
  0xea   : > { %s520_s11 = sshll.u32 %s15380_s28, 4  ;;  %p15216_p1 = scmp.ne.s32.totalorder %s16233_s13, %s15215_s1  ;;  %s521_s11 = int_to_ptr.vmem [resolvable:$true] %s520_s11 }
  0xeb   : > { %p15222_p0 = scmp.lt.u32.totalorder %s15215_s1, %s16233_s13 }
  0xec   : > { %p15218_p3 = pnand %p15216_p1, %p15521_p7 }
  0xee   : > { %p15219_p13 = pneg %p15218_p3 }
  0xf0   : > { %p15224_p2 = pnand %p15222_p0, %p15219_p13 }
  0xf2   : > { %15227 = shalt.err (!%p15224_p2)
}
  0xf3   : > { %s15228_s24 = scalar_lea.vmem %s521_s11, 16  ;;  %s15235_s9 = scalar_lea.vmem %s521_s11, 32 }
  0xf4   : > { %p15229_p4 = scmp.ne.s32.totalorder %s521_s11, %s15228_s24  ;;  %p15236_p9 = scmp.lt.s32.totalorder %s521_s11, %s521_s11 }
  0xf5   : > { %p15237_p10 = scmp.lt.s32.totalorder %s15235_s9, %s15228_s24 }
  0xf6   : > { %p15231_p6 = pnand %p15229_p4, %p15521_p7 }
  0xf7   : > { %p15238_p11 = por %p15237_p10, %p15236_p9 }
  0xf8   : > { %p15232_p8 = pneg %p15231_p6 }
  0xfa   : > { %p15239_p12 = pnand %p15238_p11, %p15232_p8 }
  0xfc   : > { %15242 = shalt.err (!%p15239_p12)
}
  0xfd   : > { %12808 = dma.hbm_to_vmem [thread:$0]  (!%p15505_p5), %s16233_s13, 16, %s521_s11, [#allocation21]  }
  0xfe   : > { %s15727_s27 = sadd.s32 1, %s15365_s23   ;;  %s45_s29 = sadd.s32 1, %s15361_s22 }
  0xff   : > { %s42_s18 = ssub.s32 %s15365_s23, %s15727_s27  ;;  %p52_p7 = scmp.ne.s32.totalorder %s15361_s22, %s15357_s21 }
 0x100   : > { %p43_p1 = scmp.eq.s32.totalorder %s42_s18, 0  ;;  %p53_p3 = scmp.eq.s32.totalorder %s15365_s23, 0 }
 0x101   : > { %p58_p13 = scmp.ne.s32.totalorder %s15357_s21, %s15353_s20  ;;  %p12826_p0 = scmp.lt.s32.totalorder %s15365_s23, 2 }
 0x102   : > { %s15739_s19 = scalar_select %p43_p1, %s15361_s22, %s45_s29  }
 0x103   : > { %p54_p2 = por %p53_p3, %p52_p7  ;;  %p16264_p4 = scmp.eq.s32.totalorder %s15490_s25, 0 }
 0x104   : > { %s534_s11 = sand.u32 1, %s15361_s22   ;;  %s16246_s30 = smul.u32 768, %s15365_s23 }
 0x105   : > { %p15743_p6 = por %p16264_p4, %p58_p13  ;;  %s15749_s2 = smul.u32 48, %s534_s11 }
 0x106   : > { %s16266_s15 = sld [smem:[#allocation31_spill]]  ;;  %p15758_p5 = pnand %p12826_p0, %p54_p2 }
 0x107   : > { %s16265_s28 = scalar_select %p15743_p6, 1, 0 }
 0x108   : > { %s553_s17 = sand.u32 1, %s15365_s23   ;;  %s538_s24 = scalar_lea.vmem [#allocation3], %s15749_s2 }
 0x109   : > { %s546_s9 = sshll.u32 %s538_s24, 4  ;;  %s535_s26 = scalar_lea.sflag [#allocation4], %s534_s11  ;;  %s15764_s9 = int_to_ptr.vmem [resolvable:$true] %s546_s9 }
 0x10a   : > { %p15245_p9 = pneg %p15758_p5 }
 0x10c   : > { %s15756_s16 = scalar_lea.hbm %s16266_s15, %s16246_s30  ;;  %s15248_s1 = scalar_lea.hbm %s16266_s15, 1536 }
 0x10d   : > { %s15243_s14 = scalar_lea.hbm %s15756_s16, 768  ;;  %p15249_p12 = scmp.lt.u32.totalorder %s15756_s16, %s16266_s15 }
 0x10e   : > { %p15244_p8 = scmp.ne.s32.totalorder %s15756_s16, %s15243_s14  ;;  %p15250_p7 = scmp.lt.u32.totalorder %s15248_s1, %s15243_s14 }
 0x10f   : > { %p15252_p3 = scmp.lt.u32.totalorder %s15243_s14, %s15756_s16 }
 0x110   : > { %p15246_p10 = pnand %p15245_p9, %p15244_p8  ;;  %p15251_p1 = por %p15250_p7, %p15249_p12 }
 0x112   : > { %p15247_p11 = pneg %p15246_p10  ;;  %p15253_p13 = por %p15252_p3, %p15251_p1 }
 0x114   : > { %p15254_p0 = pnand %p15253_p13, %p15247_p11 }
 0x116   : > { %15257 = shalt.err (!%p15254_p0)
}
 0x117   : > { %s15258_s11 = scalar_lea.vmem %s15764_s9, 768  ;;  %s15381_s24 = smov [#allocation3]  }
 0x118   : > { %p15259_p2 = scmp.ne.s32.totalorder %s15764_s9, %s15258_s11  ;;  %s15263_s29 = sshll.u32 %s15381_s24, 4  ;;  %s15264_s29 = int_to_ptr.vmem [resolvable:$false] %s15263_s29 }
 0x119   : > { %s15265_s30 = scalar_lea.vmem %s15264_s29, 1536  ;;  %p15266_p10 = scmp.lt.s32.totalorder %s15764_s9, %s15264_s29 }
 0x11a   : > { %p15261_p4 = pnand %p15259_p2, %p15245_p9  ;;  %p15267_p12 = scmp.lt.s32.totalorder %s15265_s30, %s15258_s11 }
 0x11c   : > { %p15262_p8 = pneg %p15261_p4  ;;  %p15268_p7 = por %p15267_p12, %p15266_p10 }
 0x11e   : > { %p15269_p1 = pnand %p15268_p7, %p15262_p8 }
 0x120   : > { %15272 = shalt.err (!%p15269_p1)
}
 0x121   : > { %12812 = dma.hbm_to_vmem [thread:$0]  (!%p15758_p5), %s15756_s16, 768, %s15764_s9, %s535_s26  }
 0x122   : > { %s16268_s14 = smul.u32 768, %s15365_s23  ;;  %s16269_s0 = sld [smem:[#allocation32_spill]] }
 0x123   : > { %s557_s11 = scalar_lea.vmem [#allocation5], %s15749_s2  ;;  %s554_s30 = scalar_lea.sflag [#allocation6], %s553_s17 }
 0x124   : > { %s565_s29 = sshll.u32 %s557_s11, 4  ;;  %s566_s29 = int_to_ptr.vmem [resolvable:$true] %s565_s29 }
 0x128   : > { %s15796_s24 = scalar_lea.hbm %s16269_s0, %s16268_s14  ;;  %s15278_s26 = scalar_lea.hbm %s16269_s0, 1536 }
 0x129   : > { %s15273_s3 = scalar_lea.hbm %s15796_s24, 768  ;;  %p15279_p0 = scmp.lt.u32.totalorder %s15796_s24, %s16269_s0 }
 0x12a   : > { %p15274_p11 = scmp.ne.s32.totalorder %s15796_s24, %s15273_s3  ;;  %p15280_p2 = scmp.lt.u32.totalorder %s15278_s26, %s15273_s3 }
 0x12b   : > { %p15282_p8 = scmp.lt.u32.totalorder %s15273_s3, %s15796_s24 }
 0x12c   : > { %p15276_p3 = pnand %p15274_p11, %p15245_p9  ;;  %p15281_p4 = por %p15280_p2, %p15279_p0 }
 0x12e   : > { %p15277_p13 = pneg %p15276_p3  ;;  %p15283_p10 = por %p15282_p8, %p15281_p4 }
 0x130   : > { %p15284_p12 = pnand %p15283_p10, %p15277_p13 }
 0x132   : > { %15287 = shalt.err (!%p15284_p12)
}
 0x133   : > { %s15288_s23 = scalar_lea.vmem %s566_s29, 768  ;;  %s15382_s2 = smov [#allocation5]  }
 0x134   : > { %p15289_p7 = scmp.ne.s32.totalorder %s566_s29, %s15288_s23  ;;  %s15293_s17 = sshll.u32 %s15382_s2, 4  ;;  %s15294_s17 = int_to_ptr.vmem [resolvable:$false] %s15293_s17 }
 0x135   : > { %s15295_s1 = scalar_lea.vmem %s15294_s17, 1536  ;;  %p15296_p3 = scmp.lt.s32.totalorder %s566_s29, %s15294_s17 }
 0x136   : > { %p15291_p1 = pnand %p15289_p7, %p15245_p9  ;;  %p15297_p6 = scmp.lt.s32.totalorder %s15295_s1, %s15288_s23 }
 0x138   : > { %p15292_p11 = pneg %p15291_p1  ;;  %p15298_p0 = por %p15297_p6, %p15296_p3 }
 0x13a   : > { %p15299_p2 = pnand %p15298_p0, %p15292_p11 }
 0x13c   : > { %15302 = shalt.err (!%p15299_p2)
}
 0x13d   : > { %12815 = dma.hbm_to_vmem [thread:$0]  (!%p15758_p5), %s15796_s24, 768, %s566_s29, %s554_s30  }
 0x13e   : > { %s16270_s3 = sld [smem:[#allocation30_spill]] }
 0x144   : > { %p16271_p13 = scmp.ne.s32.totalorder %s16270_s3, 0 }
 0x145   : > { %s576_s11 = sand.u32 (!%p16271_p13), 1, %s15357_s21   ;;  %p16272_p9 = scmp.ne.s32.totalorder (!%p16271_p13), %s16265_s28, 0 }
 0x146   : > { %574 = sbr.rel (%p16271_p13) target bundleno = 3044 (0xbe4), region = 80  ;;  %s577_s9 = scalar_lea.sflag (!%p16271_p13), [#allocation4], %s576_s11 }
 0x147   : > { %s12733_s16 = smul.u32 (!%p16271_p13), 48, %s576_s11 }
 0x149   : > { %s15823_s26 = scalar_lea.vmem (!%p16271_p13), [#allocation3], %s12733_s16 }
 0x14d   : > { %15320 = dma.done.wait (%p16272_p9), %s577_s9, 768  }
 0x14e   : > { %15322 = vsyncadd (%p16272_p9), %s577_s9, 4294966528  ;;  %s585_s20 = sand.u32 1, %s15490_s25   ;;  %s15830_s24 = scalar_lea.vmem [#allocation5], %s12733_s16 }
 0x14f   : > { %s586_s14 = scalar_lea.sflag [#allocation6], %s585_s20 }
 0x150   : > { %15324 = dma.done.wait (%p16272_p9), %s586_s14, 768  }
 0x151   : > { %15326 = vsyncadd (%p16272_p9), %s586_s14, 4294966528  ;;  %p16273_p6 = scmp.eq.s32.totalorder %s15490_s25, 0 }
 0x153   : > { %15328 = dma.done.wait (%p16273_p6), [#allocation6], 73728   ;;  %p16274_p5 = pmov %p16273_p6 }
 0x155   : > { %15330 = vsyncadd (%p16274_p5), [#allocation6], 4294893568  ;;  %p16275_p4 = pmov %p16274_p5 }
 0x157   : > { %15332 = dma.done.wait (%p16275_p4), [#allocation9], 73824   ;;  %p16276_p8 = pmov %p16275_p4 }
 0x158   : > { %p16277_p10 = pmov %p16275_p4 }
 0x159   : > { %15334 = vsyncadd (%p16276_p8), [#allocation9], 4294893472 }
 0x15a   : > { %15336 = dma.done.wait (%p16277_p10), [#allocation12], 12384   ;;  %p16278_p12 = pmov %p16275_p4 }
 0x15b   : > { %p16279_p7 = pmov %p16275_p4 }
 0x15c   : > { %15338 = vsyncadd (%p16278_p12), [#allocation12], 4294954912 }
 0x15d   : > { %15340 = dma.done.wait (%p16279_p7), [#allocation15], 12320   ;;  %p16280_p1 = pmov %p16275_p4 }
 0x15f   : > { %15342 = vsyncadd (%p16280_p1), [#allocation15], 4294954976  ;;  %p16281_p11 = pmov %p16280_p1 }
 0x160   : > { %p16282_p3 = pmov %p16280_p1 }
 0x161   : > { %15344 = dma.done.wait (%p16281_p11), [#allocation18], 32  }
 0x162   : > { %15346 = vsyncadd (%p16282_p3), [#allocation18], 4294967264  ;;  %p16283_p0 = pmov %p16280_p1 }
 0x164   : > { %15348 = dma.done.wait (%p16283_p0), [#allocation21], 16   ;;  %p16284_p2 = pmov %p16283_p0 }
 0x165   : > { %v12886_v1 = vld [vmem:[#allocation7 + $0x4] ss:$24 sps:$4 sm:$0xff]   ;;  %v12890_v3 = vld [vmem:[#allocation7] ss:$24 sps:$4 sm:$0xff]   ;;  %v12892_v5 = vld [vmem:[#allocation7 + $0x34] ss:$24 sps:$4 sm:$0xff]  }
 0x166   : > { %15350 = vsyncadd (%p16284_p2), [#allocation21], 4294967280  ;;  %v12888_v2 = vld [vmem:[#allocation7 + $0xc] ss:$24 sps:$4 sm:$0xff]   ;;  %4196 = vmatprep.subr.bf16.mxu0 %v12886_v1  ;;  %v12891_v4 = vld [vmem:[#allocation7 + $0x8] ss:$24 sps:$4 sm:$0xff]  }
 0x167   : > { %4454 = vmatprep.subr.bf16.mxu1 %v12888_v2  ;;  %4197 = vmatpush1.bf16.msra.mxu0 %v12890_v3  ;;  %v12894_v6 = vld [vmem:[#allocation7 + $0x3c] ss:$24 sps:$4 sm:$0xff]   ;;  %v12896_v7 = vld [vmem:[#allocation7 + $0x30] ss:$24 sps:$4 sm:$0xff]   ;;  %v12900_v10 = vld [vmem:[#allocation7 + $0x6c] ss:$24 sps:$4 sm:$0xff]  }
 0x168   : > { %4455 = vmatpush1.bf16.msra.mxu1 %v12891_v4  ;;  %4198 = vmatprep.subr.bf16.mxu0 %v12892_v5  ;;  %v12897_v8 = vld [vmem:[#allocation7 + $0x38] ss:$24 sps:$4 sm:$0xff]   ;;  %v12898_v9 = vld [vmem:[#allocation7 + $0x64] ss:$24 sps:$4 sm:$0xff]   ;;  %v12903_v12 = vld [vmem:[#allocation7 + $0x68] ss:$24 sps:$4 sm:$0xff]  }
 0x169   : > { %4456 = vmatprep.subr.bf16.mxu1 %v12894_v6  ;;  %v12902_v11 = vld [vmem:[#allocation7 + $0x60] ss:$24 sps:$4 sm:$0xff]   ;;  %v12904_v13 = vld [vmem:[#allocation7 + $0x94] ss:$24 sps:$4 sm:$0xff]   ;;  %v12908_v15 = vld [vmem:[#allocation7 + $0x90] ss:$24 sps:$4 sm:$0xff]  }
 0x16a   : > { %v12906_v14 = vld [vmem:[#allocation7 + $0x9c] ss:$24 sps:$4 sm:$0xff]   ;;  %v12909_v16 = vld [vmem:[#allocation7 + $0x98] ss:$24 sps:$4 sm:$0xff]   ;;  %v12912_v18 = vld [vmem:[#allocation7 + $0xcc] ss:$24 sps:$4 sm:$0xff]  }
 0x16b   : > { %4199 = vmatpush1.bf16.msra.mxu0 %v12896_v7  ;;  %v12910_v17 = vld [vmem:[#allocation7 + $0xc4] ss:$24 sps:$4 sm:$0xff]   ;;  %v12914_v19 = vld [vmem:[#allocation7 + $0xc0] ss:$24 sps:$4 sm:$0xff]   ;;  %v12916_v21 = vld [vmem:[#allocation7 + $0xf4] ss:$24 sps:$4 sm:$0xff]  }
 0x16c   : > { %4457 = vmatpush1.bf16.msra.mxu1 %v12897_v8  ;;  %4200 = vmatprep.subr.bf16.mxu0 %v12898_v9  ;;  %v12915_v20 = vld [vmem:[#allocation7 + $0xc8] ss:$24 sps:$4 sm:$0xff]   ;;  %v12918_v22 = vld [vmem:[#allocation7 + $0xfc] ss:$24 sps:$4 sm:$0xff]   ;;  %v12921_v24 = vld [vmem:[#allocation7 + $0xf8] ss:$24 sps:$4 sm:$0xff]  }
 0x16d   : > { %4458 = vmatprep.subr.bf16.mxu1 %v12900_v10  ;;  %v12920_v23 = vld [vmem:[#allocation7 + $0xf0] ss:$24 sps:$4 sm:$0xff]   ;;  %v12922_v25 = vld [vmem:[#allocation7 + $0x124] ss:$24 sps:$4 sm:$0xff]   ;;  %v12926_v27 = vld [vmem:[#allocation7 + $0x120] ss:$24 sps:$4 sm:$0xff]  }
 0x16e   : > { %v12924_v26 = vld [vmem:[#allocation7 + $0x12c] ss:$24 sps:$4 sm:$0xff]   ;;  %v12927_v28 = vld [vmem:[#allocation7 + $0x128] ss:$24 sps:$4 sm:$0xff]   ;;  %v12930_v30 = vld [vmem:[#allocation7 + $0x15c] ss:$24 sps:$4 sm:$0xff]  }
 0x16f   : > { %4201 = vmatpush1.bf16.msra.mxu0 %v12902_v11  ;;  %v12928_v29 = vld [vmem:[#allocation7 + $0x154] ss:$24 sps:$4 sm:$0xff]   ;;  %v12932_v31 = vld [vmem:[#allocation7 + $0x150] ss:$24 sps:$4 sm:$0xff]   ;;  %v12934_v33 = vld [vmem:[#allocation7 + $0x184] ss:$24 sps:$4 sm:$0xff]  }
 0x170   : > { %4459 = vmatpush1.bf16.msra.mxu1 %v12903_v12  ;;  %4202 = vmatprep.subr.bf16.mxu0 %v12904_v13  ;;  %v12933_v32 = vld [vmem:[#allocation7 + $0x158] ss:$24 sps:$4 sm:$0xff]   ;;  %v12936_v34 = vld [vmem:[#allocation7 + $0x18c] ss:$24 sps:$4 sm:$0xff]   ;;  %v12939_v36 = vld [vmem:[#allocation7 + $0x188] ss:$24 sps:$4 sm:$0xff]  }
 0x171   : > { %4460 = vmatprep.subr.bf16.mxu1 %v12906_v14  ;;  %v12938_v35 = vld [vmem:[#allocation7 + $0x180] ss:$24 sps:$4 sm:$0xff]   ;;  %v12940_v37 = vld [vmem:[#allocation7 + $0x1b4] ss:$24 sps:$4 sm:$0xff]   ;;  %v12944_v39 = vld [vmem:[#allocation7 + $0x1b0] ss:$24 sps:$4 sm:$0xff]  }
 0x172   : > { %v12942_v38 = vld [vmem:[#allocation7 + $0x1bc] ss:$24 sps:$4 sm:$0xff]   ;;  %v12945_v40 = vld [vmem:[#allocation7 + $0x1b8] ss:$24 sps:$4 sm:$0xff]   ;;  %v12948_v42 = vld [vmem:[#allocation7 + $0x1ec] ss:$24 sps:$4 sm:$0xff]  }
 0x173   : > { %4203 = vmatpush1.bf16.msra.mxu0 %v12908_v15  ;;  %v12946_v41 = vld [vmem:[#allocation7 + $0x1e4] ss:$24 sps:$4 sm:$0xff]   ;;  %v12950_v43 = vld [vmem:[#allocation7 + $0x1e0] ss:$24 sps:$4 sm:$0xff]   ;;  %v12952_v45 = vld [vmem:[#allocation7 + $0x214] ss:$24 sps:$4 sm:$0xff]  }
 0x174   : > { %4461 = vmatpush1.bf16.msra.mxu1 %v12909_v16  ;;  %4204 = vmatprep.subr.bf16.mxu0 %v12910_v17  ;;  %v12951_v44 = vld [vmem:[#allocation7 + $0x1e8] ss:$24 sps:$4 sm:$0xff]   ;;  %v12954_v46 = vld [vmem:[#allocation7 + $0x21c] ss:$24 sps:$4 sm:$0xff]   ;;  %v12957_v50 = vld [vmem:[#allocation7 + $0x218] ss:$24 sps:$4 sm:$0xff]  }
 0x175   : > { %4462 = vmatprep.subr.bf16.mxu1 %v12912_v18  ;;  %v685_v47 = vld [vmem:[%s15823_s26 + $0x8] sm:$0xff]  ;;  %v684_v54 = vld [vmem:[%s15823_s26] sm:$0xff]  ;;  %s16285_s30 = sld [smem:[#allocation35_spill]]  ;;  %s16286_s1 = sld [smem:[#allocation36_spill]]  ;;  %vm15384_vm0 = vmmov 0   ;;  %vm10819_vm1 = vcmask 523264  }
 0x176   : > { %v691_v48 = vld [vmem:[%s15830_s24 + $0x8] sm:$0xff]  ;;  %v690_v55 = vld [vmem:[%s15830_s24] sm:$0xff]  ;;  %vm10902_vm2 = vcmask 130048   ;;  %p680_p13 = scmp.lt.s32.totalorder %s15490_s25, 1  ;;  %s16287_s9 = sld [smem:[#allocation37_spill]]  ;;  %vm10915_vm3 = vcmask 7168  }
 0x177   : > { %4205 = vmatpush1.bf16.msra.mxu0 %v12914_v19  ;;  %v12956_v49 = vld [vmem:[#allocation7 + $0x210] ss:$24 sps:$4 sm:$0xff]   ;;  %v15862_v51 = vpack.c.bf16 %v691_v48, %v685_v47  ;;  %v12958_v52 = vld [vmem:[#allocation7 + $0x244] ss:$24 sps:$4 sm:$0xff]   ;;  %v12962_v56 = vld [vmem:[#allocation7 + $0x240] ss:$24 sps:$4 sm:$0xff]   ;;  %v15868_v58 = vpack.c.bf16 %v684_v54, %v690_v55  ;;  %v15870_v11 = vpack.c.bf16 %v690_v55, %v684_v54 }
 0x178   : > { %4463 = vmatpush1.bf16.msra.mxu1 %v12915_v20  ;;  %4206 = vmatprep.subr.bf16.mxu0 %v12916_v21  ;;  %v12960_v53 = vld [vmem:[#allocation7 + $0x24c] ss:$24 sps:$4 sm:$0xff]   ;;  %v12963_v57 = vld [vmem:[#allocation7 + $0x248] ss:$24 sps:$4 sm:$0xff]   ;;  %v12966_v60 = vld [vmem:[#allocation7 + $0x27c] ss:$24 sps:$4 sm:$0xff]  }
 0x179   : > { %4464 = vmatprep.subr.bf16.mxu1 %v12918_v22  ;;  %4228 = vmatprep.mubr.bf16.mxu0 %v15862_v51  ;;  %v12964_v59 = vld [vmem:[#allocation7 + $0x274] ss:$24 sps:$4 sm:$0xff]   ;;  %v12968_v61 = vld [vmem:[#allocation7 + $0x270] ss:$24 sps:$4 sm:$0xff]   ;;  %v12970_v63 = vld [vmem:[#allocation7 + $0x2a4] ss:$24 sps:$4 sm:$0xff]  }
 0x17a   : > { %4486 = vmatprep.mubr.bf16.mxu1 %v15862_v51  ;;  %v12969_v62 = vld [vmem:[#allocation7 + $0x278] ss:$24 sps:$4 sm:$0xff]   ;;  %v12972_v0 = vld [vmem:[#allocation7 + $0x2ac] ss:$24 sps:$4 sm:$0xff]   ;;  %v12975_v2 = vld [vmem:[#allocation7 + $0x2a8] ss:$24 sps:$4 sm:$0xff]  }
 0x17b   : > { %4207 = vmatpush1.bf16.msra.mxu0 %v12920_v23  ;;  %v12974_v1 = vld [vmem:[#allocation7 + $0x2a0] ss:$24 sps:$4 sm:$0xff]   ;;  %v12976_v3 = vld [vmem:[#allocation7 + $0x2d4] ss:$24 sps:$4 sm:$0xff]   ;;  %v12980_v5 = vld [vmem:[#allocation7 + $0x2d0] ss:$24 sps:$4 sm:$0xff]  }
 0x17c   : > { %4465 = vmatpush1.bf16.msra.mxu1 %v12921_v24  ;;  %4208 = vmatprep.subr.bf16.mxu0 %v12922_v25  ;;  %v12978_v4 = vld [vmem:[#allocation7 + $0x2dc] ss:$24 sps:$4 sm:$0xff]   ;;  %v12981_v6 = vld [vmem:[#allocation7 + $0x2d8] ss:$24 sps:$4 sm:$0xff]   ;;  %v12987_v8 = vld [vmem:[#allocation7 + $0x30c] ss:$24 sps:$4 sm:$0xff]  }
 0x17d   : > { %4466 = vmatprep.subr.bf16.mxu1 %v12924_v26  ;;  %v12984_v7 = vld [vmem:[#allocation7 + $0x304] ss:$24 sps:$4 sm:$0xff]   ;;  %v12982_v9 = vld [vmem:[#allocation7 + $0x300] ss:$24 sps:$4 sm:$0xff]   ;;  %v12990_v12 = vld [vmem:[#allocation7 + $0x334] ss:$24 sps:$4 sm:$0xff]  }
 0x17e   : > { %v12985_v10 = vld [vmem:[#allocation7 + $0x308] ss:$24 sps:$4 sm:$0xff]   ;;  %v12993_v13 = vld [vmem:[#allocation7 + $0x33c] ss:$24 sps:$4 sm:$0xff]   ;;  %v12991_v15 = vld [vmem:[#allocation7 + $0x338] ss:$24 sps:$4 sm:$0xff]  }
 0x17f   : > { %4209 = vmatpush1.bf16.msra.mxu0 %v12926_v27  ;;  %v12988_v14 = vld [vmem:[#allocation7 + $0x330] ss:$24 sps:$4 sm:$0xff]   ;;  %v12996_v16 = vld [vmem:[#allocation7 + $0x364] ss:$24 sps:$4 sm:$0xff]   ;;  %v12994_v18 = vld [vmem:[#allocation7 + $0x360] ss:$24 sps:$4 sm:$0xff]  }
 0x180   : > { %4467 = vmatpush1.bf16.msra.mxu1 %v12927_v28  ;;  %4210 = vmatprep.subr.bf16.mxu0 %v12928_v29  ;;  %v12999_v17 = vld [vmem:[#allocation7 + $0x36c] ss:$24 sps:$4 sm:$0xff]   ;;  %v12997_v19 = vld [vmem:[#allocation7 + $0x368] ss:$24 sps:$4 sm:$0xff]   ;;  %v13005_v21 = vld [vmem:[#allocation7 + $0x39c] ss:$24 sps:$4 sm:$0xff]  }
 0x181   : > { %4468 = vmatprep.subr.bf16.mxu1 %v12930_v30  ;;  %v13002_v20 = vld [vmem:[#allocation7 + $0x394] ss:$24 sps:$4 sm:$0xff]   ;;  %v13000_v22 = vld [vmem:[#allocation7 + $0x390] ss:$24 sps:$4 sm:$0xff]   ;;  %v13008_v24 = vld [vmem:[#allocation7 + $0x3c4] ss:$24 sps:$4 sm:$0xff]  }
 0x182   : > { %v13003_v23 = vld [vmem:[#allocation7 + $0x398] ss:$24 sps:$4 sm:$0xff]   ;;  %v13011_v25 = vld [vmem:[#allocation7 + $0x3cc] ss:$24 sps:$4 sm:$0xff]   ;;  %v13009_v27 = vld [vmem:[#allocation7 + $0x3c8] ss:$24 sps:$4 sm:$0xff]  }
 0x183   : > { %4211 = vmatpush1.bf16.msra.mxu0 %v12932_v31  ;;  %v13006_v26 = vld [vmem:[#allocation7 + $0x3c0] ss:$24 sps:$4 sm:$0xff]   ;;  %v13014_v28 = vld [vmem:[#allocation7 + $0x3f4] ss:$24 sps:$4 sm:$0xff]   ;;  %v13012_v30 = vld [vmem:[#allocation7 + $0x3f0] ss:$24 sps:$4 sm:$0xff]  }
 0x184   : > { %4469 = vmatpush1.bf16.msra.mxu1 %v12933_v32  ;;  %4212 = vmatprep.subr.bf16.mxu0 %v12934_v33  ;;  %v13017_v29 = vld [vmem:[#allocation7 + $0x3fc] ss:$24 sps:$4 sm:$0xff]   ;;  %v13015_v31 = vld [vmem:[#allocation7 + $0x3f8] ss:$24 sps:$4 sm:$0xff]   ;;  %v13023_v33 = vld [vmem:[#allocation7 + $0x42c] ss:$24 sps:$4 sm:$0xff]  }
 0x185   : > { %4470 = vmatprep.subr.bf16.mxu1 %v12936_v34  ;;  %v13020_v32 = vld [vmem:[#allocation7 + $0x424] ss:$24 sps:$4 sm:$0xff]   ;;  %v13038_v47 = vld [vmem:[#allocation7 + $0x4b4] ss:$24 sps:$4 sm:$0xff]   ;;  %v13042_v54 = vld [vmem:[#allocation7 + $0x4e0] ss:$24 sps:$4 sm:$0xff]  }
 0x186   : > { %v687_v34 = vld [vmem:[%s15823_s26 + $0x18] sm:$0xff]  ;;  %s16293_s25 = smov (!%p680_p13, %s15490_s25), 1 }
 0x187   : > { %4213 = vmatpush1.bf16.msra.mxu0 %v12938_v35  ;;  %v693_v35 = vld [vmem:[%s15830_s24 + $0x18] sm:$0xff]  ;;  %s11126_s3 = sshll.u32 %s16293_s25, 3 }
 0x188   : > { %4471 = vmatpush1.bf16.msra.mxu1 %v12939_v36  ;;  %4214 = vmatprep.subr.bf16.mxu0 %v12940_v37  ;;  %v13018_v36 = vld [vmem:[#allocation7 + $0x420] ss:$24 sps:$4 sm:$0xff]   ;;  %v13041_v48 = vld [vmem:[#allocation7 + $0x4bc] ss:$24 sps:$4 sm:$0xff]  }
 0x189   : > { %4472 = vmatprep.subr.bf16.mxu1 %v12942_v38  ;;  %v13021_v37 = vld [vmem:[#allocation7 + $0x428] ss:$24 sps:$4 sm:$0xff]   ;;  %v15876_v38 = vpack.c.bf16 %v693_v35, %v687_v34  ;;  %v13099_v35 = vld [vmem:[#allocation7 + $0x698] ss:$24 sps:$4 sm:$0xff]  }
 0x18a   : > { %v13045_v55 = vld [vmem:[#allocation7 + $0x4e8] ss:$24 sps:$4 sm:$0xff]  }
 0x18b   : > { %4215 = vmatpush1.bf16.msra.mxu0 %v12944_v39  ;;  %v13026_v39 = vld [vmem:[#allocation7 + $0x454] ss:$24 sps:$4 sm:$0xff]   ;;  %v13096_v34 = vld [vmem:[#allocation7 + $0x690] ss:$24 sps:$4 sm:$0xff]  }
 0x18c   : > { %4473 = vmatpush1.bf16.msra.mxu1 %v12945_v40  ;;  %4216 = vmatprep.subr.bf16.mxu0 %v12946_v41  ;;  %v13029_v40 = vld [vmem:[#allocation7 + $0x45c] ss:$24 sps:$4 sm:$0xff]   ;;  %v13024_v41 = vld [vmem:[#allocation7 + $0x450] ss:$24 sps:$4 sm:$0xff]  }
 0x18d   : > { %4474 = vmatprep.subr.bf16.mxu1 %v12948_v42  ;;  %v13027_v42 = vld [vmem:[#allocation7 + $0x458] ss:$24 sps:$4 sm:$0xff]  }
 0x18f   : > { %4217 = vmatpush1.bf16.msra.mxu0 %v12950_v43  ;;  %v13032_v43 = vld [vmem:[#allocation7 + $0x484] ss:$24 sps:$4 sm:$0xff]  }
 0x190   : > { %4475 = vmatpush1.bf16.msra.mxu1 %v12951_v44  ;;  %4218 = vmatprep.subr.bf16.mxu0 %v12952_v45  ;;  %v13035_v44 = vld [vmem:[#allocation7 + $0x48c] ss:$24 sps:$4 sm:$0xff]   ;;  %v13030_v45 = vld [vmem:[#allocation7 + $0x480] ss:$24 sps:$4 sm:$0xff]  }
 0x191   : > { %4476 = vmatprep.subr.bf16.mxu1 %v12954_v46  ;;  %v13033_v46 = vld [vmem:[#allocation7 + $0x488] ss:$24 sps:$4 sm:$0xff]  }
 0x193   : > { %4219 = vmatpush1.bf16.msra.mxu0 %v12956_v49  ;;  %v13036_v49 = vld [vmem:[#allocation7 + $0x4b0] ss:$24 sps:$4 sm:$0xff]  }
 0x194   : > { %4477 = vmatpush1.bf16.msra.mxu1 %v12957_v50  ;;  %4220 = vmatprep.subr.bf16.mxu0 %v12958_v52  ;;  %v13039_v50 = vld [vmem:[#allocation7 + $0x4b8] ss:$24 sps:$4 sm:$0xff]   ;;  %v13044_v52 = vld [vmem:[#allocation7 + $0x4e4] ss:$24 sps:$4 sm:$0xff]  }
 0x195   : > { %4478 = vmatprep.subr.bf16.mxu1 %v12960_v53  ;;  %v13047_v53 = vld [vmem:[#allocation7 + $0x4ec] ss:$24 sps:$4 sm:$0xff]  }
 0x197   : > { %4221 = vmatpush1.bf16.msra.mxu0 %v12962_v56  ;;  %v13050_v56 = vld [vmem:[#allocation7 + $0x514] ss:$24 sps:$4 sm:$0xff]  }
 0x198   : > { %4479 = vmatpush1.bf16.msra.mxu1 %v12963_v57  ;;  %4222 = vmatprep.subr.bf16.mxu0 %v12964_v59  ;;  %v13053_v57 = vld [vmem:[#allocation7 + $0x51c] ss:$24 sps:$4 sm:$0xff]   ;;  %v13048_v59 = vld [vmem:[#allocation7 + $0x510] ss:$24 sps:$4 sm:$0xff]  }
 0x199   : > { %4480 = vmatprep.subr.bf16.mxu1 %v12966_v60  ;;  %v13051_v60 = vld [vmem:[#allocation7 + $0x518] ss:$24 sps:$4 sm:$0xff]  }
 0x19b   : > { %4223 = vmatpush1.bf16.msra.mxu0 %v12968_v61  ;;  %v13056_v61 = vld [vmem:[#allocation7 + $0x544] ss:$24 sps:$4 sm:$0xff]  }
 0x19c   : > { %4481 = vmatpush1.bf16.msra.mxu1 %v12969_v62  ;;  %4224 = vmatprep.subr.bf16.mxu0 %v12970_v63  ;;  %v13059_v62 = vld [vmem:[#allocation7 + $0x54c] ss:$24 sps:$4 sm:$0xff]   ;;  %v13054_v63 = vld [vmem:[#allocation7 + $0x540] ss:$24 sps:$4 sm:$0xff]  }
 0x19d   : > { %4482 = vmatprep.subr.bf16.mxu1 %v12972_v0  ;;  %v13057_v0 = vld [vmem:[#allocation7 + $0x548] ss:$24 sps:$4 sm:$0xff]  }
 0x19f   : > { %4225 = vmatpush1.bf16.msra.mxu0 %v12974_v1  ;;  %v13062_v1 = vld [vmem:[#allocation7 + $0x574] ss:$24 sps:$4 sm:$0xff]  }
 0x1a0   : > { %4483 = vmatpush1.bf16.msra.mxu1 %v12975_v2  ;;  %4226 = vmatprep.subr.bf16.mxu0 %v12976_v3  ;;  %v13065_v2 = vld [vmem:[#allocation7 + $0x57c] ss:$24 sps:$4 sm:$0xff]   ;;  %v13060_v3 = vld [vmem:[#allocation7 + $0x570] ss:$24 sps:$4 sm:$0xff]  }
 0x1a1   : > { %4484 = vmatprep.subr.bf16.mxu1 %v12978_v4  ;;  %v13063_v4 = vld [vmem:[#allocation7 + $0x578] ss:$24 sps:$4 sm:$0xff]  }
 0x1a3   : > { %4227 = vmatpush1.bf16.msra.mxu0 %v12980_v5  ;;  %v13068_v5 = vld [vmem:[#allocation7 + $0x5a4] ss:$24 sps:$4 sm:$0xff]  }
 0x1a4   : > { %4485 = vmatpush1.bf16.msra.mxu1 %v12981_v6  ;;  %4239 = vmatprep.subr.bf16.mxu0 %v12984_v7  ;;  %v13071_v6 = vld [vmem:[#allocation7 + $0x5ac] ss:$24 sps:$4 sm:$0xff]   ;;  %v13066_v7 = vld [vmem:[#allocation7 + $0x5a0] ss:$24 sps:$4 sm:$0xff]  }
 0x1a5   : > { %4497 = vmatprep.subr.bf16.mxu1 %v12987_v8  ;;  %v13069_v8 = vld [vmem:[#allocation7 + $0x5a8] ss:$24 sps:$4 sm:$0xff]  }
 0x1a6   : > { %4229 = vmatmul.mubr.bf16.vlgmr.msra.gmra.mrb[0].mxu0 %v15870_v11 }
 0x1a7   : > { %4487 = vmatmul.mubr.bf16.vlgmr.msra.gmra.mrb[0].mxu1 %v15870_v11  ;;  %4240 = vmatpush1.bf16.msra.mxu0 %v12982_v9  ;;  %v13074_v9 = vld [vmem:[#allocation7 + $0x5d4] ss:$24 sps:$4 sm:$0xff]  }
 0x1a8   : > { %4498 = vmatpush1.bf16.msra.mxu1 %v12985_v10  ;;  %4241 = vmatprep.subr.bf16.mxu0 %v12990_v12  ;;  %v13077_v10 = vld [vmem:[#allocation7 + $0x5dc] ss:$24 sps:$4 sm:$0xff]   ;;  %v13072_v12 = vld [vmem:[#allocation7 + $0x5d0] ss:$24 sps:$4 sm:$0xff]  }
 0x1a9   : > { %4499 = vmatprep.subr.bf16.mxu1 %v12993_v13  ;;  %4271 = vmatprep.mubr.bf16.mxu0 %v15876_v38  ;;  %v13075_v13 = vld [vmem:[#allocation7 + $0x5d8] ss:$24 sps:$4 sm:$0xff]  }
 0x1aa   : > { %4529 = vmatprep.mubr.bf16.mxu1 %v15876_v38 }
 0x1ab   : > { %4242 = vmatpush1.bf16.msra.mxu0 %v12988_v14  ;;  %v13080_v14 = vld [vmem:[#allocation7 + $0x604] ss:$24 sps:$4 sm:$0xff]  }
 0x1ac   : > { %4500 = vmatpush1.bf16.msra.mxu1 %v12991_v15  ;;  %4243 = vmatprep.subr.bf16.mxu0 %v12996_v16  ;;  %v686_v15 = vld [vmem:[%s15823_s26 + $0x10] sm:$0xff] }
 0x1ad   : > { %4501 = vmatprep.subr.bf16.mxu1 %v12999_v17  ;;  %v692_v16 = vld [vmem:[%s15830_s24 + $0x10] sm:$0xff] }
 0x1ae   : > { %v13083_v17 = vld [vmem:[#allocation7 + $0x60c] ss:$24 sps:$4 sm:$0xff]  }
 0x1af   : > { %4244 = vmatpush1.bf16.msra.mxu0 %v12994_v18  ;;  %v13078_v18 = vld [vmem:[#allocation7 + $0x600] ss:$24 sps:$4 sm:$0xff]  }
 0x1b0   : > { %4502 = vmatpush1.bf16.msra.mxu1 %v12997_v19  ;;  %4245 = vmatprep.subr.bf16.mxu0 %v13002_v20  ;;  %v13081_v19 = vld [vmem:[#allocation7 + $0x608] ss:$24 sps:$4 sm:$0xff]   ;;  %v15882_v20 = vpack.c.bf16 %v692_v16, %v686_v15  ;;  %v13159_v15 = vld [vmem:[#allocation7 + $0x878] ss:$24 sps:$4 sm:$0xff]   ;;  %v13164_v16 = vld [vmem:[#allocation7 + $0x8a4] ss:$24 sps:$4 sm:$0xff]  }
 0x1b1   : > { %4503 = vmatprep.subr.bf16.mxu1 %v13005_v21  ;;  %v13086_v21 = vld [vmem:[#allocation7 + $0x634] ss:$24 sps:$4 sm:$0xff]  }
 0x1b3   : > { %4246 = vmatpush1.bf16.msra.mxu0 %v13000_v22  ;;  %v13089_v22 = vld [vmem:[#allocation7 + $0x63c] ss:$24 sps:$4 sm:$0xff]  }
 0x1b4   : > { %4504 = vmatpush1.bf16.msra.mxu1 %v13003_v23  ;;  %4247 = vmatprep.subr.bf16.mxu0 %v13008_v24  ;;  %v689_v23 = vld [vmem:[%s15823_s26 + $0x28] sm:$0xff] }
 0x1b5   : > { %4505 = vmatprep.subr.bf16.mxu1 %v13011_v25  ;;  %v695_v24 = vld [vmem:[%s15830_s24 + $0x28] sm:$0xff] }
 0x1b6   : > { %v13084_v25 = vld [vmem:[#allocation7 + $0x630] ss:$24 sps:$4 sm:$0xff]  }
 0x1b7   : > { %4248 = vmatpush1.bf16.msra.mxu0 %v13006_v26  ;;  %v13087_v26 = vld [vmem:[#allocation7 + $0x638] ss:$24 sps:$4 sm:$0xff]  }
 0x1b8   : > { %4506 = vmatpush1.bf16.msra.mxu1 %v13009_v27  ;;  %4249 = vmatprep.subr.bf16.mxu0 %v13014_v28  ;;  %v15888_v27 = vpack.c.bf16 %v695_v24, %v689_v23  ;;  %v13092_v28 = vld [vmem:[#allocation7 + $0x664] ss:$24 sps:$4 sm:$0xff]   ;;  %v13168_v23 = vld [vmem:[#allocation7 + $0x8d0] ss:$24 sps:$4 sm:$0xff]  }
 0x1b9   : > { %4507 = vmatprep.subr.bf16.mxu1 %v13017_v29  ;;  %v13095_v29 = vld [vmem:[#allocation7 + $0x66c] ss:$24 sps:$4 sm:$0xff]   ;;  %v13171_v24 = vld [vmem:[#allocation7 + $0x8d8] ss:$24 sps:$4 sm:$0xff]  }
 0x1bb   : > { %4250 = vmatpush1.bf16.msra.mxu0 %v13012_v30  ;;  %v13090_v30 = vld [vmem:[#allocation7 + $0x660] ss:$24 sps:$4 sm:$0xff]  }
 0x1bc   : > { %4508 = vmatpush1.bf16.msra.mxu1 %v13015_v31  ;;  %4251 = vmatprep.subr.bf16.mxu0 %v13020_v32  ;;  %v13093_v31 = vld [vmem:[#allocation7 + $0x668] ss:$24 sps:$4 sm:$0xff]   ;;  %v13098_v32 = vld [vmem:[#allocation7 + $0x694] ss:$24 sps:$4 sm:$0xff]  }
 0x1bd   : > { %4509 = vmatprep.subr.bf16.mxu1 %v13023_v33  ;;  %v13101_v33 = vld [vmem:[#allocation7 + $0x69c] ss:$24 sps:$4 sm:$0xff]  }
 0x1bf   : > { %4252 = vmatpush1.bf16.msra.mxu0 %v13018_v36  ;;  %v13104_v36 = vld [vmem:[#allocation7 + $0x6c4] ss:$24 sps:$4 sm:$0xff]  }
 0x1c0   : > { %4510 = vmatpush1.bf16.msra.mxu1 %v13021_v37  ;;  %4253 = vmatprep.subr.bf16.mxu0 %v13026_v39  ;;  %v13107_v37 = vld [vmem:[#allocation7 + $0x6cc] ss:$24 sps:$4 sm:$0xff]   ;;  %v13102_v39 = vld [vmem:[#allocation7 + $0x6c0] ss:$24 sps:$4 sm:$0xff]  }
 0x1c1   : > { %4511 = vmatprep.subr.bf16.mxu1 %v13029_v40  ;;  %v13105_v40 = vld [vmem:[#allocation7 + $0x6c8] ss:$24 sps:$4 sm:$0xff]  }
 0x1c3   : > { %4254 = vmatpush1.bf16.msra.mxu0 %v13024_v41  ;;  %v13110_v41 = vld [vmem:[#allocation7 + $0x6f4] ss:$24 sps:$4 sm:$0xff]  }
 0x1c4   : > { %4512 = vmatpush1.bf16.msra.mxu1 %v13027_v42  ;;  %4255 = vmatprep.subr.bf16.mxu0 %v13032_v43  ;;  %v13113_v42 = vld [vmem:[#allocation7 + $0x6fc] ss:$24 sps:$4 sm:$0xff]   ;;  %v13108_v43 = vld [vmem:[#allocation7 + $0x6f0] ss:$24 sps:$4 sm:$0xff]  }
 0x1c5   : > { %4513 = vmatprep.subr.bf16.mxu1 %v13035_v44  ;;  %v13111_v44 = vld [vmem:[#allocation7 + $0x6f8] ss:$24 sps:$4 sm:$0xff]  }
 0x1c7   : > { %4256 = vmatpush1.bf16.msra.mxu0 %v13030_v45  ;;  %v13116_v45 = vld [vmem:[#allocation7 + $0x724] ss:$24 sps:$4 sm:$0xff]  }
 0x1c8   : > { %4514 = vmatpush1.bf16.msra.mxu1 %v13033_v46  ;;  %4257 = vmatprep.subr.bf16.mxu0 %v13038_v47  ;;  %v13119_v46 = vld [vmem:[#allocation7 + $0x72c] ss:$24 sps:$4 sm:$0xff]   ;;  %v13114_v47 = vld [vmem:[#allocation7 + $0x720] ss:$24 sps:$4 sm:$0xff]  }
 0x1c9   : > { %4515 = vmatprep.subr.bf16.mxu1 %v13041_v48  ;;  %v13117_v48 = vld [vmem:[#allocation7 + $0x728] ss:$24 sps:$4 sm:$0xff]  }
 0x1cb   : > { %4258 = vmatpush1.bf16.msra.mxu0 %v13036_v49  ;;  %v13122_v49 = vld [vmem:[#allocation7 + $0x754] ss:$24 sps:$4 sm:$0xff]  }
 0x1cc   : > { %4516 = vmatpush1.bf16.msra.mxu1 %v13039_v50  ;;  %4259 = vmatprep.subr.bf16.mxu0 %v13044_v52  ;;  %v13125_v50 = vld [vmem:[#allocation7 + $0x75c] ss:$24 sps:$4 sm:$0xff]   ;;  %v13120_v52 = vld [vmem:[#allocation7 + $0x750] ss:$24 sps:$4 sm:$0xff]  }
 0x1cd   : > { %4517 = vmatprep.subr.bf16.mxu1 %v13047_v53  ;;  %v13123_v53 = vld [vmem:[#allocation7 + $0x758] ss:$24 sps:$4 sm:$0xff]  }
 0x1cf   : > { %4260 = vmatpush1.bf16.msra.mxu0 %v13042_v54  ;;  %v13128_v54 = vld [vmem:[#allocation7 + $0x784] ss:$24 sps:$4 sm:$0xff]  }
 0x1d0   : > { %4518 = vmatpush1.bf16.msra.mxu1 %v13045_v55  ;;  %4261 = vmatprep.subr.bf16.mxu0 %v13050_v56  ;;  %v13131_v55 = vld [vmem:[#allocation7 + $0x78c] ss:$24 sps:$4 sm:$0xff]   ;;  %v13126_v56 = vld [vmem:[#allocation7 + $0x780] ss:$24 sps:$4 sm:$0xff]  }
 0x1d1   : > { %4519 = vmatprep.subr.bf16.mxu1 %v13053_v57  ;;  %v13129_v57 = vld [vmem:[#allocation7 + $0x788] ss:$24 sps:$4 sm:$0xff]  }
 0x1d3   : > { %4262 = vmatpush1.bf16.msra.mxu0 %v13048_v59  ;;  %v13134_v59 = vld [vmem:[#allocation7 + $0x7b4] ss:$24 sps:$4 sm:$0xff]  }
 0x1d4   : > { %4520 = vmatpush1.bf16.msra.mxu1 %v13051_v60  ;;  %4263 = vmatprep.subr.bf16.mxu0 %v13056_v61  ;;  %v13137_v60 = vld [vmem:[#allocation7 + $0x7bc] ss:$24 sps:$4 sm:$0xff]   ;;  %v13132_v61 = vld [vmem:[#allocation7 + $0x7b0] ss:$24 sps:$4 sm:$0xff]  }
 0x1d5   : > { %4521 = vmatprep.subr.bf16.mxu1 %v13059_v62  ;;  %v13135_v62 = vld [vmem:[#allocation7 + $0x7b8] ss:$24 sps:$4 sm:$0xff]  }
 0x1d7   : > { %4264 = vmatpush1.bf16.msra.mxu0 %v13054_v63  ;;  %v13140_v63 = vld [vmem:[#allocation7 + $0x7e4] ss:$24 sps:$4 sm:$0xff]  }
 0x1d8   : > { %4522 = vmatpush1.bf16.msra.mxu1 %v13057_v0  ;;  %4265 = vmatprep.subr.bf16.mxu0 %v13062_v1  ;;  %v13143_v0 = vld [vmem:[#allocation7 + $0x7ec] ss:$24 sps:$4 sm:$0xff]   ;;  %v13138_v1 = vld [vmem:[#allocation7 + $0x7e0] ss:$24 sps:$4 sm:$0xff]  }
 0x1d9   : > { %4523 = vmatprep.subr.bf16.mxu1 %v13065_v2  ;;  %v13141_v2 = vld [vmem:[#allocation7 + $0x7e8] ss:$24 sps:$4 sm:$0xff]  }
 0x1db   : > { %4266 = vmatpush1.bf16.msra.mxu0 %v13060_v3  ;;  %v13146_v3 = vld [vmem:[#allocation7 + $0x814] ss:$24 sps:$4 sm:$0xff]  }
 0x1dc   : > { %4524 = vmatpush1.bf16.msra.mxu1 %v13063_v4  ;;  %4267 = vmatprep.subr.bf16.mxu0 %v13068_v5  ;;  %v13149_v4 = vld [vmem:[#allocation7 + $0x81c] ss:$24 sps:$4 sm:$0xff]   ;;  %v13144_v5 = vld [vmem:[#allocation7 + $0x810] ss:$24 sps:$4 sm:$0xff]  }
 0x1dd   : > { %4525 = vmatprep.subr.bf16.mxu1 %v13071_v6  ;;  %v13147_v6 = vld [vmem:[#allocation7 + $0x818] ss:$24 sps:$4 sm:$0xff]  }
 0x1df   : > { %4268 = vmatpush1.bf16.msra.mxu0 %v13066_v7  ;;  %v13152_v7 = vld [vmem:[#allocation7 + $0x844] ss:$24 sps:$4 sm:$0xff]  }
 0x1e0   : > { %4526 = vmatpush1.bf16.msra.mxu1 %v13069_v8  ;;  %4269 = vmatprep.subr.bf16.mxu0 %v13074_v9  ;;  %v13155_v8 = vld [vmem:[#allocation7 + $0x84c] ss:$24 sps:$4 sm:$0xff]   ;;  %v13150_v9 = vld [vmem:[#allocation7 + $0x840] ss:$24 sps:$4 sm:$0xff]  }
 0x1e1   : > { %4527 = vmatprep.subr.bf16.mxu1 %v13077_v10  ;;  %v13153_v10 = vld [vmem:[#allocation7 + $0x848] ss:$24 sps:$4 sm:$0xff]  }
 0x1e3   : > { %4270 = vmatpush1.bf16.msra.mxu0 %v13072_v12  ;;  %v13158_v12 = vld [vmem:[#allocation7 + $0x874] ss:$24 sps:$4 sm:$0xff]  }
 0x1e4   : > { %4528 = vmatpush1.bf16.msra.mxu1 %v13075_v13  ;;  %4282 = vmatprep.subr.bf16.mxu0 %v13080_v14  ;;  %v13161_v13 = vld [vmem:[#allocation7 + $0x87c] ss:$24 sps:$4 sm:$0xff]   ;;  %v13156_v14 = vld [vmem:[#allocation7 + $0x870] ss:$24 sps:$4 sm:$0xff]  }
 0x1e5   : > { %4540 = vmatprep.subr.bf16.mxu1 %v13083_v17  ;;  %v13167_v17 = vld [vmem:[#allocation7 + $0x8ac] ss:$24 sps:$4 sm:$0xff]  }
 0x1e6   : > { %4272 = vmatmul.mubr.bf16.vlgmr.msra.gmra.mrb[0].mxu0 %v15882_v20 }
 0x1e7   : > { %4530 = vmatmul.mubr.bf16.vlgmr.msra.gmra.mrb[0].mxu1 %v15882_v20  ;;  %4283 = vmatpush1.bf16.msra.mxu0 %v13078_v18  ;;  %v13162_v18 = vld [vmem:[#allocation7 + $0x8a0] ss:$24 sps:$4 sm:$0xff]  }
 0x1e8   : > { %4541 = vmatpush1.bf16.msra.mxu1 %v13081_v19  ;;  %4284 = vmatprep.subr.bf16.mxu0 %v13086_v21  ;;  %v13165_v19 = vld [vmem:[#allocation7 + $0x8a8] ss:$24 sps:$4 sm:$0xff]   ;;  %v13170_v21 = vld [vmem:[#allocation7 + $0x8d4] ss:$24 sps:$4 sm:$0xff]  }
 0x1e9   : > { %4542 = vmatprep.subr.bf16.mxu1 %v13089_v22  ;;  %4314 = vmatprep.mubr.bf16.mxu0 %v15888_v27  ;;  %v13173_v22 = vld [vmem:[#allocation7 + $0x8dc] ss:$24 sps:$4 sm:$0xff]  }
 0x1ea   : > { %4572 = vmatprep.mubr.bf16.mxu1 %v15888_v27 }
 0x1eb   : > { %4285 = vmatpush1.bf16.msra.mxu0 %v13084_v25  ;;  %v13176_v25 = vld [vmem:[#allocation7 + $0x904] ss:$24 sps:$4 sm:$0xff]  }
 0x1ec   : > { %4543 = vmatpush1.bf16.msra.mxu1 %v13087_v26  ;;  %4286 = vmatprep.subr.bf16.mxu0 %v13092_v28  ;;  %v688_v26 = vld [vmem:[%s15823_s26 + $0x20] sm:$0xff] }
 0x1ed   : > { %4544 = vmatprep.subr.bf16.mxu1 %v13095_v29  ;;  %v694_v28 = vld [vmem:[%s15830_s24 + $0x20] sm:$0xff] }
 0x1ee   : > { %v13179_v29 = vld [vmem:[#allocation7 + $0x90c] ss:$24 sps:$4 sm:$0xff]  }
 0x1ef   : > { %4287 = vmatpush1.bf16.msra.mxu0 %v13090_v30  ;;  %v13174_v30 = vld [vmem:[#allocation7 + $0x900] ss:$24 sps:$4 sm:$0xff]  }
 0x1f0   : > { %4545 = vmatpush1.bf16.msra.mxu1 %v13093_v31  ;;  %4288 = vmatprep.subr.bf16.mxu0 %v13098_v32  ;;  %v13177_v31 = vld [vmem:[#allocation7 + $0x908] ss:$24 sps:$4 sm:$0xff]   ;;  %v15894_v32 = vpack.c.bf16 %v694_v28, %v688_v26  ;;  %v13257_v26 = vld [vmem:[#allocation7 + $0xb7c] ss:$24 sps:$4 sm:$0xff]  }
 0x1f1   : > { %4546 = vmatprep.subr.bf16.mxu1 %v13101_v33  ;;  %v13182_v33 = vld [vmem:[#allocation7 + $0x934] ss:$24 sps:$4 sm:$0xff]   ;;  %v13252_v28 = vld [vmem:[#allocation7 + $0xb70] ss:$24 sps:$4 sm:$0xff]  }
 0x1f3   : > { %4289 = vmatpush1.bf16.msra.mxu0 %v13096_v34  ;;  %v13185_v34 = vld [vmem:[#allocation7 + $0x93c] ss:$24 sps:$4 sm:$0xff]  }
 0x1f4   : > { %4547 = vmatpush1.bf16.msra.mxu1 %v13099_v35  ;;  %4290 = vmatprep.subr.bf16.mxu0 %v13104_v36  ;;  %v14952_v35 = vld [vmem:[%s15823_s26 + $0x8] sm:$0xff] }
 0x1f5   : > { %4548 = vmatprep.subr.bf16.mxu1 %v13107_v37  ;;  %v14953_v36 = vld [vmem:[%s15830_s24 + $0x8] sm:$0xff] }
 0x1f6   : > { %v15898_v37 = vpack.c.bf16 %v14952_v35, %v14953_v36  ;;  %v13266_v35 = vld [vmem:[#allocation7 + $0xbd4] ss:$24 sps:$4 sm:$0xff]  }
 0x1f7   : > { %4291 = vmatpush1.bf16.msra.mxu0 %v13102_v39  ;;  %v13180_v39 = vld [vmem:[#allocation7 + $0x930] ss:$24 sps:$4 sm:$0xff]   ;;  %v13269_v36 = vld [vmem:[#allocation7 + $0xbdc] ss:$24 sps:$4 sm:$0xff]  }
 0x1f8   : > { %4549 = vmatpush1.bf16.msra.mxu1 %v13105_v40  ;;  %4292 = vmatprep.subr.bf16.mxu0 %v13110_v41  ;;  %v13183_v40 = vld [vmem:[#allocation7 + $0x938] ss:$24 sps:$4 sm:$0xff]   ;;  %v13188_v41 = vld [vmem:[#allocation7 + $0x964] ss:$24 sps:$4 sm:$0xff]  }
 0x1f9   : > { %4550 = vmatprep.subr.bf16.mxu1 %v13113_v42  ;;  %v13191_v42 = vld [vmem:[#allocation7 + $0x96c] ss:$24 sps:$4 sm:$0xff]  }
 0x1fb   : > { %4293 = vmatpush1.bf16.msra.mxu0 %v13108_v43  ;;  %v13186_v43 = vld [vmem:[#allocation7 + $0x960] ss:$24 sps:$4 sm:$0xff]  }
 0x1fc   : > { %4551 = vmatpush1.bf16.msra.mxu1 %v13111_v44  ;;  %4294 = vmatprep.subr.bf16.mxu0 %v13116_v45  ;;  %v13189_v44 = vld [vmem:[#allocation7 + $0x968] ss:$24 sps:$4 sm:$0xff]   ;;  %v13194_v45 = vld [vmem:[#allocation7 + $0x994] ss:$24 sps:$4 sm:$0xff]  }
 0x1fd   : > { %4552 = vmatprep.subr.bf16.mxu1 %v13119_v46  ;;  %v13197_v46 = vld [vmem:[#allocation7 + $0x99c] ss:$24 sps:$4 sm:$0xff]  }
 0x1ff   : > { %4295 = vmatpush1.bf16.msra.mxu0 %v13114_v47  ;;  %v13192_v47 = vld [vmem:[#allocation7 + $0x990] ss:$24 sps:$4 sm:$0xff]  }
 0x200   : > { %4553 = vmatpush1.bf16.msra.mxu1 %v13117_v48  ;;  %4296 = vmatprep.subr.bf16.mxu0 %v13122_v49  ;;  %v13195_v48 = vld [vmem:[#allocation7 + $0x998] ss:$24 sps:$4 sm:$0xff]   ;;  %v13200_v49 = vld [vmem:[#allocation7 + $0x9c4] ss:$24 sps:$4 sm:$0xff]  }
 0x201   : > { %4554 = vmatprep.subr.bf16.mxu1 %v13125_v50  ;;  %v13203_v50 = vld [vmem:[#allocation7 + $0x9cc] ss:$24 sps:$4 sm:$0xff]  }
 0x203   : > { %4297 = vmatpush1.bf16.msra.mxu0 %v13120_v52  ;;  %v13198_v52 = vld [vmem:[#allocation7 + $0x9c0] ss:$24 sps:$4 sm:$0xff]  }
 0x204   : > { %4555 = vmatpush1.bf16.msra.mxu1 %v13123_v53  ;;  %4298 = vmatprep.subr.bf16.mxu0 %v13128_v54  ;;  %v13201_v53 = vld [vmem:[#allocation7 + $0x9c8] ss:$24 sps:$4 sm:$0xff]   ;;  %v13206_v54 = vld [vmem:[#allocation7 + $0x9f4] ss:$24 sps:$4 sm:$0xff]  }
 0x205   : > { %4556 = vmatprep.subr.bf16.mxu1 %v13131_v55  ;;  %v13209_v55 = vld [vmem:[#allocation7 + $0x9fc] ss:$24 sps:$4 sm:$0xff]  }
 0x207   : > { %4299 = vmatpush1.bf16.msra.mxu0 %v13126_v56  ;;  %v13204_v56 = vld [vmem:[#allocation7 + $0x9f0] ss:$24 sps:$4 sm:$0xff]  }
 0x208   : > { %4557 = vmatpush1.bf16.msra.mxu1 %v13129_v57  ;;  %4300 = vmatprep.subr.bf16.mxu0 %v13134_v59  ;;  %v13207_v57 = vld [vmem:[#allocation7 + $0x9f8] ss:$24 sps:$4 sm:$0xff]   ;;  %v13212_v59 = vld [vmem:[#allocation7 + $0xa24] ss:$24 sps:$4 sm:$0xff]  }
 0x209   : > { %4558 = vmatprep.subr.bf16.mxu1 %v13137_v60  ;;  %v13215_v60 = vld [vmem:[#allocation7 + $0xa2c] ss:$24 sps:$4 sm:$0xff]  }
 0x20b   : > { %4301 = vmatpush1.bf16.msra.mxu0 %v13132_v61  ;;  %v13210_v61 = vld [vmem:[#allocation7 + $0xa20] ss:$24 sps:$4 sm:$0xff]  }
 0x20c   : > { %4559 = vmatpush1.bf16.msra.mxu1 %v13135_v62  ;;  %4302 = vmatprep.subr.bf16.mxu0 %v13140_v63  ;;  %v13213_v62 = vld [vmem:[#allocation7 + $0xa28] ss:$24 sps:$4 sm:$0xff]   ;;  %v13218_v63 = vld [vmem:[#allocation7 + $0xa54] ss:$24 sps:$4 sm:$0xff]  }
 0x20d   : > { %4560 = vmatprep.subr.bf16.mxu1 %v13143_v0  ;;  %v13221_v0 = vld [vmem:[#allocation7 + $0xa5c] ss:$24 sps:$4 sm:$0xff]  }
 0x20f   : > { %4303 = vmatpush1.bf16.msra.mxu0 %v13138_v1  ;;  %v13216_v1 = vld [vmem:[#allocation7 + $0xa50] ss:$24 sps:$4 sm:$0xff]  }
 0x210   : > { %4561 = vmatpush1.bf16.msra.mxu1 %v13141_v2  ;;  %4304 = vmatprep.subr.bf16.mxu0 %v13146_v3  ;;  %v13219_v2 = vld [vmem:[#allocation7 + $0xa58] ss:$24 sps:$4 sm:$0xff]   ;;  %v13224_v3 = vld [vmem:[#allocation7 + $0xa84] ss:$24 sps:$4 sm:$0xff]  }
 0x211   : > { %4562 = vmatprep.subr.bf16.mxu1 %v13149_v4  ;;  %v13227_v4 = vld [vmem:[#allocation7 + $0xa8c] ss:$24 sps:$4 sm:$0xff]  }
 0x213   : > { %4305 = vmatpush1.bf16.msra.mxu0 %v13144_v5  ;;  %v13222_v5 = vld [vmem:[#allocation7 + $0xa80] ss:$24 sps:$4 sm:$0xff]  }
 0x214   : > { %4563 = vmatpush1.bf16.msra.mxu1 %v13147_v6  ;;  %4306 = vmatprep.subr.bf16.mxu0 %v13152_v7  ;;  %v13225_v6 = vld [vmem:[#allocation7 + $0xa88] ss:$24 sps:$4 sm:$0xff]   ;;  %v13230_v7 = vld [vmem:[#allocation7 + $0xab4] ss:$24 sps:$4 sm:$0xff]  }
 0x215   : > { %4564 = vmatprep.subr.bf16.mxu1 %v13155_v8  ;;  %v13233_v8 = vld [vmem:[#allocation7 + $0xabc] ss:$24 sps:$4 sm:$0xff]  }
 0x217   : > { %4307 = vmatpush1.bf16.msra.mxu0 %v13150_v9  ;;  %v13228_v9 = vld [vmem:[#allocation7 + $0xab0] ss:$24 sps:$4 sm:$0xff]  }
 0x218   : > { %4565 = vmatpush1.bf16.msra.mxu1 %v13153_v10  ;;  %4308 = vmatprep.subr.bf16.mxu0 %v13158_v12  ;;  %v13231_v10 = vld [vmem:[#allocation7 + $0xab8] ss:$24 sps:$4 sm:$0xff]   ;;  %v13236_v12 = vld [vmem:[#allocation7 + $0xae4] ss:$24 sps:$4 sm:$0xff]  }
 0x219   : > { %4566 = vmatprep.subr.bf16.mxu1 %v13161_v13  ;;  %v13239_v13 = vld [vmem:[#allocation7 + $0xaec] ss:$24 sps:$4 sm:$0xff]  }
 0x21b   : > { %4309 = vmatpush1.bf16.msra.mxu0 %v13156_v14  ;;  %v13234_v14 = vld [vmem:[#allocation7 + $0xae0] ss:$24 sps:$4 sm:$0xff]  }
 0x21c   : > { %4567 = vmatpush1.bf16.msra.mxu1 %v13159_v15  ;;  %4310 = vmatprep.subr.bf16.mxu0 %v13164_v16  ;;  %v13237_v15 = vld [vmem:[#allocation7 + $0xae8] ss:$24 sps:$4 sm:$0xff]   ;;  %v13242_v16 = vld [vmem:[#allocation7 + $0xb14] ss:$24 sps:$4 sm:$0xff]  }
 0x21d   : > { %4568 = vmatprep.subr.bf16.mxu1 %v13167_v17  ;;  %v13245_v17 = vld [vmem:[#allocation7 + $0xb1c] ss:$24 sps:$4 sm:$0xff]  }
 0x21f   : > { %4311 = vmatpush1.bf16.msra.mxu0 %v13162_v18  ;;  %v13240_v18 = vld [vmem:[#allocation7 + $0xb10] ss:$24 sps:$4 sm:$0xff]  }
 0x220   : > { %4569 = vmatpush1.bf16.msra.mxu1 %v13165_v19  ;;  %4312 = vmatprep.subr.bf16.mxu0 %v13170_v21  ;;  %v13243_v19 = vld [vmem:[#allocation7 + $0xb18] ss:$24 sps:$4 sm:$0xff]   ;;  %v13248_v21 = vld [vmem:[#allocation7 + $0xb44] ss:$24 sps:$4 sm:$0xff]  }
 0x221   : > { %4570 = vmatprep.subr.bf16.mxu1 %v13173_v22  ;;  %v13251_v22 = vld [vmem:[#allocation7 + $0xb4c] ss:$24 sps:$4 sm:$0xff]  }
 0x223   : > { %4313 = vmatpush1.bf16.msra.mxu0 %v13168_v23  ;;  %v13246_v23 = vld [vmem:[#allocation7 + $0xb40] ss:$24 sps:$4 sm:$0xff]  }
 0x224   : > { %4571 = vmatpush1.bf16.msra.mxu1 %v13171_v24  ;;  %4325 = vmatprep.subr.bf16.mxu0 %v13176_v25  ;;  %v13249_v24 = vld [vmem:[#allocation7 + $0xb48] ss:$24 sps:$4 sm:$0xff]   ;;  %v13254_v25 = vld [vmem:[#allocation7 + $0xb74] ss:$24 sps:$4 sm:$0xff]  }
 0x225   : > { %4583 = vmatprep.subr.bf16.mxu1 %v13179_v29  ;;  %v13255_v29 = vld [vmem:[#allocation7 + $0xb78] ss:$24 sps:$4 sm:$0xff]  }
 0x226   : > { %4315 = vmatmul.mubr.bf16.vlgmr.msra.gmra.mrb[0].mxu0 %v15894_v32 }
 0x227   : > { %4573 = vmatmul.mubr.bf16.vlgmr.msra.gmra.mrb[0].mxu1 %v15894_v32  ;;  %4326 = vmatpush1.bf16.msra.mxu0 %v13174_v30  ;;  %v13260_v30 = vld [vmem:[#allocation7 + $0xba4] ss:$24 sps:$4 sm:$0xff]  }
 0x228   : > { %4584 = vmatpush1.bf16.msra.mxu1 %v13177_v31  ;;  %4327 = vmatprep.subr.bf16.mxu0 %v13182_v33  ;;  %v13263_v31 = vld [vmem:[#allocation7 + $0xbac] ss:$24 sps:$4 sm:$0xff]   ;;  %v13258_v33 = vld [vmem:[#allocation7 + $0xba0] ss:$24 sps:$4 sm:$0xff]  }
 0x229   : > { %4585 = vmatprep.subr.bf16.mxu1 %v13185_v34  ;;  %4357 = vmatprep.mubr.bf16.mxu0 %v15898_v37  ;;  %v13261_v34 = vld [vmem:[#allocation7 + $0xba8] ss:$24 sps:$4 sm:$0xff]  }
 0x22a   : > { %4615 = vmatprep.mubr.bf16.mxu1 %v15898_v37 }
 0x22b   : > { %4328 = vmatpush1.bf16.msra.mxu0 %v13180_v39  ;;  %v13264_v39 = vld [vmem:[#allocation7 + $0xbd0] ss:$24 sps:$4 sm:$0xff]  }
 0x22c   : > { %4586 = vmatpush1.bf16.msra.mxu1 %v13183_v40  ;;  %4329 = vmatprep.subr.bf16.mxu0 %v13188_v41  ;;  %v13267_v40 = vld [vmem:[#allocation7 + $0xbd8] ss:$24 sps:$4 sm:$0xff]   ;;  %v13272_v41 = vld [vmem:[#allocation7 + $0xc04] ss:$24 sps:$4 sm:$0xff]  }
 0x22d   : > { %4587 = vmatprep.subr.bf16.mxu1 %v13191_v42  ;;  %v13275_v42 = vld [vmem:[#allocation7 + $0xc0c] ss:$24 sps:$4 sm:$0xff]  }
 0x22f   : > { %4330 = vmatpush1.bf16.msra.mxu0 %v13186_v43  ;;  %v13270_v43 = vld [vmem:[#allocation7 + $0xc00] ss:$24 sps:$4 sm:$0xff]  }
 0x230   : > { %4588 = vmatpush1.bf16.msra.mxu1 %v13189_v44  ;;  %4331 = vmatprep.subr.bf16.mxu0 %v13194_v45  ;;  %v13273_v44 = vld [vmem:[#allocation7 + $0xc08] ss:$24 sps:$4 sm:$0xff]   ;;  %v13278_v45 = vld [vmem:[#allocation7 + $0xc34] ss:$24 sps:$4 sm:$0xff]  }
 0x231   : > { %4589 = vmatprep.subr.bf16.mxu1 %v13197_v46  ;;  %v13281_v46 = vld [vmem:[#allocation7 + $0xc3c] ss:$24 sps:$4 sm:$0xff]  }
 0x233   : > { %4332 = vmatpush1.bf16.msra.mxu0 %v13192_v47  ;;  %v14954_v47 = vld [vmem:[%s15823_s26 + $0x18] sm:$0xff] }
 0x234   : > { %4590 = vmatpush1.bf16.msra.mxu1 %v13195_v48  ;;  %4333 = vmatprep.subr.bf16.mxu0 %v13200_v49  ;;  %v14955_v48 = vld [vmem:[%s15830_s24 + $0x18] sm:$0xff] }
 0x235   : > { %4591 = vmatprep.subr.bf16.mxu1 %v13203_v50  ;;  %v15906_v49 = vpack.c.bf16 %v14954_v47, %v14955_v48  ;;  %v13276_v50 = vld [vmem:[#allocation7 + $0xc30] ss:$24 sps:$4 sm:$0xff]   ;;  %v13362_v48 = vld [vmem:[#allocation7 + $0xed4] ss:$24 sps:$4 sm:$0xff]  }
 0x236   : > { %v13357_v47 = vld [vmem:[#allocation7 + $0xea8] ss:$24 sps:$4 sm:$0xff]  }
 0x237   : > { %4334 = vmatpush1.bf16.msra.mxu0 %v13198_v52  ;;  %v13279_v52 = vld [vmem:[#allocation7 + $0xc38] ss:$24 sps:$4 sm:$0xff]  }
 0x238   : > { %4592 = vmatpush1.bf16.msra.mxu1 %v13201_v53  ;;  %4335 = vmatprep.subr.bf16.mxu0 %v13206_v54  ;;  %v13284_v53 = vld [vmem:[#allocation7 + $0xc64] ss:$24 sps:$4 sm:$0xff]  }
 0x239   : > { %4593 = vmatprep.subr.bf16.mxu1 %v13209_v55  ;;  %v13287_v54 = vld [vmem:[#allocation7 + $0xc6c] ss:$24 sps:$4 sm:$0xff]   ;;  %v13282_v55 = vld [vmem:[#allocation7 + $0xc60] ss:$24 sps:$4 sm:$0xff]  }
 0x23b   : > { %4336 = vmatpush1.bf16.msra.mxu0 %v13204_v56  ;;  %v13285_v56 = vld [vmem:[#allocation7 + $0xc68] ss:$24 sps:$4 sm:$0xff]  }
 0x23c   : > { %4594 = vmatpush1.bf16.msra.mxu1 %v13207_v57  ;;  %4337 = vmatprep.subr.bf16.mxu0 %v13212_v59  ;;  %v13290_v57 = vld [vmem:[#allocation7 + $0xc94] ss:$24 sps:$4 sm:$0xff]  }
 0x23d   : > { %4595 = vmatprep.subr.bf16.mxu1 %v13215_v60  ;;  %v13293_v59 = vld [vmem:[#allocation7 + $0xc9c] ss:$24 sps:$4 sm:$0xff]   ;;  %v13288_v60 = vld [vmem:[#allocation7 + $0xc90] ss:$24 sps:$4 sm:$0xff]  }
 0x23f   : > { %4338 = vmatpush1.bf16.msra.mxu0 %v13210_v61  ;;  %v13291_v61 = vld [vmem:[#allocation7 + $0xc98] ss:$24 sps:$4 sm:$0xff]  }
 0x240   : > { %4596 = vmatpush1.bf16.msra.mxu1 %v13213_v62  ;;  %4339 = vmatprep.subr.bf16.mxu0 %v13218_v63  ;;  %v13296_v62 = vld [vmem:[#allocation7 + $0xcc4] ss:$24 sps:$4 sm:$0xff]  }
 0x241   : > { %4597 = vmatprep.subr.bf16.mxu1 %v13221_v0  ;;  %v13299_v63 = vld [vmem:[#allocation7 + $0xccc] ss:$24 sps:$4 sm:$0xff]   ;;  %v13294_v0 = vld [vmem:[#allocation7 + $0xcc0] ss:$24 sps:$4 sm:$0xff]  }
 0x243   : > { %4340 = vmatpush1.bf16.msra.mxu0 %v13216_v1  ;;  %v13297_v1 = vld [vmem:[#allocation7 + $0xcc8] ss:$24 sps:$4 sm:$0xff]  }
 0x244   : > { %4598 = vmatpush1.bf16.msra.mxu1 %v13219_v2  ;;  %4341 = vmatprep.subr.bf16.mxu0 %v13224_v3  ;;  %v13302_v2 = vld [vmem:[#allocation7 + $0xcf4] ss:$24 sps:$4 sm:$0xff]  }
 0x245   : > { %4599 = vmatprep.subr.bf16.mxu1 %v13227_v4  ;;  %v13305_v3 = vld [vmem:[#allocation7 + $0xcfc] ss:$24 sps:$4 sm:$0xff]   ;;  %v13300_v4 = vld [vmem:[#allocation7 + $0xcf0] ss:$24 sps:$4 sm:$0xff]  }
 0x247   : > { %4342 = vmatpush1.bf16.msra.mxu0 %v13222_v5  ;;  %v13303_v5 = vld [vmem:[#allocation7 + $0xcf8] ss:$24 sps:$4 sm:$0xff]  }
 0x248   : > { %4600 = vmatpush1.bf16.msra.mxu1 %v13225_v6  ;;  %4343 = vmatprep.subr.bf16.mxu0 %v13230_v7  ;;  %v13308_v6 = vld [vmem:[#allocation7 + $0xd24] ss:$24 sps:$4 sm:$0xff]  }
 0x249   : > { %4601 = vmatprep.subr.bf16.mxu1 %v13233_v8  ;;  %v13311_v7 = vld [vmem:[#allocation7 + $0xd2c] ss:$24 sps:$4 sm:$0xff]   ;;  %v13306_v8 = vld [vmem:[#allocation7 + $0xd20] ss:$24 sps:$4 sm:$0xff]  }
 0x24b   : > { %4344 = vmatpush1.bf16.msra.mxu0 %v13228_v9  ;;  %v13309_v9 = vld [vmem:[#allocation7 + $0xd28] ss:$24 sps:$4 sm:$0xff]  }
 0x24c   : > { %4602 = vmatpush1.bf16.msra.mxu1 %v13231_v10  ;;  %4345 = vmatprep.subr.bf16.mxu0 %v13236_v12  ;;  %v13314_v10 = vld [vmem:[#allocation7 + $0xd54] ss:$24 sps:$4 sm:$0xff]  }
 0x24d   : > { %4603 = vmatprep.subr.bf16.mxu1 %v13239_v13  ;;  %v13317_v12 = vld [vmem:[#allocation7 + $0xd5c] ss:$24 sps:$4 sm:$0xff]   ;;  %v13312_v13 = vld [vmem:[#allocation7 + $0xd50] ss:$24 sps:$4 sm:$0xff]  }
 0x24f   : > { %4346 = vmatpush1.bf16.msra.mxu0 %v13234_v14  ;;  %v13315_v14 = vld [vmem:[#allocation7 + $0xd58] ss:$24 sps:$4 sm:$0xff]  }
 0x250   : > { %4604 = vmatpush1.bf16.msra.mxu1 %v13237_v15  ;;  %4347 = vmatprep.subr.bf16.mxu0 %v13242_v16  ;;  %v13320_v15 = vld [vmem:[#allocation7 + $0xd84] ss:$24 sps:$4 sm:$0xff]  }
 0x251   : > { %4605 = vmatprep.subr.bf16.mxu1 %v13245_v17  ;;  %v13323_v16 = vld [vmem:[#allocation7 + $0xd8c] ss:$24 sps:$4 sm:$0xff]   ;;  %v13318_v17 = vld [vmem:[#allocation7 + $0xd80] ss:$24 sps:$4 sm:$0xff]  }
 0x253   : > { %4348 = vmatpush1.bf16.msra.mxu0 %v13240_v18  ;;  %v13321_v18 = vld [vmem:[#allocation7 + $0xd88] ss:$24 sps:$4 sm:$0xff]  }
 0x254   : > { %4606 = vmatpush1.bf16.msra.mxu1 %v13243_v19  ;;  %4349 = vmatprep.subr.bf16.mxu0 %v13248_v21  ;;  %v13326_v19 = vld [vmem:[#allocation7 + $0xdb4] ss:$24 sps:$4 sm:$0xff]  }
 0x255   : > { %4607 = vmatprep.subr.bf16.mxu1 %v13251_v22  ;;  %v13329_v21 = vld [vmem:[#allocation7 + $0xdbc] ss:$24 sps:$4 sm:$0xff]   ;;  %v13324_v22 = vld [vmem:[#allocation7 + $0xdb0] ss:$24 sps:$4 sm:$0xff]  }
 0x257   : > { %4350 = vmatpush1.bf16.msra.mxu0 %v13246_v23  ;;  %v13327_v23 = vld [vmem:[#allocation7 + $0xdb8] ss:$24 sps:$4 sm:$0xff]  }
 0x258   : > { %4608 = vmatpush1.bf16.msra.mxu1 %v13249_v24  ;;  %4351 = vmatprep.subr.bf16.mxu0 %v13254_v25  ;;  %v13332_v24 = vld [vmem:[#allocation7 + $0xde4] ss:$24 sps:$4 sm:$0xff]  }
 0x259   : > { %4609 = vmatprep.subr.bf16.mxu1 %v13257_v26  ;;  %v13335_v25 = vld [vmem:[#allocation7 + $0xdec] ss:$24 sps:$4 sm:$0xff]   ;;  %v13330_v26 = vld [vmem:[#allocation7 + $0xde0] ss:$24 sps:$4 sm:$0xff]  }
 0x25b   : > { %4352 = vmatpush1.bf16.msra.mxu0 %v13252_v28  ;;  %v13333_v28 = vld [vmem:[#allocation7 + $0xde8] ss:$24 sps:$4 sm:$0xff]  }
 0x25c   : > { %4610 = vmatpush1.bf16.msra.mxu1 %v13255_v29  ;;  %4353 = vmatprep.subr.bf16.mxu0 %v13260_v30  ;;  %v13338_v29 = vld [vmem:[#allocation7 + $0xe14] ss:$24 sps:$4 sm:$0xff]  }
 0x25d   : > { %4611 = vmatprep.subr.bf16.mxu1 %v13263_v31  ;;  %v13341_v30 = vld [vmem:[#allocation7 + $0xe1c] ss:$24 sps:$4 sm:$0xff]   ;;  %v13336_v31 = vld [vmem:[#allocation7 + $0xe10] ss:$24 sps:$4 sm:$0xff]  }
 0x25f   : > { %4354 = vmatpush1.bf16.msra.mxu0 %v13258_v33  ;;  %v13339_v33 = vld [vmem:[#allocation7 + $0xe18] ss:$24 sps:$4 sm:$0xff]  }
 0x260   : > { %4612 = vmatpush1.bf16.msra.mxu1 %v13261_v34  ;;  %4355 = vmatprep.subr.bf16.mxu0 %v13266_v35  ;;  %v13344_v34 = vld [vmem:[#allocation7 + $0xe44] ss:$24 sps:$4 sm:$0xff]  }
 0x261   : > { %4613 = vmatprep.subr.bf16.mxu1 %v13269_v36  ;;  %v13347_v35 = vld [vmem:[#allocation7 + $0xe4c] ss:$24 sps:$4 sm:$0xff]   ;;  %v13342_v36 = vld [vmem:[#allocation7 + $0xe40] ss:$24 sps:$4 sm:$0xff]  }
 0x263   : > { %4356 = vmatpush1.bf16.msra.mxu0 %v13264_v39  ;;  %v13345_v39 = vld [vmem:[#allocation7 + $0xe48] ss:$24 sps:$4 sm:$0xff]  }
 0x264   : > { %4614 = vmatpush1.bf16.msra.mxu1 %v13267_v40  ;;  %4368 = vmatprep.subr.bf16.mxu0 %v13272_v41  ;;  %v13350_v40 = vld [vmem:[#allocation7 + $0xe74] ss:$24 sps:$4 sm:$0xff]  }
 0x265   : > { %4626 = vmatprep.subr.bf16.mxu1 %v13275_v42  ;;  %v13353_v41 = vld [vmem:[#allocation7 + $0xe7c] ss:$24 sps:$4 sm:$0xff]   ;;  %v13348_v42 = vld [vmem:[#allocation7 + $0xe70] ss:$24 sps:$4 sm:$0xff]  }
 0x266   : > { %4358 = vmatmul.mubr.bf16.vlgmr.msra.gmra.mrb[0].mxu0 %v15868_v58 }
 0x267   : > { %4616 = vmatmul.mubr.bf16.vlgmr.msra.gmra.mrb[0].mxu1 %v15868_v58  ;;  %4369 = vmatpush1.bf16.msra.mxu0 %v13270_v43  ;;  %v13351_v43 = vld [vmem:[#allocation7 + $0xe78] ss:$24 sps:$4 sm:$0xff]  }
 0x268   : > { %4627 = vmatpush1.bf16.msra.mxu1 %v13273_v44  ;;  %4370 = vmatprep.subr.bf16.mxu0 %v13278_v45  ;;  %v13356_v44 = vld [vmem:[#allocation7 + $0xea4] ss:$24 sps:$4 sm:$0xff]  }
 0x269   : > { %4628 = vmatprep.subr.bf16.mxu1 %v13281_v46  ;;  %4400 = vmatprep.mubr.bf16.mxu0 %v15906_v49  ;;  %v13359_v45 = vld [vmem:[#allocation7 + $0xeac] ss:$24 sps:$4 sm:$0xff]   ;;  %v13354_v46 = vld [vmem:[#allocation7 + $0xea0] ss:$24 sps:$4 sm:$0xff]  }
 0x26a   : > { %4658 = vmatprep.mubr.bf16.mxu1 %v15906_v49 }
 0x26b   : > { %4371 = vmatpush1.bf16.msra.mxu0 %v13276_v50  ;;  %v13365_v50 = vld [vmem:[#allocation7 + $0xedc] ss:$24 sps:$4 sm:$0xff]  }
 0x26c   : > { %4629 = vmatpush1.bf16.msra.mxu1 %v13279_v52  ;;  %4372 = vmatprep.subr.bf16.mxu0 %v13284_v53  ;;  %v13360_v52 = vld [vmem:[#allocation7 + $0xed0] ss:$24 sps:$4 sm:$0xff]  }
 0x26d   : > { %4630 = vmatprep.subr.bf16.mxu1 %v13287_v54  ;;  %v13363_v53 = vld [vmem:[#allocation7 + $0xed8] ss:$24 sps:$4 sm:$0xff]   ;;  %v13368_v54 = vld [vmem:[#allocation7 + $0xf04] ss:$24 sps:$4 sm:$0xff]  }
 0x26f   : > { %4373 = vmatpush1.bf16.msra.mxu0 %v13282_v55  ;;  %v13371_v55 = vld [vmem:[#allocation7 + $0xf0c] ss:$24 sps:$4 sm:$0xff]  }
 0x270   : > { %4631 = vmatpush1.bf16.msra.mxu1 %v13285_v56  ;;  %4374 = vmatprep.subr.bf16.mxu0 %v13290_v57  ;;  %v13366_v56 = vld [vmem:[#allocation7 + $0xf00] ss:$24 sps:$4 sm:$0xff]  }
 0x271   : > { %4632 = vmatprep.subr.bf16.mxu1 %v13293_v59  ;;  %v13369_v57 = vld [vmem:[#allocation7 + $0xf08] ss:$24 sps:$4 sm:$0xff]  }
 0x272   : > { %v14956_v59 = vld [vmem:[%s15823_s26 + $0x10] sm:$0xff] }
 0x273   : > { %4375 = vmatpush1.bf16.msra.mxu0 %v13288_v60  ;;  %v14957_v60 = vld [vmem:[%s15830_s24 + $0x10] sm:$0xff] }
 0x274   : > { %4633 = vmatpush1.bf16.msra.mxu1 %v13291_v61  ;;  %4376 = vmatprep.subr.bf16.mxu0 %v13296_v62  ;;  %v15914_v61 = vpack.c.bf16 %v14956_v59, %v14957_v60  ;;  %v13374_v62 = vld [vmem:[#allocation7 + $0xf34] ss:$24 sps:$4 sm:$0xff]   ;;  %v13444_v60 = vld [vmem:[#allocation7 + $0x1170] ss:$24 sps:$4 sm:$0xff]  }
 0x275   : > { %4634 = vmatprep.subr.bf16.mxu1 %v13299_v63  ;;  %v13377_v63 = vld [vmem:[#allocation7 + $0xf3c] ss:$24 sps:$4 sm:$0xff]  }
 0x276   : > { %v13449_v59 = vld [vmem:[#allocation7 + $0x117c] ss:$24 sps:$4 sm:$0xff]  }
 0x277   : > { %4377 = vmatpush1.bf16.msra.mxu0 %v13294_v0  ;;  %v13372_v0 = vld [vmem:[#allocation7 + $0xf30] ss:$24 sps:$4 sm:$0xff]  }
 0x278   : > { %4635 = vmatpush1.bf16.msra.mxu1 %v13297_v1  ;;  %4378 = vmatprep.subr.bf16.mxu0 %v13302_v2  ;;  %v13375_v1 = vld [vmem:[#allocation7 + $0xf38] ss:$24 sps:$4 sm:$0xff]  }
 0x279   : > { %4636 = vmatprep.subr.bf16.mxu1 %v13305_v3  ;;  %v14958_v2 = vld [vmem:[%s15823_s26 + $0x28] sm:$0xff] }
 0x27a   : > { %v14959_v3 = vld [vmem:[%s15830_s24 + $0x28] sm:$0xff] }
 0x27b   : > { %4379 = vmatpush1.bf16.msra.mxu0 %v13300_v4  ;;  %v15918_v4 = vpack.c.bf16 %v14958_v2, %v14959_v3  ;;  %v13453_v2 = vld [vmem:[#allocation7 + $0x11a8] ss:$24 sps:$4 sm:$0xff]   ;;  %v13458_v3 = vld [vmem:[#allocation7 + $0x11d4] ss:$24 sps:$4 sm:$0xff]  }
 0x27c   : > { %4637 = vmatpush1.bf16.msra.mxu1 %v13303_v5  ;;  %4380 = vmatprep.subr.bf16.mxu0 %v13308_v6  ;;  %v13380_v5 = vld [vmem:[#allocation7 + $0xf64] ss:$24 sps:$4 sm:$0xff]  }
 0x27d   : > { %4638 = vmatprep.subr.bf16.mxu1 %v13311_v7  ;;  %v13383_v6 = vld [vmem:[#allocation7 + $0xf6c] ss:$24 sps:$4 sm:$0xff]   ;;  %v13378_v7 = vld [vmem:[#allocation7 + $0xf60] ss:$24 sps:$4 sm:$0xff]  }
 0x27f   : > { %4381 = vmatpush1.bf16.msra.mxu0 %v13306_v8  ;;  %v13381_v8 = vld [vmem:[#allocation7 + $0xf68] ss:$24 sps:$4 sm:$0xff]  }
 0x280   : > { %4639 = vmatpush1.bf16.msra.mxu1 %v13309_v9  ;;  %4382 = vmatprep.subr.bf16.mxu0 %v13314_v10  ;;  %v13386_v9 = vld [vmem:[#allocation7 + $0xf94] ss:$24 sps:$4 sm:$0xff]  }
 0x281   : > { %4640 = vmatprep.subr.bf16.mxu1 %v13317_v12  ;;  %v13389_v10 = vld [vmem:[#allocation7 + $0xf9c] ss:$24 sps:$4 sm:$0xff]   ;;  %v13384_v12 = vld [vmem:[#allocation7 + $0xf90] ss:$24 sps:$4 sm:$0xff]  }
 0x283   : > { %4383 = vmatpush1.bf16.msra.mxu0 %v13312_v13  ;;  %v13387_v13 = vld [vmem:[#allocation7 + $0xf98] ss:$24 sps:$4 sm:$0xff]  }
 0x284   : > { %4641 = vmatpush1.bf16.msra.mxu1 %v13315_v14  ;;  %4384 = vmatprep.subr.bf16.mxu0 %v13320_v15  ;;  %v13392_v14 = vld [vmem:[#allocation7 + $0xfc4] ss:$24 sps:$4 sm:$0xff]  }
 0x285   : > { %4642 = vmatprep.subr.bf16.mxu1 %v13323_v16  ;;  %v13395_v15 = vld [vmem:[#allocation7 + $0xfcc] ss:$24 sps:$4 sm:$0xff]   ;;  %v13390_v16 = vld [vmem:[#allocation7 + $0xfc0] ss:$24 sps:$4 sm:$0xff]  }
 0x287   : > { %4385 = vmatpush1.bf16.msra.mxu0 %v13318_v17  ;;  %v13393_v17 = vld [vmem:[#allocation7 + $0xfc8] ss:$24 sps:$4 sm:$0xff]  }
 0x288   : > { %4643 = vmatpush1.bf16.msra.mxu1 %v13321_v18  ;;  %4386 = vmatprep.subr.bf16.mxu0 %v13326_v19  ;;  %v13398_v18 = vld [vmem:[#allocation7 + $0xff4] ss:$24 sps:$4 sm:$0xff]  }
 0x289   : > { %4644 = vmatprep.subr.bf16.mxu1 %v13329_v21  ;;  %v13401_v19 = vld [vmem:[#allocation7 + $0xffc] ss:$24 sps:$4 sm:$0xff]   ;;  %v13396_v21 = vld [vmem:[#allocation7 + $0xff0] ss:$24 sps:$4 sm:$0xff]  }
 0x28b   : > { %4387 = vmatpush1.bf16.msra.mxu0 %v13324_v22  ;;  %v13399_v22 = vld [vmem:[#allocation7 + $0xff8] ss:$24 sps:$4 sm:$0xff]  }
 0x28c   : > { %4645 = vmatpush1.bf16.msra.mxu1 %v13327_v23  ;;  %4388 = vmatprep.subr.bf16.mxu0 %v13332_v24  ;;  %v13404_v23 = vld [vmem:[#allocation7 + $0x1024] ss:$24 sps:$4 sm:$0xff]  }
 0x28d   : > { %4646 = vmatprep.subr.bf16.mxu1 %v13335_v25  ;;  %v13407_v24 = vld [vmem:[#allocation7 + $0x102c] ss:$24 sps:$4 sm:$0xff]   ;;  %v13402_v25 = vld [vmem:[#allocation7 + $0x1020] ss:$24 sps:$4 sm:$0xff]  }
 0x28f   : > { %4389 = vmatpush1.bf16.msra.mxu0 %v13330_v26  ;;  %v13405_v26 = vld [vmem:[#allocation7 + $0x1028] ss:$24 sps:$4 sm:$0xff]  }
 0x290   : > { %4647 = vmatpush1.bf16.msra.mxu1 %v13333_v28  ;;  %4390 = vmatprep.subr.bf16.mxu0 %v13338_v29  ;;  %v13410_v28 = vld [vmem:[#allocation7 + $0x1054] ss:$24 sps:$4 sm:$0xff]  }
 0x291   : > { %4648 = vmatprep.subr.bf16.mxu1 %v13341_v30  ;;  %v13413_v29 = vld [vmem:[#allocation7 + $0x105c] ss:$24 sps:$4 sm:$0xff]   ;;  %v13408_v30 = vld [vmem:[#allocation7 + $0x1050] ss:$24 sps:$4 sm:$0xff]  }
 0x293   : > { %4391 = vmatpush1.bf16.msra.mxu0 %v13336_v31  ;;  %v13411_v31 = vld [vmem:[#allocation7 + $0x1058] ss:$24 sps:$4 sm:$0xff]  }
 0x294   : > { %4649 = vmatpush1.bf16.msra.mxu1 %v13339_v33  ;;  %4392 = vmatprep.subr.bf16.mxu0 %v13344_v34  ;;  %v13416_v33 = vld [vmem:[#allocation7 + $0x1084] ss:$24 sps:$4 sm:$0xff]  }
 0x295   : > { %4650 = vmatprep.subr.bf16.mxu1 %v13347_v35  ;;  %v13419_v34 = vld [vmem:[#allocation7 + $0x108c] ss:$24 sps:$4 sm:$0xff]   ;;  %v13414_v35 = vld [vmem:[#allocation7 + $0x1080] ss:$24 sps:$4 sm:$0xff]  }
 0x297   : > { %4393 = vmatpush1.bf16.msra.mxu0 %v13342_v36  ;;  %v13417_v36 = vld [vmem:[#allocation7 + $0x1088] ss:$24 sps:$4 sm:$0xff]  }
 0x298   : > { %4651 = vmatpush1.bf16.msra.mxu1 %v13345_v39  ;;  %4394 = vmatprep.subr.bf16.mxu0 %v13350_v40  ;;  %v13422_v39 = vld [vmem:[#allocation7 + $0x10b4] ss:$24 sps:$4 sm:$0xff]  }
 0x299   : > { %4652 = vmatprep.subr.bf16.mxu1 %v13353_v41  ;;  %v13425_v40 = vld [vmem:[#allocation7 + $0x10bc] ss:$24 sps:$4 sm:$0xff]   ;;  %v13420_v41 = vld [vmem:[#allocation7 + $0x10b0] ss:$24 sps:$4 sm:$0xff]  }
 0x29b   : > { %4395 = vmatpush1.bf16.msra.mxu0 %v13348_v42  ;;  %v13423_v42 = vld [vmem:[#allocation7 + $0x10b8] ss:$24 sps:$4 sm:$0xff]  }
 0x29c   : > { %4653 = vmatpush1.bf16.msra.mxu1 %v13351_v43  ;;  %4396 = vmatprep.subr.bf16.mxu0 %v13356_v44  ;;  %v13428_v43 = vld [vmem:[#allocation7 + $0x10e4] ss:$24 sps:$4 sm:$0xff]  }
 0x29d   : > { %4654 = vmatprep.subr.bf16.mxu1 %v13359_v45  ;;  %v13431_v44 = vld [vmem:[#allocation7 + $0x10ec] ss:$24 sps:$4 sm:$0xff]   ;;  %v13426_v45 = vld [vmem:[#allocation7 + $0x10e0] ss:$24 sps:$4 sm:$0xff]  }
 0x29f   : > { %4397 = vmatpush1.bf16.msra.mxu0 %v13354_v46  ;;  %v13429_v46 = vld [vmem:[#allocation7 + $0x10e8] ss:$24 sps:$4 sm:$0xff]  }
 0x2a0   : > { %4655 = vmatpush1.bf16.msra.mxu1 %v13357_v47  ;;  %4398 = vmatprep.subr.bf16.mxu0 %v13362_v48  ;;  %v13434_v47 = vld [vmem:[#allocation7 + $0x1114] ss:$24 sps:$4 sm:$0xff]  }
 0x2a1   : > { %4656 = vmatprep.subr.bf16.mxu1 %v13365_v50  ;;  %v13437_v48 = vld [vmem:[#allocation7 + $0x111c] ss:$24 sps:$4 sm:$0xff]   ;;  %v13432_v50 = vld [vmem:[#allocation7 + $0x1110] ss:$24 sps:$4 sm:$0xff]  }
 0x2a3   : > { %4399 = vmatpush1.bf16.msra.mxu0 %v13360_v52  ;;  %v13435_v52 = vld [vmem:[#allocation7 + $0x1118] ss:$24 sps:$4 sm:$0xff]  }
 0x2a4   : > { %4657 = vmatpush1.bf16.msra.mxu1 %v13363_v53  ;;  %4411 = vmatprep.subr.bf16.mxu0 %v13368_v54  ;;  %v13440_v53 = vld [vmem:[#allocation7 + $0x1144] ss:$24 sps:$4 sm:$0xff]  }
 0x2a5   : > { %4669 = vmatprep.subr.bf16.mxu1 %v13371_v55  ;;  %v13443_v54 = vld [vmem:[#allocation7 + $0x114c] ss:$24 sps:$4 sm:$0xff]   ;;  %v13438_v55 = vld [vmem:[#allocation7 + $0x1140] ss:$24 sps:$4 sm:$0xff]  }
 0x2a6   : > { %4401 = vmatmul.mubr.bf16.vlgmr.msra.gmra.mrb[0].mxu0 %v15914_v61 }
 0x2a7   : > { %4659 = vmatmul.mubr.bf16.vlgmr.msra.gmra.mrb[0].mxu1 %v15914_v61  ;;  %4412 = vmatpush1.bf16.msra.mxu0 %v13366_v56  ;;  %v13441_v56 = vld [vmem:[#allocation7 + $0x1148] ss:$24 sps:$4 sm:$0xff]  }
 0x2a8   : > { %4670 = vmatpush1.bf16.msra.mxu1 %v13369_v57  ;;  %4413 = vmatprep.subr.bf16.mxu0 %v13374_v62  ;;  %v13446_v57 = vld [vmem:[#allocation7 + $0x1174] ss:$24 sps:$4 sm:$0xff]   ;;  %v13447_v62 = vld [vmem:[#allocation7 + $0x1178] ss:$24 sps:$4 sm:$0xff]  }
 0x2a9   : > { %4671 = vmatprep.subr.bf16.mxu1 %v13377_v63  ;;  %4443 = vmatprep.mubr.bf16.mxu0 %v15918_v4  ;;  %v13452_v63 = vld [vmem:[#allocation7 + $0x11a4] ss:$24 sps:$4 sm:$0xff]  }
 0x2aa   : > { %4701 = vmatprep.mubr.bf16.mxu1 %v15918_v4 }
 0x2ab   : > { %4414 = vmatpush1.bf16.msra.mxu0 %v13372_v0  ;;  %v13455_v0 = vld [vmem:[#allocation7 + $0x11ac] ss:$24 sps:$4 sm:$0xff]  }
 0x2ac   : > { %4672 = vmatpush1.bf16.msra.mxu1 %v13375_v1  ;;  %4415 = vmatprep.subr.bf16.mxu0 %v13380_v5  ;;  %v13450_v1 = vld [vmem:[#allocation7 + $0x11a0] ss:$24 sps:$4 sm:$0xff]   ;;  %v13461_v5 = vld [vmem:[#allocation7 + $0x11dc] ss:$24 sps:$4 sm:$0xff]  }
 0x2ad   : > { %4673 = vmatprep.subr.bf16.mxu1 %v13383_v6  ;;  %v13456_v6 = vld [vmem:[#allocation7 + $0x11d0] ss:$24 sps:$4 sm:$0xff]  }
 0x2af   : > { %4416 = vmatpush1.bf16.msra.mxu0 %v13378_v7  ;;  %v13459_v7 = vld [vmem:[#allocation7 + $0x11d8] ss:$24 sps:$4 sm:$0xff]  }
 0x2b0   : > { %4674 = vmatpush1.bf16.msra.mxu1 %v13381_v8  ;;  %4417 = vmatprep.subr.bf16.mxu0 %v13386_v9  ;;  %v13464_v8 = vld [vmem:[#allocation7 + $0x14] ss:$24 sps:$4 sm:$0xff]  }
 0x2b1   : > { %4675 = vmatprep.subr.bf16.mxu1 %v13389_v10  ;;  %v14960_v9 = vld [vmem:[%s15823_s26 + $0x20] sm:$0xff]  ;;  %s683_s26 = scalar_lea.vmem %s16287_s9, %s11126_s3 }
 0x2b2   : > { %v14961_v10 = vld [vmem:[%s15830_s24 + $0x20] sm:$0xff] }
 0x2b3   : > { %4418 = vmatpush1.bf16.msra.mxu0 %v13384_v12  ;;  %v15926_v12 = vpack.c.bf16 %v14960_v9, %v14961_v10  ;;  %v13630_v9 = vld [vmem:[#allocation10 + $0x150] ss:$24 sps:$4 sm:$0xff]   ;;  %v13638_v10 = vld [vmem:[#allocation10 + $0x184] ss:$24 sps:$4 sm:$0xff]  }
 0x2b4   : > { %4676 = vmatpush1.bf16.msra.mxu1 %v13387_v13  ;;  %4419 = vmatprep.subr.bf16.mxu0 %v13392_v14  ;;  %v13462_v13 = vld [vmem:[#allocation7 + $0x10] ss:$24 sps:$4 sm:$0xff]   ;;  %v13467_v14 = vld [vmem:[#allocation7 + $0x44] ss:$24 sps:$4 sm:$0xff]  }
 0x2b5   : > { %4677 = vmatprep.subr.bf16.mxu1 %v13395_v15  ;;  %v13465_v15 = vld [vmem:[#allocation7 + $0x40] ss:$24 sps:$4 sm:$0xff]  }
 0x2b7   : > { %4420 = vmatpush1.bf16.msra.mxu0 %v13390_v16  ;;  %v13470_v16 = vld [vmem:[#allocation7 + $0x74] ss:$24 sps:$4 sm:$0xff]  }
 0x2b8   : > { %4678 = vmatpush1.bf16.msra.mxu1 %v13393_v17  ;;  %4421 = vmatprep.subr.bf16.mxu0 %v13398_v18  ;;  %v13468_v17 = vld [vmem:[#allocation7 + $0x70] ss:$24 sps:$4 sm:$0xff]   ;;  %v13473_v18 = vld [vmem:[#allocation7 + $0xa4] ss:$24 sps:$4 sm:$0xff]  }
 0x2b9   : > { %4679 = vmatprep.subr.bf16.mxu1 %v13401_v19  ;;  %v13471_v19 = vld [vmem:[#allocation7 + $0xa0] ss:$24 sps:$4 sm:$0xff]  }
 0x2bb   : > { %4422 = vmatpush1.bf16.msra.mxu0 %v13396_v21  ;;  %v13476_v21 = vld [vmem:[#allocation7 + $0xd4] ss:$24 sps:$4 sm:$0xff]  }
 0x2bc   : > { %4680 = vmatpush1.bf16.msra.mxu1 %v13399_v22  ;;  %4423 = vmatprep.subr.bf16.mxu0 %v13404_v23  ;;  %v13474_v22 = vld [vmem:[#allocation7 + $0xd0] ss:$24 sps:$4 sm:$0xff]   ;;  %v13479_v23 = vld [vmem:[#allocation7 + $0x104] ss:$24 sps:$4 sm:$0xff]  }
 0x2bd   : > { %4681 = vmatprep.subr.bf16.mxu1 %v13407_v24  ;;  %v13477_v24 = vld [vmem:[#allocation7 + $0x100] ss:$24 sps:$4 sm:$0xff]  }
 0x2bf   : > { %4424 = vmatpush1.bf16.msra.mxu0 %v13402_v25  ;;  %v13482_v25 = vld [vmem:[#allocation7 + $0x134] ss:$24 sps:$4 sm:$0xff]  }
 0x2c0   : > { %4682 = vmatpush1.bf16.msra.mxu1 %v13405_v26  ;;  %4425 = vmatprep.subr.bf16.mxu0 %v13410_v28  ;;  %v13480_v26 = vld [vmem:[#allocation7 + $0x130] ss:$24 sps:$4 sm:$0xff]   ;;  %v13483_v28 = vld [vmem:[#allocation7 + $0x160] ss:$24 sps:$4 sm:$0xff]  }
 0x2c1   : > { %4683 = vmatprep.subr.bf16.mxu1 %v13413_v29  ;;  %v13488_v29 = vld [vmem:[#allocation7 + $0x194] ss:$24 sps:$4 sm:$0xff]  }
 0x2c3   : > { %4426 = vmatpush1.bf16.msra.mxu0 %v13408_v30  ;;  %v13486_v30 = vld [vmem:[#allocation7 + $0x190] ss:$24 sps:$4 sm:$0xff]  }
 0x2c4   : > { %4684 = vmatpush1.bf16.msra.mxu1 %v13411_v31  ;;  %4427 = vmatprep.subr.bf16.mxu0 %v13416_v33  ;;  %v13491_v31 = vld [vmem:[#allocation7 + $0x1c4] ss:$24 sps:$4 sm:$0xff]   ;;  %v13489_v33 = vld [vmem:[#allocation7 + $0x1c0] ss:$24 sps:$4 sm:$0xff]  }
 0x2c5   : > { %4685 = vmatprep.subr.bf16.mxu1 %v13419_v34  ;;  %v13494_v34 = vld [vmem:[#allocation7 + $0x1f4] ss:$24 sps:$4 sm:$0xff]  }
 0x2c7   : > { %4428 = vmatpush1.bf16.msra.mxu0 %v13414_v35  ;;  %v13590_v35 = vld [vmem:[#allocation10 + $0x4] ss:$24 sps:$4 sm:$0xff]  }
 0x2c8   : > { %4686 = vmatpush1.bf16.msra.mxu1 %v13417_v36  ;;  %4429 = vmatprep.subr.bf16.mxu0 %v13422_v39  ;;  %v13492_v36 = vld [vmem:[#allocation7 + $0x1f0] ss:$24 sps:$4 sm:$0xff]   ;;  %v13497_v39 = vld [vmem:[#allocation7 + $0x224] ss:$24 sps:$4 sm:$0xff]  }
 0x2c9   : > { %4687 = vmatprep.subr.bf16.mxu1 %v13425_v40  ;;  %v13588_v40 = vld [vmem:[#allocation10] ss:$24 sps:$4 sm:$0xff]  }
 0x2cb   : > { %4430 = vmatpush1.bf16.msra.mxu0 %v13420_v41  ;;  %v13596_v41 = vld [vmem:[#allocation10 + $0x34] ss:$24 sps:$4 sm:$0xff]  }
 0x2cc   : > { %4688 = vmatpush1.bf16.msra.mxu1 %v13423_v42  ;;  %4431 = vmatprep.subr.bf16.mxu0 %v13428_v43  ;;  %v13495_v42 = vld [vmem:[#allocation7 + $0x220] ss:$24 sps:$4 sm:$0xff]   ;;  %v13500_v43 = vld [vmem:[#allocation7 + $0x254] ss:$24 sps:$4 sm:$0xff]  }
 0x2cd   : > { %4689 = vmatprep.subr.bf16.mxu1 %v13431_v44  ;;  %v13594_v44 = vld [vmem:[#allocation10 + $0x30] ss:$24 sps:$4 sm:$0xff]  }
 0x2cf   : > { %4432 = vmatpush1.bf16.msra.mxu0 %v13426_v45  ;;  %v13602_v45 = vld [vmem:[#allocation10 + $0x64] ss:$24 sps:$4 sm:$0xff]  }
 0x2d0   : > { %4690 = vmatpush1.bf16.msra.mxu1 %v13429_v46  ;;  %4433 = vmatprep.subr.bf16.mxu0 %v13434_v47  ;;  %v13498_v46 = vld [vmem:[#allocation7 + $0x250] ss:$24 sps:$4 sm:$0xff]   ;;  %v13503_v47 = vld [vmem:[#allocation7 + $0x284] ss:$24 sps:$4 sm:$0xff]  }
 0x2d1   : > { %4691 = vmatprep.subr.bf16.mxu1 %v13437_v48  ;;  %v13600_v48 = vld [vmem:[#allocation10 + $0x60] ss:$24 sps:$4 sm:$0xff]  }
 0x2d3   : > { %4434 = vmatpush1.bf16.msra.mxu0 %v13432_v50  ;;  %v13608_v50 = vld [vmem:[#allocation10 + $0x94] ss:$24 sps:$4 sm:$0xff]  }
 0x2d4   : > { %4692 = vmatpush1.bf16.msra.mxu1 %v13435_v52  ;;  %4435 = vmatprep.subr.bf16.mxu0 %v13440_v53  ;;  %v13501_v52 = vld [vmem:[#allocation7 + $0x280] ss:$24 sps:$4 sm:$0xff]   ;;  %v13506_v53 = vld [vmem:[#allocation7 + $0x2b4] ss:$24 sps:$4 sm:$0xff]  }
 0x2d5   : > { %4693 = vmatprep.subr.bf16.mxu1 %v13443_v54  ;;  %v13606_v54 = vld [vmem:[#allocation10 + $0x90] ss:$24 sps:$4 sm:$0xff]  }
 0x2d7   : > { %4436 = vmatpush1.bf16.msra.mxu0 %v13438_v55  ;;  %v13614_v55 = vld [vmem:[#allocation10 + $0xc4] ss:$24 sps:$4 sm:$0xff]  }
 0x2d8   : > { %4694 = vmatpush1.bf16.msra.mxu1 %v13441_v56  ;;  %4437 = vmatprep.subr.bf16.mxu0 %v13446_v57  ;;  %v13504_v56 = vld [vmem:[#allocation7 + $0x2b0] ss:$24 sps:$4 sm:$0xff]   ;;  %v13509_v57 = vld [vmem:[#allocation7 + $0x2e4] ss:$24 sps:$4 sm:$0xff]  }
 0x2d9   : > { %4695 = vmatprep.subr.bf16.mxu1 %v13449_v59  ;;  %v13612_v59 = vld [vmem:[#allocation10 + $0xc0] ss:$24 sps:$4 sm:$0xff]  }
 0x2db   : > { %4438 = vmatpush1.bf16.msra.mxu0 %v13444_v60  ;;  %v13620_v60 = vld [vmem:[#allocation10 + $0xf4] ss:$24 sps:$4 sm:$0xff]  }
 0x2dc   : > { %4696 = vmatpush1.bf16.msra.mxu1 %v13447_v62  ;;  %4439 = vmatprep.subr.bf16.mxu0 %v13452_v63  ;;  %v13507_v62 = vld [vmem:[#allocation7 + $0x2e0] ss:$24 sps:$4 sm:$0xff]   ;;  %v13512_v63 = vld [vmem:[#allocation7 + $0x314] ss:$24 sps:$4 sm:$0xff]  }
 0x2dd   : > { %4697 = vmatprep.subr.bf16.mxu1 %v13455_v0  ;;  %v13618_v0 = vld [vmem:[#allocation10 + $0xf0] ss:$24 sps:$4 sm:$0xff]  }
 0x2df   : > { %4440 = vmatpush1.bf16.msra.mxu0 %v13450_v1  ;;  %v13626_v1 = vld [vmem:[#allocation10 + $0x124] ss:$24 sps:$4 sm:$0xff]  }
 0x2e0   : > { %4698 = vmatpush1.bf16.msra.mxu1 %v13453_v2  ;;  %4441 = vmatprep.subr.bf16.mxu0 %v13458_v3  ;;  %v13510_v2 = vld [vmem:[#allocation7 + $0x310] ss:$24 sps:$4 sm:$0xff]   ;;  %v13515_v3 = vld [vmem:[#allocation7 + $0x344] ss:$24 sps:$4 sm:$0xff]  }
 0x2e1   : > { %4699 = vmatprep.subr.bf16.mxu1 %v13461_v5  ;;  %v13624_v5 = vld [vmem:[#allocation10 + $0x120] ss:$24 sps:$4 sm:$0xff]  }
 0x2e3   : > { %4442 = vmatpush1.bf16.msra.mxu0 %v13456_v6  ;;  %v13632_v6 = vld [vmem:[#allocation10 + $0x154] ss:$24 sps:$4 sm:$0xff]  }
 0x2e4   : > { %4700 = vmatpush1.bf16.msra.mxu1 %v13459_v7  ;;  %4712 = vmatprep.subr.bf16.mxu0 %v13464_v8  ;;  %v13513_v7 = vld [vmem:[#allocation7 + $0x340] ss:$24 sps:$4 sm:$0xff]   ;;  %v13518_v8 = vld [vmem:[#allocation7 + $0x374] ss:$24 sps:$4 sm:$0xff]  }
 0x2e5   : > { %8482 = vmatprep.subr.bf16.mxu1 %v13590_v35  ;;  %v13534_v35 = vld [vmem:[#allocation7 + $0x490] ss:$24 sps:$4 sm:$0xff]  }
 0x2e6   : > { %4444 = vmatmul.mubr.bf16.vlgmr.msra.gmra.mrb[0].mxu0 %v15926_v12 }
 0x2e7   : > { %4702 = vmatmul.mubr.bf16.vlgmr.msra.gmra.mrb[0].mxu1 %v15926_v12  ;;  %4713 = vmatpush1.bf16.msra.mxu0 %v13462_v13  ;;  %v13516_v13 = vld [vmem:[#allocation7 + $0x370] ss:$24 sps:$4 sm:$0xff]  }
 0x2e8   : > { %4744 = vmatprep.mubr.bf16.mxu0 %v15862_v51  ;;  %4714 = vmatprep.subr.bf16.mxu0 %v13467_v14  ;;  %v13485_v51 = vld [vmem:[#allocation7 + $0x164] ss:$24 sps:$4 sm:$0xff]  }
 0x2e9   : > { %8483 = vmatpush1.bf16.msra.mxu1 %v13588_v40  ;;  %v13521_v14 = vld [vmem:[#allocation7 + $0x3a4] ss:$24 sps:$4 sm:$0xff]  }
 0x2ea   : > { %8484 = vmatprep.subr.bf16.mxu1 %v13596_v41  ;;  %v13674_v40 = vld [vmem:[#allocation10 + $0x2a4] ss:$24 sps:$4 sm:$0xff]   ;;  %v13672_v41 = vld [vmem:[#allocation10 + $0x2a0] ss:$24 sps:$4 sm:$0xff]  }
 0x2eb   : > { %4715 = vmatpush1.bf16.msra.mxu0 %v13465_v15  ;;  %v13636_v15 = vld [vmem:[#allocation10 + $0x180] ss:$24 sps:$4 sm:$0xff]  }
 0x2ec   : > { %4716 = vmatprep.subr.bf16.mxu0 %v13470_v16  ;;  %v13644_v16 = vld [vmem:[#allocation10 + $0x1b4] ss:$24 sps:$4 sm:$0xff]  }
 0x2ed   : > { %8485 = vmatpush1.bf16.msra.mxu1 %v13594_v44  ;;  %v13680_v44 = vld [vmem:[#allocation10 + $0x2d4] ss:$24 sps:$4 sm:$0xff]  }
 0x2ee   : > { %8486 = vmatprep.subr.bf16.mxu1 %v13602_v45  ;;  %v13678_v45 = vld [vmem:[#allocation10 + $0x2d0] ss:$24 sps:$4 sm:$0xff]  }
 0x2ef   : > { %4717 = vmatpush1.bf16.msra.mxu0 %v13468_v17  ;;  %v13524_v17 = vld [vmem:[#allocation7 + $0x3d4] ss:$24 sps:$4 sm:$0xff]  }
 0x2f0   : > { %4718 = vmatprep.subr.bf16.mxu0 %v13473_v18  ;;  %v13642_v18 = vld [vmem:[#allocation10 + $0x1b0] ss:$24 sps:$4 sm:$0xff]  }
 0x2f1   : > { %8487 = vmatpush1.bf16.msra.mxu1 %v13600_v48  ;;  %v13686_v48 = vld [vmem:[#allocation10 + $0x304] ss:$24 sps:$4 sm:$0xff]  }
 0x2f2   : > { %8488 = vmatprep.subr.bf16.mxu1 %v13608_v50  ;;  %v13543_v50 = vld [vmem:[#allocation7 + $0x520] ss:$24 sps:$4 sm:$0xff]  }
 0x2f3   : > { %4719 = vmatpush1.bf16.msra.mxu0 %v13471_v19  ;;  %v13522_v19 = vld [vmem:[#allocation7 + $0x3d0] ss:$24 sps:$4 sm:$0xff]  }
 0x2f4   : > { %4720 = vmatprep.subr.bf16.mxu0 %v13476_v21  ;;  %v13527_v21 = vld [vmem:[#allocation7 + $0x404] ss:$24 sps:$4 sm:$0xff]  }
 0x2f5   : > { %8489 = vmatpush1.bf16.msra.mxu1 %v13606_v54  ;;  %v13551_v54 = vld [vmem:[#allocation7 + $0x584] ss:$24 sps:$4 sm:$0xff]  }
 0x2f6   : > { %8490 = vmatprep.subr.bf16.mxu1 %v13614_v55  ;;  %v13549_v55 = vld [vmem:[#allocation7 + $0x580] ss:$24 sps:$4 sm:$0xff]  }
 0x2f7   : > { %4721 = vmatpush1.bf16.msra.mxu0 %v13474_v22  ;;  %v13648_v22 = vld [vmem:[#allocation10 + $0x1e0] ss:$24 sps:$4 sm:$0xff]  }
 0x2f8   : > { %4722 = vmatprep.subr.bf16.mxu0 %v13479_v23  ;;  %v13656_v23 = vld [vmem:[#allocation10 + $0x214] ss:$24 sps:$4 sm:$0xff]  }
 0x2f9   : > { %8491 = vmatpush1.bf16.msra.mxu1 %v13612_v59  ;;  %v13557_v59 = vld [vmem:[#allocation7 + $0x5e4] ss:$24 sps:$4 sm:$0xff]  }
 0x2fa   : > { %8492 = vmatprep.subr.bf16.mxu1 %v13620_v60  ;;  %v13555_v60 = vld [vmem:[#allocation7 + $0x5e0] ss:$24 sps:$4 sm:$0xff]  }
 0x2fb   : > { %4723 = vmatpush1.bf16.msra.mxu0 %v13477_v24  ;;  %v13525_v24 = vld [vmem:[#allocation7 + $0x400] ss:$24 sps:$4 sm:$0xff]  }
 0x2fc   : > { %4724 = vmatprep.subr.bf16.mxu0 %v13482_v25  ;;  %v13530_v25 = vld [vmem:[#allocation7 + $0x434] ss:$24 sps:$4 sm:$0xff]  }
 0x2fd   : > { %8493 = vmatpush1.bf16.msra.mxu1 %v13618_v0  ;;  %v13563_v0 = vld [vmem:[#allocation7 + $0x644] ss:$24 sps:$4 sm:$0xff]  }
 0x2fe   : > { %8494 = vmatprep.subr.bf16.mxu1 %v13626_v1  ;;  %v13561_v1 = vld [vmem:[#allocation7 + $0x640] ss:$24 sps:$4 sm:$0xff]  }
 0x2ff   : > { %4725 = vmatpush1.bf16.msra.mxu0 %v13480_v26  ;;  %v13654_v26 = vld [vmem:[#allocation10 + $0x210] ss:$24 sps:$4 sm:$0xff]  }
 0x300   : > { %4726 = vmatprep.subr.bf16.mxu0 %v13485_v51  ;;  %v13528_v51 = vld [vmem:[#allocation7 + $0x430] ss:$24 sps:$4 sm:$0xff]  }
 0x301   : > { %8495 = vmatpush1.bf16.msra.mxu1 %v13624_v5  ;;  %v13569_v5 = vld [vmem:[#allocation7 + $0x6a4] ss:$24 sps:$4 sm:$0xff]  }
 0x302   : > { %8496 = vmatprep.subr.bf16.mxu1 %v13632_v6  ;;  %v13567_v6 = vld [vmem:[#allocation7 + $0x6a0] ss:$24 sps:$4 sm:$0xff]  }
 0x303   : > { %4727 = vmatpush1.bf16.msra.mxu0 %v13483_v28  ;;  %v13533_v28 = vld [vmem:[#allocation7 + $0x464] ss:$24 sps:$4 sm:$0xff]  }
 0x304   : > { %4728 = vmatprep.subr.bf16.mxu0 %v13488_v29  ;;  %v13531_v29 = vld [vmem:[#allocation7 + $0x460] ss:$24 sps:$4 sm:$0xff]  }
 0x305   : > { %8497 = vmatpush1.bf16.msra.mxu1 %v13630_v9  ;;  %v13575_v9 = vld [vmem:[#allocation7 + $0x704] ss:$24 sps:$4 sm:$0xff]  }
 0x306   : > { %8498 = vmatprep.subr.bf16.mxu1 %v13638_v10  ;;  %v13573_v10 = vld [vmem:[#allocation7 + $0x700] ss:$24 sps:$4 sm:$0xff]  }
 0x307   : > { %4729 = vmatpush1.bf16.msra.mxu0 %v13486_v30  ;;  %v13662_v30 = vld [vmem:[#allocation10 + $0x244] ss:$24 sps:$4 sm:$0xff]  }
 0x308   : > { %4730 = vmatprep.subr.bf16.mxu0 %v13491_v31  ;;  %v13660_v31 = vld [vmem:[#allocation10 + $0x240] ss:$24 sps:$4 sm:$0xff]  }
 0x309   : > { %8499 = vmatpush1.bf16.msra.mxu1 %v13636_v15  ;;  %v13584_v15 = vld [vmem:[#allocation7 + $0x794] ss:$24 sps:$4 sm:$0xff]  }
 0x30a   : > { %8500 = vmatprep.subr.bf16.mxu1 %v13644_v16  ;;  %v13582_v16 = vld [vmem:[#allocation7 + $0x790] ss:$24 sps:$4 sm:$0xff]  }
 0x30b   : > { %4731 = vmatpush1.bf16.msra.mxu0 %v13489_v33  ;;  %v13536_v33 = vld [vmem:[#allocation7 + $0x494] ss:$24 sps:$4 sm:$0xff]  }
 0x30c   : > { %4732 = vmatprep.subr.bf16.mxu0 %v13494_v34  ;;  %v13668_v34 = vld [vmem:[#allocation10 + $0x274] ss:$24 sps:$4 sm:$0xff]  }
 0x30d   : > { %8501 = vmatpush1.bf16.msra.mxu1 %v13642_v18  ;;  %v13593_v18 = vld [vmem:[#allocation7 + $0x7f4] ss:$24 sps:$4 sm:$0xff]  }
 0x30f   : > { %4733 = vmatpush1.bf16.msra.mxu0 %v13492_v36  ;;  %v13666_v36 = vld [vmem:[#allocation10 + $0x270] ss:$24 sps:$4 sm:$0xff]  }
 0x310   : > { %4734 = vmatprep.subr.bf16.mxu0 %v13497_v39  ;;  %v13539_v39 = vld [vmem:[#allocation7 + $0x4c4] ss:$24 sps:$4 sm:$0xff]  }
 0x313   : > { %4735 = vmatpush1.bf16.msra.mxu0 %v13495_v42  ;;  %v13537_v42 = vld [vmem:[#allocation7 + $0x4c0] ss:$24 sps:$4 sm:$0xff]  }
 0x314   : > { %4736 = vmatprep.subr.bf16.mxu0 %v13500_v43  ;;  %v13542_v43 = vld [vmem:[#allocation7 + $0x4f4] ss:$24 sps:$4 sm:$0xff]  }
 0x317   : > { %4737 = vmatpush1.bf16.msra.mxu0 %v13498_v46  ;;  %v13540_v46 = vld [vmem:[#allocation7 + $0x4f0] ss:$24 sps:$4 sm:$0xff]  }
 0x318   : > { %4738 = vmatprep.subr.bf16.mxu0 %v13503_v47  ;;  %v13545_v47 = vld [vmem:[#allocation7 + $0x524] ss:$24 sps:$4 sm:$0xff]  }
 0x31b   : > { %4739 = vmatpush1.bf16.msra.mxu0 %v13501_v52  ;;  %v13548_v52 = vld [vmem:[#allocation7 + $0x554] ss:$24 sps:$4 sm:$0xff]  }
 0x31c   : > { %4740 = vmatprep.subr.bf16.mxu0 %v13506_v53  ;;  %v13546_v53 = vld [vmem:[#allocation7 + $0x550] ss:$24 sps:$4 sm:$0xff]  }
 0x31f   : > { %4741 = vmatpush1.bf16.msra.mxu0 %v13504_v56  ;;  %v13554_v56 = vld [vmem:[#allocation7 + $0x5b4] ss:$24 sps:$4 sm:$0xff]  }
 0x320   : > { %4742 = vmatprep.subr.bf16.mxu0 %v13509_v57  ;;  %v13552_v57 = vld [vmem:[#allocation7 + $0x5b0] ss:$24 sps:$4 sm:$0xff]  }
 0x323   : > { %4743 = vmatpush1.bf16.msra.mxu0 %v13507_v62  ;;  %v13560_v62 = vld [vmem:[#allocation7 + $0x614] ss:$24 sps:$4 sm:$0xff]  }
 0x324   : > { %4755 = vmatprep.subr.bf16.mxu0 %v13512_v63  ;;  %v13558_v63 = vld [vmem:[#allocation7 + $0x610] ss:$24 sps:$4 sm:$0xff]  }
 0x326   : > { %4745 = vmatmul.mubr.bf16.vlgmr.msra.gmra.mrb[4].mxu0 %v15870_v11  ;;  %v13519_v11 = vld [vmem:[#allocation7 + $0x3a0] ss:$24 sps:$4 sm:$0xff]  }
 0x327   : > { %4756 = vmatpush1.bf16.msra.mxu0 %v13510_v2  ;;  %4787 = vmatprep.mubr.bf16.mxu0 %v15876_v38  ;;  %v13650_v38 = vld [vmem:[#allocation10 + $0x1e4] ss:$24 sps:$4 sm:$0xff]  }
 0x328   : > { %4757 = vmatprep.subr.bf16.mxu0 %v13515_v3  ;;  %8502 = vmatprep.subr.bf16.mxu1 %v13650_v38  ;;  %v13566_v2 = vld [vmem:[#allocation7 + $0x674] ss:$24 sps:$4 sm:$0xff]   ;;  %v13564_v3 = vld [vmem:[#allocation7 + $0x670] ss:$24 sps:$4 sm:$0xff]  }
 0x329   : > { %8503 = vmatpush1.bf16.msra.mxu1 %v13648_v22  ;;  %v13591_v38 = vld [vmem:[#allocation7 + $0x7f0] ss:$24 sps:$4 sm:$0xff]   ;;  %v13605_v22 = vld [vmem:[#allocation7 + $0x854] ss:$24 sps:$4 sm:$0xff]  }
 0x32a   : > { %8504 = vmatprep.subr.bf16.mxu1 %v13656_v23  ;;  %v13603_v23 = vld [vmem:[#allocation7 + $0x850] ss:$24 sps:$4 sm:$0xff]  }
 0x32b   : > { %4758 = vmatpush1.bf16.msra.mxu0 %v13513_v7  ;;  %v13572_v7 = vld [vmem:[#allocation7 + $0x6d4] ss:$24 sps:$4 sm:$0xff]  }
 0x32c   : > { %4759 = vmatprep.subr.bf16.mxu0 %v13518_v8  ;;  %v13570_v8 = vld [vmem:[#allocation7 + $0x6d0] ss:$24 sps:$4 sm:$0xff]  }
 0x32d   : > { %8505 = vmatpush1.bf16.msra.mxu1 %v13654_v26  ;;  %v13617_v26 = vld [vmem:[#allocation7 + $0x8b4] ss:$24 sps:$4 sm:$0xff]  }
 0x32e   : > { %8506 = vmatprep.subr.bf16.mxu1 %v13662_v30  ;;  %v13629_v30 = vld [vmem:[#allocation7 + $0x914] ss:$24 sps:$4 sm:$0xff]  }
 0x32f   : > { %4760 = vmatpush1.bf16.msra.mxu0 %v13516_v13  ;;  %v13576_v13 = vld [vmem:[#allocation7 + $0x730] ss:$24 sps:$4 sm:$0xff]  }
 0x330   : > { %4761 = vmatprep.subr.bf16.mxu0 %v13521_v14  ;;  %v13579_v14 = vld [vmem:[#allocation7 + $0x760] ss:$24 sps:$4 sm:$0xff]  }
 0x331   : > { %8507 = vmatpush1.bf16.msra.mxu1 %v13660_v31  ;;  %v13627_v31 = vld [vmem:[#allocation7 + $0x910] ss:$24 sps:$4 sm:$0xff]  }
 0x332   : > { %8508 = vmatprep.subr.bf16.mxu1 %v13668_v34  ;;  %v13633_v34 = vld [vmem:[#allocation7 + $0x940] ss:$24 sps:$4 sm:$0xff]  }
 0x333   : > { %4762 = vmatpush1.bf16.msra.mxu0 %v13519_v11  ;;  %v13587_v11 = vld [vmem:[#allocation7 + $0x7c4] ss:$24 sps:$4 sm:$0xff]  }
 0x334   : > { %4763 = vmatprep.subr.bf16.mxu0 %v13524_v17  ;;  %v13585_v17 = vld [vmem:[#allocation7 + $0x7c0] ss:$24 sps:$4 sm:$0xff]  }
 0x335   : > { %8509 = vmatpush1.bf16.msra.mxu1 %v13666_v36  ;;  %v1286_v36 = vlaneseq }
 0x336   : > { %8510 = vmatprep.subr.bf16.mxu1 %v13674_v40  ;;  %v13647_v40 = vld [vmem:[#allocation7 + $0x9a4] ss:$24 sps:$4 sm:$0xff]  }
 0x337   : > { %4764 = vmatpush1.bf16.msra.mxu0 %v13522_v19  ;;  %v13599_v19 = vld [vmem:[#allocation7 + $0x824] ss:$24 sps:$4 sm:$0xff]  }
 0x338   : > { %4765 = vmatprep.subr.bf16.mxu0 %v13527_v21  ;;  %v13597_v21 = vld [vmem:[#allocation7 + $0x820] ss:$24 sps:$4 sm:$0xff]  }
 0x339   : > { %8511 = vmatpush1.bf16.msra.mxu1 %v13672_v41  ;;  %v15937_v41 = vshrl.u32 %v1286_v36, 7 }
 0x33a   : > { %8512 = vmatprep.subr.bf16.mxu1 %v13680_v44  ;;  %v13651_v44 = vld [vmem:[#allocation7 + $0x9d0] ss:$24 sps:$4 sm:$0xff]  }
 0x33b   : > { %4766 = vmatpush1.bf16.msra.mxu0 %v13525_v24  ;;  %v13611_v24 = vld [vmem:[#allocation7 + $0x884] ss:$24 sps:$4 sm:$0xff]  }
 0x33c   : > { %4767 = vmatprep.subr.bf16.mxu0 %v13530_v25  ;;  %v13609_v25 = vld [vmem:[#allocation7 + $0x880] ss:$24 sps:$4 sm:$0xff]  }
 0x33d   : > { %8513 = vmatpush1.bf16.msra.mxu1 %v13678_v45  ;;  %v1284_v45 = vld [vmem:[#allocation8] sm:$0x3f] }
 0x33e   : > { %8525 = vmatprep.subr.bf16.mxu1 %v13686_v48  ;;  %v13659_v48 = vld [vmem:[#allocation7 + $0xa04] ss:$24 sps:$4 sm:$0xff]  }
 0x33f   : > { %4768 = vmatpush1.bf16.msra.mxu0 %v13528_v51  ;;  %v13615_v51 = vld [vmem:[#allocation7 + $0x8b0] ss:$24 sps:$4 sm:$0xff]  }
 0x340   : > { %4769 = vmatprep.subr.bf16.mxu0 %v13533_v28  ;;  %v13623_v28 = vld [vmem:[#allocation7 + $0x8e4] ss:$24 sps:$4 sm:$0xff]  }
 0x343   : > { %4770 = vmatpush1.bf16.msra.mxu0 %v13531_v29  ;;  %v13621_v29 = vld [vmem:[#allocation7 + $0x8e0] ss:$24 sps:$4 sm:$0xff]  }
 0x344   : > { %4771 = vmatprep.subr.bf16.mxu0 %v13536_v33  ;;  %v13635_v33 = vld [vmem:[#allocation7 + $0x944] ss:$24 sps:$4 sm:$0xff]  }
 0x347   : > { %4772 = vmatpush1.bf16.msra.mxu0 %v13534_v35  ;;  %v13641_v35 = vld [vmem:[#allocation7 + $0x974] ss:$24 sps:$4 sm:$0xff]  }
 0x348   : > { %4773 = vmatprep.subr.bf16.mxu0 %v13539_v39  ;;  %v13639_v39 = vld [vmem:[#allocation7 + $0x970] ss:$24 sps:$4 sm:$0xff]  }
 0x34b   : > { %4774 = vmatpush1.bf16.msra.mxu0 %v13537_v42  ;;  %v13645_v42 = vld [vmem:[#allocation7 + $0x9a0] ss:$24 sps:$4 sm:$0xff]  }
 0x34c   : > { %4775 = vmatprep.subr.bf16.mxu0 %v13542_v43  ;;  %v13653_v43 = vld [vmem:[#allocation7 + $0x9d4] ss:$24 sps:$4 sm:$0xff]  }
 0x34f   : > { %4776 = vmatpush1.bf16.msra.mxu0 %v13540_v46  ;;  %v1296_v46 = vsub.s32 2, %v15937_v41 }
 0x350   : > { %4777 = vmatprep.subr.bf16.mxu0 %v13545_v47  ;;  %v1300_v47 = vsub.s32 3, %v15937_v41 }
 0x353   : > { %4778 = vmatpush1.bf16.msra.mxu0 %v13543_v50 }
 0x354   : > { %4779 = vmatprep.subr.bf16.mxu0 %v13548_v52  ;;  %v1297_v52 = vrot.slane %v1284_v45, %v1296_v46 }
 0x357   : > { %4780 = vmatpush1.bf16.msra.mxu0 %v13546_v53 }
 0x358   : > { %4781 = vmatprep.subr.bf16.mxu0 %v13551_v54  ;;  %v1301_v54 = vrot.slane %v1284_v45, %v1300_v47 }
 0x35b   : > { %4782 = vmatpush1.bf16.msra.mxu0 %v13549_v55  ;;  %v13657_v55 = vld [vmem:[#allocation7 + $0xa00] ss:$24 sps:$4 sm:$0xff]  }
 0x35c   : > { %4783 = vmatprep.subr.bf16.mxu0 %v13554_v56  ;;  %v13665_v56 = vld [vmem:[#allocation7 + $0xa34] ss:$24 sps:$4 sm:$0xff]  }
 0x35f   : > { %4784 = vmatpush1.bf16.msra.mxu0 %v13552_v57 }
 0x360   : > { %4785 = vmatprep.subr.bf16.mxu0 %v13557_v59 }
 0x363   : > { %4786 = vmatpush1.bf16.msra.mxu0 %v13555_v60 }
 0x364   : > { %4798 = vmatprep.subr.bf16.mxu0 %v13560_v62 }
 0x366   : > { %4788 = vmatmul.mubr.bf16.vlgmr.msra.gmra.mrb[4].mxu0 %v15882_v20  ;;  %v13578_v20 = vld [vmem:[#allocation7 + $0x734] ss:$24 sps:$4 sm:$0xff]  }
 0x367   : > { %4799 = vmatpush1.bf16.msra.mxu0 %v13558_v63  ;;  %4830 = vmatprep.mubr.bf16.mxu0 %v15888_v27  ;;  %v13581_v27 = vld [vmem:[#allocation7 + $0x764] ss:$24 sps:$4 sm:$0xff]  }
 0x368   : > { %4800 = vmatprep.subr.bf16.mxu0 %v13563_v0 }
 0x36b   : > { %4801 = vmatpush1.bf16.msra.mxu0 %v13561_v1 }
 0x36c   : > { %4802 = vmatprep.subr.bf16.mxu0 %v13566_v2 }
 0x36f   : > { %4803 = vmatpush1.bf16.msra.mxu0 %v13564_v3 }
 0x370   : > { %4804 = vmatprep.subr.bf16.mxu0 %v13569_v5 }
 0x373   : > { %4805 = vmatpush1.bf16.msra.mxu0 %v13567_v6  ;;  %v13663_v6 = vld [vmem:[#allocation7 + $0xa30] ss:$24 sps:$4 sm:$0xff]  }
 0x374   : > { %4806 = vmatprep.subr.bf16.mxu0 %v13572_v7  ;;  %v13671_v7 = vld [vmem:[#allocation7 + $0xa64] ss:$24 sps:$4 sm:$0xff]  }
 0x377   : > { %4807 = vmatpush1.bf16.msra.mxu0 %v13570_v8 }
 0x378   : > { %4808 = vmatprep.subr.bf16.mxu0 %v13575_v9 }
 0x37b   : > { %4809 = vmatpush1.bf16.msra.mxu0 %v13573_v10 }
 0x37c   : > { %4810 = vmatprep.subr.bf16.mxu0 %v13578_v20 }
 0x37f   : > { %4811 = vmatpush1.bf16.msra.mxu0 %v13576_v13 }
 0x380   : > { %4812 = vmatprep.subr.bf16.mxu0 %v13581_v27 }
 0x383   : > { %4813 = vmatpush1.bf16.msra.mxu0 %v13579_v14  ;;  %v13669_v14 = vld [vmem:[#allocation7 + $0xa60] ss:$24 sps:$4 sm:$0xff]  }
 0x384   : > { %4814 = vmatprep.subr.bf16.mxu0 %v13584_v15  ;;  %v13677_v15 = vld [vmem:[#allocation7 + $0xa94] ss:$24 sps:$4 sm:$0xff]  }
 0x387   : > { %4815 = vmatpush1.bf16.msra.mxu0 %v13582_v16  ;;  %v13675_v16 = vld [vmem:[#allocation7 + $0xa90] ss:$24 sps:$4 sm:$0xff]  }
 0x388   : > { %4816 = vmatprep.subr.bf16.mxu0 %v13587_v11  ;;  %v13683_v11 = vld [vmem:[#allocation7 + $0xac4] ss:$24 sps:$4 sm:$0xff]  }
 0x38b   : > { %4817 = vmatpush1.bf16.msra.mxu0 %v13585_v17 }
 0x38c   : > { %4818 = vmatprep.subr.bf16.mxu0 %v13593_v18 }
 0x38f   : > { %4819 = vmatpush1.bf16.msra.mxu0 %v13591_v38  ;;  %v13681_v38 = vld [vmem:[#allocation7 + $0xac0] ss:$24 sps:$4 sm:$0xff]  }
 0x390   : > { %4820 = vmatprep.subr.bf16.mxu0 %v13599_v19  ;;  %v13689_v19 = vld [vmem:[#allocation7 + $0xaf4] ss:$24 sps:$4 sm:$0xff]  }
 0x393   : > { %4821 = vmatpush1.bf16.msra.mxu0 %v13597_v21 }
 0x394   : > { %4822 = vmatprep.subr.bf16.mxu0 %v13605_v22 }
 0x397   : > { %4823 = vmatpush1.bf16.msra.mxu0 %v13603_v23 }
 0x398   : > { %4824 = vmatprep.subr.bf16.mxu0 %v13611_v24 }
 0x39b   : > { %4825 = vmatpush1.bf16.msra.mxu0 %v13609_v25  ;;  %v13684_v25 = vld [vmem:[#allocation10 + $0x300] ss:$24 sps:$4 sm:$0xff]  }
 0x39c   : > { %4826 = vmatprep.subr.bf16.mxu0 %v13617_v26 }
 0x39f   : > { %4827 = vmatpush1.bf16.msra.mxu0 %v13615_v51  ;;  %v13687_v51 = vld [vmem:[#allocation7 + $0xaf0] ss:$24 sps:$4 sm:$0xff]  }
 0x3a0   : > { %4828 = vmatprep.subr.bf16.mxu0 %v13623_v28  ;;  %v13695_v28 = vld [vmem:[#allocation7 + $0xb24] ss:$24 sps:$4 sm:$0xff]  }
 0x3a3   : > { %4829 = vmatpush1.bf16.msra.mxu0 %v13621_v29 }
 0x3a4   : > { %4841 = vmatprep.subr.bf16.mxu0 %v13629_v30 }
 0x3a6   : > { %4831 = vmatmul.mubr.bf16.vlgmr.msra.gmra.mrb[4].mxu0 %v15894_v32  ;;  %v15940_v32 = vsub.s32 0, %v15937_v41 }
 0x3a7   : > { %4842 = vmatpush1.bf16.msra.mxu0 %v13627_v31  ;;  %4873 = vmatprep.mubr.bf16.mxu0 %v15898_v37  ;;  %v15944_v37 = vsub.s32 1, %v15937_v41  ;;  %v13692_v31 = vld [vmem:[#allocation10 + $0x334] ss:$24 sps:$4 sm:$0xff]  }
 0x3a8   : > { %4843 = vmatprep.subr.bf16.mxu0 %v13635_v33  ;;  %v1289_v50 = vrot.slane %v1284_v45, %v15940_v32 }
 0x3a9   : > { %v1293_v53 = vrot.slane %v1284_v45, %v15944_v37  ;;  %v13701_v45 = vld [vmem:[#allocation7 + $0xb54] ss:$24 sps:$4 sm:$0xff]  }
 0x3ab   : > { %4844 = vmatpush1.bf16.msra.mxu0 %v13633_v34 }
 0x3ac   : > { %4845 = vmatprep.subr.bf16.mxu0 %v13641_v35 }
 0x3af   : > { %4846 = vmatpush1.bf16.msra.mxu0 %v13639_v39 }
 0x3b0   : > { %4847 = vmatprep.subr.bf16.mxu0 %v13647_v40 }
 0x3b3   : > { %4848 = vmatpush1.bf16.msra.mxu0 %v13645_v42 }
 0x3b4   : > { %4849 = vmatprep.subr.bf16.mxu0 %v13653_v43  ;;  %v13690_v43 = vld [vmem:[#allocation10 + $0x330] ss:$24 sps:$4 sm:$0xff]  }
 0x3b7   : > { %4850 = vmatpush1.bf16.msra.mxu0 %v13651_v44  ;;  %v13693_v44 = vld [vmem:[#allocation7 + $0xb20] ss:$24 sps:$4 sm:$0xff]  }
 0x3b8   : > { %4851 = vmatprep.subr.bf16.mxu0 %v13659_v48  ;;  %v13698_v48 = vld [vmem:[#allocation10 + $0x364] ss:$24 sps:$4 sm:$0xff]  }
 0x3b9   : > { %v4445_v57 = vpop.f32.mrb[0].mxu0 }
 0x3ba   : > { %v4703_v59 = vpop.f32.mrb[0].mxu1  ;;  %v12585_v60 = vadd.f32 %v4445_v57, %v1289_v50  ;;  %v4447_v63 = vpop.f32.mrb[1].mxu0  ;;  %v13713_v57 = vld [vmem:[#allocation7 + $0xbb4] ss:$24 sps:$4 sm:$0xff]  }
 0x3bb   : > { %v12589_v62 = vadd.f32 %v4703_v59, %v1297_v52  ;;  %v4705_v0 = vpop.f32.mrb[1].mxu1  ;;  %v12586_v1 = vadd.f32 %v4447_v63, %v1293_v53  ;;  %v4449_v3 = vpop.f32.mrb[2].mxu0  ;;  %4852 = vmatpush1.bf16.msra.mxu0 %v13657_v55  ;;  %v13702_v55 = vld [vmem:[#allocation10 + $0x390] ss:$24 sps:$4 sm:$0xff]   ;;  %v13710_v59 = vld [vmem:[#allocation10 + $0x3c4] ss:$24 sps:$4 sm:$0xff]  }
 0x3bc   : > { %v12590_v2 = vadd.f32 %v4705_v0, %v1301_v54  ;;  %v4707_v5 = vpop.f32.mrb[2].mxu1  ;;  %14902 = vtanh.f32 %v12585_v60  ;;  %v12587_v8 = vadd.f32 %v4449_v3, %v1289_v50  ;;  %v4451_v9 = vpop.f32.mrb[3].mxu0  ;;  %4853 = vmatprep.subr.bf16.mxu0 %v13665_v56  ;;  %v13696_v50 = vld [vmem:[#allocation10 + $0x360] ss:$24 sps:$4 sm:$0xff]   ;;  %v13716_v0 = vld [vmem:[#allocation10 + $0x3f4] ss:$24 sps:$4 sm:$0xff]  }
 0x3bd   : > { %v4709_v10 = vpop.f32.mrb[3].mxu1  ;;  %14904 = vtanh.f32 %v12589_v62  ;;  %v12591_v20 = vadd.f32 %v4707_v5, %v1297_v52  ;;  %v12588_v13 = vadd.f32 %v4451_v9, %v1293_v53  ;;  %v13699_v52 = vld [vmem:[#allocation7 + $0xb50] ss:$24 sps:$4 sm:$0xff]   ;;  %v13707_v53 = vld [vmem:[#allocation7 + $0xb84] ss:$24 sps:$4 sm:$0xff]  }
 0x3be   : > { %14906 = vtanh.f32 %v12586_v1  ;;  %v12592_v27 = vadd.f32 %v4709_v10, %v1301_v54  ;;  %v13704_v54 = vld [vmem:[#allocation10 + $0x394] ss:$24 sps:$4 sm:$0xff]   ;;  %v13708_v60 = vld [vmem:[#allocation10 + $0x3c0] ss:$24 sps:$4 sm:$0xff]   ;;  %v13714_v1 = vld [vmem:[#allocation10 + $0x3f0] ss:$24 sps:$4 sm:$0xff]  }
 0x3bf   : > { %14908 = vtanh.f32 %v12590_v2  ;;  %4854 = vmatpush1.bf16.msra.mxu0 %v13663_v6  ;;  %v13705_v56 = vld [vmem:[#allocation7 + $0xb80] ss:$24 sps:$4 sm:$0xff]   ;;  %v13711_v62 = vld [vmem:[#allocation7 + $0xbb0] ss:$24 sps:$4 sm:$0xff]   ;;  %v13719_v63 = vld [vmem:[#allocation7 + $0xbe4] ss:$24 sps:$4 sm:$0xff]  }
 0x3c0   : > { %14910 = vtanh.f32 %v12587_v8  ;;  %4855 = vmatprep.subr.bf16.mxu0 %v13671_v7  ;;  %v13717_v2 = vld [vmem:[#allocation7 + $0xbe0] ss:$24 sps:$4 sm:$0xff]   ;;  %v13725_v3 = vld [vmem:[#allocation7 + $0xc14] ss:$24 sps:$4 sm:$0xff]   ;;  %v13723_v6 = vld [vmem:[#allocation7 + $0xc10] ss:$24 sps:$4 sm:$0xff]  }
 0x3c1   : > { %14912 = vtanh.f32 %v12591_v20  ;;  %v13722_v5 = vld [vmem:[#allocation10 + $0x424] ss:$24 sps:$4 sm:$0xff]   ;;  %v13720_v8 = vld [vmem:[#allocation10 + $0x420] ss:$24 sps:$4 sm:$0xff]   ;;  %v13728_v9 = vld [vmem:[#allocation10 + $0x454] ss:$24 sps:$4 sm:$0xff]  }
 0x3c2   : > { %14914 = vtanh.f32 %v12588_v13  ;;  %v13731_v7 = vld [vmem:[#allocation7 + $0xc44] ss:$24 sps:$4 sm:$0xff]   ;;  %v13726_v10 = vld [vmem:[#allocation10 + $0x450] ss:$24 sps:$4 sm:$0xff]  }
 0x3c3   : > { %14916 = vtanh.f32 %v12592_v27  ;;  %4856 = vmatpush1.bf16.msra.mxu0 %v13669_v14  ;;  %v13729_v20 = vld [vmem:[#allocation7 + $0xc40] ss:$24 sps:$4 sm:$0xff]   ;;  %v13737_v13 = vld [vmem:[#allocation7 + $0xc74] ss:$24 sps:$4 sm:$0xff]  }
 0x3c4   : > { %4857 = vmatprep.subr.bf16.mxu0 %v13677_v15  ;;  %v13734_v27 = vld [vmem:[#allocation10 + $0x484] ss:$24 sps:$4 sm:$0xff]   ;;  %v13732_v14 = vld [vmem:[#allocation10 + $0x480] ss:$24 sps:$4 sm:$0xff]  }
 0x3c5   : > { %v13735_v15 = vld [vmem:[#allocation7 + $0xc70] ss:$24 sps:$4 sm:$0xff]  }
 0x3c6   : > { %v14903_v17 = vpop.eup %14902 }
 0x3c7   : > { %v14905_v18 = vpop.eup %14904  ;;  %4858 = vmatpush1.bf16.msra.mxu0 %v13675_v16  ;;  %v13743_v16 = vld [vmem:[#allocation7 + $0xca4] ss:$24 sps:$4 sm:$0xff]  }
 0x3c8   : > { %v14907_v21 = vpop.eup %14906  ;;  %4859 = vmatprep.subr.bf16.mxu0 %v13683_v11  ;;  %v13740_v11 = vld [vmem:[#allocation10 + $0x4b4] ss:$24 sps:$4 sm:$0xff]  }
 0x3c9   : > { %v14909_v22 = vpop.eup %14908 }
 0x3ca   : > { %v14911_v23 = vpop.eup %14910 }
 0x3cb   : > { %v14913_v24 = vpop.eup %14912  ;;  %4860 = vmatpush1.bf16.msra.mxu0 %v13681_v38  ;;  %v15953_v26 = vpack.c.bf16 %v14911_v23, %v14903_v17  ;;  %v15955_v29 = vpack.c.bf16 %v14903_v17, %v14911_v23  ;;  %v13741_v17 = vld [vmem:[#allocation7 + $0xca0] ss:$24 sps:$4 sm:$0xff]  }
 0x3cc   : > { %v14915_v30 = vpop.eup %14914  ;;  %4861 = vmatprep.subr.bf16.mxu0 %v13689_v19  ;;  %v15957_v33 = vpack.c.bf16 %v14913_v24, %v14905_v18  ;;  %v15959_v34 = vpack.c.bf16 %v14905_v18, %v14913_v24  ;;  %v13749_v18 = vld [vmem:[#allocation7 + $0xcd4] ss:$24 sps:$4 sm:$0xff]   ;;  %v13747_v19 = vld [vmem:[#allocation7 + $0xcd0] ss:$24 sps:$4 sm:$0xff]   ;;  %v13753_v24 = vld [vmem:[#allocation7 + $0xd00] ss:$24 sps:$4 sm:$0xff]  }
 0x3cd   : > { %v14917_v35 = vpop.eup %14916  ;;  %v15961_v36 = vpack.c.bf16 %v14915_v30, %v14907_v21  ;;  %v15963_v39 = vpack.c.bf16 %v14907_v21, %v14915_v30  ;;  %v13746_v38 = vld [vmem:[#allocation10 + $0x4e4] ss:$24 sps:$4 sm:$0xff]   ;;  %v13750_v23 = vld [vmem:[#allocation10 + $0x510] ss:$24 sps:$4 sm:$0xff]  }
 0x3ce   : > { %v15965_v40 = vpack.c.bf16 %v14917_v35, %v14909_v22  ;;  %v15967_v42 = vpack.c.bf16 %v14909_v22, %v14917_v35  ;;  %v13755_v21 = vld [vmem:[#allocation7 + $0xd04] ss:$24 sps:$4 sm:$0xff]   ;;  %v13759_v30 = vld [vmem:[#allocation7 + $0xd30] ss:$24 sps:$4 sm:$0xff]  }
 0x3cf   : > { %8514 = vmatprep.mubr.bf16.mxu1 %v15961_v36  ;;  %4862 = vmatpush1.bf16.msra.mxu0 %v13687_v51  ;;  %v13752_v22 = vld [vmem:[#allocation10 + $0x514] ss:$24 sps:$4 sm:$0xff]   ;;  %v13758_v51 = vld [vmem:[#allocation10 + $0x544] ss:$24 sps:$4 sm:$0xff]  }
 0x3d0   : > { %8515 = vmatmul.mubr.bf16.vlgmr.msra.gmra.mrb[4].mxu1 %v15953_v26  ;;  %4863 = vmatprep.subr.bf16.mxu0 %v13695_v28  ;;  %v13756_v28 = vld [vmem:[#allocation10 + $0x540] ss:$24 sps:$4 sm:$0xff]   ;;  %v13764_v35 = vld [vmem:[#allocation10 + $0x574] ss:$24 sps:$4 sm:$0xff]  }
 0x3d1   : > { %8526 = vmatpush1.bf16.msra.mxu1 %v13684_v25  ;;  %8557 = vmatprep.mubr.bf16.mxu1 %v15965_v40  ;;  %v13761_v25 = vld [vmem:[#allocation7 + $0xd34] ss:$24 sps:$4 sm:$0xff]  }
 0x3d2   : > { %8527 = vmatprep.subr.bf16.mxu1 %v13692_v31  ;;  %v13767_v31 = vld [vmem:[#allocation7 + $0xd64] ss:$24 sps:$4 sm:$0xff]  }
 0x3d3   : > { %4864 = vmatpush1.bf16.msra.mxu0 %v13693_v44  ;;  %v13765_v44 = vld [vmem:[#allocation7 + $0xd60] ss:$24 sps:$4 sm:$0xff]  }
 0x3d4   : > { %4865 = vmatprep.subr.bf16.mxu0 %v13701_v45  ;;  %v13773_v45 = vld [vmem:[#allocation7 + $0xd94] ss:$24 sps:$4 sm:$0xff]  }
 0x3d5   : > { %8528 = vmatpush1.bf16.msra.mxu1 %v13690_v43  ;;  %v13762_v43 = vld [vmem:[#allocation10 + $0x570] ss:$24 sps:$4 sm:$0xff]  }
 0x3d6   : > { %8529 = vmatprep.subr.bf16.mxu1 %v13698_v48  ;;  %v13770_v48 = vld [vmem:[#allocation10 + $0x5a4] ss:$24 sps:$4 sm:$0xff]  }
 0x3d7   : > { %4866 = vmatpush1.bf16.msra.mxu0 %v13699_v52  ;;  %v13779_v52 = vld [vmem:[#allocation7 + $0xdc4] ss:$24 sps:$4 sm:$0xff]  }
 0x3d8   : > { %4867 = vmatprep.subr.bf16.mxu0 %v13707_v53  ;;  %v13768_v53 = vld [vmem:[#allocation10 + $0x5a0] ss:$24 sps:$4 sm:$0xff]  }
 0x3d9   : > { %8530 = vmatpush1.bf16.msra.mxu1 %v13696_v50  ;;  %v13771_v50 = vld [vmem:[#allocation7 + $0xd90] ss:$24 sps:$4 sm:$0xff]  }
 0x3da   : > { %8531 = vmatprep.subr.bf16.mxu1 %v13704_v54  ;;  %v13776_v54 = vld [vmem:[#allocation10 + $0x5d4] ss:$24 sps:$4 sm:$0xff]  }
 0x3db   : > { %4868 = vmatpush1.bf16.msra.mxu0 %v13705_v56  ;;  %v13782_v56 = vld [vmem:[#allocation7 + $0xdf4] ss:$24 sps:$4 sm:$0xff]  }
 0x3dc   : > { %4869 = vmatprep.subr.bf16.mxu0 %v13713_v57  ;;  %v13774_v57 = vld [vmem:[#allocation10 + $0x5d0] ss:$24 sps:$4 sm:$0xff]  }
 0x3dd   : > { %8532 = vmatpush1.bf16.msra.mxu1 %v13702_v55  ;;  %v13777_v55 = vld [vmem:[#allocation7 + $0xdc0] ss:$24 sps:$4 sm:$0xff]  }
 0x3de   : > { %8533 = vmatprep.subr.bf16.mxu1 %v13710_v59  ;;  %v13780_v59 = vld [vmem:[#allocation7 + $0xdf0] ss:$24 sps:$4 sm:$0xff]  }
 0x3df   : > { %4870 = vmatpush1.bf16.msra.mxu0 %v13711_v62  ;;  %v13783_v62 = vld [vmem:[#allocation7 + $0xe20] ss:$24 sps:$4 sm:$0xff]  }
 0x3e0   : > { %4871 = vmatprep.subr.bf16.mxu0 %v13719_v63  ;;  %v13788_v63 = vld [vmem:[#allocation7 + $0xe54] ss:$24 sps:$4 sm:$0xff]  }
 0x3e1   : > { %8534 = vmatpush1.bf16.msra.mxu1 %v13708_v60  ;;  %v13785_v60 = vld [vmem:[#allocation7 + $0xe24] ss:$24 sps:$4 sm:$0xff]  }
 0x3e2   : > { %8535 = vmatprep.subr.bf16.mxu1 %v13716_v0  ;;  %v13786_v0 = vld [vmem:[#allocation7 + $0xe50] ss:$24 sps:$4 sm:$0xff]  }
 0x3e3   : > { %4872 = vmatpush1.bf16.msra.mxu0 %v13717_v2  ;;  %v13789_v2 = vld [vmem:[#allocation7 + $0xe80] ss:$24 sps:$4 sm:$0xff]  }
 0x3e4   : > { %4884 = vmatprep.subr.bf16.mxu0 %v13725_v3  ;;  %v13794_v3 = vld [vmem:[#allocation7 + $0xeb4] ss:$24 sps:$4 sm:$0xff]  }
 0x3e5   : > { %8536 = vmatpush1.bf16.msra.mxu1 %v13714_v1  ;;  %v13791_v1 = vld [vmem:[#allocation7 + $0xe84] ss:$24 sps:$4 sm:$0xff]  }
 0x3e6   : > { %8537 = vmatprep.subr.bf16.mxu1 %v13722_v5  ;;  %4874 = vmatmul.mubr.bf16.vlgmr.msra.gmra.mrb[4].mxu0 %v15868_v58  ;;  %v13738_v58 = vld [vmem:[#allocation10 + $0x4b0] ss:$24 sps:$4 sm:$0xff]  }
 0x3e7   : > { %4885 = vmatpush1.bf16.msra.mxu0 %v13723_v6  ;;  %4916 = vmatprep.mubr.bf16.mxu0 %v15906_v49  ;;  %v13744_v49 = vld [vmem:[#allocation10 + $0x4e0] ss:$24 sps:$4 sm:$0xff]  }
 0x3e8   : > { %4886 = vmatprep.subr.bf16.mxu0 %v13731_v7  ;;  %v13792_v5 = vld [vmem:[#allocation7 + $0xeb0] ss:$24 sps:$4 sm:$0xff]   ;;  %v13797_v6 = vld [vmem:[#allocation7 + $0xee4] ss:$24 sps:$4 sm:$0xff]   ;;  %v13795_v7 = vld [vmem:[#allocation7 + $0xee0] ss:$24 sps:$4 sm:$0xff]  }
 0x3e9   : > { %8538 = vmatpush1.bf16.msra.mxu1 %v13720_v8  ;;  %v13800_v8 = vld [vmem:[#allocation7 + $0xf14] ss:$24 sps:$4 sm:$0xff]  }
 0x3ea   : > { %8539 = vmatprep.subr.bf16.mxu1 %v13728_v9  ;;  %v13798_v9 = vld [vmem:[#allocation7 + $0xf10] ss:$24 sps:$4 sm:$0xff]  }
 0x3eb   : > { %4887 = vmatpush1.bf16.msra.mxu0 %v13729_v20  ;;  %v13801_v20 = vld [vmem:[#allocation7 + $0xf40] ss:$24 sps:$4 sm:$0xff]  }
 0x3ec   : > { %4888 = vmatprep.subr.bf16.mxu0 %v13737_v13  ;;  %v13806_v13 = vld [vmem:[#allocation7 + $0xf74] ss:$24 sps:$4 sm:$0xff]  }
 0x3ed   : > { %8540 = vmatpush1.bf16.msra.mxu1 %v13726_v10  ;;  %v13803_v10 = vld [vmem:[#allocation7 + $0xf44] ss:$24 sps:$4 sm:$0xff]  }
 0x3ee   : > { %8541 = vmatprep.subr.bf16.mxu1 %v13734_v27  ;;  %v13804_v27 = vld [vmem:[#allocation7 + $0xf70] ss:$24 sps:$4 sm:$0xff]  }
 0x3ef   : > { %4889 = vmatpush1.bf16.msra.mxu0 %v13735_v15  ;;  %v13807_v15 = vld [vmem:[#allocation7 + $0xfa0] ss:$24 sps:$4 sm:$0xff]  }
 0x3f0   : > { %4890 = vmatprep.subr.bf16.mxu0 %v13743_v16  ;;  %v13812_v16 = vld [vmem:[#allocation7 + $0xfd4] ss:$24 sps:$4 sm:$0xff]  }
 0x3f1   : > { %8542 = vmatpush1.bf16.msra.mxu1 %v13732_v14  ;;  %v13809_v14 = vld [vmem:[#allocation7 + $0xfa4] ss:$24 sps:$4 sm:$0xff]  }
 0x3f2   : > { %8543 = vmatprep.subr.bf16.mxu1 %v13740_v11  ;;  %v13810_v11 = vld [vmem:[#allocation7 + $0xfd0] ss:$24 sps:$4 sm:$0xff]  }
 0x3f3   : > { %4891 = vmatpush1.bf16.msra.mxu0 %v13741_v17  ;;  %v13818_v17 = vld [vmem:[#allocation7 + $0x1034] ss:$24 sps:$4 sm:$0xff]  }
 0x3f4   : > { %4892 = vmatprep.subr.bf16.mxu0 %v13749_v18  ;;  %v13821_v18 = vld [vmem:[#allocation7 + $0x1064] ss:$24 sps:$4 sm:$0xff]  }
 0x3f5   : > { %8544 = vmatpush1.bf16.msra.mxu1 %v13738_v58  ;;  %v13815_v58 = vld [vmem:[#allocation7 + $0x1004] ss:$24 sps:$4 sm:$0xff]  }
 0x3f6   : > { %8545 = vmatprep.subr.bf16.mxu1 %v13746_v38  ;;  %v13819_v38 = vld [vmem:[#allocation7 + $0x1060] ss:$24 sps:$4 sm:$0xff]  }
 0x3f7   : > { %4893 = vmatpush1.bf16.msra.mxu0 %v13747_v19  ;;  %v13822_v19 = vld [vmem:[#allocation7 + $0x1090] ss:$24 sps:$4 sm:$0xff]  }
 0x3f8   : > { %4894 = vmatprep.subr.bf16.mxu0 %v13755_v21  ;;  %v13827_v21 = vld [vmem:[#allocation7 + $0x10c4] ss:$24 sps:$4 sm:$0xff]  }
 0x3f9   : > { %8546 = vmatpush1.bf16.msra.mxu1 %v13744_v49  ;;  %v13824_v49 = vld [vmem:[#allocation7 + $0x1094] ss:$24 sps:$4 sm:$0xff]  }
 0x3fa   : > { %8547 = vmatprep.subr.bf16.mxu1 %v13752_v22  ;;  %v13825_v22 = vld [vmem:[#allocation7 + $0x10c0] ss:$24 sps:$4 sm:$0xff]  }
 0x3fb   : > { %4895 = vmatpush1.bf16.msra.mxu0 %v13753_v24  ;;  %v13828_v24 = vld [vmem:[#allocation7 + $0x10f0] ss:$24 sps:$4 sm:$0xff]  }
 0x3fc   : > { %4896 = vmatprep.subr.bf16.mxu0 %v13761_v25  ;;  %v13833_v25 = vld [vmem:[#allocation7 + $0x1124] ss:$24 sps:$4 sm:$0xff]  }
 0x3fd   : > { %8548 = vmatpush1.bf16.msra.mxu1 %v13750_v23  ;;  %v13830_v23 = vld [vmem:[#allocation7 + $0x10f4] ss:$24 sps:$4 sm:$0xff]  }
 0x3fe   : > { %8549 = vmatprep.subr.bf16.mxu1 %v13758_v51  ;;  %v13831_v51 = vld [vmem:[#allocation7 + $0x1120] ss:$24 sps:$4 sm:$0xff]  }
 0x3ff   : > { %4897 = vmatpush1.bf16.msra.mxu0 %v13759_v30  ;;  %v13834_v30 = vld [vmem:[#allocation7 + $0x1150] ss:$24 sps:$4 sm:$0xff]  }
 0x400   : > { %4898 = vmatprep.subr.bf16.mxu0 %v13767_v31  ;;  %v13839_v31 = vld [vmem:[#allocation7 + $0x1184] ss:$24 sps:$4 sm:$0xff]  }
 0x401   : > { %8550 = vmatpush1.bf16.msra.mxu1 %v13756_v28  ;;  %v13836_v28 = vld [vmem:[#allocation7 + $0x1154] ss:$24 sps:$4 sm:$0xff]  }
 0x402   : > { %8551 = vmatprep.subr.bf16.mxu1 %v13764_v35  ;;  %v13837_v35 = vld [vmem:[#allocation7 + $0x1180] ss:$24 sps:$4 sm:$0xff]  }
 0x403   : > { %4899 = vmatpush1.bf16.msra.mxu0 %v13765_v44  ;;  %v13840_v44 = vld [vmem:[#allocation7 + $0x11b0] ss:$24 sps:$4 sm:$0xff]  }
 0x404   : > { %4900 = vmatprep.subr.bf16.mxu0 %v13773_v45  ;;  %v13845_v45 = vld [vmem:[#allocation7 + $0x11e4] ss:$24 sps:$4 sm:$0xff]  }
 0x405   : > { %8552 = vmatpush1.bf16.msra.mxu1 %v13762_v43  ;;  %v13842_v43 = vld [vmem:[#allocation7 + $0x11b4] ss:$24 sps:$4 sm:$0xff]  }
 0x406   : > { %8553 = vmatprep.subr.bf16.mxu1 %v13770_v48  ;;  %v13843_v48 = vld [vmem:[#allocation7 + $0x11e0] ss:$24 sps:$4 sm:$0xff]  }
 0x407   : > { %4901 = vmatpush1.bf16.msra.mxu0 %v13771_v50  ;;  %v13848_v50 = vld [vmem:[#allocation10 + $0xc] ss:$24 sps:$4 sm:$0xff]  }
 0x408   : > { %4902 = vmatprep.subr.bf16.mxu0 %v13779_v52  ;;  %v13846_v52 = vld [vmem:[#allocation10 + $0x8] ss:$24 sps:$4 sm:$0xff]  }
 0x409   : > { %8554 = vmatpush1.bf16.msra.mxu1 %v13768_v53  ;;  %v13851_v53 = vld [vmem:[#allocation10 + $0x3c] ss:$24 sps:$4 sm:$0xff]  }
 0x40a   : > { %8555 = vmatprep.subr.bf16.mxu1 %v13776_v54  ;;  %v13942_v54 = vld [vmem:[#allocation10 + $0x600] ss:$24 sps:$4 sm:$0xff]  }
 0x40b   : > { %4903 = vmatpush1.bf16.msra.mxu0 %v13777_v55  ;;  %v13944_v55 = vld [vmem:[#allocation10 + $0x604] ss:$24 sps:$4 sm:$0xff]  }
 0x40c   : > { %4904 = vmatprep.subr.bf16.mxu0 %v13782_v56  ;;  %v13849_v56 = vld [vmem:[#allocation10 + $0x38] ss:$24 sps:$4 sm:$0xff]  }
 0x40d   : > { %8556 = vmatpush1.bf16.msra.mxu1 %v13774_v57  ;;  %v13950_v57 = vld [vmem:[#allocation10 + $0x634] ss:$24 sps:$4 sm:$0xff]  }
 0x40e   : > { %8568 = vmatprep.subr.bf16.mxu1 %v13944_v55  ;;  %v13891_v55 = vld [vmem:[#allocation10 + $0x2d8] ss:$24 sps:$4 sm:$0xff]  }
 0x40f   : > { %4905 = vmatpush1.bf16.msra.mxu0 %v13780_v59  ;;  %v13854_v59 = vld [vmem:[#allocation10 + $0x6c] ss:$24 sps:$4 sm:$0xff]  }
 0x410   : > { %8558 = vmatmul.mubr.bf16.vlgmr.msra.gmra.mrb[4].mxu1 %v15957_v33  ;;  %4906 = vmatprep.subr.bf16.mxu0 %v13785_v60  ;;  %v13948_v60 = vld [vmem:[#allocation10 + $0x630] ss:$24 sps:$4 sm:$0xff]  }
 0x411   : > { %8569 = vmatpush1.bf16.msra.mxu1 %v13942_v54  ;;  %v13893_v54 = vld [vmem:[#allocation10 + $0x2dc] ss:$24 sps:$4 sm:$0xff]  }
 0x412   : > { %8570 = vmatprep.subr.bf16.mxu1 %v13950_v57  ;;  %v13894_v57 = vld [vmem:[#allocation10 + $0x308] ss:$24 sps:$4 sm:$0xff]  }
 0x413   : > { %4907 = vmatpush1.bf16.msra.mxu0 %v13783_v62  ;;  %v13852_v62 = vld [vmem:[#allocation10 + $0x68] ss:$24 sps:$4 sm:$0xff]  }
 0x414   : > { %4908 = vmatprep.subr.bf16.mxu0 %v13788_v63  ;;  %v13956_v63 = vld [vmem:[#allocation10 + $0x664] ss:$24 sps:$4 sm:$0xff]  }
 0x415   : > { %8571 = vmatpush1.bf16.msra.mxu1 %v13948_v60  ;;  %v13897_v60 = vld [vmem:[#allocation10 + $0x338] ss:$24 sps:$4 sm:$0xff]  }
 0x416   : > { %8572 = vmatprep.subr.bf16.mxu1 %v13956_v63  ;;  %v13900_v63 = vld [vmem:[#allocation10 + $0x368] ss:$24 sps:$4 sm:$0xff]  }
 0x417   : > { %4909 = vmatpush1.bf16.msra.mxu0 %v13786_v0  ;;  %v13857_v0 = vld [vmem:[#allocation10 + $0x9c] ss:$24 sps:$4 sm:$0xff]  }
 0x418   : > { %4910 = vmatprep.subr.bf16.mxu0 %v13791_v1  ;;  %v13855_v1 = vld [vmem:[#allocation10 + $0x98] ss:$24 sps:$4 sm:$0xff]  }
 0x41b   : > { %4911 = vmatpush1.bf16.msra.mxu0 %v13789_v2  ;;  %v13962_v2 = vld [vmem:[#allocation10 + $0x694] ss:$24 sps:$4 sm:$0xff]  }
 0x41c   : > { %4912 = vmatprep.subr.bf16.mxu0 %v13794_v3  ;;  %v13860_v3 = vld [vmem:[#allocation10 + $0xcc] ss:$24 sps:$4 sm:$0xff]  }
 0x41f   : > { %4913 = vmatpush1.bf16.msra.mxu0 %v13792_v5  ;;  %v13960_v5 = vld [vmem:[#allocation10 + $0x690] ss:$24 sps:$4 sm:$0xff]  }
 0x420   : > { %4914 = vmatprep.subr.bf16.mxu0 %v13797_v6  ;;  %v13858_v6 = vld [vmem:[#allocation10 + $0xc8] ss:$24 sps:$4 sm:$0xff]  }
 0x423   : > { %4915 = vmatpush1.bf16.msra.mxu0 %v13795_v7  ;;  %v13968_v7 = vld [vmem:[#allocation10 + $0x6c4] ss:$24 sps:$4 sm:$0xff]  }
 0x424   : > { %4927 = vmatprep.subr.bf16.mxu0 %v13800_v8  ;;  %v13863_v8 = vld [vmem:[#allocation10 + $0xfc] ss:$24 sps:$4 sm:$0xff]  }
 0x426   : > { %4917 = vmatmul.mubr.bf16.vlgmr.msra.gmra.mrb[4].mxu0 %v15914_v61  ;;  %v13813_v61 = vld [vmem:[#allocation7 + $0x1000] ss:$24 sps:$4 sm:$0xff]  }
 0x427   : > { %4928 = vmatpush1.bf16.msra.mxu0 %v13798_v9  ;;  %4959 = vmatprep.mubr.bf16.mxu0 %v15918_v4  ;;  %v13816_v4 = vld [vmem:[#allocation7 + $0x1030] ss:$24 sps:$4 sm:$0xff]  }
 0x428   : > { %4929 = vmatprep.subr.bf16.mxu0 %v13803_v10  ;;  %v13966_v9 = vld [vmem:[#allocation10 + $0x6c0] ss:$24 sps:$4 sm:$0xff]  }
 0x429   : > { %v13861_v10 = vld [vmem:[#allocation10 + $0xf8] ss:$24 sps:$4 sm:$0xff]  }
 0x42b   : > { %4930 = vmatpush1.bf16.msra.mxu0 %v13801_v20  ;;  %v13974_v20 = vld [vmem:[#allocation10 + $0x6f4] ss:$24 sps:$4 sm:$0xff]  }
 0x42c   : > { %4931 = vmatprep.subr.bf16.mxu0 %v13806_v13  ;;  %v13866_v13 = vld [vmem:[#allocation10 + $0x12c] ss:$24 sps:$4 sm:$0xff]  }
 0x42f   : > { %4932 = vmatpush1.bf16.msra.mxu0 %v13804_v27  ;;  %v13972_v27 = vld [vmem:[#allocation10 + $0x6f0] ss:$24 sps:$4 sm:$0xff]  }
 0x430   : > { %4933 = vmatprep.subr.bf16.mxu0 %v13809_v14  ;;  %v13864_v14 = vld [vmem:[#allocation10 + $0x128] ss:$24 sps:$4 sm:$0xff]  }
 0x433   : > { %4934 = vmatpush1.bf16.msra.mxu0 %v13807_v15  ;;  %v13980_v15 = vld [vmem:[#allocation10 + $0x724] ss:$24 sps:$4 sm:$0xff]  }
 0x434   : > { %4935 = vmatprep.subr.bf16.mxu0 %v13812_v16  ;;  %v13869_v16 = vld [vmem:[#allocation10 + $0x15c] ss:$24 sps:$4 sm:$0xff]  }
 0x437   : > { %4936 = vmatpush1.bf16.msra.mxu0 %v13810_v11  ;;  %v13978_v11 = vld [vmem:[#allocation10 + $0x720] ss:$24 sps:$4 sm:$0xff]  }
 0x438   : > { %4937 = vmatprep.subr.bf16.mxu0 %v13815_v58  ;;  %v13867_v58 = vld [vmem:[#allocation10 + $0x158] ss:$24 sps:$4 sm:$0xff]  }
 0x43b   : > { %4938 = vmatpush1.bf16.msra.mxu0 %v13813_v61  ;;  %v13986_v61 = vld [vmem:[#allocation10 + $0x754] ss:$24 sps:$4 sm:$0xff]  }
 0x43c   : > { %4939 = vmatprep.subr.bf16.mxu0 %v13818_v17  ;;  %v13872_v17 = vld [vmem:[#allocation10 + $0x18c] ss:$24 sps:$4 sm:$0xff]  }
 0x43f   : > { %4940 = vmatpush1.bf16.msra.mxu0 %v13816_v4  ;;  %v13984_v4 = vld [vmem:[#allocation10 + $0x750] ss:$24 sps:$4 sm:$0xff]  }
 0x440   : > { %4941 = vmatprep.subr.bf16.mxu0 %v13821_v18  ;;  %v13870_v18 = vld [vmem:[#allocation10 + $0x188] ss:$24 sps:$4 sm:$0xff]  }
 0x443   : > { %4942 = vmatpush1.bf16.msra.mxu0 %v13819_v38  ;;  %v13992_v38 = vld [vmem:[#allocation10 + $0x784] ss:$24 sps:$4 sm:$0xff]  }
 0x444   : > { %4943 = vmatprep.subr.bf16.mxu0 %v13824_v49  ;;  %v13875_v49 = vld [vmem:[#allocation10 + $0x1bc] ss:$24 sps:$4 sm:$0xff]  }
 0x447   : > { %4944 = vmatpush1.bf16.msra.mxu0 %v13822_v19  ;;  %v13990_v19 = vld [vmem:[#allocation10 + $0x780] ss:$24 sps:$4 sm:$0xff]  }
 0x448   : > { %4945 = vmatprep.subr.bf16.mxu0 %v13827_v21  ;;  %v13873_v21 = vld [vmem:[#allocation10 + $0x1b8] ss:$24 sps:$4 sm:$0xff]  }
 0x44b   : > { %4946 = vmatpush1.bf16.msra.mxu0 %v13825_v22  ;;  %v13998_v22 = vld [vmem:[#allocation10 + $0x7b4] ss:$24 sps:$4 sm:$0xff]  }
 0x44c   : > { %4947 = vmatprep.subr.bf16.mxu0 %v13830_v23  ;;  %v13878_v23 = vld [vmem:[#allocation10 + $0x1ec] ss:$24 sps:$4 sm:$0xff]  }
 0x44f   : > { %4948 = vmatpush1.bf16.msra.mxu0 %v13828_v24  ;;  %v13996_v24 = vld [vmem:[#allocation10 + $0x7b0] ss:$24 sps:$4 sm:$0xff]  }
 0x450   : > { %4949 = vmatprep.subr.bf16.mxu0 %v13833_v25  ;;  %v13876_v25 = vld [vmem:[#allocation10 + $0x1e8] ss:$24 sps:$4 sm:$0xff]  }
 0x453   : > { %4950 = vmatpush1.bf16.msra.mxu0 %v13831_v51  ;;  %v14004_v51 = vld [vmem:[#allocation10 + $0x7e4] ss:$24 sps:$4 sm:$0xff]  }
 0x454   : > { %4951 = vmatprep.subr.bf16.mxu0 %v13836_v28  ;;  %v13881_v28 = vld [vmem:[#allocation10 + $0x21c] ss:$24 sps:$4 sm:$0xff]  }
 0x457   : > { %4952 = vmatpush1.bf16.msra.mxu0 %v13834_v30  ;;  %v14002_v30 = vld [vmem:[#allocation10 + $0x7e0] ss:$24 sps:$4 sm:$0xff]  }
 0x458   : > { %4953 = vmatprep.subr.bf16.mxu0 %v13839_v31  ;;  %v13879_v31 = vld [vmem:[#allocation10 + $0x218] ss:$24 sps:$4 sm:$0xff]  }
 0x45b   : > { %4954 = vmatpush1.bf16.msra.mxu0 %v13837_v35  ;;  %v14010_v35 = vld [vmem:[#allocation10 + $0x814] ss:$24 sps:$4 sm:$0xff]  }
 0x45c   : > { %4955 = vmatprep.subr.bf16.mxu0 %v13842_v43  ;;  %v13884_v43 = vld [vmem:[#allocation10 + $0x24c] ss:$24 sps:$4 sm:$0xff]  }
 0x45f   : > { %4956 = vmatpush1.bf16.msra.mxu0 %v13840_v44  ;;  %v14008_v44 = vld [vmem:[#allocation10 + $0x810] ss:$24 sps:$4 sm:$0xff]  }
 0x460   : > { %4957 = vmatprep.subr.bf16.mxu0 %v13845_v45  ;;  %v13882_v45 = vld [vmem:[#allocation10 + $0x248] ss:$24 sps:$4 sm:$0xff]  }
 0x463   : > { %4958 = vmatpush1.bf16.msra.mxu0 %v13843_v48  ;;  %v13887_v48 = vld [vmem:[#allocation10 + $0x27c] ss:$24 sps:$4 sm:$0xff]  }
 0x464   : > { %8740 = vmatprep.subr.bf16.mxu0 %v13848_v50  ;;  %v13885_v50 = vld [vmem:[#allocation10 + $0x278] ss:$24 sps:$4 sm:$0xff]  }
 0x466   : > { %4960 = vmatmul.mubr.bf16.vlgmr.msra.gmra.mrb[4].mxu0 %v15926_v12  ;;  %v13954_v12 = vld [vmem:[#allocation10 + $0x660] ss:$24 sps:$4 sm:$0xff]  }
 0x467   : > { %8741 = vmatpush1.bf16.msra.mxu0 %v13846_v52  ;;  %8772 = vmatprep.mubr.bf16.mxu0 %v15961_v36  ;;  %v13890_v52 = vld [vmem:[#allocation10 + $0x2ac] ss:$24 sps:$4 sm:$0xff]  }
 0x468   : > { %8742 = vmatprep.subr.bf16.mxu0 %v13851_v53  ;;  %8573 = vmatpush1.bf16.msra.mxu1 %v13954_v12  ;;  %v13888_v53 = vld [vmem:[#allocation10 + $0x2a8] ss:$24 sps:$4 sm:$0xff]   ;;  %v13903_v12 = vld [vmem:[#allocation10 + $0x398] ss:$24 sps:$4 sm:$0xff]  }
 0x469   : > { %8574 = vmatprep.subr.bf16.mxu1 %v13962_v2  ;;  %v13906_v2 = vld [vmem:[#allocation10 + $0x3c8] ss:$24 sps:$4 sm:$0xff]  }
 0x46b   : > { %8743 = vmatpush1.bf16.msra.mxu0 %v13849_v56  ;;  %v13896_v56 = vld [vmem:[#allocation10 + $0x30c] ss:$24 sps:$4 sm:$0xff]  }
 0x46c   : > { %8744 = vmatprep.subr.bf16.mxu0 %v13854_v59  ;;  %8575 = vmatpush1.bf16.msra.mxu1 %v13960_v5  ;;  %v13899_v59 = vld [vmem:[#allocation10 + $0x33c] ss:$24 sps:$4 sm:$0xff]   ;;  %v13909_v5 = vld [vmem:[#allocation10 + $0x3f8] ss:$24 sps:$4 sm:$0xff]  }
 0x46d   : > { %8576 = vmatprep.subr.bf16.mxu1 %v13968_v7  ;;  %v13912_v7 = vld [vmem:[#allocation10 + $0x428] ss:$24 sps:$4 sm:$0xff]  }
 0x46f   : > { %8745 = vmatpush1.bf16.msra.mxu0 %v13852_v62  ;;  %v13902_v62 = vld [vmem:[#allocation10 + $0x36c] ss:$24 sps:$4 sm:$0xff]  }
 0x470   : > { %8746 = vmatprep.subr.bf16.mxu0 %v13857_v0  ;;  %8577 = vmatpush1.bf16.msra.mxu1 %v13966_v9  ;;  %v13905_v0 = vld [vmem:[#allocation10 + $0x39c] ss:$24 sps:$4 sm:$0xff]  }
 0x471   : > { %8578 = vmatprep.subr.bf16.mxu1 %v13974_v20  ;;  %v14016_v9 = vld [vmem:[#allocation10 + $0x844] ss:$24 sps:$4 sm:$0xff]   ;;  %v14014_v20 = vld [vmem:[#allocation10 + $0x840] ss:$24 sps:$4 sm:$0xff]  }
 0x473   : > { %8747 = vmatpush1.bf16.msra.mxu0 %v13855_v1  ;;  %v13908_v1 = vld [vmem:[#allocation10 + $0x3cc] ss:$24 sps:$4 sm:$0xff]  }
 0x474   : > { %8748 = vmatprep.subr.bf16.mxu0 %v13860_v3  ;;  %8579 = vmatpush1.bf16.msra.mxu1 %v13972_v27  ;;  %v13911_v3 = vld [vmem:[#allocation10 + $0x3fc] ss:$24 sps:$4 sm:$0xff]  }
 0x475   : > { %8580 = vmatprep.subr.bf16.mxu1 %v13980_v15  ;;  %v14022_v27 = vld [vmem:[#allocation10 + $0x874] ss:$24 sps:$4 sm:$0xff]   ;;  %v14028_v15 = vld [vmem:[#allocation10 + $0x8a4] ss:$24 sps:$4 sm:$0xff]  }
 0x477   : > { %8749 = vmatpush1.bf16.msra.mxu0 %v13858_v6  ;;  %v13914_v6 = vld [vmem:[#allocation10 + $0x42c] ss:$24 sps:$4 sm:$0xff]  }
 0x478   : > { %8750 = vmatprep.subr.bf16.mxu0 %v13863_v8  ;;  %8581 = vmatpush1.bf16.msra.mxu1 %v13978_v11  ;;  %v13917_v8 = vld [vmem:[#allocation10 + $0x45c] ss:$24 sps:$4 sm:$0xff]  }
 0x479   : > { %8582 = vmatprep.subr.bf16.mxu1 %v13986_v61  ;;  %v13923_v11 = vld [vmem:[#allocation10 + $0x4bc] ss:$24 sps:$4 sm:$0xff]  }
 0x47a   : > { %v14034_v61 = vld [vmem:[#allocation10 + $0x8d4] ss:$24 sps:$4 sm:$0xff]  }
 0x47b   : > { %8751 = vmatpush1.bf16.msra.mxu0 %v13861_v10  ;;  %v13915_v10 = vld [vmem:[#allocation10 + $0x458] ss:$24 sps:$4 sm:$0xff]  }
 0x47c   : > { %8752 = vmatprep.subr.bf16.mxu0 %v13866_v13  ;;  %8583 = vmatpush1.bf16.msra.mxu1 %v13984_v4  ;;  %v13920_v13 = vld [vmem:[#allocation10 + $0x48c] ss:$24 sps:$4 sm:$0xff]  }
 0x47d   : > { %8584 = vmatprep.subr.bf16.mxu1 %v13992_v38  ;;  %v13926_v4 = vld [vmem:[#allocation10 + $0x4ec] ss:$24 sps:$4 sm:$0xff]   ;;  %v13924_v38 = vld [vmem:[#allocation10 + $0x4e8] ss:$24 sps:$4 sm:$0xff]  }
 0x47f   : > { %8753 = vmatpush1.bf16.msra.mxu0 %v13864_v14  ;;  %v14020_v14 = vld [vmem:[#allocation10 + $0x870] ss:$24 sps:$4 sm:$0xff]  }
 0x480   : > { %8754 = vmatprep.subr.bf16.mxu0 %v13869_v16  ;;  %8585 = vmatpush1.bf16.msra.mxu1 %v13990_v19  ;;  %v13918_v16 = vld [vmem:[#allocation10 + $0x488] ss:$24 sps:$4 sm:$0xff]   ;;  %v14040_v19 = vld [vmem:[#allocation10 + $0x904] ss:$24 sps:$4 sm:$0xff]  }
 0x481   : > { %8586 = vmatprep.subr.bf16.mxu1 %v13998_v22  ;;  %v13932_v22 = vld [vmem:[#allocation10 + $0x54c] ss:$24 sps:$4 sm:$0xff]  }
 0x483   : > { %8755 = vmatpush1.bf16.msra.mxu0 %v13867_v58  ;;  %v14026_v58 = vld [vmem:[#allocation10 + $0x8a0] ss:$24 sps:$4 sm:$0xff]  }
 0x484   : > { %8756 = vmatprep.subr.bf16.mxu0 %v13872_v17  ;;  %8587 = vmatpush1.bf16.msra.mxu1 %v13996_v24  ;;  %v13921_v17 = vld [vmem:[#allocation10 + $0x4b8] ss:$24 sps:$4 sm:$0xff]   ;;  %v13935_v24 = vld [vmem:[#allocation10 + $0x57c] ss:$24 sps:$4 sm:$0xff]  }
 0x485   : > { %8588 = vmatprep.subr.bf16.mxu1 %v14004_v51  ;;  %v13938_v51 = vld [vmem:[#allocation10 + $0x5ac] ss:$24 sps:$4 sm:$0xff]  }
 0x487   : > { %8757 = vmatpush1.bf16.msra.mxu0 %v13870_v18  ;;  %v14032_v18 = vld [vmem:[#allocation10 + $0x8d0] ss:$24 sps:$4 sm:$0xff]  }
 0x488   : > { %8758 = vmatprep.subr.bf16.mxu0 %v13875_v49  ;;  %8589 = vmatpush1.bf16.msra.mxu1 %v14002_v30  ;;  %v13929_v49 = vld [vmem:[#allocation10 + $0x51c] ss:$24 sps:$4 sm:$0xff]  }
 0x489   : > { %8590 = vmatprep.subr.bf16.mxu1 %v14010_v35  ;;  %v13941_v30 = vld [vmem:[#allocation10 + $0x5dc] ss:$24 sps:$4 sm:$0xff]   ;;  %v13947_v35 = vld [vmem:[#allocation10 + $0x60c] ss:$24 sps:$4 sm:$0xff]  }
 0x48b   : > { %8759 = vmatpush1.bf16.msra.mxu0 %v13873_v21  ;;  %v13927_v21 = vld [vmem:[#allocation10 + $0x518] ss:$24 sps:$4 sm:$0xff]  }
 0x48c   : > { %8760 = vmatprep.subr.bf16.mxu0 %v13878_v23  ;;  %8591 = vmatpush1.bf16.msra.mxu1 %v14008_v44  ;;  %v13930_v23 = vld [vmem:[#allocation10 + $0x548] ss:$24 sps:$4 sm:$0xff]   ;;  %v13953_v44 = vld [vmem:[#allocation10 + $0x63c] ss:$24 sps:$4 sm:$0xff]  }
 0x48d   : > { %8592 = vmatprep.subr.bf16.mxu1 %v14016_v9  ;;  %v14017_v9 = vld [vmem:[#allocation10 + $0x848] ss:$24 sps:$4 sm:$0xff]  }
 0x48f   : > { %8761 = vmatpush1.bf16.msra.mxu0 %v13876_v25  ;;  %v13933_v25 = vld [vmem:[#allocation10 + $0x578] ss:$24 sps:$4 sm:$0xff]  }
 0x490   : > { %8762 = vmatprep.subr.bf16.mxu0 %v13881_v28  ;;  %8593 = vmatpush1.bf16.msra.mxu1 %v14014_v20  ;;  %v13936_v28 = vld [vmem:[#allocation10 + $0x5a8] ss:$24 sps:$4 sm:$0xff]   ;;  %v14023_v20 = vld [vmem:[#allocation10 + $0x878] ss:$24 sps:$4 sm:$0xff]  }
 0x491   : > { %8594 = vmatprep.subr.bf16.mxu1 %v14022_v27  ;;  %v14029_v27 = vld [vmem:[#allocation10 + $0x8a8] ss:$24 sps:$4 sm:$0xff]  }
 0x493   : > { %8763 = vmatpush1.bf16.msra.mxu0 %v13879_v31  ;;  %v13939_v31 = vld [vmem:[#allocation10 + $0x5d8] ss:$24 sps:$4 sm:$0xff]  }
 0x494   : > { %8764 = vmatprep.subr.bf16.mxu0 %v13884_v43  ;;  %8595 = vmatpush1.bf16.msra.mxu1 %v14020_v14  ;;  %v13945_v43 = vld [vmem:[#allocation10 + $0x608] ss:$24 sps:$4 sm:$0xff]   ;;  %v14037_v14 = vld [vmem:[#allocation10 + $0x8dc] ss:$24 sps:$4 sm:$0xff]  }
 0x495   : > { %8596 = vmatprep.subr.bf16.mxu1 %v14028_v15  ;;  %v14035_v15 = vld [vmem:[#allocation10 + $0x8d8] ss:$24 sps:$4 sm:$0xff]  }
 0x497   : > { %8765 = vmatpush1.bf16.msra.mxu0 %v13882_v45  ;;  %v13951_v45 = vld [vmem:[#allocation10 + $0x638] ss:$24 sps:$4 sm:$0xff]  }
 0x498   : > { %8766 = vmatprep.subr.bf16.mxu0 %v13887_v48  ;;  %8597 = vmatpush1.bf16.msra.mxu1 %v14026_v58  ;;  %v13959_v48 = vld [vmem:[#allocation10 + $0x66c] ss:$24 sps:$4 sm:$0xff]   ;;  %v1308_v58 = vsub.s32 5, %v15937_v41 }
 0x499   : > { %8598 = vmatprep.subr.bf16.mxu1 %v14034_v61  ;;  %v14962_v61 = vld [vmem:[#allocation8] sm:$0x3f] }
 0x49b   : > { %8767 = vmatpush1.bf16.msra.mxu0 %v13885_v50  ;;  %v13957_v50 = vld [vmem:[#allocation10 + $0x668] ss:$24 sps:$4 sm:$0xff]  }
 0x49c   : > { %8768 = vmatprep.subr.bf16.mxu0 %v13890_v52  ;;  %8599 = vmatpush1.bf16.msra.mxu1 %v14032_v18  ;;  %v13965_v52 = vld [vmem:[#allocation10 + $0x69c] ss:$24 sps:$4 sm:$0xff]  }
 0x49d   : > { %8611 = vmatprep.subr.bf16.mxu1 %v14040_v19 }
 0x49f   : > { %8769 = vmatpush1.bf16.msra.mxu0 %v13888_v53  ;;  %v13963_v53 = vld [vmem:[#allocation10 + $0x698] ss:$24 sps:$4 sm:$0xff]  }
 0x4a0   : > { %8770 = vmatprep.subr.bf16.mxu0 %v13893_v54  ;;  %v13971_v54 = vld [vmem:[#allocation10 + $0x6cc] ss:$24 sps:$4 sm:$0xff]  }
 0x4a3   : > { %8771 = vmatpush1.bf16.msra.mxu0 %v13891_v55  ;;  %v13969_v55 = vld [vmem:[#allocation10 + $0x6c8] ss:$24 sps:$4 sm:$0xff]  }
 0x4a4   : > { %8783 = vmatprep.subr.bf16.mxu0 %v13896_v56  ;;  %v13977_v56 = vld [vmem:[#allocation10 + $0x6fc] ss:$24 sps:$4 sm:$0xff]  }
 0x4a6   : > { %8773 = vmatmul.mubr.bf16.vlgmr.msra.gmra.mrb[8].mxu0 %v15953_v26 }
 0x4a7   : > { %8784 = vmatpush1.bf16.msra.mxu0 %v13894_v57  ;;  %8815 = vmatprep.mubr.bf16.mxu0 %v15965_v40  ;;  %v13975_v57 = vld [vmem:[#allocation10 + $0x6f8] ss:$24 sps:$4 sm:$0xff]  }
 0x4a8   : > { %8785 = vmatprep.subr.bf16.mxu0 %v13899_v59  ;;  %v13983_v59 = vld [vmem:[#allocation10 + $0x72c] ss:$24 sps:$4 sm:$0xff]  }
 0x4ab   : > { %8786 = vmatpush1.bf16.msra.mxu0 %v13897_v60  ;;  %v13981_v60 = vld [vmem:[#allocation10 + $0x728] ss:$24 sps:$4 sm:$0xff]  }
 0x4ac   : > { %8787 = vmatprep.subr.bf16.mxu0 %v13902_v62  ;;  %v13989_v62 = vld [vmem:[#allocation10 + $0x75c] ss:$24 sps:$4 sm:$0xff]  }
 0x4af   : > { %8788 = vmatpush1.bf16.msra.mxu0 %v13900_v63  ;;  %v13987_v63 = vld [vmem:[#allocation10 + $0x758] ss:$24 sps:$4 sm:$0xff]  }
 0x4b0   : > { %8789 = vmatprep.subr.bf16.mxu0 %v13905_v0  ;;  %v13995_v0 = vld [vmem:[#allocation10 + $0x78c] ss:$24 sps:$4 sm:$0xff]  }
 0x4b3   : > { %8790 = vmatpush1.bf16.msra.mxu0 %v13903_v12  ;;  %v13993_v12 = vld [vmem:[#allocation10 + $0x788] ss:$24 sps:$4 sm:$0xff]  }
 0x4b4   : > { %8791 = vmatprep.subr.bf16.mxu0 %v13908_v1  ;;  %v14001_v1 = vld [vmem:[#allocation10 + $0x7bc] ss:$24 sps:$4 sm:$0xff]  }
 0x4b7   : > { %8792 = vmatpush1.bf16.msra.mxu0 %v13906_v2  ;;  %v13999_v2 = vld [vmem:[#allocation10 + $0x7b8] ss:$24 sps:$4 sm:$0xff]  }
 0x4b8   : > { %8793 = vmatprep.subr.bf16.mxu0 %v13911_v3  ;;  %v14007_v3 = vld [vmem:[#allocation10 + $0x7ec] ss:$24 sps:$4 sm:$0xff]  }
 0x4bb   : > { %8794 = vmatpush1.bf16.msra.mxu0 %v13909_v5  ;;  %v14005_v5 = vld [vmem:[#allocation10 + $0x7e8] ss:$24 sps:$4 sm:$0xff]  }
 0x4bc   : > { %8795 = vmatprep.subr.bf16.mxu0 %v13914_v6  ;;  %v14013_v6 = vld [vmem:[#allocation10 + $0x81c] ss:$24 sps:$4 sm:$0xff]  }
 0x4bf   : > { %8796 = vmatpush1.bf16.msra.mxu0 %v13912_v7  ;;  %v14011_v7 = vld [vmem:[#allocation10 + $0x818] ss:$24 sps:$4 sm:$0xff]  }
 0x4c0   : > { %8797 = vmatprep.subr.bf16.mxu0 %v13917_v8  ;;  %v14019_v8 = vld [vmem:[#allocation10 + $0x84c] ss:$24 sps:$4 sm:$0xff]  }
 0x4c3   : > { %8798 = vmatpush1.bf16.msra.mxu0 %v13915_v10  ;;  %v14025_v10 = vld [vmem:[#allocation10 + $0x87c] ss:$24 sps:$4 sm:$0xff]  }
 0x4c4   : > { %8799 = vmatprep.subr.bf16.mxu0 %v13920_v13  ;;  %v14031_v13 = vld [vmem:[#allocation10 + $0x8ac] ss:$24 sps:$4 sm:$0xff]  }
 0x4c7   : > { %8800 = vmatpush1.bf16.msra.mxu0 %v13918_v16  ;;  %v14043_v16 = vld [vmem:[#allocation10 + $0x90c] ss:$24 sps:$4 sm:$0xff]  }
 0x4c8   : > { %8801 = vmatprep.subr.bf16.mxu0 %v13923_v11  ;;  %v1304_v11 = vsub.s32 4, %v15937_v41 }
 0x4cb   : > { %8802 = vmatpush1.bf16.msra.mxu0 %v13921_v17  ;;  %v1305_v17 = vrot.slane %v14962_v61, %v1304_v11 }
 0x4cc   : > { %8803 = vmatprep.subr.bf16.mxu0 %v13926_v4  ;;  %v1309_v4 = vrot.slane %v14962_v61, %v1308_v58  ;;  %v14088_v61 = vld [vmem:[#allocation10 + $0xa84] ss:$24 sps:$4 sm:$0xff]  }
 0x4cf   : > { %8804 = vmatpush1.bf16.msra.mxu0 %v13924_v38 }
 0x4d0   : > { %8805 = vmatprep.subr.bf16.mxu0 %v13929_v49 }
 0x4d3   : > { %8806 = vmatpush1.bf16.msra.mxu0 %v13927_v21 }
 0x4d4   : > { %8807 = vmatprep.subr.bf16.mxu0 %v13932_v22 }
 0x4d7   : > { %8808 = vmatpush1.bf16.msra.mxu0 %v13930_v23 }
 0x4d8   : > { %8809 = vmatprep.subr.bf16.mxu0 %v13935_v24 }
 0x4db   : > { %8810 = vmatpush1.bf16.msra.mxu0 %v13933_v25 }
 0x4dc   : > { %8811 = vmatprep.subr.bf16.mxu0 %v13938_v51 }
 0x4df   : > { %8812 = vmatpush1.bf16.msra.mxu0 %v13936_v28 }
 0x4e0   : > { %8813 = vmatprep.subr.bf16.mxu0 %v13941_v30 }
 0x4e3   : > { %8814 = vmatpush1.bf16.msra.mxu0 %v13939_v31 }
 0x4e4   : > { %8826 = vmatprep.subr.bf16.mxu0 %v13947_v35 }
 0x4e6   : > { %8816 = vmatmul.mubr.bf16.vlgmr.msra.gmra.mrb[8].mxu0 %v15957_v33 }
 0x4e7   : > { %8827 = vmatpush1.bf16.msra.mxu0 %v13945_v43 }
 0x4e8   : > { %8828 = vmatprep.subr.bf16.mxu0 %v13953_v44  ;;  %v14038_v44 = vld [vmem:[#allocation10 + $0x900] ss:$24 sps:$4 sm:$0xff]  }
 0x4eb   : > { %8829 = vmatpush1.bf16.msra.mxu0 %v13951_v45  ;;  %v14041_v45 = vld [vmem:[#allocation10 + $0x908] ss:$24 sps:$4 sm:$0xff]  }
 0x4ec   : > { %8830 = vmatprep.subr.bf16.mxu0 %v13959_v48 }
 0x4ef   : > { %8831 = vmatpush1.bf16.msra.mxu0 %v13957_v50  ;;  %v14046_v50 = vld [vmem:[#allocation10 + $0x934] ss:$24 sps:$4 sm:$0xff]  }
 0x4f0   : > { %8832 = vmatprep.subr.bf16.mxu0 %v13965_v52  ;;  %v14049_v52 = vld [vmem:[#allocation10 + $0x93c] ss:$24 sps:$4 sm:$0xff]  }
 0x4f3   : > { %8833 = vmatpush1.bf16.msra.mxu0 %v13963_v53  ;;  %v14044_v53 = vld [vmem:[#allocation10 + $0x930] ss:$24 sps:$4 sm:$0xff]  }
 0x4f4   : > { %8834 = vmatprep.subr.bf16.mxu0 %v13971_v54  ;;  %v14047_v54 = vld [vmem:[#allocation10 + $0x938] ss:$24 sps:$4 sm:$0xff]  }
 0x4f7   : > { %8835 = vmatpush1.bf16.msra.mxu0 %v13969_v55  ;;  %v14052_v55 = vld [vmem:[#allocation10 + $0x964] ss:$24 sps:$4 sm:$0xff]  }
 0x4f8   : > { %8836 = vmatprep.subr.bf16.mxu0 %v13977_v56  ;;  %v14055_v56 = vld [vmem:[#allocation10 + $0x96c] ss:$24 sps:$4 sm:$0xff]  }
 0x4fb   : > { %8837 = vmatpush1.bf16.msra.mxu0 %v13975_v57  ;;  %v14050_v57 = vld [vmem:[#allocation10 + $0x960] ss:$24 sps:$4 sm:$0xff]  }
 0x4fc   : > { %8838 = vmatprep.subr.bf16.mxu0 %v13983_v59  ;;  %v14053_v59 = vld [vmem:[#allocation10 + $0x968] ss:$24 sps:$4 sm:$0xff]  }
 0x4ff   : > { %8839 = vmatpush1.bf16.msra.mxu0 %v13981_v60  ;;  %v14058_v60 = vld [vmem:[#allocation10 + $0x994] ss:$24 sps:$4 sm:$0xff]  }
 0x500   : > { %8840 = vmatprep.subr.bf16.mxu0 %v13989_v62  ;;  %v14061_v62 = vld [vmem:[#allocation10 + $0x99c] ss:$24 sps:$4 sm:$0xff]  }
 0x503   : > { %8841 = vmatpush1.bf16.msra.mxu0 %v13987_v63  ;;  %v14056_v63 = vld [vmem:[#allocation10 + $0x990] ss:$24 sps:$4 sm:$0xff]  }
 0x504   : > { %8842 = vmatprep.subr.bf16.mxu0 %v13995_v0  ;;  %v14059_v0 = vld [vmem:[#allocation10 + $0x998] ss:$24 sps:$4 sm:$0xff]  }
 0x507   : > { %8843 = vmatpush1.bf16.msra.mxu0 %v13993_v12  ;;  %v14064_v12 = vld [vmem:[#allocation10 + $0x9c4] ss:$24 sps:$4 sm:$0xff]  }
 0x508   : > { %8844 = vmatprep.subr.bf16.mxu0 %v14001_v1  ;;  %v14067_v1 = vld [vmem:[#allocation10 + $0x9cc] ss:$24 sps:$4 sm:$0xff]  }
 0x50b   : > { %8845 = vmatpush1.bf16.msra.mxu0 %v13999_v2  ;;  %v14062_v2 = vld [vmem:[#allocation10 + $0x9c0] ss:$24 sps:$4 sm:$0xff]  }
 0x50c   : > { %8846 = vmatprep.subr.bf16.mxu0 %v14007_v3  ;;  %v14065_v3 = vld [vmem:[#allocation10 + $0x9c8] ss:$24 sps:$4 sm:$0xff]  }
 0x50f   : > { %8847 = vmatpush1.bf16.msra.mxu0 %v14005_v5  ;;  %v14070_v5 = vld [vmem:[#allocation10 + $0x9f4] ss:$24 sps:$4 sm:$0xff]  }
 0x510   : > { %8848 = vmatprep.subr.bf16.mxu0 %v14013_v6  ;;  %v14073_v6 = vld [vmem:[#allocation10 + $0x9fc] ss:$24 sps:$4 sm:$0xff]  }
 0x513   : > { %8849 = vmatpush1.bf16.msra.mxu0 %v14011_v7  ;;  %v14068_v7 = vld [vmem:[#allocation10 + $0x9f0] ss:$24 sps:$4 sm:$0xff]  }
 0x514   : > { %8850 = vmatprep.subr.bf16.mxu0 %v14019_v8  ;;  %v14071_v8 = vld [vmem:[#allocation10 + $0x9f8] ss:$24 sps:$4 sm:$0xff]  }
 0x517   : > { %8851 = vmatpush1.bf16.msra.mxu0 %v14017_v9  ;;  %v14076_v9 = vld [vmem:[#allocation10 + $0xa24] ss:$24 sps:$4 sm:$0xff]  }
 0x518   : > { %8852 = vmatprep.subr.bf16.mxu0 %v14025_v10  ;;  %v14079_v10 = vld [vmem:[#allocation10 + $0xa2c] ss:$24 sps:$4 sm:$0xff]  }
 0x51b   : > { %8853 = vmatpush1.bf16.msra.mxu0 %v14023_v20  ;;  %v14074_v20 = vld [vmem:[#allocation10 + $0xa20] ss:$24 sps:$4 sm:$0xff]  }
 0x51c   : > { %8854 = vmatprep.subr.bf16.mxu0 %v14031_v13  ;;  %v14077_v13 = vld [vmem:[#allocation10 + $0xa28] ss:$24 sps:$4 sm:$0xff]  }
 0x51f   : > { %8855 = vmatpush1.bf16.msra.mxu0 %v14029_v27  ;;  %v14082_v27 = vld [vmem:[#allocation10 + $0xa54] ss:$24 sps:$4 sm:$0xff]  }
 0x520   : > { %8856 = vmatprep.subr.bf16.mxu0 %v14037_v14  ;;  %v14085_v14 = vld [vmem:[#allocation10 + $0xa5c] ss:$24 sps:$4 sm:$0xff]  }
 0x523   : > { %8857 = vmatpush1.bf16.msra.mxu0 %v14035_v15  ;;  %v14080_v15 = vld [vmem:[#allocation10 + $0xa50] ss:$24 sps:$4 sm:$0xff]  }
 0x524   : > { %8869 = vmatprep.subr.bf16.mxu0 %v14043_v16  ;;  %v14083_v16 = vld [vmem:[#allocation10 + $0xa58] ss:$24 sps:$4 sm:$0xff]  }
 0x539   : > { %v4961_v18 = vpop.f32.mrb[4].mxu0 }
 0x53a   : > { %v12593_v38 = vadd.f32 %v4961_v18, %v1305_v17  ;;  %v4963_v49 = vpop.f32.mrb[5].mxu0  ;;  %v14089_v18 = vld [vmem:[#allocation10 + $0xa88] ss:$24 sps:$4 sm:$0xff]  }
 0x53b   : > { %v12594_v19 = vadd.f32 %v4963_v49, %v1309_v4  ;;  %v4965_v21 = vpop.f32.mrb[6].mxu0  ;;  %v14097_v49 = vld [vmem:[#allocation10 + $0xabc] ss:$24 sps:$4 sm:$0xff]  }
 0x53c   : > { %14918 = vtanh.f32 %v12593_v38  ;;  %v12595_v22 = vadd.f32 %v4965_v21, %v1305_v17  ;;  %v4967_v23 = vpop.f32.mrb[7].mxu0  ;;  %v14091_v17 = vld [vmem:[#allocation10 + $0xa8c] ss:$24 sps:$4 sm:$0xff]   ;;  %v14095_v21 = vld [vmem:[#allocation10 + $0xab8] ss:$24 sps:$4 sm:$0xff]  }
 0x53d   : > { %14920 = vtanh.f32 %v12594_v19  ;;  %v12596_v24 = vadd.f32 %v4967_v23, %v1309_v4  ;;  %v14086_v4 = vld [vmem:[#allocation10 + $0xa80] ss:$24 sps:$4 sm:$0xff]   ;;  %v14094_v38 = vld [vmem:[#allocation10 + $0xab4] ss:$24 sps:$4 sm:$0xff]   ;;  %v14092_v19 = vld [vmem:[#allocation10 + $0xab0] ss:$24 sps:$4 sm:$0xff]  }
 0x53e   : > { %14922 = vtanh.f32 %v12595_v22  ;;  %v14100_v22 = vld [vmem:[#allocation10 + $0xae4] ss:$24 sps:$4 sm:$0xff]  }
 0x53f   : > { %14924 = vtanh.f32 %v12596_v24  ;;  %v14103_v23 = vld [vmem:[#allocation10 + $0xaec] ss:$24 sps:$4 sm:$0xff]   ;;  %v14098_v24 = vld [vmem:[#allocation10 + $0xae0] ss:$24 sps:$4 sm:$0xff]  }
 0x546   : > { %v14919_v25 = vpop.eup %14918 }
 0x547   : > { %v14921_v51 = vpop.eup %14920 }
 0x548   : > { %v14923_v28 = vpop.eup %14922 }
 0x549   : > { %v14925_v30 = vpop.eup %14924  ;;  %v15988_v31 = vpack.c.bf16 %v14923_v28, %v14919_v25  ;;  %v15990_v35 = vpack.c.bf16 %v14919_v25, %v14923_v28  ;;  %v14101_v25 = vld [vmem:[#allocation10 + $0xae8] ss:$24 sps:$4 sm:$0xff]   ;;  %v14109_v28 = vld [vmem:[#allocation10 + $0xb1c] ss:$24 sps:$4 sm:$0xff]  }
 0x54a   : > { %v15992_v43 = vpack.c.bf16 %v14925_v30, %v14921_v51  ;;  %v15994_v48 = vpack.c.bf16 %v14921_v51, %v14925_v30  ;;  %v14106_v51 = vld [vmem:[#allocation10 + $0xb14] ss:$24 sps:$4 sm:$0xff]   ;;  %v14104_v30 = vld [vmem:[#allocation10 + $0xb10] ss:$24 sps:$4 sm:$0xff]  }
 0x54c   : > { %8600 = vmatprep.mubr.bf16.mxu1 %v15992_v43  ;;  %8858 = vmatprep.mubr.bf16.mxu0 %v15992_v43 }
 0x54d   : > { %8601 = vmatmul.mubr.bf16.vlgmr.msra.gmra.mrb[4].mxu1 %v15988_v31  ;;  %8859 = vmatmul.mubr.bf16.vlgmr.msra.gmra.mrb[8].mxu0 %v15988_v31 }
 0x54e   : > { %8612 = vmatpush1.bf16.msra.mxu1 %v14038_v44  ;;  %8870 = vmatpush1.bf16.msra.mxu0 %v14041_v45  ;;  %v14107_v44 = vld [vmem:[#allocation10 + $0xb18] ss:$24 sps:$4 sm:$0xff]   ;;  %v14112_v45 = vld [vmem:[#allocation10 + $0xb44] ss:$24 sps:$4 sm:$0xff]  }
 0x54f   : > { %8643 = vmatprep.mubr.bf16.mxu1 %v15963_v39  ;;  %8901 = vmatprep.mubr.bf16.mxu0 %v15963_v39 }
 0x550   : > { %8613 = vmatprep.subr.bf16.mxu1 %v14046_v50  ;;  %8871 = vmatprep.subr.bf16.mxu0 %v14049_v52  ;;  %v14115_v50 = vld [vmem:[#allocation10 + $0xb4c] ss:$24 sps:$4 sm:$0xff]   ;;  %v14110_v52 = vld [vmem:[#allocation10 + $0xb40] ss:$24 sps:$4 sm:$0xff]  }
 0x552   : > { %8614 = vmatpush1.bf16.msra.mxu1 %v14044_v53  ;;  %8872 = vmatpush1.bf16.msra.mxu0 %v14047_v54  ;;  %v14113_v53 = vld [vmem:[#allocation10 + $0xb48] ss:$24 sps:$4 sm:$0xff]   ;;  %v14118_v54 = vld [vmem:[#allocation10 + $0xb74] ss:$24 sps:$4 sm:$0xff]  }
 0x553   : > { %8615 = vmatprep.subr.bf16.mxu1 %v14052_v55  ;;  %8873 = vmatprep.subr.bf16.mxu0 %v14055_v56  ;;  %v14121_v55 = vld [vmem:[#allocation10 + $0xb7c] ss:$24 sps:$4 sm:$0xff]   ;;  %v14116_v56 = vld [vmem:[#allocation10 + $0xb70] ss:$24 sps:$4 sm:$0xff]  }
 0x556   : > { %8616 = vmatpush1.bf16.msra.mxu1 %v14050_v57  ;;  %8874 = vmatpush1.bf16.msra.mxu0 %v14053_v59  ;;  %v14119_v57 = vld [vmem:[#allocation10 + $0xb78] ss:$24 sps:$4 sm:$0xff]   ;;  %v14124_v59 = vld [vmem:[#allocation10 + $0xba4] ss:$24 sps:$4 sm:$0xff]  }
 0x557   : > { %8617 = vmatprep.subr.bf16.mxu1 %v14058_v60  ;;  %8875 = vmatprep.subr.bf16.mxu0 %v14061_v62  ;;  %v14127_v60 = vld [vmem:[#allocation10 + $0xbac] ss:$24 sps:$4 sm:$0xff]   ;;  %v14122_v62 = vld [vmem:[#allocation10 + $0xba0] ss:$24 sps:$4 sm:$0xff]  }
 0x55a   : > { %8618 = vmatpush1.bf16.msra.mxu1 %v14056_v63  ;;  %8876 = vmatpush1.bf16.msra.mxu0 %v14059_v0  ;;  %v14125_v63 = vld [vmem:[#allocation10 + $0xba8] ss:$24 sps:$4 sm:$0xff]   ;;  %v14130_v0 = vld [vmem:[#allocation10 + $0xbd4] ss:$24 sps:$4 sm:$0xff]  }
 0x55b   : > { %8619 = vmatprep.subr.bf16.mxu1 %v14064_v12  ;;  %8877 = vmatprep.subr.bf16.mxu0 %v14067_v1  ;;  %v14133_v12 = vld [vmem:[#allocation10 + $0xbdc] ss:$24 sps:$4 sm:$0xff]   ;;  %v14128_v1 = vld [vmem:[#allocation10 + $0xbd0] ss:$24 sps:$4 sm:$0xff]  }
 0x55e   : > { %8620 = vmatpush1.bf16.msra.mxu1 %v14062_v2  ;;  %8878 = vmatpush1.bf16.msra.mxu0 %v14065_v3  ;;  %v14131_v2 = vld [vmem:[#allocation10 + $0xbd8] ss:$24 sps:$4 sm:$0xff]   ;;  %v14136_v3 = vld [vmem:[#allocation10 + $0xc04] ss:$24 sps:$4 sm:$0xff]  }
 0x55f   : > { %8621 = vmatprep.subr.bf16.mxu1 %v14070_v5  ;;  %8879 = vmatprep.subr.bf16.mxu0 %v14073_v6  ;;  %v14139_v5 = vld [vmem:[#allocation10 + $0xc0c] ss:$24 sps:$4 sm:$0xff]   ;;  %v14134_v6 = vld [vmem:[#allocation10 + $0xc00] ss:$24 sps:$4 sm:$0xff]  }
 0x562   : > { %8622 = vmatpush1.bf16.msra.mxu1 %v14068_v7  ;;  %8880 = vmatpush1.bf16.msra.mxu0 %v14071_v8  ;;  %v14137_v7 = vld [vmem:[#allocation10 + $0xc08] ss:$24 sps:$4 sm:$0xff]   ;;  %v14142_v8 = vld [vmem:[#allocation10 + $0xc34] ss:$24 sps:$4 sm:$0xff]  }
 0x563   : > { %8623 = vmatprep.subr.bf16.mxu1 %v14076_v9  ;;  %8881 = vmatprep.subr.bf16.mxu0 %v14079_v10  ;;  %v14145_v9 = vld [vmem:[#allocation10 + $0xc3c] ss:$24 sps:$4 sm:$0xff]   ;;  %v14140_v10 = vld [vmem:[#allocation10 + $0xc30] ss:$24 sps:$4 sm:$0xff]  }
 0x566   : > { %8624 = vmatpush1.bf16.msra.mxu1 %v14074_v20  ;;  %8882 = vmatpush1.bf16.msra.mxu0 %v14077_v13  ;;  %v14143_v20 = vld [vmem:[#allocation10 + $0xc38] ss:$24 sps:$4 sm:$0xff]   ;;  %v14148_v13 = vld [vmem:[#allocation10 + $0xc64] ss:$24 sps:$4 sm:$0xff]  }
 0x567   : > { %8625 = vmatprep.subr.bf16.mxu1 %v14082_v27  ;;  %8883 = vmatprep.subr.bf16.mxu0 %v14085_v14  ;;  %v14151_v27 = vld [vmem:[#allocation10 + $0xc6c] ss:$24 sps:$4 sm:$0xff]   ;;  %v14146_v14 = vld [vmem:[#allocation10 + $0xc60] ss:$24 sps:$4 sm:$0xff]  }
 0x56a   : > { %8626 = vmatpush1.bf16.msra.mxu1 %v14080_v15  ;;  %8884 = vmatpush1.bf16.msra.mxu0 %v14083_v16  ;;  %v14149_v15 = vld [vmem:[#allocation10 + $0xc68] ss:$24 sps:$4 sm:$0xff]   ;;  %v14154_v16 = vld [vmem:[#allocation10 + $0xc94] ss:$24 sps:$4 sm:$0xff]  }
 0x56b   : > { %8627 = vmatprep.subr.bf16.mxu1 %v14088_v61  ;;  %8885 = vmatprep.subr.bf16.mxu0 %v14091_v17  ;;  %v14157_v61 = vld [vmem:[#allocation10 + $0xc9c] ss:$24 sps:$4 sm:$0xff]   ;;  %v14152_v17 = vld [vmem:[#allocation10 + $0xc90] ss:$24 sps:$4 sm:$0xff]  }
 0x56e   : > { %8628 = vmatpush1.bf16.msra.mxu1 %v14086_v4  ;;  %8886 = vmatpush1.bf16.msra.mxu0 %v14089_v18  ;;  %v14155_v4 = vld [vmem:[#allocation10 + $0xc98] ss:$24 sps:$4 sm:$0xff]   ;;  %v14160_v18 = vld [vmem:[#allocation10 + $0xcc4] ss:$24 sps:$4 sm:$0xff]  }
 0x56f   : > { %8629 = vmatprep.subr.bf16.mxu1 %v14094_v38  ;;  %8887 = vmatprep.subr.bf16.mxu0 %v14097_v49  ;;  %v14163_v38 = vld [vmem:[#allocation10 + $0xccc] ss:$24 sps:$4 sm:$0xff]   ;;  %v14158_v49 = vld [vmem:[#allocation10 + $0xcc0] ss:$24 sps:$4 sm:$0xff]  }
 0x572   : > { %8630 = vmatpush1.bf16.msra.mxu1 %v14092_v19  ;;  %8888 = vmatpush1.bf16.msra.mxu0 %v14095_v21  ;;  %v14161_v19 = vld [vmem:[#allocation10 + $0xcc8] ss:$24 sps:$4 sm:$0xff]   ;;  %v14166_v21 = vld [vmem:[#allocation10 + $0xcf4] ss:$24 sps:$4 sm:$0xff]  }
 0x573   : > { %8631 = vmatprep.subr.bf16.mxu1 %v14100_v22  ;;  %8889 = vmatprep.subr.bf16.mxu0 %v14103_v23  ;;  %v14169_v22 = vld [vmem:[#allocation10 + $0xcfc] ss:$24 sps:$4 sm:$0xff]   ;;  %v14164_v23 = vld [vmem:[#allocation10 + $0xcf0] ss:$24 sps:$4 sm:$0xff]  }
 0x576   : > { %8632 = vmatpush1.bf16.msra.mxu1 %v14098_v24  ;;  %8890 = vmatpush1.bf16.msra.mxu0 %v14101_v25  ;;  %v14167_v24 = vld [vmem:[#allocation10 + $0xcf8] ss:$24 sps:$4 sm:$0xff]   ;;  %v14172_v25 = vld [vmem:[#allocation10 + $0xd24] ss:$24 sps:$4 sm:$0xff]  }
 0x577   : > { %8633 = vmatprep.subr.bf16.mxu1 %v14106_v51  ;;  %8891 = vmatprep.subr.bf16.mxu0 %v14109_v28  ;;  %v14175_v51 = vld [vmem:[#allocation10 + $0xd2c] ss:$24 sps:$4 sm:$0xff]   ;;  %v14170_v28 = vld [vmem:[#allocation10 + $0xd20] ss:$24 sps:$4 sm:$0xff]  }
 0x57a   : > { %8634 = vmatpush1.bf16.msra.mxu1 %v14104_v30  ;;  %8892 = vmatpush1.bf16.msra.mxu0 %v14107_v44  ;;  %v14173_v30 = vld [vmem:[#allocation10 + $0xd28] ss:$24 sps:$4 sm:$0xff]   ;;  %v14178_v44 = vld [vmem:[#allocation10 + $0xd54] ss:$24 sps:$4 sm:$0xff]  }
 0x57b   : > { %8635 = vmatprep.subr.bf16.mxu1 %v14112_v45  ;;  %8893 = vmatprep.subr.bf16.mxu0 %v14115_v50  ;;  %v14181_v45 = vld [vmem:[#allocation10 + $0xd5c] ss:$24 sps:$4 sm:$0xff]   ;;  %v14176_v50 = vld [vmem:[#allocation10 + $0xd50] ss:$24 sps:$4 sm:$0xff]  }
 0x57e   : > { %8636 = vmatpush1.bf16.msra.mxu1 %v14110_v52  ;;  %8894 = vmatpush1.bf16.msra.mxu0 %v14113_v53  ;;  %v14179_v52 = vld [vmem:[#allocation10 + $0xd58] ss:$24 sps:$4 sm:$0xff]   ;;  %v14184_v53 = vld [vmem:[#allocation10 + $0xd84] ss:$24 sps:$4 sm:$0xff]  }
 0x57f   : > { %8637 = vmatprep.subr.bf16.mxu1 %v14118_v54  ;;  %8895 = vmatprep.subr.bf16.mxu0 %v14121_v55  ;;  %v14187_v54 = vld [vmem:[#allocation10 + $0xd8c] ss:$24 sps:$4 sm:$0xff]   ;;  %v14182_v55 = vld [vmem:[#allocation10 + $0xd80] ss:$24 sps:$4 sm:$0xff]  }
 0x582   : > { %8638 = vmatpush1.bf16.msra.mxu1 %v14116_v56  ;;  %8896 = vmatpush1.bf16.msra.mxu0 %v14119_v57  ;;  %v14185_v56 = vld [vmem:[#allocation10 + $0xd88] ss:$24 sps:$4 sm:$0xff]   ;;  %v14190_v57 = vld [vmem:[#allocation10 + $0xdb4] ss:$24 sps:$4 sm:$0xff]  }
 0x583   : > { %8639 = vmatprep.subr.bf16.mxu1 %v14124_v59  ;;  %8897 = vmatprep.subr.bf16.mxu0 %v14127_v60  ;;  %v14193_v59 = vld [vmem:[#allocation10 + $0xdbc] ss:$24 sps:$4 sm:$0xff]   ;;  %v14188_v60 = vld [vmem:[#allocation10 + $0xdb0] ss:$24 sps:$4 sm:$0xff]  }
 0x586   : > { %8640 = vmatpush1.bf16.msra.mxu1 %v14122_v62  ;;  %8898 = vmatpush1.bf16.msra.mxu0 %v14125_v63  ;;  %v14191_v62 = vld [vmem:[#allocation10 + $0xdb8] ss:$24 sps:$4 sm:$0xff]   ;;  %v14196_v63 = vld [vmem:[#allocation10 + $0xde4] ss:$24 sps:$4 sm:$0xff]  }
 0x587   : > { %8641 = vmatprep.subr.bf16.mxu1 %v14130_v0  ;;  %8899 = vmatprep.subr.bf16.mxu0 %v14133_v12  ;;  %v14199_v0 = vld [vmem:[#allocation10 + $0xdec] ss:$24 sps:$4 sm:$0xff]   ;;  %v14194_v12 = vld [vmem:[#allocation10 + $0xde0] ss:$24 sps:$4 sm:$0xff]  }
 0x58a   : > { %8642 = vmatpush1.bf16.msra.mxu1 %v14128_v1  ;;  %8900 = vmatpush1.bf16.msra.mxu0 %v14131_v2  ;;  %v14197_v1 = vld [vmem:[#allocation10 + $0xde8] ss:$24 sps:$4 sm:$0xff]   ;;  %v14202_v2 = vld [vmem:[#allocation10 + $0xe14] ss:$24 sps:$4 sm:$0xff]  }
 0x58b   : > { %8654 = vmatprep.subr.bf16.mxu1 %v14136_v3  ;;  %8912 = vmatprep.subr.bf16.mxu0 %v14139_v5  ;;  %v14205_v3 = vld [vmem:[#allocation10 + $0xe1c] ss:$24 sps:$4 sm:$0xff]   ;;  %v14200_v5 = vld [vmem:[#allocation10 + $0xe10] ss:$24 sps:$4 sm:$0xff]  }
 0x58d   : > { %8644 = vmatmul.mubr.bf16.vlgmr.msra.gmra.mrb[4].mxu1 %v15955_v29  ;;  %8902 = vmatmul.mubr.bf16.vlgmr.msra.gmra.mrb[8].mxu0 %v15955_v29 }
 0x58e   : > { %8655 = vmatpush1.bf16.msra.mxu1 %v14134_v6  ;;  %8686 = vmatprep.mubr.bf16.mxu1 %v15967_v42  ;;  %v14203_v6 = vld [vmem:[#allocation10 + $0xe18] ss:$24 sps:$4 sm:$0xff]  }
 0x58f   : > { %8913 = vmatpush1.bf16.msra.mxu0 %v14137_v7  ;;  %8944 = vmatprep.mubr.bf16.mxu0 %v15967_v42  ;;  %v14208_v7 = vld [vmem:[#allocation10 + $0xe44] ss:$24 sps:$4 sm:$0xff]  }
 0x590   : > { %8656 = vmatprep.subr.bf16.mxu1 %v14142_v8  ;;  %8914 = vmatprep.subr.bf16.mxu0 %v14145_v9  ;;  %v14211_v8 = vld [vmem:[#allocation10 + $0xe4c] ss:$24 sps:$4 sm:$0xff]   ;;  %v14206_v9 = vld [vmem:[#allocation10 + $0xe40] ss:$24 sps:$4 sm:$0xff]  }
 0x592   : > { %8657 = vmatpush1.bf16.msra.mxu1 %v14140_v10  ;;  %v14209_v10 = vld [vmem:[#allocation10 + $0xe48] ss:$24 sps:$4 sm:$0xff]  }
 0x593   : > { %8915 = vmatpush1.bf16.msra.mxu0 %v14143_v20  ;;  %8658 = vmatprep.subr.bf16.mxu1 %v14148_v13  ;;  %v14214_v20 = vld [vmem:[#allocation10 + $0xe74] ss:$24 sps:$4 sm:$0xff]  }
 0x594   : > { %8916 = vmatprep.subr.bf16.mxu0 %v14151_v27  ;;  %v14217_v13 = vld [vmem:[#allocation10 + $0xe7c] ss:$24 sps:$4 sm:$0xff]   ;;  %v14212_v27 = vld [vmem:[#allocation10 + $0xe70] ss:$24 sps:$4 sm:$0xff]  }
 0x596   : > { %8659 = vmatpush1.bf16.msra.mxu1 %v14146_v14  ;;  %v14215_v14 = vld [vmem:[#allocation10 + $0xe78] ss:$24 sps:$4 sm:$0xff]  }
 0x597   : > { %8917 = vmatpush1.bf16.msra.mxu0 %v14149_v15  ;;  %8660 = vmatprep.subr.bf16.mxu1 %v14154_v16  ;;  %v14220_v15 = vld [vmem:[#allocation10 + $0xea4] ss:$24 sps:$4 sm:$0xff]  }
 0x598   : > { %8918 = vmatprep.subr.bf16.mxu0 %v14157_v61  ;;  %v14223_v16 = vld [vmem:[#allocation10 + $0xeac] ss:$24 sps:$4 sm:$0xff]   ;;  %v14218_v61 = vld [vmem:[#allocation10 + $0xea0] ss:$24 sps:$4 sm:$0xff]  }
 0x59a   : > { %8661 = vmatpush1.bf16.msra.mxu1 %v14152_v17  ;;  %v14221_v17 = vld [vmem:[#allocation10 + $0xea8] ss:$24 sps:$4 sm:$0xff]  }
 0x59b   : > { %8919 = vmatpush1.bf16.msra.mxu0 %v14155_v4  ;;  %8662 = vmatprep.subr.bf16.mxu1 %v14160_v18  ;;  %v14226_v4 = vld [vmem:[#allocation10 + $0xed4] ss:$24 sps:$4 sm:$0xff]  }
 0x59c   : > { %8920 = vmatprep.subr.bf16.mxu0 %v14163_v38  ;;  %v14229_v18 = vld [vmem:[#allocation10 + $0xedc] ss:$24 sps:$4 sm:$0xff]   ;;  %v14224_v38 = vld [vmem:[#allocation10 + $0xed0] ss:$24 sps:$4 sm:$0xff]  }
 0x59e   : > { %8663 = vmatpush1.bf16.msra.mxu1 %v14158_v49  ;;  %v14227_v49 = vld [vmem:[#allocation10 + $0xed8] ss:$24 sps:$4 sm:$0xff]  }
 0x59f   : > { %8921 = vmatpush1.bf16.msra.mxu0 %v14161_v19  ;;  %8664 = vmatprep.subr.bf16.mxu1 %v14166_v21  ;;  %v14232_v19 = vld [vmem:[#allocation10 + $0xf04] ss:$24 sps:$4 sm:$0xff]  }
 0x5a0   : > { %8922 = vmatprep.subr.bf16.mxu0 %v14169_v22  ;;  %v14235_v21 = vld [vmem:[#allocation10 + $0xf0c] ss:$24 sps:$4 sm:$0xff]   ;;  %v14230_v22 = vld [vmem:[#allocation10 + $0xf00] ss:$24 sps:$4 sm:$0xff]  }
 0x5a2   : > { %8665 = vmatpush1.bf16.msra.mxu1 %v14164_v23  ;;  %v14233_v23 = vld [vmem:[#allocation10 + $0xf08] ss:$24 sps:$4 sm:$0xff]  }
 0x5a3   : > { %8923 = vmatpush1.bf16.msra.mxu0 %v14167_v24  ;;  %8666 = vmatprep.subr.bf16.mxu1 %v14172_v25  ;;  %v14238_v24 = vld [vmem:[#allocation10 + $0xf34] ss:$24 sps:$4 sm:$0xff]  }
 0x5a4   : > { %8924 = vmatprep.subr.bf16.mxu0 %v14175_v51  ;;  %v14241_v25 = vld [vmem:[#allocation10 + $0xf3c] ss:$24 sps:$4 sm:$0xff]   ;;  %v14236_v51 = vld [vmem:[#allocation10 + $0xf30] ss:$24 sps:$4 sm:$0xff]  }
 0x5a6   : > { %8667 = vmatpush1.bf16.msra.mxu1 %v14170_v28  ;;  %v14239_v28 = vld [vmem:[#allocation10 + $0xf38] ss:$24 sps:$4 sm:$0xff]  }
 0x5a7   : > { %8925 = vmatpush1.bf16.msra.mxu0 %v14173_v30  ;;  %8668 = vmatprep.subr.bf16.mxu1 %v14178_v44  ;;  %v14244_v30 = vld [vmem:[#allocation10 + $0xf64] ss:$24 sps:$4 sm:$0xff]  }
 0x5a8   : > { %8926 = vmatprep.subr.bf16.mxu0 %v14181_v45  ;;  %v14247_v44 = vld [vmem:[#allocation10 + $0xf6c] ss:$24 sps:$4 sm:$0xff]   ;;  %v14242_v45 = vld [vmem:[#allocation10 + $0xf60] ss:$24 sps:$4 sm:$0xff]  }
 0x5aa   : > { %8669 = vmatpush1.bf16.msra.mxu1 %v14176_v50  ;;  %v14245_v50 = vld [vmem:[#allocation10 + $0xf68] ss:$24 sps:$4 sm:$0xff]  }
 0x5ab   : > { %8927 = vmatpush1.bf16.msra.mxu0 %v14179_v52  ;;  %8670 = vmatprep.subr.bf16.mxu1 %v14184_v53  ;;  %v14250_v52 = vld [vmem:[#allocation10 + $0xf94] ss:$24 sps:$4 sm:$0xff]  }
 0x5ac   : > { %8928 = vmatprep.subr.bf16.mxu0 %v14187_v54  ;;  %v14253_v53 = vld [vmem:[#allocation10 + $0xf9c] ss:$24 sps:$4 sm:$0xff]   ;;  %v14248_v54 = vld [vmem:[#allocation10 + $0xf90] ss:$24 sps:$4 sm:$0xff]  }
 0x5ae   : > { %8671 = vmatpush1.bf16.msra.mxu1 %v14182_v55  ;;  %v14251_v55 = vld [vmem:[#allocation10 + $0xf98] ss:$24 sps:$4 sm:$0xff]  }
 0x5af   : > { %8929 = vmatpush1.bf16.msra.mxu0 %v14185_v56  ;;  %8672 = vmatprep.subr.bf16.mxu1 %v14190_v57  ;;  %v14256_v56 = vld [vmem:[#allocation10 + $0xfc4] ss:$24 sps:$4 sm:$0xff]  }
 0x5b0   : > { %8930 = vmatprep.subr.bf16.mxu0 %v14193_v59  ;;  %v14259_v57 = vld [vmem:[#allocation10 + $0xfcc] ss:$24 sps:$4 sm:$0xff]   ;;  %v14254_v59 = vld [vmem:[#allocation10 + $0xfc0] ss:$24 sps:$4 sm:$0xff]  }
 0x5b2   : > { %8673 = vmatpush1.bf16.msra.mxu1 %v14188_v60  ;;  %v14257_v60 = vld [vmem:[#allocation10 + $0xfc8] ss:$24 sps:$4 sm:$0xff]  }
 0x5b3   : > { %8931 = vmatpush1.bf16.msra.mxu0 %v14191_v62  ;;  %8674 = vmatprep.subr.bf16.mxu1 %v14196_v63  ;;  %v14262_v62 = vld [vmem:[#allocation10 + $0xff4] ss:$24 sps:$4 sm:$0xff]  }
 0x5b4   : > { %8932 = vmatprep.subr.bf16.mxu0 %v14199_v0  ;;  %v14265_v63 = vld [vmem:[#allocation10 + $0xffc] ss:$24 sps:$4 sm:$0xff]   ;;  %v14260_v0 = vld [vmem:[#allocation10 + $0xff0] ss:$24 sps:$4 sm:$0xff]  }
 0x5b6   : > { %8675 = vmatpush1.bf16.msra.mxu1 %v14194_v12  ;;  %v14263_v12 = vld [vmem:[#allocation10 + $0xff8] ss:$24 sps:$4 sm:$0xff]  }
 0x5b7   : > { %8933 = vmatpush1.bf16.msra.mxu0 %v14197_v1  ;;  %8676 = vmatprep.subr.bf16.mxu1 %v14202_v2  ;;  %v14268_v1 = vld [vmem:[#allocation10 + $0x1024] ss:$24 sps:$4 sm:$0xff]  }
 0x5b8   : > { %8934 = vmatprep.subr.bf16.mxu0 %v14205_v3  ;;  %v14271_v2 = vld [vmem:[#allocation10 + $0x102c] ss:$24 sps:$4 sm:$0xff]   ;;  %v14266_v3 = vld [vmem:[#allocation10 + $0x1020] ss:$24 sps:$4 sm:$0xff]  }
 0x5ba   : > { %8677 = vmatpush1.bf16.msra.mxu1 %v14200_v5  ;;  %v14269_v5 = vld [vmem:[#allocation10 + $0x1028] ss:$24 sps:$4 sm:$0xff]  }
 0x5bb   : > { %8935 = vmatpush1.bf16.msra.mxu0 %v14203_v6  ;;  %8678 = vmatprep.subr.bf16.mxu1 %v14208_v7  ;;  %v14274_v6 = vld [vmem:[#allocation10 + $0x1054] ss:$24 sps:$4 sm:$0xff]  }
 0x5bc   : > { %8936 = vmatprep.subr.bf16.mxu0 %v14211_v8  ;;  %v14277_v7 = vld [vmem:[#allocation10 + $0x105c] ss:$24 sps:$4 sm:$0xff]   ;;  %v14272_v8 = vld [vmem:[#allocation10 + $0x1050] ss:$24 sps:$4 sm:$0xff]  }
 0x5be   : > { %8679 = vmatpush1.bf16.msra.mxu1 %v14206_v9  ;;  %v14275_v9 = vld [vmem:[#allocation10 + $0x1058] ss:$24 sps:$4 sm:$0xff]  }
 0x5bf   : > { %8937 = vmatpush1.bf16.msra.mxu0 %v14209_v10  ;;  %8680 = vmatprep.subr.bf16.mxu1 %v14214_v20  ;;  %v14280_v10 = vld [vmem:[#allocation10 + $0x1084] ss:$24 sps:$4 sm:$0xff]  }
 0x5c0   : > { %8938 = vmatprep.subr.bf16.mxu0 %v14217_v13  ;;  %v14283_v20 = vld [vmem:[#allocation10 + $0x108c] ss:$24 sps:$4 sm:$0xff]   ;;  %v14278_v13 = vld [vmem:[#allocation10 + $0x1080] ss:$24 sps:$4 sm:$0xff]  }
 0x5c2   : > { %8681 = vmatpush1.bf16.msra.mxu1 %v14212_v27  ;;  %v14281_v27 = vld [vmem:[#allocation10 + $0x1088] ss:$24 sps:$4 sm:$0xff]  }
 0x5c3   : > { %8939 = vmatpush1.bf16.msra.mxu0 %v14215_v14  ;;  %8682 = vmatprep.subr.bf16.mxu1 %v14220_v15  ;;  %v14286_v14 = vld [vmem:[#allocation10 + $0x10b4] ss:$24 sps:$4 sm:$0xff]  }
 0x5c4   : > { %8940 = vmatprep.subr.bf16.mxu0 %v14223_v16  ;;  %v14289_v15 = vld [vmem:[#allocation10 + $0x10bc] ss:$24 sps:$4 sm:$0xff]   ;;  %v14284_v16 = vld [vmem:[#allocation10 + $0x10b0] ss:$24 sps:$4 sm:$0xff]  }
 0x5c6   : > { %8683 = vmatpush1.bf16.msra.mxu1 %v14218_v61  ;;  %v14287_v61 = vld [vmem:[#allocation10 + $0x10b8] ss:$24 sps:$4 sm:$0xff]  }
 0x5c7   : > { %8941 = vmatpush1.bf16.msra.mxu0 %v14221_v17  ;;  %8684 = vmatprep.subr.bf16.mxu1 %v14226_v4  ;;  %v14292_v17 = vld [vmem:[#allocation10 + $0x10e4] ss:$24 sps:$4 sm:$0xff]  }
 0x5c8   : > { %8942 = vmatprep.subr.bf16.mxu0 %v14229_v18  ;;  %v14295_v4 = vld [vmem:[#allocation10 + $0x10ec] ss:$24 sps:$4 sm:$0xff]   ;;  %v14290_v18 = vld [vmem:[#allocation10 + $0x10e0] ss:$24 sps:$4 sm:$0xff]  }
 0x5ca   : > { %8685 = vmatpush1.bf16.msra.mxu1 %v14224_v38  ;;  %v14293_v38 = vld [vmem:[#allocation10 + $0x10e8] ss:$24 sps:$4 sm:$0xff]  }
 0x5cb   : > { %8943 = vmatpush1.bf16.msra.mxu0 %v14227_v49  ;;  %8697 = vmatprep.subr.bf16.mxu1 %v14232_v19  ;;  %v14298_v49 = vld [vmem:[#allocation10 + $0x1114] ss:$24 sps:$4 sm:$0xff]  }
 0x5cc   : > { %8955 = vmatprep.subr.bf16.mxu0 %v14235_v21  ;;  %v14301_v19 = vld [vmem:[#allocation10 + $0x111c] ss:$24 sps:$4 sm:$0xff]   ;;  %v14296_v21 = vld [vmem:[#allocation10 + $0x1110] ss:$24 sps:$4 sm:$0xff]  }
 0x5cd   : > { %8687 = vmatmul.mubr.bf16.vlgmr.msra.gmra.mrb[4].mxu1 %v15959_v34 }
 0x5ce   : > { %8945 = vmatmul.mubr.bf16.vlgmr.msra.gmra.mrb[8].mxu0 %v15959_v34  ;;  %8698 = vmatpush1.bf16.msra.mxu1 %v14230_v22  ;;  %v14299_v22 = vld [vmem:[#allocation10 + $0x1118] ss:$24 sps:$4 sm:$0xff]  }
 0x5cf   : > { %8729 = vmatprep.mubr.bf16.mxu1 %v15994_v48  ;;  %8956 = vmatpush1.bf16.msra.mxu0 %v14233_v23  ;;  %v14304_v23 = vld [vmem:[#allocation10 + $0x1144] ss:$24 sps:$4 sm:$0xff]  }
 0x5d0   : > { %8987 = vmatprep.mubr.bf16.mxu0 %v15994_v48  ;;  %8699 = vmatprep.subr.bf16.mxu1 %v14238_v24  ;;  %v14307_v24 = vld [vmem:[#allocation10 + $0x114c] ss:$24 sps:$4 sm:$0xff]  }
 0x5d1   : > { %8957 = vmatprep.subr.bf16.mxu0 %v14241_v25  ;;  %v14302_v25 = vld [vmem:[#allocation10 + $0x1140] ss:$24 sps:$4 sm:$0xff]  }
 0x5d2   : > { %8700 = vmatpush1.bf16.msra.mxu1 %v14236_v51  ;;  %v14305_v51 = vld [vmem:[#allocation10 + $0x1148] ss:$24 sps:$4 sm:$0xff]  }
 0x5d3   : > { %8958 = vmatpush1.bf16.msra.mxu0 %v14239_v28  ;;  %8701 = vmatprep.subr.bf16.mxu1 %v14244_v30  ;;  %v14310_v28 = vld [vmem:[#allocation10 + $0x1174] ss:$24 sps:$4 sm:$0xff]  }
 0x5d4   : > { %8959 = vmatprep.subr.bf16.mxu0 %v14247_v44  ;;  %v14313_v30 = vld [vmem:[#allocation10 + $0x117c] ss:$24 sps:$4 sm:$0xff]   ;;  %v14308_v44 = vld [vmem:[#allocation10 + $0x1170] ss:$24 sps:$4 sm:$0xff]  }
 0x5d6   : > { %8702 = vmatpush1.bf16.msra.mxu1 %v14242_v45  ;;  %v14311_v45 = vld [vmem:[#allocation10 + $0x1178] ss:$24 sps:$4 sm:$0xff]  }
 0x5d7   : > { %8960 = vmatpush1.bf16.msra.mxu0 %v14245_v50  ;;  %8703 = vmatprep.subr.bf16.mxu1 %v14250_v52  ;;  %v14316_v50 = vld [vmem:[#allocation10 + $0x11a4] ss:$24 sps:$4 sm:$0xff]  }
 0x5d8   : > { %8961 = vmatprep.subr.bf16.mxu0 %v14253_v53  ;;  %v14319_v52 = vld [vmem:[#allocation10 + $0x11ac] ss:$24 sps:$4 sm:$0xff]   ;;  %v14314_v53 = vld [vmem:[#allocation10 + $0x11a0] ss:$24 sps:$4 sm:$0xff]  }
 0x5da   : > { %8704 = vmatpush1.bf16.msra.mxu1 %v14248_v54  ;;  %v14317_v54 = vld [vmem:[#allocation10 + $0x11a8] ss:$24 sps:$4 sm:$0xff]  }
 0x5db   : > { %8962 = vmatpush1.bf16.msra.mxu0 %v14251_v55  ;;  %8705 = vmatprep.subr.bf16.mxu1 %v14256_v56  ;;  %v14322_v55 = vld [vmem:[#allocation10 + $0x11d4] ss:$24 sps:$4 sm:$0xff]  }
 0x5dc   : > { %8963 = vmatprep.subr.bf16.mxu0 %v14259_v57  ;;  %v14325_v56 = vld [vmem:[#allocation10 + $0x11dc] ss:$24 sps:$4 sm:$0xff]   ;;  %v14320_v57 = vld [vmem:[#allocation10 + $0x11d0] ss:$24 sps:$4 sm:$0xff]  }
 0x5de   : > { %8706 = vmatpush1.bf16.msra.mxu1 %v14254_v59  ;;  %v14323_v59 = vld [vmem:[#allocation10 + $0x11d8] ss:$24 sps:$4 sm:$0xff]  }
 0x5df   : > { %8964 = vmatpush1.bf16.msra.mxu0 %v14257_v60  ;;  %8707 = vmatprep.subr.bf16.mxu1 %v14262_v62  ;;  %v14328_v60 = vld [vmem:[#allocation10 + $0x14] ss:$24 sps:$4 sm:$0xff]   ;;  %v14326_v62 = vld [vmem:[#allocation10 + $0x10] ss:$24 sps:$4 sm:$0xff]  }
 0x5e0   : > { %8965 = vmatprep.subr.bf16.mxu0 %v14265_v63  ;;  %v14331_v63 = vld [vmem:[#allocation10 + $0x44] ss:$24 sps:$4 sm:$0xff]  }
 0x5e2   : > { %8708 = vmatpush1.bf16.msra.mxu1 %v14260_v0  ;;  %v14329_v0 = vld [vmem:[#allocation10 + $0x40] ss:$24 sps:$4 sm:$0xff]  }
 0x5e3   : > { %8966 = vmatpush1.bf16.msra.mxu0 %v14263_v12  ;;  %8709 = vmatprep.subr.bf16.mxu1 %v14268_v1  ;;  %v14334_v12 = vld [vmem:[#allocation10 + $0x74] ss:$24 sps:$4 sm:$0xff]   ;;  %v14332_v1 = vld [vmem:[#allocation10 + $0x70] ss:$24 sps:$4 sm:$0xff]  }
 0x5e4   : > { %8967 = vmatprep.subr.bf16.mxu0 %v14271_v2  ;;  %v14337_v2 = vld [vmem:[#allocation10 + $0xa4] ss:$24 sps:$4 sm:$0xff]  }
 0x5e6   : > { %8710 = vmatpush1.bf16.msra.mxu1 %v14266_v3  ;;  %v14335_v3 = vld [vmem:[#allocation10 + $0xa0] ss:$24 sps:$4 sm:$0xff]  }
 0x5e7   : > { %8968 = vmatpush1.bf16.msra.mxu0 %v14269_v5  ;;  %8711 = vmatprep.subr.bf16.mxu1 %v14274_v6  ;;  %v14340_v5 = vld [vmem:[#allocation10 + $0xd4] ss:$24 sps:$4 sm:$0xff]   ;;  %v14338_v6 = vld [vmem:[#allocation10 + $0xd0] ss:$24 sps:$4 sm:$0xff]  }
 0x5e8   : > { %8969 = vmatprep.subr.bf16.mxu0 %v14277_v7  ;;  %v14343_v7 = vld [vmem:[#allocation10 + $0x104] ss:$24 sps:$4 sm:$0xff]  }
 0x5ea   : > { %8712 = vmatpush1.bf16.msra.mxu1 %v14272_v8  ;;  %v14341_v8 = vld [vmem:[#allocation10 + $0x100] ss:$24 sps:$4 sm:$0xff]  }
 0x5eb   : > { %8970 = vmatpush1.bf16.msra.mxu0 %v14275_v9  ;;  %8713 = vmatprep.subr.bf16.mxu1 %v14280_v10  ;;  %v14346_v9 = vld [vmem:[#allocation10 + $0x134] ss:$24 sps:$4 sm:$0xff]   ;;  %v14349_v10 = vld [vmem:[#allocation10 + $0x164] ss:$24 sps:$4 sm:$0xff]  }
 0x5ec   : > { %8971 = vmatprep.subr.bf16.mxu0 %v14283_v20  ;;  %v14347_v20 = vld [vmem:[#allocation10 + $0x160] ss:$24 sps:$4 sm:$0xff]  }
 0x5ee   : > { %8714 = vmatpush1.bf16.msra.mxu1 %v14278_v13  ;;  %v14352_v13 = vld [vmem:[#allocation10 + $0x194] ss:$24 sps:$4 sm:$0xff]  }
 0x5ef   : > { %8972 = vmatpush1.bf16.msra.mxu0 %v14281_v27  ;;  %8715 = vmatprep.subr.bf16.mxu1 %v14286_v14  ;;  %v14350_v27 = vld [vmem:[#allocation10 + $0x190] ss:$24 sps:$4 sm:$0xff]   ;;  %v14355_v14 = vld [vmem:[#allocation10 + $0x1c4] ss:$24 sps:$4 sm:$0xff]  }
 0x5f0   : > { %8973 = vmatprep.subr.bf16.mxu0 %v14289_v15  ;;  %v14353_v15 = vld [vmem:[#allocation10 + $0x1c0] ss:$24 sps:$4 sm:$0xff]  }
 0x5f2   : > { %8716 = vmatpush1.bf16.msra.mxu1 %v14284_v16  ;;  %v14358_v16 = vld [vmem:[#allocation10 + $0x1f4] ss:$24 sps:$4 sm:$0xff]  }
 0x5f3   : > { %8974 = vmatpush1.bf16.msra.mxu0 %v14287_v61  ;;  %8717 = vmatprep.subr.bf16.mxu1 %v14292_v17  ;;  %v14356_v61 = vld [vmem:[#allocation10 + $0x1f0] ss:$24 sps:$4 sm:$0xff]  }
 0x5f4   : > { %8975 = vmatprep.subr.bf16.mxu0 %v14295_v4  ;;  %v14452_v17 = vld [vmem:[#allocation14] ss:$8 sps:$4 sm:$0xff]   ;;  %v14454_v4 = vld [vmem:[#allocation14 + $0x4] ss:$8 sps:$4 sm:$0xff]  }
 0x5f6   : > { %8718 = vmatpush1.bf16.msra.mxu1 %v14290_v18  ;;  %v14361_v18 = vld [vmem:[#allocation10 + $0x224] ss:$24 sps:$4 sm:$0xff]  }
 0x5f7   : > { %8976 = vmatpush1.bf16.msra.mxu0 %v14293_v38  ;;  %8719 = vmatprep.subr.bf16.mxu1 %v14298_v49  ;;  %v14359_v38 = vld [vmem:[#allocation10 + $0x220] ss:$24 sps:$4 sm:$0xff]  }
 0x5f8   : > { %8977 = vmatprep.subr.bf16.mxu0 %v14301_v19  ;;  %v14458_v49 = vld [vmem:[#allocation14 + $0x10] ss:$8 sps:$4 sm:$0xff]   ;;  %v14460_v19 = vld [vmem:[#allocation14 + $0x14] ss:$8 sps:$4 sm:$0xff]  }
 0x5fa   : > { %8720 = vmatpush1.bf16.msra.mxu1 %v14296_v21  ;;  %v14364_v21 = vld [vmem:[#allocation10 + $0x254] ss:$24 sps:$4 sm:$0xff]  }
 0x5fb   : > { %8978 = vmatpush1.bf16.msra.mxu0 %v14299_v22  ;;  %8721 = vmatprep.subr.bf16.mxu1 %v14304_v23  ;;  %v14362_v22 = vld [vmem:[#allocation10 + $0x250] ss:$24 sps:$4 sm:$0xff]  }
 0x5fc   : > { %8979 = vmatprep.subr.bf16.mxu0 %v14307_v24  ;;  %v14464_v23 = vld [vmem:[#allocation14 + $0x20] ss:$8 sps:$4 sm:$0xff]   ;;  %v14466_v24 = vld [vmem:[#allocation14 + $0x24] ss:$8 sps:$4 sm:$0xff]  }
 0x5fe   : > { %8722 = vmatpush1.bf16.msra.mxu1 %v14302_v25  ;;  %v14367_v25 = vld [vmem:[#allocation10 + $0x284] ss:$24 sps:$4 sm:$0xff]  }
 0x5ff   : > { %8980 = vmatpush1.bf16.msra.mxu0 %v14305_v51  ;;  %8723 = vmatprep.subr.bf16.mxu1 %v14310_v28  ;;  %v14365_v51 = vld [vmem:[#allocation10 + $0x280] ss:$24 sps:$4 sm:$0xff]  }
 0x600   : > { %8981 = vmatprep.subr.bf16.mxu0 %v14313_v30  ;;  %v14470_v28 = vld [vmem:[#allocation14 + $0x30] ss:$8 sps:$4 sm:$0xff]   ;;  %v14472_v30 = vld [vmem:[#allocation14 + $0x34] ss:$8 sps:$4 sm:$0xff]  }
 0x602   : > { %8724 = vmatpush1.bf16.msra.mxu1 %v14308_v44  ;;  %v14370_v44 = vld [vmem:[#allocation10 + $0x2b4] ss:$24 sps:$4 sm:$0xff]  }
 0x603   : > { %8982 = vmatpush1.bf16.msra.mxu0 %v14311_v45  ;;  %8725 = vmatprep.subr.bf16.mxu1 %v14316_v50  ;;  %v14368_v45 = vld [vmem:[#allocation10 + $0x2b0] ss:$24 sps:$4 sm:$0xff]  }
 0x604   : > { %8983 = vmatprep.subr.bf16.mxu0 %v14319_v52  ;;  %v14476_v50 = vld [vmem:[#allocation14 + $0x40] ss:$8 sps:$4 sm:$0xff]   ;;  %v14478_v52 = vld [vmem:[#allocation14 + $0x44] ss:$8 sps:$4 sm:$0xff]  }
 0x606   : > { %8726 = vmatpush1.bf16.msra.mxu1 %v14314_v53  ;;  %v14373_v53 = vld [vmem:[#allocation10 + $0x2e4] ss:$24 sps:$4 sm:$0xff]  }
 0x607   : > { %8984 = vmatpush1.bf16.msra.mxu0 %v14317_v54  ;;  %8727 = vmatprep.subr.bf16.mxu1 %v14322_v55  ;;  %v14371_v54 = vld [vmem:[#allocation10 + $0x2e0] ss:$24 sps:$4 sm:$0xff]  }
 0x608   : > { %8985 = vmatprep.subr.bf16.mxu0 %v14325_v56  ;;  %v14482_v55 = vld [vmem:[#allocation14 + $0x50] ss:$8 sps:$4 sm:$0xff]   ;;  %v14484_v56 = vld [vmem:[#allocation14 + $0x54] ss:$8 sps:$4 sm:$0xff]  }
 0x60a   : > { %8728 = vmatpush1.bf16.msra.mxu1 %v14320_v57  ;;  %v14376_v57 = vld [vmem:[#allocation10 + $0x314] ss:$24 sps:$4 sm:$0xff]  }
 0x60b   : > { %8986 = vmatpush1.bf16.msra.mxu0 %v14323_v59  ;;  %8998 = vmatprep.subr.bf16.mxu1 %v14328_v60  ;;  %v14374_v59 = vld [vmem:[#allocation10 + $0x310] ss:$24 sps:$4 sm:$0xff]  }
 0x60c   : > { %9952 = vmatprep.subr.bf16.mxu0 %v14454_v4  ;;  %v14488_v60 = vld [vmem:[#allocation14 + $0x60] ss:$8 sps:$4 sm:$0xff]   ;;  %v14395_v4 = vld [vmem:[#allocation10 + $0x460] ss:$24 sps:$4 sm:$0xff]  }
 0x60d   : > { %8730 = vmatmul.mubr.bf16.vlgmr.msra.gmra.mrb[4].mxu1 %v15990_v35 }
 0x60e   : > { %8988 = vmatmul.mubr.bf16.vlgmr.msra.gmra.mrb[8].mxu0 %v15990_v35  ;;  %8999 = vmatpush1.bf16.msra.mxu1 %v14326_v62  ;;  %v14490_v62 = vld [vmem:[#allocation14 + $0x64] ss:$8 sps:$4 sm:$0xff]  }
 0x60f   : > { %9030 = vmatprep.mubr.bf16.mxu1 %v15961_v36  ;;  %9000 = vmatprep.subr.bf16.mxu1 %v14331_v63  ;;  %v14344_v36 = vld [vmem:[#allocation10 + $0x130] ss:$24 sps:$4 sm:$0xff]   ;;  %v14379_v63 = vld [vmem:[#allocation10 + $0x344] ss:$24 sps:$4 sm:$0xff]  }
 0x610   : > { %9953 = vmatpush1.bf16.msra.mxu0 %v14452_v17  ;;  %v14397_v17 = vld [vmem:[#allocation10 + $0x464] ss:$24 sps:$4 sm:$0xff]  }
 0x611   : > { %9954 = vmatprep.subr.bf16.mxu0 %v14460_v19  ;;  %v14398_v19 = vld [vmem:[#allocation10 + $0x490] ss:$24 sps:$4 sm:$0xff]  }
 0x612   : > { %9001 = vmatpush1.bf16.msra.mxu1 %v14329_v0  ;;  %v14377_v0 = vld [vmem:[#allocation10 + $0x340] ss:$24 sps:$4 sm:$0xff]  }
 0x613   : > { %9002 = vmatprep.subr.bf16.mxu1 %v14334_v12  ;;  %v14494_v12 = vld [vmem:[#allocation14 + $0x70] ss:$8 sps:$4 sm:$0xff]  }
 0x614   : > { %9955 = vmatpush1.bf16.msra.mxu0 %v14458_v49  ;;  %v14524_v49 = vld [vmem:[#allocation14 + $0xc0] ss:$8 sps:$4 sm:$0xff]  }
 0x615   : > { %9956 = vmatprep.subr.bf16.mxu0 %v14466_v24  ;;  %v14401_v24 = vld [vmem:[#allocation10 + $0x4c0] ss:$24 sps:$4 sm:$0xff]  }
 0x616   : > { %9003 = vmatpush1.bf16.msra.mxu1 %v14332_v1  ;;  %v14496_v1 = vld [vmem:[#allocation14 + $0x74] ss:$8 sps:$4 sm:$0xff]  }
 0x617   : > { %9004 = vmatprep.subr.bf16.mxu1 %v14337_v2  ;;  %v14382_v2 = vld [vmem:[#allocation10 + $0x374] ss:$24 sps:$4 sm:$0xff]  }
 0x618   : > { %9957 = vmatpush1.bf16.msra.mxu0 %v14464_v23  ;;  %v14530_v23 = vld [vmem:[#allocation14 + $0xd0] ss:$8 sps:$4 sm:$0xff]  }
 0x619   : > { %9958 = vmatprep.subr.bf16.mxu0 %v14472_v30  ;;  %v14404_v30 = vld [vmem:[#allocation10 + $0x4f0] ss:$24 sps:$4 sm:$0xff]  }
 0x61a   : > { %9005 = vmatpush1.bf16.msra.mxu1 %v14335_v3  ;;  %v14380_v3 = vld [vmem:[#allocation10 + $0x370] ss:$24 sps:$4 sm:$0xff]  }
 0x61b   : > { %9006 = vmatprep.subr.bf16.mxu1 %v14340_v5  ;;  %v14500_v5 = vld [vmem:[#allocation14 + $0x80] ss:$8 sps:$4 sm:$0xff]  }
 0x61c   : > { %9959 = vmatpush1.bf16.msra.mxu0 %v14470_v28  ;;  %v14536_v28 = vld [vmem:[#allocation14 + $0xe0] ss:$8 sps:$4 sm:$0xff]  }
 0x61d   : > { %9960 = vmatprep.subr.bf16.mxu0 %v14478_v52  ;;  %v14407_v52 = vld [vmem:[#allocation10 + $0x520] ss:$24 sps:$4 sm:$0xff]  }
 0x61e   : > { %9007 = vmatpush1.bf16.msra.mxu1 %v14338_v6  ;;  %v14502_v6 = vld [vmem:[#allocation14 + $0x84] ss:$8 sps:$4 sm:$0xff]  }
 0x61f   : > { %9008 = vmatprep.subr.bf16.mxu1 %v14343_v7  ;;  %v14385_v7 = vld [vmem:[#allocation10 + $0x3a4] ss:$24 sps:$4 sm:$0xff]  }
 0x620   : > { %9961 = vmatpush1.bf16.msra.mxu0 %v14476_v50  ;;  %v14542_v50 = vld [vmem:[#allocation14 + $0xf0] ss:$8 sps:$4 sm:$0xff]  }
 0x621   : > { %9962 = vmatprep.subr.bf16.mxu0 %v14484_v56  ;;  %v14413_v56 = vld [vmem:[#allocation10 + $0x580] ss:$24 sps:$4 sm:$0xff]  }
 0x622   : > { %9009 = vmatpush1.bf16.msra.mxu1 %v14341_v8  ;;  %v14506_v8 = vld [vmem:[#allocation14 + $0x90] ss:$8 sps:$4 sm:$0xff]  }
 0x623   : > { %9010 = vmatprep.subr.bf16.mxu1 %v14346_v9  ;;  %v14508_v9 = vld [vmem:[#allocation14 + $0x94] ss:$8 sps:$4 sm:$0xff]  }
 0x624   : > { %9963 = vmatpush1.bf16.msra.mxu0 %v14482_v55  ;;  %v14415_v55 = vld [vmem:[#allocation10 + $0x584] ss:$24 sps:$4 sm:$0xff]  }
 0x625   : > { %9964 = vmatprep.subr.bf16.mxu0 %v14490_v62  ;;  %v14419_v62 = vld [vmem:[#allocation10 + $0x5e0] ss:$24 sps:$4 sm:$0xff]  }
 0x626   : > { %9011 = vmatpush1.bf16.msra.mxu1 %v14344_v36  ;;  %v14386_v36 = vld [vmem:[#allocation10 + $0x3d0] ss:$24 sps:$4 sm:$0xff]  }
 0x627   : > { %9012 = vmatprep.subr.bf16.mxu1 %v14349_v10  ;;  %v14512_v10 = vld [vmem:[#allocation14 + $0xa0] ss:$8 sps:$4 sm:$0xff]  }
 0x628   : > { %9965 = vmatpush1.bf16.msra.mxu0 %v14488_v60  ;;  %v14421_v60 = vld [vmem:[#allocation10 + $0x5e4] ss:$24 sps:$4 sm:$0xff]  }
 0x629   : > { %9966 = vmatprep.subr.bf16.mxu0 %v14496_v1  ;;  %v14425_v1 = vld [vmem:[#allocation10 + $0x640] ss:$24 sps:$4 sm:$0xff]  }
 0x62a   : > { %9013 = vmatpush1.bf16.msra.mxu1 %v14347_v20  ;;  %v14514_v20 = vld [vmem:[#allocation14 + $0xa4] ss:$8 sps:$4 sm:$0xff]  }
 0x62b   : > { %9014 = vmatprep.subr.bf16.mxu1 %v14352_v13  ;;  %v14391_v13 = vld [vmem:[#allocation10 + $0x404] ss:$24 sps:$4 sm:$0xff]  }
 0x62c   : > { %9967 = vmatpush1.bf16.msra.mxu0 %v14494_v12  ;;  %v14427_v12 = vld [vmem:[#allocation10 + $0x644] ss:$24 sps:$4 sm:$0xff]  }
 0x62d   : > { %9968 = vmatprep.subr.bf16.mxu0 %v14502_v6  ;;  %v14431_v6 = vld [vmem:[#allocation10 + $0x6a0] ss:$24 sps:$4 sm:$0xff]  }
 0x62e   : > { %9015 = vmatpush1.bf16.msra.mxu1 %v14350_v27  ;;  %v14389_v27 = vld [vmem:[#allocation10 + $0x400] ss:$24 sps:$4 sm:$0xff]  }
 0x62f   : > { %9016 = vmatprep.subr.bf16.mxu1 %v14355_v14  ;;  %v14394_v14 = vld [vmem:[#allocation10 + $0x434] ss:$24 sps:$4 sm:$0xff]  }
 0x630   : > { %9969 = vmatpush1.bf16.msra.mxu0 %v14500_v5  ;;  %v14433_v5 = vld [vmem:[#allocation10 + $0x6a4] ss:$24 sps:$4 sm:$0xff]  }
 0x631   : > { %9970 = vmatprep.subr.bf16.mxu0 %v14508_v9  ;;  %v14442_v9 = vld [vmem:[#allocation10 + $0x734] ss:$24 sps:$4 sm:$0xff]  }
 0x632   : > { %9017 = vmatpush1.bf16.msra.mxu1 %v14353_v15  ;;  %v14520_v15 = vld [vmem:[#allocation14 + $0xb4] ss:$8 sps:$4 sm:$0xff]  }
 0x633   : > { %9018 = vmatprep.subr.bf16.mxu1 %v14358_v16  ;;  %v14392_v16 = vld [vmem:[#allocation10 + $0x430] ss:$24 sps:$4 sm:$0xff]  }
 0x634   : > { %9971 = vmatpush1.bf16.msra.mxu0 %v14506_v8  ;;  %v14439_v8 = vld [vmem:[#allocation10 + $0x704] ss:$24 sps:$4 sm:$0xff]  }
 0x635   : > { %9972 = vmatprep.subr.bf16.mxu0 %v14514_v20  ;;  %v14446_v20 = vld [vmem:[#allocation10 + $0x790] ss:$24 sps:$4 sm:$0xff]  }
 0x636   : > { %9019 = vmatpush1.bf16.msra.mxu1 %v14356_v61  ;;  %v14518_v61 = vld [vmem:[#allocation14 + $0xb0] ss:$8 sps:$4 sm:$0xff]  }
 0x637   : > { %9020 = vmatprep.subr.bf16.mxu1 %v14361_v18  ;;  %v14526_v18 = vld [vmem:[#allocation14 + $0xc4] ss:$8 sps:$4 sm:$0xff]  }
 0x638   : > { %9973 = vmatpush1.bf16.msra.mxu0 %v14512_v10  ;;  %v14448_v10 = vld [vmem:[#allocation10 + $0x794] ss:$24 sps:$4 sm:$0xff]  }
 0x639   : > { %9974 = vmatprep.subr.bf16.mxu0 %v14520_v15  ;;  %v14455_v15 = vld [vmem:[#allocation10 + $0x7f0] ss:$24 sps:$4 sm:$0xff]  }
 0x63a   : > { %9021 = vmatpush1.bf16.msra.mxu1 %v14359_v38  ;;  %v14400_v38 = vld [vmem:[#allocation10 + $0x494] ss:$24 sps:$4 sm:$0xff]  }
 0x63b   : > { %9022 = vmatprep.subr.bf16.mxu1 %v14364_v21  ;;  %v14532_v21 = vld [vmem:[#allocation14 + $0xd4] ss:$8 sps:$4 sm:$0xff]  }
 0x63c   : > { %9975 = vmatpush1.bf16.msra.mxu0 %v14518_v61  ;;  %v14461_v61 = vld [vmem:[#allocation10 + $0x820] ss:$24 sps:$4 sm:$0xff]  }
 0x63d   : > { %9976 = vmatprep.subr.bf16.mxu0 %v14526_v18  ;;  %v14475_v18 = vld [vmem:[#allocation10 + $0x884] ss:$24 sps:$4 sm:$0xff]  }
 0x63e   : > { %9023 = vmatpush1.bf16.msra.mxu1 %v14362_v22  ;;  %v14403_v22 = vld [vmem:[#allocation10 + $0x4c4] ss:$24 sps:$4 sm:$0xff]  }
 0x63f   : > { %9024 = vmatprep.subr.bf16.mxu1 %v14367_v25  ;;  %v14538_v25 = vld [vmem:[#allocation14 + $0xe4] ss:$8 sps:$4 sm:$0xff]  }
 0x640   : > { %9977 = vmatpush1.bf16.msra.mxu0 %v14524_v49  ;;  %v14481_v49 = vld [vmem:[#allocation10 + $0x8b4] ss:$24 sps:$4 sm:$0xff]  }
 0x641   : > { %9978 = vmatprep.subr.bf16.mxu0 %v14532_v21  ;;  %v14487_v21 = vld [vmem:[#allocation10 + $0x8e4] ss:$24 sps:$4 sm:$0xff]  }
 0x642   : > { %9025 = vmatpush1.bf16.msra.mxu1 %v14365_v51  ;;  %v14406_v51 = vld [vmem:[#allocation10 + $0x4f4] ss:$24 sps:$4 sm:$0xff]  }
 0x643   : > { %9026 = vmatprep.subr.bf16.mxu1 %v14370_v44  ;;  %v14544_v44 = vld [vmem:[#allocation14 + $0xf4] ss:$8 sps:$4 sm:$0xff]  }
 0x644   : > { %9979 = vmatpush1.bf16.msra.mxu0 %v14530_v23  ;;  %v14493_v23 = vld [vmem:[#allocation10 + $0x914] ss:$24 sps:$4 sm:$0xff]  }
 0x645   : > { %9980 = vmatprep.subr.bf16.mxu0 %v14538_v25  ;;  %v14499_v25 = vld [vmem:[#allocation10 + $0x944] ss:$24 sps:$4 sm:$0xff]  }
 0x646   : > { %9027 = vmatpush1.bf16.msra.mxu1 %v14368_v45  ;;  %v14409_v45 = vld [vmem:[#allocation10 + $0x524] ss:$24 sps:$4 sm:$0xff]  }
 0x647   : > { %9028 = vmatprep.subr.bf16.mxu1 %v14373_v53  ;;  %v14412_v53 = vld [vmem:[#allocation10 + $0x554] ss:$24 sps:$4 sm:$0xff]  }
 0x648   : > { %9981 = vmatpush1.bf16.msra.mxu0 %v14536_v28  ;;  %v14505_v28 = vld [vmem:[#allocation10 + $0x974] ss:$24 sps:$4 sm:$0xff]  }
 0x649   : > { %9982 = vmatprep.subr.bf16.mxu0 %v14544_v44  ;;  %v14511_v44 = vld [vmem:[#allocation10 + $0x9a4] ss:$24 sps:$4 sm:$0xff]  }
 0x64a   : > { %9029 = vmatpush1.bf16.msra.mxu1 %v14371_v54  ;;  %v14410_v54 = vld [vmem:[#allocation10 + $0x550] ss:$24 sps:$4 sm:$0xff]  }
 0x64b   : > { %9041 = vmatprep.subr.bf16.mxu1 %v14376_v57  ;;  %v14418_v57 = vld [vmem:[#allocation10 + $0x5b4] ss:$24 sps:$4 sm:$0xff]  }
 0x64c   : > { %9983 = vmatpush1.bf16.msra.mxu0 %v14542_v50  ;;  %v14517_v50 = vld [vmem:[#allocation10 + $0x9d4] ss:$24 sps:$4 sm:$0xff]  }
 0x64d   : > { %9031 = vmatmul.mubr.bf16.vlgmr.msra.gmra.mrb[8].mxu1 %v15953_v26  ;;  %v14383_v26 = vld [vmem:[#allocation10 + $0x3a0] ss:$24 sps:$4 sm:$0xff]  }
 0x64e   : > { %9042 = vmatpush1.bf16.msra.mxu1 %v14374_v59  ;;  %9073 = vmatprep.mubr.bf16.mxu1 %v15965_v40  ;;  %v14388_v40 = vld [vmem:[#allocation10 + $0x3d4] ss:$24 sps:$4 sm:$0xff]   ;;  %v14416_v59 = vld [vmem:[#allocation10 + $0x5b0] ss:$24 sps:$4 sm:$0xff]  }
 0x64f   : > { %9043 = vmatprep.subr.bf16.mxu1 %v14379_v63  ;;  %v14424_v63 = vld [vmem:[#allocation10 + $0x614] ss:$24 sps:$4 sm:$0xff]  }
 0x652   : > { %9044 = vmatpush1.bf16.msra.mxu1 %v14377_v0  ;;  %v14422_v0 = vld [vmem:[#allocation10 + $0x610] ss:$24 sps:$4 sm:$0xff]  }
 0x653   : > { %9045 = vmatprep.subr.bf16.mxu1 %v14382_v2  ;;  %v14430_v2 = vld [vmem:[#allocation10 + $0x674] ss:$24 sps:$4 sm:$0xff]  }
 0x656   : > { %9046 = vmatpush1.bf16.msra.mxu1 %v14380_v3  ;;  %v14428_v3 = vld [vmem:[#allocation10 + $0x670] ss:$24 sps:$4 sm:$0xff]  }
 0x657   : > { %9047 = vmatprep.subr.bf16.mxu1 %v14385_v7  ;;  %v14436_v7 = vld [vmem:[#allocation10 + $0x6d4] ss:$24 sps:$4 sm:$0xff]  }
 0x65a   : > { %9048 = vmatpush1.bf16.msra.mxu1 %v14383_v26  ;;  %v14434_v26 = vld [vmem:[#allocation10 + $0x6d0] ss:$24 sps:$4 sm:$0xff]  }
 0x65b   : > { %9049 = vmatprep.subr.bf16.mxu1 %v14388_v40  ;;  %v14445_v40 = vld [vmem:[#allocation10 + $0x764] ss:$24 sps:$4 sm:$0xff]  }
 0x65e   : > { %9050 = vmatpush1.bf16.msra.mxu1 %v14386_v36  ;;  %v14443_v36 = vld [vmem:[#allocation10 + $0x760] ss:$24 sps:$4 sm:$0xff]  }
 0x65f   : > { %9051 = vmatprep.subr.bf16.mxu1 %v14391_v13  ;;  %v14451_v13 = vld [vmem:[#allocation10 + $0x7c4] ss:$24 sps:$4 sm:$0xff]  }
 0x662   : > { %9052 = vmatpush1.bf16.msra.mxu1 %v14389_v27  ;;  %v14449_v27 = vld [vmem:[#allocation10 + $0x7c0] ss:$24 sps:$4 sm:$0xff]  }
 0x663   : > { %9053 = vmatprep.subr.bf16.mxu1 %v14394_v14  ;;  %v14457_v14 = vld [vmem:[#allocation10 + $0x7f4] ss:$24 sps:$4 sm:$0xff]  }
 0x666   : > { %9054 = vmatpush1.bf16.msra.mxu1 %v14392_v16  ;;  %v14463_v16 = vld [vmem:[#allocation10 + $0x824] ss:$24 sps:$4 sm:$0xff]  }
 0x667   : > { %9055 = vmatprep.subr.bf16.mxu1 %v14397_v17  ;;  %v14469_v17 = vld [vmem:[#allocation10 + $0x854] ss:$24 sps:$4 sm:$0xff]  }
 0x66a   : > { %9056 = vmatpush1.bf16.msra.mxu1 %v14395_v4  ;;  %v14467_v4 = vld [vmem:[#allocation10 + $0x850] ss:$24 sps:$4 sm:$0xff]  }
 0x66b   : > { %9057 = vmatprep.subr.bf16.mxu1 %v14400_v38  ;;  %v14473_v38 = vld [vmem:[#allocation10 + $0x880] ss:$24 sps:$4 sm:$0xff]  }
 0x66e   : > { %9058 = vmatpush1.bf16.msra.mxu1 %v14398_v19  ;;  %v14479_v19 = vld [vmem:[#allocation10 + $0x8b0] ss:$24 sps:$4 sm:$0xff]  }
 0x66f   : > { %9059 = vmatprep.subr.bf16.mxu1 %v14403_v22  ;;  %v14485_v22 = vld [vmem:[#allocation10 + $0x8e0] ss:$24 sps:$4 sm:$0xff]  }
 0x672   : > { %9060 = vmatpush1.bf16.msra.mxu1 %v14401_v24  ;;  %v14491_v24 = vld [vmem:[#allocation10 + $0x910] ss:$24 sps:$4 sm:$0xff]  }
 0x673   : > { %9061 = vmatprep.subr.bf16.mxu1 %v14406_v51  ;;  %v14497_v51 = vld [vmem:[#allocation10 + $0x940] ss:$24 sps:$4 sm:$0xff]  }
 0x676   : > { %9062 = vmatpush1.bf16.msra.mxu1 %v14404_v30  ;;  %v14503_v30 = vld [vmem:[#allocation10 + $0x970] ss:$24 sps:$4 sm:$0xff]  }
 0x677   : > { %9063 = vmatprep.subr.bf16.mxu1 %v14409_v45  ;;  %v14509_v45 = vld [vmem:[#allocation10 + $0x9a0] ss:$24 sps:$4 sm:$0xff]  }
 0x67a   : > { %9064 = vmatpush1.bf16.msra.mxu1 %v14407_v52  ;;  %v14515_v52 = vld [vmem:[#allocation10 + $0x9d0] ss:$24 sps:$4 sm:$0xff]  }
 0x67b   : > { %9065 = vmatprep.subr.bf16.mxu1 %v14412_v53  ;;  %v16019_v53 = vld [vmem:[#allocation11] sm:$0x3f] }
 0x67e   : > { %9066 = vmatpush1.bf16.msra.mxu1 %v14410_v54  ;;  %v16026_v54 = vrot.slane %v16019_v53, %v1296_v46 }
 0x67f   : > { %9067 = vmatprep.subr.bf16.mxu1 %v14415_v55  ;;  %v5579_v55 = vrot.slane %v16019_v53, %v15944_v37 }
 0x682   : > { %9068 = vmatpush1.bf16.msra.mxu1 %v14413_v56  ;;  %v14521_v56 = vld [vmem:[#allocation10 + $0xa00] ss:$24 sps:$4 sm:$0xff]  }
 0x683   : > { %9069 = vmatprep.subr.bf16.mxu1 %v14418_v57  ;;  %v16033_v57 = vrot.slane %v16019_v53, %v1300_v47 }
 0x686   : > { %9070 = vmatpush1.bf16.msra.mxu1 %v14416_v59  ;;  %v14529_v59 = vld [vmem:[#allocation10 + $0xa34] ss:$24 sps:$4 sm:$0xff]  }
 0x687   : > { %9071 = vmatprep.subr.bf16.mxu1 %v14421_v60 }
 0x68a   : > { %9072 = vmatpush1.bf16.msra.mxu1 %v14419_v62 }
 0x68b   : > { %9084 = vmatprep.subr.bf16.mxu1 %v14424_v63 }
 0x68d   : > { %9074 = vmatmul.mubr.bf16.vlgmr.msra.gmra.mrb[8].mxu1 %v15957_v33  ;;  %v14437_v33 = vld [vmem:[#allocation10 + $0x700] ss:$24 sps:$4 sm:$0xff]  }
 0x68e   : > { %9085 = vmatpush1.bf16.msra.mxu1 %v14422_v0  ;;  %9116 = vmatprep.mubr.bf16.mxu1 %v15992_v43  ;;  %v14440_v43 = vld [vmem:[#allocation10 + $0x730] ss:$24 sps:$4 sm:$0xff]  }
 0x68f   : > { %9086 = vmatprep.subr.bf16.mxu1 %v14427_v12 }
 0x692   : > { %9087 = vmatpush1.bf16.msra.mxu1 %v14425_v1 }
 0x693   : > { %9088 = vmatprep.subr.bf16.mxu1 %v14430_v2 }
 0x696   : > { %9089 = vmatpush1.bf16.msra.mxu1 %v14428_v3  ;;  %v14527_v3 = vld [vmem:[#allocation10 + $0xa30] ss:$24 sps:$4 sm:$0xff]  }
 0x697   : > { %9090 = vmatprep.subr.bf16.mxu1 %v14433_v5 }
 0x69a   : > { %9091 = vmatpush1.bf16.msra.mxu1 %v14431_v6 }
 0x69b   : > { %9092 = vmatprep.subr.bf16.mxu1 %v14436_v7  ;;  %v14535_v7 = vld [vmem:[#allocation10 + $0xa64] ss:$24 sps:$4 sm:$0xff]  }
 0x69e   : > { %9093 = vmatpush1.bf16.msra.mxu1 %v14434_v26 }
 0x69f   : > { %9094 = vmatprep.subr.bf16.mxu1 %v14439_v8 }
 0x6a2   : > { %9095 = vmatpush1.bf16.msra.mxu1 %v14437_v33 }
 0x6a3   : > { %9096 = vmatprep.subr.bf16.mxu1 %v14442_v9  ;;  %v14533_v9 = vld [vmem:[#allocation10 + $0xa60] ss:$24 sps:$4 sm:$0xff]  }
 0x6a6   : > { %9097 = vmatpush1.bf16.msra.mxu1 %v14440_v43  ;;  %v14541_v43 = vld [vmem:[#allocation10 + $0xa94] ss:$24 sps:$4 sm:$0xff]  }
 0x6a7   : > { %9098 = vmatprep.subr.bf16.mxu1 %v14445_v40  ;;  %v14539_v40 = vld [vmem:[#allocation10 + $0xa90] ss:$24 sps:$4 sm:$0xff]  }
 0x6aa   : > { %9099 = vmatpush1.bf16.msra.mxu1 %v14443_v36  ;;  %v14547_v36 = vld [vmem:[#allocation10 + $0xac4] ss:$24 sps:$4 sm:$0xff]  }
 0x6ab   : > { %9100 = vmatprep.subr.bf16.mxu1 %v14448_v10  ;;  %v14545_v10 = vld [vmem:[#allocation10 + $0xac0] ss:$24 sps:$4 sm:$0xff]  }
 0x6ae   : > { %9101 = vmatpush1.bf16.msra.mxu1 %v14446_v20  ;;  %v14550_v20 = vld [vmem:[#allocation10 + $0xaf4] ss:$24 sps:$4 sm:$0xff]  }
 0x6af   : > { %9102 = vmatprep.subr.bf16.mxu1 %v14451_v13 }
 0x6b2   : > { %9103 = vmatpush1.bf16.msra.mxu1 %v14449_v27  ;;  %v14548_v27 = vld [vmem:[#allocation10 + $0xaf0] ss:$24 sps:$4 sm:$0xff]  }
 0x6b3   : > { %9104 = vmatprep.subr.bf16.mxu1 %v14457_v14 }
 0x6b6   : > { %9105 = vmatpush1.bf16.msra.mxu1 %v14455_v15  ;;  %v14553_v15 = vld [vmem:[#allocation10 + $0xb24] ss:$24 sps:$4 sm:$0xff]  }
 0x6b7   : > { %9106 = vmatprep.subr.bf16.mxu1 %v14463_v16 }
 0x6ba   : > { %9107 = vmatpush1.bf16.msra.mxu1 %v14461_v61 }
 0x6bb   : > { %9108 = vmatprep.subr.bf16.mxu1 %v14469_v17  ;;  %v14551_v17 = vld [vmem:[#allocation10 + $0xb20] ss:$24 sps:$4 sm:$0xff]  }
 0x6be   : > { %9109 = vmatpush1.bf16.msra.mxu1 %v14467_v4  ;;  %v14556_v4 = vld [vmem:[#allocation10 + $0xb54] ss:$24 sps:$4 sm:$0xff]  }
 0x6bf   : > { %9110 = vmatprep.subr.bf16.mxu1 %v14475_v18  ;;  %v14554_v18 = vld [vmem:[#allocation10 + $0xb50] ss:$24 sps:$4 sm:$0xff]  }
 0x6c2   : > { %9111 = vmatpush1.bf16.msra.mxu1 %v14473_v38  ;;  %v14559_v38 = vld [vmem:[#allocation10 + $0xb84] ss:$24 sps:$4 sm:$0xff]  }
 0x6c3   : > { %9112 = vmatprep.subr.bf16.mxu1 %v14481_v49  ;;  %v14557_v49 = vld [vmem:[#allocation10 + $0xb80] ss:$24 sps:$4 sm:$0xff]  }
 0x6c6   : > { %9113 = vmatpush1.bf16.msra.mxu1 %v14479_v19  ;;  %v14562_v19 = vld [vmem:[#allocation10 + $0xbb4] ss:$24 sps:$4 sm:$0xff]  }
 0x6c7   : > { %9114 = vmatprep.subr.bf16.mxu1 %v14487_v21  ;;  %v14560_v21 = vld [vmem:[#allocation10 + $0xbb0] ss:$24 sps:$4 sm:$0xff]  }
 0x6ca   : > { %9115 = vmatpush1.bf16.msra.mxu1 %v14485_v22  ;;  %v14565_v22 = vld [vmem:[#allocation10 + $0xbe4] ss:$24 sps:$4 sm:$0xff]  }
 0x6cb   : > { %9127 = vmatprep.subr.bf16.mxu1 %v14493_v23  ;;  %v14563_v23 = vld [vmem:[#allocation10 + $0xbe0] ss:$24 sps:$4 sm:$0xff]  }
 0x6cd   : > { %9117 = vmatmul.mubr.bf16.vlgmr.msra.gmra.mrb[8].mxu1 %v15988_v31  ;;  %v14523_v31 = vld [vmem:[#allocation10 + $0xa04] ss:$24 sps:$4 sm:$0xff]  }
 0x6ce   : > { %9128 = vmatpush1.bf16.msra.mxu1 %v14491_v24  ;;  %9159 = vmatprep.mubr.bf16.mxu1 %v15963_v39  ;;  %v5575_v39 = vrot.slane %v16019_v53, %v15940_v32  ;;  %v14568_v24 = vld [vmem:[#allocation10 + $0xc14] ss:$24 sps:$4 sm:$0xff]  }
 0x6cf   : > { %9129 = vmatprep.subr.bf16.mxu1 %v14499_v25  ;;  %v14566_v25 = vld [vmem:[#allocation10 + $0xc10] ss:$24 sps:$4 sm:$0xff]  }
 0x6d2   : > { %9130 = vmatpush1.bf16.msra.mxu1 %v14497_v51  ;;  %v14571_v51 = vld [vmem:[#allocation10 + $0xc44] ss:$24 sps:$4 sm:$0xff]  }
 0x6d3   : > { %9131 = vmatprep.subr.bf16.mxu1 %v14505_v28  ;;  %v14569_v28 = vld [vmem:[#allocation10 + $0xc40] ss:$24 sps:$4 sm:$0xff]  }
 0x6d6   : > { %9132 = vmatpush1.bf16.msra.mxu1 %v14503_v30  ;;  %v14574_v30 = vld [vmem:[#allocation10 + $0xc74] ss:$24 sps:$4 sm:$0xff]  }
 0x6d7   : > { %9133 = vmatprep.subr.bf16.mxu1 %v14511_v44  ;;  %v14572_v44 = vld [vmem:[#allocation10 + $0xc70] ss:$24 sps:$4 sm:$0xff]  }
 0x6da   : > { %9134 = vmatpush1.bf16.msra.mxu1 %v14509_v45  ;;  %v14577_v45 = vld [vmem:[#allocation10 + $0xca4] ss:$24 sps:$4 sm:$0xff]  }
 0x6db   : > { %9135 = vmatprep.subr.bf16.mxu1 %v14517_v50  ;;  %v14575_v50 = vld [vmem:[#allocation10 + $0xca0] ss:$24 sps:$4 sm:$0xff]  }
 0x6de   : > { %9136 = vmatpush1.bf16.msra.mxu1 %v14515_v52  ;;  %v14580_v52 = vld [vmem:[#allocation10 + $0xcd4] ss:$24 sps:$4 sm:$0xff]  }
 0x6df   : > { %9137 = vmatprep.subr.bf16.mxu1 %v14523_v31  ;;  %v14578_v31 = vld [vmem:[#allocation10 + $0xcd0] ss:$24 sps:$4 sm:$0xff]  }
 0x6e0   : > { %v8731_v60 = vpop.f32.mrb[4].mxu1 }
 0x6e1   : > { %v16035_v62 = vadd.f32 %v8731_v60, %v5575_v39  ;;  %v8989_v63 = vpop.f32.mrb[8].mxu0  ;;  %v8733_v0 = vpop.f32.mrb[5].mxu1  ;;  %v14592_v60 = vld [vmem:[#allocation10 + $0xd94] ss:$24 sps:$4 sm:$0xff]  }
 0x6e2   : > { %v16038_v12 = vadd.f32 %v8989_v63, %v16026_v54  ;;  %v16040_v46 = vadd.f32 %v8733_v0, %v5579_v55  ;;  %v8991_v1 = vpop.f32.mrb[9].mxu0  ;;  %v8735_v2 = vpop.f32.mrb[6].mxu1  ;;  %9138 = vmatpush1.bf16.msra.mxu1 %v14521_v56  ;;  %v14589_v56 = vld [vmem:[#allocation10 + $0xd64] ss:$24 sps:$4 sm:$0xff]   ;;  %v14590_v63 = vld [vmem:[#allocation10 + $0xd90] ss:$24 sps:$4 sm:$0xff]  }
 0x6e3   : > { %v16043_v5 = vadd.f32 %v8991_v1, %v16033_v57  ;;  %v16045_v47 = vpop.f32.mrb[10].mxu0  ;;  %v8737_v6 = vpop.f32.mrb[7].mxu1  ;;  %9139 = vmatprep.subr.bf16.mxu1 %v14529_v59  ;;  %v12599_v26 = vadd.f32 %v8735_v2, %v5575_v39  ;;  %v14583_v39 = vld [vmem:[#allocation10 + $0xd04] ss:$24 sps:$4 sm:$0xff]   ;;  %v14587_v59 = vld [vmem:[#allocation10 + $0xd60] ss:$24 sps:$4 sm:$0xff]  }
 0x6e4   : > { %v16047_v8 = vpop.f32.mrb[11].mxu0  ;;  %v12600_v33 = vadd.f32 %v8737_v6, %v5579_v55  ;;  %v14586_v55 = vld [vmem:[#allocation10 + $0xd34] ss:$24 sps:$4 sm:$0xff]   ;;  %v14595_v0 = vld [vmem:[#allocation10 + $0xdc4] ss:$24 sps:$4 sm:$0xff]  }
 0x6e5   : > { %14926 = vtanh.f32 %v12599_v26  ;;  %v14593_v1 = vld [vmem:[#allocation10 + $0xdc0] ss:$24 sps:$4 sm:$0xff]   ;;  %v14598_v2 = vld [vmem:[#allocation10 + $0xdf4] ss:$24 sps:$4 sm:$0xff]   ;;  %v14601_v6 = vld [vmem:[#allocation10 + $0xe24] ss:$24 sps:$4 sm:$0xff]  }
 0x6e6   : > { %9140 = vmatpush1.bf16.msra.mxu1 %v14527_v3  ;;  %14928 = vtanh.f32 %v12600_v33  ;;  %v14596_v3 = vld [vmem:[#allocation10 + $0xdf0] ss:$24 sps:$4 sm:$0xff]   ;;  %v14604_v26 = vld [vmem:[#allocation10 + $0xe54] ss:$24 sps:$4 sm:$0xff]  }
 0x6e7   : > { %9141 = vmatprep.subr.bf16.mxu1 %v14535_v7  ;;  %v14599_v7 = vld [vmem:[#allocation10 + $0xe20] ss:$24 sps:$4 sm:$0xff]   ;;  %v14602_v33 = vld [vmem:[#allocation10 + $0xe50] ss:$24 sps:$4 sm:$0xff]  }
 0x6ea   : > { %9142 = vmatpush1.bf16.msra.mxu1 %v14533_v9  ;;  %v14607_v9 = vld [vmem:[#allocation10 + $0xe84] ss:$24 sps:$4 sm:$0xff]  }
 0x6eb   : > { %9143 = vmatprep.subr.bf16.mxu1 %v14541_v43  ;;  %v14605_v43 = vld [vmem:[#allocation10 + $0xe80] ss:$24 sps:$4 sm:$0xff]  }
 0x6ee   : > { %9144 = vmatpush1.bf16.msra.mxu1 %v14539_v40  ;;  %v14610_v40 = vld [vmem:[#allocation10 + $0xeb4] ss:$24 sps:$4 sm:$0xff]  }
 0x6ef   : > { %9145 = vmatprep.subr.bf16.mxu1 %v14547_v36  ;;  %v14927_v13 = vpop.eup %14926  ;;  %v14608_v36 = vld [vmem:[#allocation10 + $0xeb0] ss:$24 sps:$4 sm:$0xff]  }
 0x6f0   : > { %v14929_v14 = vpop.eup %14928  ;;  %v9274_v61 = vpack.c.bf16 %v14927_v13, %v14927_v13  ;;  %v14616_v13 = vld [vmem:[#allocation10 + $0xf14] ss:$24 sps:$4 sm:$0xff]  }
 0x6f1   : > { %v9275_v16 = vpack.c.bf16 %v14929_v14, %v14929_v14  ;;  %v14619_v14 = vld [vmem:[#allocation10 + $0xf44] ss:$24 sps:$4 sm:$0xff]  }
 0x6f2   : > { %9146 = vmatpush1.bf16.msra.mxu1 %v14545_v10  ;;  %v14613_v10 = vld [vmem:[#allocation10 + $0xee4] ss:$24 sps:$4 sm:$0xff]  }
 0x6f3   : > { %9147 = vmatprep.subr.bf16.mxu1 %v14550_v20  ;;  %9984 = vmatprep.mubr.bf16.mxu0 %v9275_v16  ;;  %v14611_v20 = vld [vmem:[#allocation10 + $0xee0] ss:$24 sps:$4 sm:$0xff]   ;;  %v14622_v16 = vld [vmem:[#allocation10 + $0xf74] ss:$24 sps:$4 sm:$0xff]  }
 0x6f4   : > { %9985 = vmatmul.mubr.bf16.vlgmr.msra.gmra.mrb[12].mxu0 %v9274_v61  ;;  %v14620_v61 = vld [vmem:[#allocation10 + $0xf70] ss:$24 sps:$4 sm:$0xff]  }
 0x6f6   : > { %9148 = vmatpush1.bf16.msra.mxu1 %v14548_v27  ;;  %v14614_v27 = vld [vmem:[#allocation10 + $0xf10] ss:$24 sps:$4 sm:$0xff]  }
 0x6f7   : > { %9149 = vmatprep.subr.bf16.mxu1 %v14553_v15  ;;  %v14617_v15 = vld [vmem:[#allocation10 + $0xf40] ss:$24 sps:$4 sm:$0xff]  }
 0x6fa   : > { %9150 = vmatpush1.bf16.msra.mxu1 %v14551_v17  ;;  %v14625_v17 = vld [vmem:[#allocation10 + $0xfa4] ss:$24 sps:$4 sm:$0xff]  }
 0x6fb   : > { %9151 = vmatprep.subr.bf16.mxu1 %v14556_v4  ;;  %v14623_v4 = vld [vmem:[#allocation10 + $0xfa0] ss:$24 sps:$4 sm:$0xff]  }
 0x6fe   : > { %9152 = vmatpush1.bf16.msra.mxu1 %v14554_v18  ;;  %v14628_v18 = vld [vmem:[#allocation10 + $0xfd4] ss:$24 sps:$4 sm:$0xff]  }
 0x6ff   : > { %9153 = vmatprep.subr.bf16.mxu1 %v14559_v38  ;;  %v14626_v38 = vld [vmem:[#allocation10 + $0xfd0] ss:$24 sps:$4 sm:$0xff]  }
 0x702   : > { %9154 = vmatpush1.bf16.msra.mxu1 %v14557_v49  ;;  %v14631_v49 = vld [vmem:[#allocation10 + $0x1004] ss:$24 sps:$4 sm:$0xff]  }
 0x703   : > { %9155 = vmatprep.subr.bf16.mxu1 %v14562_v19  ;;  %v14634_v19 = vld [vmem:[#allocation10 + $0x1034] ss:$24 sps:$4 sm:$0xff]  }
 0x706   : > { %9156 = vmatpush1.bf16.msra.mxu1 %v14560_v21  ;;  %v14637_v21 = vld [vmem:[#allocation10 + $0x1064] ss:$24 sps:$4 sm:$0xff]  }
 0x707   : > { %9157 = vmatprep.subr.bf16.mxu1 %v14565_v22  ;;  %v14635_v22 = vld [vmem:[#allocation10 + $0x1060] ss:$24 sps:$4 sm:$0xff]  }
 0x70a   : > { %9158 = vmatpush1.bf16.msra.mxu1 %v14563_v23  ;;  %v14640_v23 = vld [vmem:[#allocation10 + $0x1094] ss:$24 sps:$4 sm:$0xff]  }
 0x70b   : > { %9170 = vmatprep.subr.bf16.mxu1 %v14568_v24  ;;  %v14638_v24 = vld [vmem:[#allocation10 + $0x1090] ss:$24 sps:$4 sm:$0xff]  }
 0x70d   : > { %9160 = vmatmul.mubr.bf16.vlgmr.msra.gmra.mrb[8].mxu1 %v15955_v29  ;;  %v14581_v29 = vld [vmem:[#allocation10 + $0xd00] ss:$24 sps:$4 sm:$0xff]  }
 0x70e   : > { %9171 = vmatpush1.bf16.msra.mxu1 %v14566_v25  ;;  %9202 = vmatprep.mubr.bf16.mxu1 %v15967_v42  ;;  %v14584_v42 = vld [vmem:[#allocation10 + $0xd30] ss:$24 sps:$4 sm:$0xff]   ;;  %v14643_v25 = vld [vmem:[#allocation10 + $0x10c4] ss:$24 sps:$4 sm:$0xff]  }
 0x70f   : > { %9172 = vmatprep.subr.bf16.mxu1 %v14571_v51  ;;  %v14641_v51 = vld [vmem:[#allocation10 + $0x10c0] ss:$24 sps:$4 sm:$0xff]  }
 0x712   : > { %9173 = vmatpush1.bf16.msra.mxu1 %v14569_v28  ;;  %v14646_v28 = vld [vmem:[#allocation10 + $0x10f4] ss:$24 sps:$4 sm:$0xff]  }
 0x713   : > { %9174 = vmatprep.subr.bf16.mxu1 %v14574_v30  ;;  %v14644_v30 = vld [vmem:[#allocation10 + $0x10f0] ss:$24 sps:$4 sm:$0xff]  }
 0x716   : > { %9175 = vmatpush1.bf16.msra.mxu1 %v14572_v44  ;;  %v14649_v44 = vld [vmem:[#allocation10 + $0x1124] ss:$24 sps:$4 sm:$0xff]  }
 0x717   : > { %9176 = vmatprep.subr.bf16.mxu1 %v14577_v45  ;;  %v14647_v45 = vld [vmem:[#allocation10 + $0x1120] ss:$24 sps:$4 sm:$0xff]  }
 0x71a   : > { %9177 = vmatpush1.bf16.msra.mxu1 %v14575_v50  ;;  %v14652_v50 = vld [vmem:[#allocation10 + $0x1154] ss:$24 sps:$4 sm:$0xff]  }
 0x71b   : > { %9178 = vmatprep.subr.bf16.mxu1 %v14580_v52  ;;  %v14650_v52 = vld [vmem:[#allocation10 + $0x1150] ss:$24 sps:$4 sm:$0xff]  }
 0x71e   : > { %9179 = vmatpush1.bf16.msra.mxu1 %v14578_v31  ;;  %v12604_v31 = vadd.f32 %v16047_v8, %v16033_v57  ;;  %v14667_v57 = vld [vmem:[#allocation14 + $0x114] ss:$8 sps:$4 sm:$0xff]  }
 0x71f   : > { %9180 = vmatprep.subr.bf16.mxu1 %v14583_v39  ;;  %v14655_v39 = vld [vmem:[#allocation10 + $0x1184] ss:$24 sps:$4 sm:$0xff]  }
 0x720   : > { %14930 = vtanh.f32 %v12604_v31  ;;  %v14823_v31 = vld [vmem:[#allocation14 + $0x2a4] ss:$8 sps:$4 sm:$0xff]  }
 0x722   : > { %9181 = vmatpush1.bf16.msra.mxu1 %v14581_v29  ;;  %v14653_v29 = vld [vmem:[#allocation10 + $0x1180] ss:$24 sps:$4 sm:$0xff]  }
 0x723   : > { %9182 = vmatprep.subr.bf16.mxu1 %v14586_v55  ;;  %v14658_v55 = vld [vmem:[#allocation10 + $0x11b4] ss:$24 sps:$4 sm:$0xff]  }
 0x726   : > { %9183 = vmatpush1.bf16.msra.mxu1 %v14584_v42  ;;  %v14656_v42 = vld [vmem:[#allocation10 + $0x11b0] ss:$24 sps:$4 sm:$0xff]  }
 0x727   : > { %9184 = vmatprep.subr.bf16.mxu1 %v14589_v56  ;;  %v14661_v56 = vld [vmem:[#allocation10 + $0x11e4] ss:$24 sps:$4 sm:$0xff]  }
 0x72a   : > { %9185 = vmatpush1.bf16.msra.mxu1 %v14587_v59  ;;  %v14659_v59 = vld [vmem:[#allocation10 + $0x11e0] ss:$24 sps:$4 sm:$0xff]  }
 0x72b   : > { %9186 = vmatprep.subr.bf16.mxu1 %v14592_v60  ;;  %v14664_v60 = vld [vmem:[#allocation14 + $0x104] ss:$8 sps:$4 sm:$0xff]  }
 0x72e   : > { %9187 = vmatpush1.bf16.msra.mxu1 %v14590_v63  ;;  %v14931_v63 = vpop.eup %14930 }
 0x72f   : > { %9188 = vmatprep.subr.bf16.mxu1 %v14595_v0  ;;  %v14662_v0 = vld [vmem:[#allocation14 + $0x100] ss:$8 sps:$4 sm:$0xff]   ;;  %v9277_v8 = vpack.c.bf16 %v14931_v63, %v14931_v63  ;;  %v14703_v63 = vld [vmem:[#allocation14 + $0x1d4] ss:$8 sps:$4 sm:$0xff]  }
 0x732   : > { %9189 = vmatpush1.bf16.msra.mxu1 %v14593_v1  ;;  %v14761_v1 = vld [vmem:[#allocation14 + $0x200] ss:$8 sps:$4 sm:$0xff]  }
 0x733   : > { %9190 = vmatprep.subr.bf16.mxu1 %v14598_v2  ;;  %v14665_v2 = vld [vmem:[#allocation14 + $0x110] ss:$8 sps:$4 sm:$0xff]  }
 0x736   : > { %9191 = vmatpush1.bf16.msra.mxu1 %v14596_v3  ;;  %v14763_v3 = vld [vmem:[#allocation14 + $0x204] ss:$8 sps:$4 sm:$0xff]  }
 0x737   : > { %9192 = vmatprep.subr.bf16.mxu1 %v14601_v6  ;;  %v14670_v6 = vld [vmem:[#allocation14 + $0x124] ss:$8 sps:$4 sm:$0xff]   ;;  %10034 = vmatprep.subr.bf16.mxu0 %v14763_v3 }
 0x738   : > { %10035 = vmatpush1.bf16.msra.mxu0 %v14761_v1  ;;  %v14709_v1 = vld [vmem:[#allocation14 + $0x1f4] ss:$8 sps:$4 sm:$0xff]  }
 0x73a   : > { %9193 = vmatpush1.bf16.msra.mxu1 %v14599_v7  ;;  %v14769_v7 = vld [vmem:[#allocation14 + $0x214] ss:$8 sps:$4 sm:$0xff]  }
 0x73b   : > { %9194 = vmatprep.subr.bf16.mxu1 %v14604_v26  ;;  %v14767_v26 = vld [vmem:[#allocation14 + $0x210] ss:$8 sps:$4 sm:$0xff]   ;;  %10036 = vmatprep.subr.bf16.mxu0 %v14769_v7  ;;  %v14710_v7 = vld [vmem:[#allocation13] ss:$8 sps:$4 sm:$0xff]  }
 0x73c   : > { %10037 = vmatpush1.bf16.msra.mxu0 %v14767_v26 }
 0x73e   : > { %9195 = vmatpush1.bf16.msra.mxu1 %v14602_v33  ;;  %v14668_v33 = vld [vmem:[#allocation14 + $0x120] ss:$8 sps:$4 sm:$0xff]  }
 0x73f   : > { %9196 = vmatprep.subr.bf16.mxu1 %v14607_v9  ;;  %v14673_v9 = vld [vmem:[#allocation14 + $0x134] ss:$8 sps:$4 sm:$0xff]  }
 0x742   : > { %9197 = vmatpush1.bf16.msra.mxu1 %v14605_v43  ;;  %v14775_v43 = vld [vmem:[#allocation14 + $0x224] ss:$8 sps:$4 sm:$0xff]  }
 0x743   : > { %9198 = vmatprep.subr.bf16.mxu1 %v14610_v40  ;;  %v14773_v40 = vld [vmem:[#allocation14 + $0x220] ss:$8 sps:$4 sm:$0xff]   ;;  %10038 = vmatprep.subr.bf16.mxu0 %v14775_v43 }
 0x744   : > { %10039 = vmatpush1.bf16.msra.mxu0 %v14773_v40 }
 0x746   : > { %9199 = vmatpush1.bf16.msra.mxu1 %v14608_v36  ;;  %v14676_v36 = vld [vmem:[#allocation14 + $0x144] ss:$8 sps:$4 sm:$0xff]  }
 0x747   : > { %9200 = vmatprep.subr.bf16.mxu1 %v14613_v10  ;;  %v14781_v10 = vld [vmem:[#allocation14 + $0x234] ss:$8 sps:$4 sm:$0xff]  }
 0x748   : > { %10040 = vmatprep.subr.bf16.mxu0 %v14781_v10  ;;  %v14716_v10 = vld [vmem:[#allocation13 + $0x20] ss:$8 sps:$4 sm:$0xff]  }
 0x74a   : > { %9201 = vmatpush1.bf16.msra.mxu1 %v14611_v20  ;;  %v14779_v20 = vld [vmem:[#allocation14 + $0x230] ss:$8 sps:$4 sm:$0xff]  }
 0x74b   : > { %9213 = vmatprep.subr.bf16.mxu1 %v14616_v13  ;;  %v14674_v13 = vld [vmem:[#allocation14 + $0x140] ss:$8 sps:$4 sm:$0xff]   ;;  %10041 = vmatpush1.bf16.msra.mxu0 %v14779_v20  ;;  %v14721_v20 = vld [vmem:[#allocation13 + $0x34] ss:$8 sps:$4 sm:$0xff]  }
 0x74d   : > { %9203 = vmatmul.mubr.bf16.vlgmr.msra.gmra.mrb[8].mxu1 %v15959_v34  ;;  %v14629_v34 = vld [vmem:[#allocation10 + $0x1000] ss:$24 sps:$4 sm:$0xff]  }
 0x74e   : > { %9214 = vmatpush1.bf16.msra.mxu1 %v14614_v27  ;;  %9245 = vmatprep.mubr.bf16.mxu1 %v15994_v48  ;;  %v14632_v48 = vld [vmem:[#allocation10 + $0x1030] ss:$24 sps:$4 sm:$0xff]   ;;  %v14679_v27 = vld [vmem:[#allocation14 + $0x154] ss:$8 sps:$4 sm:$0xff]  }
 0x74f   : > { %9215 = vmatprep.subr.bf16.mxu1 %v14619_v14  ;;  %v14787_v14 = vld [vmem:[#allocation14 + $0x244] ss:$8 sps:$4 sm:$0xff]  }
 0x750   : > { %10042 = vmatprep.subr.bf16.mxu0 %v14787_v14  ;;  %v14722_v14 = vld [vmem:[#allocation13 + $0x40] ss:$8 sps:$4 sm:$0xff]  }
 0x752   : > { %9216 = vmatpush1.bf16.msra.mxu1 %v14617_v15  ;;  %v14785_v15 = vld [vmem:[#allocation14 + $0x240] ss:$8 sps:$4 sm:$0xff]  }
 0x753   : > { %9217 = vmatprep.subr.bf16.mxu1 %v14622_v16  ;;  %v14677_v16 = vld [vmem:[#allocation14 + $0x150] ss:$8 sps:$4 sm:$0xff]   ;;  %10043 = vmatpush1.bf16.msra.mxu0 %v14785_v15  ;;  %v14727_v15 = vld [vmem:[#allocation13 + $0x54] ss:$8 sps:$4 sm:$0xff]  }
 0x756   : > { %9218 = vmatpush1.bf16.msra.mxu1 %v14620_v61  ;;  %v14682_v61 = vld [vmem:[#allocation14 + $0x164] ss:$8 sps:$4 sm:$0xff]  }
 0x757   : > { %9219 = vmatprep.subr.bf16.mxu1 %v14625_v17  ;;  %v14793_v17 = vld [vmem:[#allocation14 + $0x254] ss:$8 sps:$4 sm:$0xff]  }
 0x758   : > { %10044 = vmatprep.subr.bf16.mxu0 %v14793_v17  ;;  %v14728_v17 = vld [vmem:[#allocation13 + $0x60] ss:$8 sps:$4 sm:$0xff]  }
 0x75a   : > { %9220 = vmatpush1.bf16.msra.mxu1 %v14623_v4  ;;  %v14791_v4 = vld [vmem:[#allocation14 + $0x250] ss:$8 sps:$4 sm:$0xff]  }
 0x75b   : > { %9221 = vmatprep.subr.bf16.mxu1 %v14628_v18  ;;  %v14680_v18 = vld [vmem:[#allocation14 + $0x160] ss:$8 sps:$4 sm:$0xff]   ;;  %10045 = vmatpush1.bf16.msra.mxu0 %v14791_v4  ;;  %v14733_v4 = vld [vmem:[#allocation13 + $0x74] ss:$8 sps:$4 sm:$0xff]  }
 0x75e   : > { %9222 = vmatpush1.bf16.msra.mxu1 %v14626_v38  ;;  %v14685_v38 = vld [vmem:[#allocation14 + $0x174] ss:$8 sps:$4 sm:$0xff]  }
 0x75f   : > { %9223 = vmatprep.subr.bf16.mxu1 %v14631_v49  ;;  %v14799_v49 = vld [vmem:[#allocation14 + $0x264] ss:$8 sps:$4 sm:$0xff]  }
 0x760   : > { %10046 = vmatprep.subr.bf16.mxu0 %v14799_v49  ;;  %v14833_v49 = vld [vmem:[#allocation14 + $0x2c0] ss:$8 sps:$4 sm:$0xff]  }
 0x762   : > { %9224 = vmatpush1.bf16.msra.mxu1 %v14629_v34  ;;  %v14797_v34 = vld [vmem:[#allocation14 + $0x260] ss:$8 sps:$4 sm:$0xff]  }
 0x763   : > { %9225 = vmatprep.subr.bf16.mxu1 %v14634_v19  ;;  %v14683_v19 = vld [vmem:[#allocation14 + $0x170] ss:$8 sps:$4 sm:$0xff]   ;;  %10047 = vmatpush1.bf16.msra.mxu0 %v14797_v34  ;;  %v14736_v34 = vld [vmem:[#allocation13 + $0x84] ss:$8 sps:$4 sm:$0xff]  }
 0x766   : > { %9226 = vmatpush1.bf16.msra.mxu1 %v14632_v48  ;;  %v14688_v48 = vld [vmem:[#allocation14 + $0x184] ss:$8 sps:$4 sm:$0xff]  }
 0x767   : > { %9227 = vmatprep.subr.bf16.mxu1 %v14637_v21  ;;  %v14805_v21 = vld [vmem:[#allocation14 + $0x274] ss:$8 sps:$4 sm:$0xff]  }
 0x768   : > { %10048 = vmatprep.subr.bf16.mxu0 %v14805_v21  ;;  %v14839_v21 = vld [vmem:[#allocation14 + $0x2d0] ss:$8 sps:$4 sm:$0xff]  }
 0x76a   : > { %9228 = vmatpush1.bf16.msra.mxu1 %v14635_v22  ;;  %v14803_v22 = vld [vmem:[#allocation14 + $0x270] ss:$8 sps:$4 sm:$0xff]  }
 0x76b   : > { %9229 = vmatprep.subr.bf16.mxu1 %v14640_v23  ;;  %v14686_v23 = vld [vmem:[#allocation14 + $0x180] ss:$8 sps:$4 sm:$0xff]   ;;  %10049 = vmatpush1.bf16.msra.mxu0 %v14803_v22  ;;  %v14739_v22 = vld [vmem:[#allocation13 + $0x94] ss:$8 sps:$4 sm:$0xff]  }
 0x76e   : > { %9230 = vmatpush1.bf16.msra.mxu1 %v14638_v24  ;;  %v14691_v24 = vld [vmem:[#allocation14 + $0x194] ss:$8 sps:$4 sm:$0xff]  }
 0x76f   : > { %9231 = vmatprep.subr.bf16.mxu1 %v14643_v25  ;;  %v14811_v25 = vld [vmem:[#allocation14 + $0x284] ss:$8 sps:$4 sm:$0xff]  }
 0x770   : > { %10050 = vmatprep.subr.bf16.mxu0 %v14811_v25  ;;  %v14845_v25 = vld [vmem:[#allocation14 + $0x2e0] ss:$8 sps:$4 sm:$0xff]  }
 0x772   : > { %9232 = vmatpush1.bf16.msra.mxu1 %v14641_v51  ;;  %v14809_v51 = vld [vmem:[#allocation14 + $0x280] ss:$8 sps:$4 sm:$0xff]  }
 0x773   : > { %9233 = vmatprep.subr.bf16.mxu1 %v14646_v28  ;;  %v14689_v28 = vld [vmem:[#allocation14 + $0x190] ss:$8 sps:$4 sm:$0xff]   ;;  %10051 = vmatpush1.bf16.msra.mxu0 %v14809_v51  ;;  %v14742_v51 = vld [vmem:[#allocation13 + $0xa4] ss:$8 sps:$4 sm:$0xff]  }
 0x776   : > { %9234 = vmatpush1.bf16.msra.mxu1 %v14644_v30  ;;  %v14694_v30 = vld [vmem:[#allocation14 + $0x1a4] ss:$8 sps:$4 sm:$0xff]  }
 0x777   : > { %9235 = vmatprep.subr.bf16.mxu1 %v14649_v44  ;;  %v14817_v44 = vld [vmem:[#allocation14 + $0x294] ss:$8 sps:$4 sm:$0xff]  }
 0x778   : > { %10052 = vmatprep.subr.bf16.mxu0 %v14817_v44  ;;  %v14740_v44 = vld [vmem:[#allocation13 + $0xa0] ss:$8 sps:$4 sm:$0xff]  }
 0x77a   : > { %9236 = vmatpush1.bf16.msra.mxu1 %v14647_v45  ;;  %v14815_v45 = vld [vmem:[#allocation14 + $0x290] ss:$8 sps:$4 sm:$0xff]  }
 0x77b   : > { %9237 = vmatprep.subr.bf16.mxu1 %v14652_v50  ;;  %v14692_v50 = vld [vmem:[#allocation14 + $0x1a0] ss:$8 sps:$4 sm:$0xff]   ;;  %10053 = vmatpush1.bf16.msra.mxu0 %v14815_v45  ;;  %v14745_v45 = vld [vmem:[#allocation13 + $0xb4] ss:$8 sps:$4 sm:$0xff]  }
 0x77c   : > { %10054 = vmatprep.subr.bf16.mxu0 %v14823_v31  ;;  %v14748_v31 = vld [vmem:[#allocation13 + $0xc4] ss:$8 sps:$4 sm:$0xff]  }
 0x77e   : > { %9238 = vmatpush1.bf16.msra.mxu1 %v14650_v52  ;;  %v14697_v52 = vld [vmem:[#allocation14 + $0x1b4] ss:$8 sps:$4 sm:$0xff]  }
 0x77f   : > { %9239 = vmatprep.subr.bf16.mxu1 %v14655_v39  ;;  %v14821_v39 = vld [vmem:[#allocation14 + $0x2a0] ss:$8 sps:$4 sm:$0xff]  }
 0x780   : > { %10055 = vmatpush1.bf16.msra.mxu0 %v14821_v39  ;;  %v14746_v39 = vld [vmem:[#allocation13 + $0xc0] ss:$8 sps:$4 sm:$0xff]  }
 0x782   : > { %9240 = vmatpush1.bf16.msra.mxu1 %v14653_v29  ;;  %v14695_v29 = vld [vmem:[#allocation14 + $0x1b0] ss:$8 sps:$4 sm:$0xff]  }
 0x783   : > { %9241 = vmatprep.subr.bf16.mxu1 %v14658_v55  ;;  %v14700_v55 = vld [vmem:[#allocation14 + $0x1c4] ss:$8 sps:$4 sm:$0xff]  }
 0x786   : > { %9242 = vmatpush1.bf16.msra.mxu1 %v14656_v42  ;;  %v14829_v42 = vld [vmem:[#allocation14 + $0x2b4] ss:$8 sps:$4 sm:$0xff]  }
 0x787   : > { %9243 = vmatprep.subr.bf16.mxu1 %v14661_v56  ;;  %v14827_v56 = vld [vmem:[#allocation14 + $0x2b0] ss:$8 sps:$4 sm:$0xff]   ;;  %10056 = vmatprep.subr.bf16.mxu0 %v14829_v42  ;;  %v14754_v42 = vld [vmem:[#allocation13 + $0xe4] ss:$8 sps:$4 sm:$0xff]  }
 0x788   : > { %10057 = vmatpush1.bf16.msra.mxu0 %v14827_v56  ;;  %v14752_v56 = vld [vmem:[#allocation13 + $0xe0] ss:$8 sps:$4 sm:$0xff]  }
 0x78a   : > { %9244 = vmatpush1.bf16.msra.mxu1 %v14659_v59  ;;  %v12603_v59 = vadd.f32 %v16045_v47, %v16026_v54  ;;  %v14712_v54 = vld [vmem:[#allocation13 + $0x4] ss:$8 sps:$4 sm:$0xff]  }
 0x78b   : > { %9993 = vmatprep.subr.bf16.mxu1 %v14664_v60  ;;  %v14698_v60 = vld [vmem:[#allocation14 + $0x1c0] ss:$8 sps:$4 sm:$0xff]  }
 0x78c   : > { %14932 = vtanh.f32 %v12603_v59  ;;  %v14757_v59 = vld [vmem:[#allocation13 + $0xf4] ss:$8 sps:$4 sm:$0xff]  }
 0x78d   : > { %9246 = vmatmul.mubr.bf16.vlgmr.msra.gmra.mrb[8].mxu1 %v15990_v35  ;;  %v14671_v35 = vld [vmem:[#allocation14 + $0x130] ss:$8 sps:$4 sm:$0xff]   ;;  %14934 = vtanh.f32 %v16040_v46  ;;  %v14715_v46 = vld [vmem:[#allocation13 + $0x14] ss:$8 sps:$4 sm:$0xff]  }
 0x78e   : > { %9994 = vmatpush1.bf16.msra.mxu1 %v14662_v0  ;;  %10025 = vmatprep.mubr.bf16.mxu1 %v9277_v8  ;;  %v14701_v0 = vld [vmem:[#allocation14 + $0x1d0] ss:$8 sps:$4 sm:$0xff]   ;;  %v14704_v8 = vld [vmem:[#allocation14 + $0x1e0] ss:$8 sps:$4 sm:$0xff]   ;;  %14936 = vtanh.f32 %v16035_v62 }
 0x78f   : > { %9995 = vmatprep.subr.bf16.mxu1 %v14667_v57  ;;  %v14706_v57 = vld [vmem:[#allocation14 + $0x1e4] ss:$8 sps:$4 sm:$0xff]   ;;  %v14764_v62 = vld [vmem:[#allocation13 + $0x210] ss:$8 sps:$4 sm:$0xff]   ;;  %14938 = vtanh.f32 %v16043_v5 }
 0x792   : > { %9996 = vmatpush1.bf16.msra.mxu1 %v14665_v2  ;;  %v14707_v2 = vld [vmem:[#allocation14 + $0x1f0] ss:$8 sps:$4 sm:$0xff]  }
 0x793   : > { %9997 = vmatprep.subr.bf16.mxu1 %v14670_v6 }
 0x796   : > { %9998 = vmatpush1.bf16.msra.mxu1 %v14668_v33  ;;  %v14933_v47 = vpop.eup %14932 }
 0x797   : > { %9999 = vmatprep.subr.bf16.mxu1 %v14673_v9  ;;  %v14935_v3 = vpop.eup %14934  ;;  %v9276_v26 = vpack.c.bf16 %v14933_v47, %v14933_v47  ;;  %v14778_v47 = vld [vmem:[#allocation13 + $0x234] ss:$8 sps:$4 sm:$0xff]  }
 0x798   : > { %v9269_v9 = vpack.c.bf16 %v14935_v3, %v14935_v3  ;;  %v14776_v3 = vld [vmem:[#allocation13 + $0x230] ss:$8 sps:$4 sm:$0xff]  }
 0x79a   : > { %10000 = vmatpush1.bf16.msra.mxu1 %v14671_v35  ;;  %v14713_v35 = vld [vmem:[#allocation13 + $0x10] ss:$8 sps:$4 sm:$0xff]  }
 0x79b   : > { %10001 = vmatprep.subr.bf16.mxu1 %v14676_v36  ;;  %v14718_v36 = vld [vmem:[#allocation13 + $0x24] ss:$8 sps:$4 sm:$0xff]  }
 0x79e   : > { %10002 = vmatpush1.bf16.msra.mxu1 %v14674_v13  ;;  %v14719_v13 = vld [vmem:[#allocation13 + $0x30] ss:$8 sps:$4 sm:$0xff]  }
 0x79f   : > { %10003 = vmatprep.subr.bf16.mxu1 %v14679_v27  ;;  %v14724_v27 = vld [vmem:[#allocation13 + $0x44] ss:$8 sps:$4 sm:$0xff]  }
 0x7a2   : > { %10004 = vmatpush1.bf16.msra.mxu1 %v14677_v16  ;;  %v14725_v16 = vld [vmem:[#allocation13 + $0x50] ss:$8 sps:$4 sm:$0xff]  }
 0x7a3   : > { %10005 = vmatprep.subr.bf16.mxu1 %v14682_v61  ;;  %v14730_v61 = vld [vmem:[#allocation13 + $0x64] ss:$8 sps:$4 sm:$0xff]  }
 0x7a6   : > { %10006 = vmatpush1.bf16.msra.mxu1 %v14680_v18  ;;  %v14835_v18 = vld [vmem:[#allocation14 + $0x2c4] ss:$8 sps:$4 sm:$0xff]  }
 0x7a7   : > { %10007 = vmatprep.subr.bf16.mxu1 %v14685_v38  ;;  %v14731_v38 = vld [vmem:[#allocation13 + $0x70] ss:$8 sps:$4 sm:$0xff]   ;;  %10058 = vmatprep.subr.bf16.mxu0 %v14835_v18  ;;  %v14838_v18 = vld [vmem:[#allocation13 + $0x2d4] ss:$8 sps:$4 sm:$0xff]  }
 0x7a8   : > { %10059 = vmatpush1.bf16.msra.mxu0 %v14833_v49  ;;  %v14844_v49 = vld [vmem:[#allocation13 + $0x2e4] ss:$8 sps:$4 sm:$0xff]  }
 0x7aa   : > { %10008 = vmatpush1.bf16.msra.mxu1 %v14683_v19  ;;  %v14841_v19 = vld [vmem:[#allocation14 + $0x2d4] ss:$8 sps:$4 sm:$0xff]  }
 0x7ab   : > { %10009 = vmatprep.subr.bf16.mxu1 %v14688_v48  ;;  %v14734_v48 = vld [vmem:[#allocation13 + $0x80] ss:$8 sps:$4 sm:$0xff]   ;;  %10060 = vmatprep.subr.bf16.mxu0 %v14841_v19  ;;  %v14850_v19 = vld [vmem:[#allocation13 + $0x2f4] ss:$8 sps:$4 sm:$0xff]  }
 0x7ac   : > { %10061 = vmatpush1.bf16.msra.mxu0 %v14839_v21  ;;  %v5591_v21 = vrot.slane %v16019_v53, %v1304_v11 }
 0x7ae   : > { %10010 = vmatpush1.bf16.msra.mxu1 %v14686_v23  ;;  %v14847_v23 = vld [vmem:[#allocation14 + $0x2e4] ss:$8 sps:$4 sm:$0xff]  }
 0x7af   : > { %10011 = vmatprep.subr.bf16.mxu1 %v14691_v24  ;;  %v14737_v24 = vld [vmem:[#allocation13 + $0x90] ss:$8 sps:$4 sm:$0xff]   ;;  %10062 = vmatprep.subr.bf16.mxu0 %v14847_v23 }
 0x7b0   : > { %10063 = vmatpush1.bf16.msra.mxu0 %v14845_v25 }
 0x7b2   : > { %10012 = vmatpush1.bf16.msra.mxu1 %v14689_v28  ;;  %v14851_v28 = vld [vmem:[#allocation14 + $0x2f0] ss:$8 sps:$4 sm:$0xff]  }
 0x7b3   : > { %10013 = vmatprep.subr.bf16.mxu1 %v14694_v30  ;;  %v14853_v30 = vld [vmem:[#allocation14 + $0x2f4] ss:$8 sps:$4 sm:$0xff]  }
 0x7b4   : > { %10064 = vmatprep.subr.bf16.mxu0 %v14853_v30 }
 0x7b5   : > { %10065 = vmatpush1.bf16.msra.mxu0 %v14851_v28 }
 0x7b6   : > { %10014 = vmatpush1.bf16.msra.mxu1 %v14692_v50  ;;  %v14856_v50 = vld [vmem:[#allocation13 + $0x104] ss:$8 sps:$4 sm:$0xff]  }
 0x7b7   : > { %10015 = vmatprep.subr.bf16.mxu1 %v14697_v52  ;;  %10596 = vmatprep.subr.bf16.mxu0 %v14856_v50  ;;  %v14743_v52 = vld [vmem:[#allocation13 + $0xb0] ss:$8 sps:$4 sm:$0xff]  }
 0x7ba   : > { %10016 = vmatpush1.bf16.msra.mxu1 %v14695_v29  ;;  %v14751_v29 = vld [vmem:[#allocation13 + $0xd4] ss:$8 sps:$4 sm:$0xff]  }
 0x7bb   : > { %10017 = vmatprep.subr.bf16.mxu1 %v14700_v55  ;;  %v14749_v55 = vld [vmem:[#allocation13 + $0xd0] ss:$8 sps:$4 sm:$0xff]  }
 0x7be   : > { %10018 = vmatpush1.bf16.msra.mxu1 %v14698_v60  ;;  %v14755_v60 = vld [vmem:[#allocation13 + $0xf0] ss:$8 sps:$4 sm:$0xff]  }
 0x7bf   : > { %10019 = vmatprep.subr.bf16.mxu1 %v14703_v63  ;;  %v14760_v63 = vld [vmem:[#allocation13 + $0x204] ss:$8 sps:$4 sm:$0xff]  }
 0x7c2   : > { %10020 = vmatpush1.bf16.msra.mxu1 %v14701_v0  ;;  %v14937_v0 = vpop.eup %14936 }
 0x7c3   : > { %10021 = vmatprep.subr.bf16.mxu1 %v14706_v57  ;;  %v14758_v57 = vld [vmem:[#allocation13 + $0x200] ss:$8 sps:$4 sm:$0xff]   ;;  %v14939_v50 = vpop.eup %14938 }
 0x7c6   : > { %10022 = vmatpush1.bf16.msra.mxu1 %v14704_v8  ;;  %v9268_v8 = vpack.c.bf16 %v14937_v0, %v14937_v0  ;;  %v14863_v0 = vld [vmem:[#allocation13 + $0x130] ss:$8 sps:$4 sm:$0xff]  }
 0x7c7   : > { %10023 = vmatprep.subr.bf16.mxu1 %v14709_v1  ;;  %v16059_v6 = vpop.f32.mrb[12].mxu0  ;;  %v14766_v1 = vld [vmem:[#allocation13 + $0x214] ss:$8 sps:$4 sm:$0xff]  }
 0x7c8   : > { %v16061_v33 = vpop.f32.mrb[13].mxu0 }
 0x7c9   : > { %v9990_v43 = vpop.f32.mrb[14].mxu0 }
 0x7ca   : > { %10024 = vmatpush1.bf16.msra.mxu1 %v14707_v2  ;;  %v9991_v40 = vpop.f32.mrb[15].mxu0  ;;  %v14772_v2 = vld [vmem:[#allocation13 + $0x224] ss:$8 sps:$4 sm:$0xff]  }
 0x7cb   : > { %10555 = vmatprep.subr.bf16.mxu1 %v14712_v54  ;;  %v14770_v54 = vld [vmem:[#allocation13 + $0x220] ss:$8 sps:$4 sm:$0xff]   ;;  %v14796_v43 = vld [vmem:[#allocation13 + $0x264] ss:$8 sps:$4 sm:$0xff]  }
 0x7cc   : > { %v14794_v40 = vld [vmem:[#allocation13 + $0x260] ss:$8 sps:$4 sm:$0xff]  }
 0x7cd   : > { %10026 = vmatmul.mubr.bf16.vlgmr.msra.gmra.mrb[12].mxu1 %v9276_v26  ;;  %v14782_v26 = vld [vmem:[#allocation13 + $0x240] ss:$8 sps:$4 sm:$0xff]  }
 0x7ce   : > { %10556 = vmatpush1.bf16.msra.mxu1 %v14710_v7  ;;  %10587 = vmatprep.mubr.bf16.mxu1 %v9269_v9  ;;  %v14784_v7 = vld [vmem:[#allocation13 + $0x244] ss:$8 sps:$4 sm:$0xff]   ;;  %v14788_v9 = vld [vmem:[#allocation13 + $0x250] ss:$8 sps:$4 sm:$0xff]  }
 0x7cf   : > { %10557 = vmatprep.subr.bf16.mxu1 %v14715_v46  ;;  %v14790_v46 = vld [vmem:[#allocation13 + $0x254] ss:$8 sps:$4 sm:$0xff]  }
 0x7d2   : > { %10558 = vmatpush1.bf16.msra.mxu1 %v14713_v35  ;;  %v14802_v35 = vld [vmem:[#allocation13 + $0x274] ss:$8 sps:$4 sm:$0xff]  }
 0x7d3   : > { %10559 = vmatprep.subr.bf16.mxu1 %v14718_v36  ;;  %v14800_v36 = vld [vmem:[#allocation13 + $0x270] ss:$8 sps:$4 sm:$0xff]  }
 0x7d6   : > { %10560 = vmatpush1.bf16.msra.mxu1 %v14716_v10  ;;  %v14808_v10 = vld [vmem:[#allocation13 + $0x284] ss:$8 sps:$4 sm:$0xff]  }
 0x7d7   : > { %10561 = vmatprep.subr.bf16.mxu1 %v14721_v20  ;;  %v14806_v20 = vld [vmem:[#allocation13 + $0x280] ss:$8 sps:$4 sm:$0xff]  }
 0x7da   : > { %10562 = vmatpush1.bf16.msra.mxu1 %v14719_v13  ;;  %v14814_v13 = vld [vmem:[#allocation13 + $0x294] ss:$8 sps:$4 sm:$0xff]  }
 0x7db   : > { %10563 = vmatprep.subr.bf16.mxu1 %v14724_v27  ;;  %v14812_v27 = vld [vmem:[#allocation13 + $0x290] ss:$8 sps:$4 sm:$0xff]  }
 0x7de   : > { %10564 = vmatpush1.bf16.msra.mxu1 %v14722_v14  ;;  %v14820_v14 = vld [vmem:[#allocation13 + $0x2a4] ss:$8 sps:$4 sm:$0xff]  }
 0x7df   : > { %10565 = vmatprep.subr.bf16.mxu1 %v14727_v15  ;;  %v14818_v15 = vld [vmem:[#allocation13 + $0x2a0] ss:$8 sps:$4 sm:$0xff]  }
 0x7e2   : > { %10566 = vmatpush1.bf16.msra.mxu1 %v14725_v16  ;;  %v14826_v16 = vld [vmem:[#allocation13 + $0x2b4] ss:$8 sps:$4 sm:$0xff]  }
 0x7e3   : > { %10567 = vmatprep.subr.bf16.mxu1 %v14730_v61  ;;  %v14824_v61 = vld [vmem:[#allocation13 + $0x2b0] ss:$8 sps:$4 sm:$0xff]  }
 0x7e6   : > { %10568 = vmatpush1.bf16.msra.mxu1 %v14728_v17  ;;  %v14832_v17 = vld [vmem:[#allocation13 + $0x2c4] ss:$8 sps:$4 sm:$0xff]  }
 0x7e7   : > { %10569 = vmatprep.subr.bf16.mxu1 %v14733_v4  ;;  %v14830_v4 = vld [vmem:[#allocation13 + $0x2c0] ss:$8 sps:$4 sm:$0xff]  }
 0x7ea   : > { %10570 = vmatpush1.bf16.msra.mxu1 %v14731_v38  ;;  %v14836_v38 = vld [vmem:[#allocation13 + $0x2d0] ss:$8 sps:$4 sm:$0xff]  }
 0x7eb   : > { %10571 = vmatprep.subr.bf16.mxu1 %v14736_v34  ;;  %v14842_v34 = vld [vmem:[#allocation13 + $0x2e0] ss:$8 sps:$4 sm:$0xff]  }
 0x7ee   : > { %10572 = vmatpush1.bf16.msra.mxu1 %v14734_v48  ;;  %v14848_v48 = vld [vmem:[#allocation13 + $0x2f0] ss:$8 sps:$4 sm:$0xff]  }
 0x7ef   : > { %10573 = vmatprep.subr.bf16.mxu1 %v14739_v22  ;;  %v5595_v22 = vrot.slane %v16019_v53, %v1308_v58 }
 0x7f2   : > { %10574 = vmatpush1.bf16.msra.mxu1 %v14737_v24 }
 0x7f3   : > { %10575 = vmatprep.subr.bf16.mxu1 %v14742_v51 }
 0x7f6   : > { %10576 = vmatpush1.bf16.msra.mxu1 %v14740_v44 }
 0x7f7   : > { %10577 = vmatprep.subr.bf16.mxu1 %v14745_v45 }
 0x7fa   : > { %10578 = vmatpush1.bf16.msra.mxu1 %v14743_v52 }
 0x7fb   : > { %10579 = vmatprep.subr.bf16.mxu1 %v14748_v31 }
 0x7fe   : > { %10580 = vmatpush1.bf16.msra.mxu1 %v14746_v39 }
 0x7ff   : > { %10581 = vmatprep.subr.bf16.mxu1 %v14751_v29  ;;  %v14854_v29 = vld [vmem:[#allocation13 + $0x100] ss:$8 sps:$4 sm:$0xff]  }
 0x802   : > { %10582 = vmatpush1.bf16.msra.mxu1 %v14749_v55  ;;  %v14859_v55 = vld [vmem:[#allocation13 + $0x114] ss:$8 sps:$4 sm:$0xff]  }
 0x803   : > { %10583 = vmatprep.subr.bf16.mxu1 %v14754_v42  ;;  %v9271_v42 = vpack.c.bf16 %v14939_v50, %v14939_v50 }
 0x806   : > { %10584 = vmatpush1.bf16.msra.mxu1 %v14752_v56  ;;  %v14857_v56 = vld [vmem:[#allocation13 + $0x110] ss:$8 sps:$4 sm:$0xff]  }
 0x807   : > { %10585 = vmatprep.subr.bf16.mxu1 %v14757_v59  ;;  %v14862_v59 = vld [vmem:[#allocation13 + $0x124] ss:$8 sps:$4 sm:$0xff]  }
 0x80a   : > { %10586 = vmatpush1.bf16.msra.mxu1 %v14755_v60  ;;  %v14860_v60 = vld [vmem:[#allocation13 + $0x120] ss:$8 sps:$4 sm:$0xff]  }
 0x80b   : > { %10637 = vmatprep.subr.bf16.mxu1 %v14760_v63  ;;  %v14865_v63 = vld [vmem:[#allocation13 + $0x134] ss:$8 sps:$4 sm:$0xff]  }
 0x80d   : > { %10588 = vmatmul.mubr.bf16.vlgmr.msra.gmra.mrb[16].mxu1 %v9268_v8  ;;  %v14866_v8 = vld [vmem:[#allocation13 + $0x140] ss:$8 sps:$4 sm:$0xff]  }
 0x80e   : > { %10638 = vmatpush1.bf16.msra.mxu1 %v14758_v57  ;;  %v14868_v57 = vld [vmem:[#allocation13 + $0x144] ss:$8 sps:$4 sm:$0xff]  }
 0x80f   : > { %10639 = vmatprep.subr.bf16.mxu1 %v14766_v1  ;;  %v14871_v1 = vld [vmem:[#allocation13 + $0x154] ss:$8 sps:$4 sm:$0xff]  }
 0x812   : > { %10640 = vmatpush1.bf16.msra.mxu1 %v14764_v62  ;;  %v14869_v62 = vld [vmem:[#allocation13 + $0x150] ss:$8 sps:$4 sm:$0xff]  }
 0x813   : > { %10641 = vmatprep.subr.bf16.mxu1 %v14772_v2  ;;  %v14874_v2 = vld [vmem:[#allocation13 + $0x164] ss:$8 sps:$4 sm:$0xff]  }
 0x816   : > { %10642 = vmatpush1.bf16.msra.mxu1 %v14770_v54  ;;  %v14872_v54 = vld [vmem:[#allocation13 + $0x160] ss:$8 sps:$4 sm:$0xff]  }
 0x817   : > { %10643 = vmatprep.subr.bf16.mxu1 %v14778_v47  ;;  %v14877_v47 = vld [vmem:[#allocation13 + $0x174] ss:$8 sps:$4 sm:$0xff]  }
 0x81a   : > { %10644 = vmatpush1.bf16.msra.mxu1 %v14776_v3  ;;  %v14875_v3 = vld [vmem:[#allocation13 + $0x170] ss:$8 sps:$4 sm:$0xff]  }
 0x81b   : > { %10645 = vmatprep.subr.bf16.mxu1 %v14784_v7  ;;  %v14880_v7 = vld [vmem:[#allocation13 + $0x184] ss:$8 sps:$4 sm:$0xff]  }
 0x81e   : > { %10646 = vmatpush1.bf16.msra.mxu1 %v14782_v26  ;;  %v14878_v26 = vld [vmem:[#allocation13 + $0x180] ss:$8 sps:$4 sm:$0xff]  }
 0x81f   : > { %10647 = vmatprep.subr.bf16.mxu1 %v14790_v46  ;;  %v14883_v46 = vld [vmem:[#allocation13 + $0x194] ss:$8 sps:$4 sm:$0xff]  }
 0x822   : > { %10648 = vmatpush1.bf16.msra.mxu1 %v14788_v9  ;;  %v14881_v9 = vld [vmem:[#allocation13 + $0x190] ss:$8 sps:$4 sm:$0xff]  }
 0x823   : > { %10649 = vmatprep.subr.bf16.mxu1 %v14796_v43  ;;  %v14886_v43 = vld [vmem:[#allocation13 + $0x1a4] ss:$8 sps:$4 sm:$0xff]  }
 0x826   : > { %10650 = vmatpush1.bf16.msra.mxu1 %v14794_v40  ;;  %v14884_v40 = vld [vmem:[#allocation13 + $0x1a0] ss:$8 sps:$4 sm:$0xff]  }
 0x827   : > { %10651 = vmatprep.subr.bf16.mxu1 %v14802_v35  ;;  %v14889_v35 = vld [vmem:[#allocation13 + $0x1b4] ss:$8 sps:$4 sm:$0xff]  }
 0x82a   : > { %10652 = vmatpush1.bf16.msra.mxu1 %v14800_v36  ;;  %v14887_v36 = vld [vmem:[#allocation13 + $0x1b0] ss:$8 sps:$4 sm:$0xff]  }
 0x82b   : > { %10653 = vmatprep.subr.bf16.mxu1 %v14808_v10  ;;  %v14892_v10 = vld [vmem:[#allocation13 + $0x1c4] ss:$8 sps:$4 sm:$0xff]  }
 0x82e   : > { %10654 = vmatpush1.bf16.msra.mxu1 %v14806_v20 }
 0x82f   : > { %10655 = vmatprep.subr.bf16.mxu1 %v14814_v13 }
 0x832   : > { %10656 = vmatpush1.bf16.msra.mxu1 %v14812_v27 }
 0x833   : > { %10657 = vmatprep.subr.bf16.mxu1 %v14820_v14  ;;  %v14890_v14 = vld [vmem:[#allocation13 + $0x1c0] ss:$8 sps:$4 sm:$0xff]  }
 0x836   : > { %10658 = vmatpush1.bf16.msra.mxu1 %v14818_v15 }
 0x837   : > { %10659 = vmatprep.subr.bf16.mxu1 %v14826_v16 }
 0x83a   : > { %10660 = vmatpush1.bf16.msra.mxu1 %v14824_v61  ;;  %v14895_v61 = vld [vmem:[#allocation13 + $0x1d4] ss:$8 sps:$4 sm:$0xff]  }
 0x83b   : > { %10661 = vmatprep.subr.bf16.mxu1 %v14832_v17 }
 0x83e   : > { %10662 = vmatpush1.bf16.msra.mxu1 %v14830_v4  ;;  %v14893_v4 = vld [vmem:[#allocation13 + $0x1d0] ss:$8 sps:$4 sm:$0xff]  }
 0x83f   : > { %10663 = vmatprep.subr.bf16.mxu1 %v14838_v18  ;;  %v14898_v18 = vld [vmem:[#allocation13 + $0x1e4] ss:$8 sps:$4 sm:$0xff]  }
 0x842   : > { %10664 = vmatpush1.bf16.msra.mxu1 %v14836_v38  ;;  %v14896_v38 = vld [vmem:[#allocation13 + $0x1e0] ss:$8 sps:$4 sm:$0xff]  }
 0x843   : > { %10665 = vmatprep.subr.bf16.mxu1 %v14844_v49  ;;  %v14899_v49 = vld [vmem:[#allocation13 + $0x1f0] ss:$8 sps:$4 sm:$0xff]  }
 0x846   : > { %10666 = vmatpush1.bf16.msra.mxu1 %v14842_v34 }
 0x847   : > { %10667 = vmatprep.subr.bf16.mxu1 %v14850_v19  ;;  %v10710_v19 = vld [vmem:[%s16285_s30 + $0x80] sm:$0xff] }
 0x84a   : > { %10668 = vmatpush1.bf16.msra.mxu1 %v14848_v48  ;;  %v10694_v48 = vld [vmem:[%s16285_s30] sm:$0xff] }
 0x860   : > { %v9247_v23 = vpop.f32.mrb[8].mxu1 }
 0x861   : > { %v12605_v24 = vadd.f32 %v9247_v23, %v5591_v21  ;;  %v9249_v25 = vpop.f32.mrb[9].mxu1  ;;  %v10712_v23 = vld [vmem:[%s16285_s30 + $0x90] sm:$0xff] }
 0x862   : > { %v12606_v51 = vadd.f32 %v9249_v25, %v5595_v22  ;;  %v9251_v28 = vpop.f32.mrb[10].mxu1 }
 0x863   : > { %14940 = vtanh.f32 %v12605_v24  ;;  %v12607_v30 = vadd.f32 %v9251_v28, %v5591_v21  ;;  %v9253_v44 = vpop.f32.mrb[11].mxu1  ;;  %v10713_v24 = vld [vmem:[%s16285_s30 + $0x98] sm:$0xff]  ;;  %v10696_v28 = vld [vmem:[%s16285_s30 + $0x10] sm:$0xff] }
 0x864   : > { %14942 = vtanh.f32 %v12606_v51  ;;  %v12608_v45 = vadd.f32 %v9253_v44, %v5595_v22  ;;  %v10695_v22 = vld [vmem:[%s16285_s30 + $0x8] sm:$0xff]  ;;  %v12545_v51 = vpack.c.bf16 %v10713_v24, %v10712_v23  ;;  %v10714_v44 = vld [vmem:[%s16285_s30 + $0xa0] sm:$0xff] }
 0x865   : > { %14944 = vtanh.f32 %v12607_v30  ;;  %v12543_v25 = vpack.c.bf16 %v10695_v22, %v10694_v48  ;;  %v10697_v30 = vld [vmem:[%s16285_s30 + $0x18] sm:$0xff] }
 0x866   : > { %14946 = vtanh.f32 %v12608_v45  ;;  %v10715_v45 = vld [vmem:[%s16285_s30 + $0xa8] sm:$0xff]  ;;  %v12547_v50 = vpack.c.bf16 %v10697_v30, %v10696_v28 }
 0x867   : > { %14948 = vtanh.f32 %v16038_v12  ;;  %v10711_v12 = vld [vmem:[%s16285_s30 + $0x88] sm:$0xff] }
 0x868   : > { %v12541_v21 = vpack.c.bf16 %v10711_v12, %v10710_v19 }
 0x86d   : > { %v14941_v11 = vpop.eup %14940 }
 0x86e   : > { %v14943_v52 = vpop.eup %14942  ;;  %v9272_v53 = vpack.c.bf16 %v14941_v11, %v14941_v11  ;;  %v12549_v11 = vpack.c.bf16 %v10715_v45, %v10714_v44  ;;  %v10678_v44 = vld [vmem:[#allocation16] sm:$0x3] }
 0x86f   : > { %v14945_v41 = vpop.eup %14944  ;;  %v9273_v31 = vpack.c.bf16 %v14943_v52, %v14943_v52  ;;  %v10698_v52 = vld [vmem:[%s16285_s30 + $0x20] sm:$0xff] }
 0x870   : > { %v14947_v58 = vpop.eup %14946  ;;  %v9278_v5 = vpack.c.bf16 %v14945_v41, %v14945_v41  ;;  %v10699_v41 = vld [vmem:[%s16285_s30 + $0x28] sm:$0xff] }
 0x871   : > { %v9279_v39 = vpack.c.bf16 %v14947_v58, %v14947_v58  ;;  %10669 = vmatprep.mubr.bf16.mxu1 %v9273_v31  ;;  %v14949_v34 = vpop.eup %14948  ;;  %v10716_v31 = vld [vmem:[%s16285_s30 + $0xb0] sm:$0xff]  ;;  %v10717_v58 = vld [vmem:[%s16285_s30 + $0xb8] sm:$0xff] }
 0x872   : > { %10670 = vmatmul.mubr.bf16.vlgmr.msra.gmra.mrb[20].mxu1 %v9272_v53  ;;  %v12551_v53 = vpack.c.bf16 %v10699_v41, %v10698_v52 }
 0x873   : > { %10066 = vmatprep.mubr.bf16.mxu0 %v9279_v39  ;;  %v12553_v39 = vpack.c.bf16 %v10717_v58, %v10716_v31  ;;  %v10687_v58 = vrot.slane %v10678_v44, %v15944_v37  ;;  %v10810_v37 = vld [vmem:[%s16286_s1 + $0x30] sm:$0xff] }
 0x874   : > { %10067 = vmatmul.mubr.bf16.vlgmr.msra.gmra.mrb[16].mxu0 %v9278_v5  ;;  %v10701_v5 = vld [vmem:[%s16285_s30 + $0x38] sm:$0xff] }
 0x875   : > { %10597 = vmatpush1.bf16.msra.mxu0 %v14854_v29  ;;  %10628 = vmatprep.mubr.bf16.mxu0 %v9271_v42  ;;  %v10700_v29 = vld [vmem:[%s16285_s30 + $0x30] sm:$0xff]  ;;  %v10719_v42 = vld [vmem:[%s16285_s30 + $0xc8] sm:$0xff] }
 0x876   : > { %10598 = vmatprep.subr.bf16.mxu0 %v14859_v55  ;;  %v10718_v55 = vld [vmem:[%s16285_s30 + $0xc0] sm:$0xff] }
 0x879   : > { %10599 = vmatpush1.bf16.msra.mxu0 %v14857_v56  ;;  %v12555_v56 = vpack.c.bf16 %v10701_v5, %v10700_v29 }
 0x87a   : > { %10600 = vmatprep.subr.bf16.mxu0 %v14862_v59  ;;  %v12557_v59 = vpack.c.bf16 %v10719_v42, %v10718_v55  ;;  %v10808_v42 = vld [vmem:[%s16286_s1 + $0x20] sm:$0xff] }
 0x87d   : > { %10601 = vmatpush1.bf16.msra.mxu0 %v14860_v60  ;;  %v10702_v60 = vld [vmem:[%s16285_s30 + $0x40] sm:$0xff] }
 0x87e   : > { %10602 = vmatprep.subr.bf16.mxu0 %v14865_v63  ;;  %v10703_v63 = vld [vmem:[%s16285_s30 + $0x48] sm:$0xff] }
 0x881   : > { %10603 = vmatpush1.bf16.msra.mxu0 %v14863_v0  ;;  %v10720_v0 = vld [vmem:[%s16285_s30 + $0xd0] sm:$0xff] }
 0x882   : > { %10604 = vmatprep.subr.bf16.mxu0 %v14868_v57  ;;  %v10721_v57 = vld [vmem:[%s16285_s30 + $0xd8] sm:$0xff] }
 0x885   : > { %10605 = vmatpush1.bf16.msra.mxu0 %v14866_v8  ;;  %v12559_v8 = vpack.c.bf16 %v10703_v63, %v10702_v60  ;;  %v15385_v63 = vmov 0.0  }
 0x886   : > { %10606 = vmatprep.subr.bf16.mxu0 %v14871_v1  ;;  %v12561_v1 = vpack.c.bf16 %v10721_v57, %v10720_v0  ;;  %12538 = vmatprep.mubr.msk.f32.mxu1 %vm15384_vm0, %v15385_v63  ;;  %v12471_v57 = vld [vmem:[#allocation17] ss:$0 sm:$0xff] }
 0x889   : > { %10607 = vmatpush1.bf16.msra.mxu0 %v14869_v62 }
 0x88a   : > { %10608 = vmatprep.subr.bf16.mxu0 %v14874_v2 }
 0x88d   : > { %10609 = vmatpush1.bf16.msra.mxu0 %v14872_v54 }
 0x88e   : > { %10610 = vmatprep.subr.bf16.mxu0 %v14877_v47 }
 0x891   : > { %10611 = vmatpush1.bf16.msra.mxu0 %v14875_v3  ;;  %v10704_v3 = vld [vmem:[%s16285_s30 + $0x50] sm:$0xff] }
 0x892   : > { %10612 = vmatprep.subr.bf16.mxu0 %v14880_v7  ;;  %v10705_v7 = vld [vmem:[%s16285_s30 + $0x58] sm:$0xff] }
 0x895   : > { %10613 = vmatpush1.bf16.msra.mxu0 %v14878_v26  ;;  %v12563_v26 = vpack.c.bf16 %v10705_v7, %v10704_v3 }
 0x896   : > { %10614 = vmatprep.subr.bf16.mxu0 %v14883_v46  ;;  %v10722_v46 = vld [vmem:[%s16285_s30 + $0xe0] sm:$0xff] }
 0x899   : > { %10615 = vmatpush1.bf16.msra.mxu0 %v14881_v9  ;;  %v10723_v9 = vld [vmem:[%s16285_s30 + $0xe8] sm:$0xff] }
 0x89a   : > { %10616 = vmatprep.subr.bf16.mxu0 %v14886_v43  ;;  %v12565_v43 = vpack.c.bf16 %v10723_v9, %v10722_v46 }
 0x89d   : > { %10617 = vmatpush1.bf16.msra.mxu0 %v14884_v40  ;;  %v10706_v40 = vld [vmem:[%s16285_s30 + $0x60] sm:$0xff] }
 0x89e   : > { %10618 = vmatprep.subr.bf16.mxu0 %v14889_v35  ;;  %v10707_v35 = vld [vmem:[%s16285_s30 + $0x68] sm:$0xff] }
 0x8a0   : > { %v10027_v20 = vpop.f32.mrb[12].mxu1 }
 0x8a1   : > { %v16072_v13 = vadd.f32 %v10027_v20, %v16059_v6  ;;  %10619 = vmatpush1.bf16.msra.mxu0 %v14887_v36  ;;  %v10029_v27 = vpop.f32.mrb[13].mxu1  ;;  %v14901_v6 = vld [vmem:[#allocation13 + $0x1f4] ss:$8 sps:$4 sm:$0xff]   ;;  %v12567_v36 = vpack.c.bf16 %v10707_v35, %v10706_v40  ;;  %v10725_v20 = vld [vmem:[%s16285_s30 + $0xf8] sm:$0xff]  ;;  %v12475_v40 = vld [vmem:[#allocation2] ss:$0 sm:$0xff] }
 0x8a2   : > { %v16075_v15 = vadd.f32 %v10029_v27, %v16061_v33  ;;  %v10031_v16 = vpop.f32.mrb[14].mxu1  ;;  %10620 = vmatprep.subr.bf16.mxu0 %v14892_v10  ;;  %v9270_v33 = vpack.c.bf16 %v14949_v34, %v14949_v34  ;;  %v10724_v10 = vld [vmem:[%s16285_s30 + $0xf0] sm:$0xff] }
 0x8a3   : > { %v10032_v17 = vpop.f32.mrb[15].mxu1  ;;  %v10708_v27 = vld [vmem:[%s16285_s30 + $0x70] sm:$0xff]  ;;  %v10709_v16 = vld [vmem:[%s16285_s30 + $0x78] sm:$0xff] }
 0x8a4   : > { %v10804_v17 = vld [vmem:[%s16286_s1] sm:$0xff] }
 0x8a5   : > { %10621 = vmatpush1.bf16.msra.mxu0 %v14890_v14  ;;  %v12569_v14 = vpack.c.bf16 %v10725_v20, %v10724_v10 }
 0x8a6   : > { %10622 = vmatprep.subr.bf16.mxu0 %v14895_v61  ;;  %v12571_v61 = vpack.c.bf16 %v10709_v16, %v10708_v27 }
 0x8a9   : > { %10623 = vmatpush1.bf16.msra.mxu0 %v14893_v4  ;;  %v10805_v4 = vld [vmem:[%s16286_s1 + $0x8] sm:$0xff] }
 0x8aa   : > { %10624 = vmatprep.subr.bf16.mxu0 %v14898_v18  ;;  %v10806_v18 = vld [vmem:[%s16286_s1 + $0x10] sm:$0xff] }
 0x8ad   : > { %10625 = vmatpush1.bf16.msra.mxu0 %v14896_v38  ;;  %v15383_v38 = vmov 0.0|0.0  }
 0x8ae   : > { %10626 = vmatprep.subr.bf16.mxu0 %v14901_v6  ;;  %12573 = vmatprep.subr.bf16.mxu1 %v15383_v38  ;;  %v12574_v6 = vpack.c.bf16 %v10805_v4, %v10804_v17 }
 0x8b0   : > { %12575 = vmatpush3.bf16.msra.mxu1 %v12574_v6 }
 0x8b1   : > { %10627 = vmatpush1.bf16.msra.mxu0 %v14899_v49  ;;  %v10807_v49 = vld [vmem:[%s16286_s1 + $0x18] sm:$0xff]  ;;  %12576 = vmatprep.subr.bf16.mxu1 %v15383_v38 }
 0x8b2   : > { %12542 = vmatprep.subr.bf16.mxu0 %v12541_v21  ;;  %v12577_v34 = vpack.c.bf16 %v10807_v49, %v10806_v18 }
 0x8b4   : > { %10629 = vmatmul.mubr.bf16.vlgmr.msra.gmra.mrb[20].mxu0 %v9270_v33  ;;  %12578 = vmatpush3.bf16.msra.mxu1 %v12577_v34 }
 0x8b5   : > { %12544 = vmatpush3.bf16.msra.mxu0 %v12543_v25  ;;  %12579 = vmatprep.subr.bf16.mxu1 %v15383_v38 }
 0x8b6   : > { %12546 = vmatprep.subr.bf16.mxu0 %v12545_v51 }
 0x8b9   : > { %12548 = vmatpush3.bf16.msra.mxu0 %v12547_v50 }
 0x8ba   : > { %12550 = vmatprep.subr.bf16.mxu0 %v12549_v11  ;;  %v10683_v11 = vrot.slane %v10678_v44, %v15940_v32  ;;  %v10809_v32 = vld [vmem:[%s16286_s1 + $0x28] sm:$0xff] }
 0x8bd   : > { %12552 = vmatpush3.bf16.msra.mxu0 %v12551_v53 }
 0x8be   : > { %12554 = vmatprep.subr.bf16.mxu0 %v12553_v39 }
 0x8c1   : > { %12556 = vmatpush3.bf16.msra.mxu0 %v12555_v56  ;;  %v12580_v56 = vpack.c.bf16 %v10809_v32, %v10808_v42 }
 0x8c2   : > { %12558 = vmatprep.subr.bf16.mxu0 %v12557_v59  ;;  %v10811_v59 = vld [vmem:[%s16286_s1 + $0x38] sm:$0xff] }
 0x8c3   : > { %12581 = vmatpush3.bf16.msra.mxu1 %v12580_v56  ;;  %v12583_v60 = vpack.c.bf16 %v10811_v59, %v10810_v37 }
 0x8c4   : > { %12582 = vmatprep.subr.bf16.mxu1 %v15383_v38 }
 0x8c5   : > { %12560 = vmatpush3.bf16.msra.mxu0 %v12559_v8 }
 0x8c6   : > { %12562 = vmatprep.subr.bf16.mxu0 %v12561_v1 }
 0x8c7   : > { %12584 = vmatpush3.bf16.msra.mxu1 %v12583_v60 }
 0x8c9   : > { %12564 = vmatpush3.bf16.msra.mxu0 %v12563_v26  ;;  %v12474_v26 = vld [vmem:[#allocation20] ss:$0 sm:$0xff] }
 0x8ca   : > { %12566 = vmatprep.subr.bf16.mxu0 %v12565_v43 }
 0x8cd   : > { %12568 = vmatpush3.bf16.msra.mxu0 %v12567_v36 }
 0x8ce   : > { %12570 = vmatprep.subr.bf16.mxu0 %v12569_v14 }
 0x8d1   : > { %12572 = vmatpush3.bf16.msra.mxu0 %v12571_v61 }
 0x8e0   : > { %v10589_v62 = vpop.f32.mrb[16].mxu1 }
 0x8e1   : > { %v10591_v2 = vpop.f32.mrb[17].mxu1 }
 0x8e2   : > { %v10593_v54 = vpop.f32.mrb[18].mxu1 }
 0x8e3   : > { %v10594_v47 = vpop.f32.mrb[19].mxu1  ;;  %v12472_v54 = vld [vmem:[#allocation19] ss:$0 sm:$0xff] }
 0x945   : > { %v10671_v33 = vpop.f32.mrb[20].mxu1 }
 0x946   : > { %v10673_v19 = vpop.f32.mrb[21].mxu1 }
 0x947   : > { %v10068_v12 = vpop.f32.mrb[16].mxu0  ;;  %v10675_v48 = vpop.f32.mrb[22].mxu1 }
 0x948   : > { %v10069_v21 = vadd.f32 %v10068_v12, %v16072_v13  ;;  %v10070_v22 = vpop.f32.mrb[17].mxu0  ;;  %v10676_v23 = vpop.f32.mrb[23].mxu1 }
 0x949   : > { %v10071_v24 = vadd.f32 %v10070_v22, %v16075_v15  ;;  %v10072_v25 = vpop.f32.mrb[18].mxu0 }
 0x94a   : > { %v10073_v51 = vpop.f32.mrb[19].mxu0  ;;  %v10590_v28 = vadd.f32 %v10589_v62, %v10069_v21 }
 0x94b   : > { %v10592_v30 = vadd.f32 %v10591_v2, %v10071_v24 }
 0x987   : > { %v10630_v45 = vpop.f32.mrb[20].mxu0 }
 0x988   : > { %v10631_v50 = vadd.f32 %v10630_v45, %v10590_v28  ;;  %v10632_v52 = vpop.f32.mrb[21].mxu0 }
 0x989   : > { %v10633_v41 = vadd.f32 %v10632_v52, %v10592_v30  ;;  %v10634_v31 = vpop.f32.mrb[22].mxu0 }
 0x98a   : > { %v10672_v53 = vadd.f32 %v10671_v33, %v10631_v50  ;;  %v10635_v13 = vpop.f32.mrb[23].mxu0 }
 0x98b   : > { %v10674_v39 = vadd.f32 %v10673_v19, %v10633_v41 }
 0x98c   : > { %v10690_v29 = vadd.f32 %v10683_v11, %v10672_v53 }
 0x98d   : > { %v10691_v5 = vadd.f32 %v10687_v58, %v10674_v39 }
 0x98e   : > { %v10692_v55 = vmax.f32 %v10690_v29, 0.0 }
 0x98f   : > { %v10693_v15 = vmax.f32 %v10691_v5, 0.0 }
 0x991   : > { %10797 = vmatprep.mubr.f32.mxu0 %v10693_v15 }
 0x992   : > { %10798 = vmatmul.mubr.f32.vlgmr.msra.gmra.mrb[24].mxu0 %v10692_v55 }
 0xa65   : > { %v12510_v0 = vpop.f32.mrb[24].mxu0 }
 0xa66   : > { %v12511_v8 = vpop.f32.mrb[25].mxu0 }
 0xa67   : > { %v12512_v1 = vadd.f32 %v12511_v8, %v12510_v0 }
 0xa69   : > { %v10800_v62 = vadd.f32 %v12512_v1, %v12471_v57 }
 0xa6b   : > { %v10803_v2 = vmax.f32 %v10800_v62, 0.0 }
 0xa6d   : > { %12539 = vmatmul.mubr.msk.f32.vlgmr.msra.gmra.mrb[24].mxu1 %vm10819_vm1, %v10803_v2 }
 0xb40   : > { %v10889_v47 = vpop.f32.mrb[24].mxu1 }
 0xb41   : > { %v10890_v3 = vadd.f32 %v12472_v54, %v10889_v47  ;;  %v12540_v7 = vpop.f32.mrb[25].mxu1 }
 0xb43   : > { %v10893_v46 = vmax.f32 %v10890_v3, 0.0 }
 0xb45   : > { %v10901_v9 = vmul.f32 %v12474_v26, %v10893_v46 }
 0xb47   : > { %v10903_v43 = vsel %vm10902_vm2, %v10901_v9, 0.0 }
 0xb48   : > { %10904 = vadd.xlane.f32.xlu0 %v10903_v43 }
 0xbd5   : > { %v10905_v35 = vpop.xlane.xlu0 %10904 }
 0xbd6   : > { %v10913_v36 = vadd.f32 %v12475_v40, %v10905_v35 }
 0xbd8   : > { %14950 = vtanh.f32 %v10913_v36 }
 0xbe2   : > { %v14951_v10 = vpop.eup %14950 }
 0xbe3   : > { %10916 = vst.msk [vmem:[%s683_s26] sm:$0xff] %vm10915_vm3, %v14951_v10 }
 0xbe4 PF: > { %p35_p9 = scmp.ge.s32.totalorder %s15727_s27, 4   ;;  %s16288_s20 = smov %s15357_s21 }
 0xbe5   : > { %s16289_s21 = smov %s15361_s22  ;;  %s16290_s22 = smov %s15739_s19 }
 0xbe6   : > { %s16291_s23 = smov %s15727_s27  ;;  %37 = sbr.rel (!%p35_p9) target bundleno = 18 (0x12), region = 173 }
 0xbed   :  { %10936 = vsyncpa [#allocation4], 1 }
 0xbee   :  { %10938 = vsyncpa [#allocation4 + $0x1], 1 }
 0xbef   :  { %10939 = vsyncpa [#allocation6], 1 }
 0xbf0   :  { %10941 = vsyncpa [#allocation6 + $0x1], 1 }
 0xbf1   :  { %10942 = vsyncpa [#allocation9], 1 }
 0xbf2   :  { %10943 = vsyncpa [#allocation12], 1 }
 0xbf3   :  { %10944 = vsyncpa [#allocation15], 1 }
 0xbf4   :  { %10945 = vsyncpa [#allocation18], 1 }
 0xbf5   :  { %10946 = vsyncpa [#allocation21], 1 }

</bundles_post_ra>
